<compile_context>
chip_gen: v7x
topology: tpu7x:2x2x1
jax: 0.10.0
libtpu: 0.0.40
codegen_flags: <defaults>
</compile_context>

<pallas_src>
import math

import jax
import jax.numpy as jnp
from jax import lax
from jax.experimental import pallas as pl
from jax.experimental.pallas import tpu as pltpu


# (cin, cout, maxpool-after-this-layer) for the torch Sequential in VGGLoss.features
_VGG_CFG = (
    (3, 64, False),
    (64, 64, True),
    (64, 128, False),
    (128, 128, True),
    (128, 256, False),
    (256, 256, False),
    (256, 256, False),
)


def _make_conv3x3_kernel(H, W, cin, cout, pool):
    """conv3x3(stride 1, pad 1) + bias + ReLU (+ fused 2x2/stride-2 maxpool)."""
    M = H * W
    P = W + 1  # zero rows padded on each side of the flattened image
    dots = dict(preferred_element_type=jnp.float32,
                precision=lax.Precision.HIGHEST)

    def kernel(x_ref, w_ref, b_ref, o_ref):
        # x_ref: (1, M + 2P, cin)  row-padded, row-major flattened image
        # w_ref: (9, cin, cout)    taps ordered (dy, dx) = (-1..1, -1..1)
        # b_ref: (1, cout)
        # o_ref: (1, M, cout)  or  (1, M // 4, cout) when pool=True
        xp = x_ref[0]                                             # (M+2P, cin)
        col = lax.broadcasted_iota(jnp.int32, (M, 1), 0) % W      # x coordinate
        acc = jnp.zeros((M, cout), jnp.float32)
        k = 0
        for dy in (-1, 0, 1):
            for dx in (-1, 0, 1):
                off = P + dy * W + dx                             # static, >= 0
                tap = xp[off:off + M, :]                          # x[m + dy*W + dx] (0 in pad)
                if dx != 0:
                    ok = (col + dx >= 0) & (col + dx <= W - 1)    # W-boundary mask
                    tap = jnp.where(ok, tap, 0.0)
                acc = acc + jnp.dot(tap, w_ref[k], **dots)        # MXU matmul
                k += 1
        acc = jnp.maximum(acc + b_ref[...], 0.0)                  # bias + ReLU

        if not pool:
            o_ref[0] = acc
            return

        # fused 2x2 / stride-2 max pool
        Ho, Wo = H // 2, W // 2
        Mo = Ho * Wo
        L = M - W - 1
        win = jnp.maximum(jnp.maximum(acc[0:L, :], acc[1:L + 1, :]),
                          jnp.maximum(acc[W:W + L, :], acc[W + 1:W + 1 + L, :]))
        row_o = lax.broadcasted_iota(jnp.int32, (Mo, L), 0)
        row_i = lax.broadcasted_iota(jnp.int32, (Mo, L), 1)
        src = 2 * (row_o // Wo) * W + 2 * (row_o % Wo)            # even (y, x) anchors
        sel = (row_i == src).astype(jnp.float32)                  # one-hot rows -> exact
        o_ref[0] = jnp.dot(sel, win, **dots)                      # gather-as-matmul

    return kernel


def conv3x3_relu(x, w, b, H, W, pool):
    """x: (B, H*W, cin) f32;  w: (3, 3, cin, cout) HWIO;  b: (cout,)."""
    B, M, cin = x.shape
    assert M == H * W
    cout = w.shape[-1]
    P = W + 1
    Mo = (H // 2) * (W // 2) if pool else M

    xp = jnp.pad(x, ((0, 0), (P, P), (0, 0)))                     # zero row halo
    w9 = w.reshape(9, cin, cout)
    b2 = b.reshape(1, cout)

    flops = 2 * B * M * cin * cout * 9
    if pool:
        flops += 2 * B * Mo * (M - W - 1) * cout
    bytes_accessed = 4 * (B * (M + 2 * P) * cin + 9 * cin * cout + cout + B * Mo * cout)

    return pl.pallas_call(
        _make_conv3x3_kernel(H, W, cin, cout, pool),
        out_shape=jax.ShapeDtypeStruct((B, Mo, cout), jnp.float32),
        grid_spec=pltpu.PrefetchScalarGridSpec(
            num_scalar_prefetch=0,
            grid=(B,),
            in_specs=[
                pl.BlockSpec((1, M + 2 * P, cin), lambda n: (n, 0, 0)),
                pl.BlockSpec((9, cin, cout), lambda n: (0, 0, 0)),
                pl.BlockSpec((1, cout), lambda n: (0, 0)),
            ],
            out_specs=pl.BlockSpec((1, Mo, cout), lambda n: (n, 0, 0)),
        ),
        compiler_params=pltpu.CompilerParams(
            dimension_semantics=("parallel",)),
        cost_estimate=pl.CostEstimate(flops=flops, transcendentals=0,
                                      bytes_accessed=bytes_accessed),
    )(xp, w9, b2)


def vgg_features(x_flat, params, H, W):
    """Run the 7-layer feature stack; x_flat: (B, H*W, 3) f32."""
    act, h, w = x_flat, H, W
    for (wk, bk), (_, _, pool) in zip(params, _VGG_CFG):
        act = conv3x3_relu(act, wk, bk, h, w, pool)
        if pool:
            h //= 2
            w //= 2
    return act


def mse_loss(a, b):
    """Mean squared error between two (N, M, C) feature tensors (Pallas)."""
    N, M, C = a.shape
    inv_cnt = 1.0 / float(N * M * C)

    def kernel(a_ref, b_ref, o_ref, acc_ref):
        i = pl.program_id(0)

        @pl.when(i == 0)
        def _():
            acc_ref[...] = jnp.zeros_like(acc_ref)

        d = a_ref[0] - b_ref[0]
        acc_ref[...] += d * d                      # lane-dense f32 accumulator

        @pl.when(i == pl.num_programs(0) - 1)
        def _():
            # single cross-lane reduce + single (1,1) store at the very end
            total = jnp.sum(acc_ref[...]) * inv_cnt
            o_ref[...] = jnp.zeros((1, 1), jnp.float32) + total

    out = pl.pallas_call(
        kernel,
        out_shape=jax.ShapeDtypeStruct((1, 1), jnp.float32),
        grid_spec=pltpu.PrefetchScalarGridSpec(
            num_scalar_prefetch=0,
            grid=(N,),
            in_specs=[
                pl.BlockSpec((1, M, C), lambda i: (i, 0, 0)),
                pl.BlockSpec((1, M, C), lambda i: (i, 0, 0)),
            ],
            out_specs=pl.BlockSpec((1, 1), lambda i: (0, 0)),
            scratch_shapes=[pltpu.VMEM((M, C), jnp.float32)],
        ),
        compiler_params=pltpu.CompilerParams(
            dimension_semantics=("arbitrary",)),
    )(a, b)
    return out[0, 0]


def vgg_loss(real_y, fake_y, params):
    """Forward pass of the PyTorch VGGLoss module, built on Pallas kernels."""
    n, _, H, W = real_y.shape
    x = jnp.concatenate([real_y, fake_y], axis=0)             # run both through features
    x = jnp.repeat(x, 3, axis=1)                              # .repeat((1, 3, 1, 1))
    x = jnp.transpose(x, (0, 2, 3, 1)).astype(jnp.float32)    # NCHW -> NHWC
    x = x.reshape(2 * n, H * W, 3)                            # channels-last, lane-dense
    feats = vgg_features(x, params, H, W)                     # (2n, Ho*Wo, 256)
    return mse_loss(feats[:n], feats[n:])                     # F.mse_loss(real_f, fake_f)


def init_params(key):
    # TODO(synk): the PyTorch module loads pretrained weights via torch.load(path);
    # no file I/O is allowed here, so deterministic He-initialized weights stand in
    # (identical forward math, different numbers).
    params = []
    for cin, cout, _ in _VGG_CFG:
        key, kw, kb = jax.random.split(key, 3)
        w = jax.random.normal(kw, (3, 3, cin, cout), jnp.float32) * math.sqrt(2.0 / (9 * cin))
        b = jax.random.normal(kb, (cout,), jnp.float32) * 0.01
        params.append((w, b))
    return params


def vgg_loss_ref(real_y, fake_y, params):
    """Pure-JAX reference of the same forward pass."""
    def features(x_nchw):
        act = jnp.transpose(jnp.repeat(x_nchw, 3, axis=1), (0, 2, 3, 1)).astype(jnp.float32)
        for (w, b), (_, _, pool) in zip(params, _VGG_CFG):
            act = lax.conv_general_dilated(
                act, w, (1, 1), "SAME",
                dimension_numbers=("NHWC", "HWIO", "NHWC"),
                precision=lax.Precision.HIGHEST)
            act = jnp.maximum(act + b, 0.0)
            if pool:
                act = lax.reduce_window(act, -jnp.inf, lax.max,
                                        (1, 2, 2, 1), (1, 2, 2, 1), "VALID")
        return act

    rf = features(real_y)
    ff = features(fake_y)
    return jnp.mean((rf - ff) ** 2)


if __name__ == "__main__":
    root = jax.random.PRNGKey(0)
    k_real, k_fake, k_par = jax.random.split(root, 3)
    N, H, W = 2, 16, 16
    real_y = jax.random.normal(k_real, (N, 1, H, W), jnp.float32)
    fake_y = jax.random.normal(k_fake, (N, 1, H, W), jnp.float32)
    params = init_params(k_par)

    out = jax.block_until_ready(vgg_loss(real_y, fake_y, params))
    ref = jax.block_until_ready(vgg_loss_ref(real_y, fake_y, params))

    assert jnp.allclose(out, ref, rtol=1e-3, atol=1e-5), (out, ref)
    print("KERNEL_OK")
</pallas_src>

<mosaic_0001>
module attributes {stable_mosaic.version = 11 : i64} {
  func.func @kernel(%arg0: i32, %arg1: memref<1x290x3xf32, #tpu.memory_space<vmem>>, %arg2: memref<9x3x64xf32, #tpu.memory_space<vmem>>, %arg3: memref<1x64xf32, #tpu.memory_space<vmem>>, %arg4: memref<1x256x64xf32, #tpu.memory_space<vmem>>) attributes {dimension_semantics = [#tpu.dimension_semantics<parallel>], iteration_bounds = array<i64: 4>, scalar_prefetch = 0 : i64, scratch_operands = 0 : i64, tpu.core_type = #tpu.core_type<tc>, window_params = [{transform_indices = @transform_0, window_bounds = array<i64: 1, 290, 3>}, {pipeline_mode = #tpu.pipeline_mode<synchronous>, transform_indices = @transform_1, window_bounds = array<i64: 9, 3, 64>}, {pipeline_mode = #tpu.pipeline_mode<synchronous>, transform_indices = @transform_2, window_bounds = array<i64: 1, 64>}, {transform_indices = @transform_3, window_bounds = array<i64: 1, 256, 64>}]} {
    %c0 = arith.constant 0 : index
    %c0_0 = arith.constant 0 : index
    %c0_1 = arith.constant 0 : index
    %0 = vector.load %arg1[%c0, %c0_0, %c0_1] : memref<1x290x3xf32, #tpu.memory_space<vmem>>, vector<1x290x3xf32>
    %1 = vector.shape_cast %0 : vector<1x290x3xf32> to vector<290x3xf32>
    %2 = tpu.iota {dimensions = array<i32: 0>} : vector<256x1xi32>
    %c16_i32 = arith.constant 16 : i32
    %c0_i32 = arith.constant 0 : i32
    %3 = arith.cmpi eq, %c16_i32, %c0_i32 : i32
    %c1_i32 = arith.constant 1 : i32
    %4 = arith.select %3, %c1_i32, %c16_i32 : i32
    %5 = vector.broadcast %4 : i32 to vector<256x1xi32>
    %6 = arith.remsi %2, %5 : vector<256x1xi32>
    %c0_i32_2 = arith.constant 0 : i32
    %7 = vector.broadcast %c0_i32_2 : i32 to vector<256x1xi32>
    %8 = arith.cmpi ne, %6, %7 : vector<256x1xi32>
    %c0_i32_3 = arith.constant 0 : i32
    %9 = vector.broadcast %c0_i32_3 : i32 to vector<256x1xi32>
    %10 = arith.cmpi slt, %6, %9 : vector<256x1xi32>
    %c0_i32_4 = arith.constant 0 : i32
    %11 = arith.cmpi slt, %4, %c0_i32_4 : i32
    %12 = vector.broadcast %11 : i1 to vector<256x1xi1>
    %13 = vector.broadcast %12 : vector<256x1xi1> to vector<256x1xi1>
    %14 = arith.xori %10, %13 : vector<256x1xi1>
    %15 = arith.andi %14, %8 : vector<256x1xi1>
    %16 = vector.broadcast %4 : i32 to vector<256x1xi32>
    %17 = arith.addi %6, %16 : vector<256x1xi32>
    %18 = arith.select %15, %17, %6 : vector<256x1xi1>, vector<256x1xi32>
    %cst = arith.constant 0.000000e+00 : f32
    %19 = vector.broadcast %cst : f32 to vector<256x64xf32>
    %20 = vector.extract_strided_slice %1 {offsets = [0, 0], sizes = [256, 3], strides = [1, 1]} : vector<290x3xf32> to vector<256x3xf32>
    %c-1_i32 = arith.constant -1 : i32
    %21 = vector.broadcast %c-1_i32 : i32 to vector<256x1xi32>
    %22 = arith.addi %18, %21 : vector<256x1xi32>
    %c0_i32_5 = arith.constant 0 : i32
    %23 = vector.broadcast %c0_i32_5 : i32 to vector<256x1xi32>
    %24 = arith.cmpi sge, %22, %23 : vector<256x1xi32>
    %c-1_i32_6 = arith.constant -1 : i32
    %25 = vector.broadcast %c-1_i32_6 : i32 to vector<256x1xi32>
    %26 = arith.addi %18, %25 : vector<256x1xi32>
    %c15_i32 = arith.constant 15 : i32
    %27 = vector.broadcast %c15_i32 : i32 to vector<256x1xi32>
    %28 = arith.cmpi sle, %26, %27 : vector<256x1xi32>
    %29 = arith.andi %24, %28 : vector<256x1xi1>
    %cst_7 = arith.constant 0.000000e+00 : f32
    %30 = vector.shape_cast %29 : vector<256x1xi1> to vector<256x1xi1>
    %31 = vector.broadcast %30 : vector<256x1xi1> to vector<256x3xi1>
    %32 = vector.broadcast %cst_7 : f32 to vector<256x3xf32>
    %33 = arith.select %31, %20, %32 : vector<256x3xi1>, vector<256x3xf32>
    %c0_8 = arith.constant 0 : index
    %c0_9 = arith.constant 0 : index
    %c0_10 = arith.constant 0 : index
    %34 = vector.load %arg2[%c0_8, %c0_9, %c0_10] : memref<9x3x64xf32, #tpu.memory_space<vmem>>, vector<1x3x64xf32>
    %35 = vector.shape_cast %34 : vector<1x3x64xf32> to vector<3x64xf32>
    %cst_11 = arith.constant dense<0.000000e+00> : vector<256x64xf32>
    %36 = tpu.matmul %33, %35, %cst_11 {dimension_numbers = #tpu.dot_dimension_numbers<[1], [0], [0], [1], [0, 0, 1, 1], [], []>, precision = #tpu.contract_precision<fp32>} : vector<256x3xf32>, vector<3x64xf32>, vector<256x64xf32> -> vector<256x64xf32>
    %37 = arith.addf %19, %36 : vector<256x64xf32>
    %38 = vector.extract_strided_slice %1 {offsets = [1, 0], sizes = [256, 3], strides = [1, 1]} : vector<290x3xf32> to vector<256x3xf32>
    %c1 = arith.constant 1 : index
    %c0_12 = arith.constant 0 : index
    %c0_13 = arith.constant 0 : index
    %39 = vector.load %arg2[%c1, %c0_12, %c0_13] : memref<9x3x64xf32, #tpu.memory_space<vmem>>, vector<1x3x64xf32>
    %40 = vector.shape_cast %39 : vector<1x3x64xf32> to vector<3x64xf32>
    %cst_14 = arith.constant dense<0.000000e+00> : vector<256x64xf32>
    %41 = tpu.matmul %38, %40, %cst_14 {dimension_numbers = #tpu.dot_dimension_numbers<[1], [0], [0], [1], [0, 0, 1, 1], [], []>, precision = #tpu.contract_precision<fp32>} : vector<256x3xf32>, vector<3x64xf32>, vector<256x64xf32> -> vector<256x64xf32>
    %42 = arith.addf %37, %41 : vector<256x64xf32>
    %43 = vector.extract_strided_slice %1 {offsets = [2, 0], sizes = [256, 3], strides = [1, 1]} : vector<290x3xf32> to vector<256x3xf32>
    %c1_i32_15 = arith.constant 1 : i32
    %44 = vector.broadcast %c1_i32_15 : i32 to vector<256x1xi32>
    %45 = arith.addi %18, %44 : vector<256x1xi32>
    %c0_i32_16 = arith.constant 0 : i32
    %46 = vector.broadcast %c0_i32_16 : i32 to vector<256x1xi32>
    %47 = arith.cmpi sge, %45, %46 : vector<256x1xi32>
    %c1_i32_17 = arith.constant 1 : i32
    %48 = vector.broadcast %c1_i32_17 : i32 to vector<256x1xi32>
    %49 = arith.addi %18, %48 : vector<256x1xi32>
    %c15_i32_18 = arith.constant 15 : i32
    %50 = vector.broadcast %c15_i32_18 : i32 to vector<256x1xi32>
    %51 = arith.cmpi sle, %49, %50 : vector<256x1xi32>
    %52 = arith.andi %47, %51 : vector<256x1xi1>
    %cst_19 = arith.constant 0.000000e+00 : f32
    %53 = vector.shape_cast %52 : vector<256x1xi1> to vector<256x1xi1>
    %54 = vector.broadcast %53 : vector<256x1xi1> to vector<256x3xi1>
    %55 = vector.broadcast %cst_19 : f32 to vector<256x3xf32>
    %56 = arith.select %54, %43, %55 : vector<256x3xi1>, vector<256x3xf32>
    %c2 = arith.constant 2 : index
    %c0_20 = arith.constant 0 : index
    %c0_21 = arith.constant 0 : index
    %57 = vector.load %arg2[%c2, %c0_20, %c0_21] : memref<9x3x64xf32, #tpu.memory_space<vmem>>, vector<1x3x64xf32>
    %58 = vector.shape_cast %57 : vector<1x3x64xf32> to vector<3x64xf32>
    %cst_22 = arith.constant dense<0.000000e+00> : vector<256x64xf32>
    %59 = tpu.matmul %56, %58, %cst_22 {dimension_numbers = #tpu.dot_dimension_numbers<[1], [0], [0], [1], [0, 0, 1, 1], [], []>, precision = #tpu.contract_precision<fp32>} : vector<256x3xf32>, vector<3x64xf32>, vector<256x64xf32> -> vector<256x64xf32>
    %60 = arith.addf %42, %59 : vector<256x64xf32>
    %61 = vector.extract_strided_slice %1 {offsets = [16, 0], sizes = [256, 3], strides = [1, 1]} : vector<290x3xf32> to vector<256x3xf32>
    %c-1_i32_23 = arith.constant -1 : i32
    %62 = vector.broadcast %c-1_i32_23 : i32 to vector<256x1xi32>
    %63 = arith.addi %18, %62 : vector<256x1xi32>
    %c0_i32_24 = arith.constant 0 : i32
    %64 = vector.broadcast %c0_i32_24 : i32 to vector<256x1xi32>
    %65 = arith.cmpi sge, %63, %64 : vector<256x1xi32>
    %c-1_i32_25 = arith.constant -1 : i32
    %66 = vector.broadcast %c-1_i32_25 : i32 to vector<256x1xi32>
    %67 = arith.addi %18, %66 : vector<256x1xi32>
    %c15_i32_26 = arith.constant 15 : i32
    %68 = vector.broadcast %c15_i32_26 : i32 to vector<256x1xi32>
    %69 = arith.cmpi sle, %67, %68 : vector<256x1xi32>
    %70 = arith.andi %65, %69 : vector<256x1xi1>
    %cst_27 = arith.constant 0.000000e+00 : f32
    %71 = vector.shape_cast %70 : vector<256x1xi1> to vector<256x1xi1>
    %72 = vector.broadcast %71 : vector<256x1xi1> to vector<256x3xi1>
    %73 = vector.broadcast %cst_27 : f32 to vector<256x3xf32>
    %74 = arith.select %72, %61, %73 : vector<256x3xi1>, vector<256x3xf32>
    %c3 = arith.constant 3 : index
    %c0_28 = arith.constant 0 : index
    %c0_29 = arith.constant 0 : index
    %75 = vector.load %arg2[%c3, %c0_28, %c0_29] : memref<9x3x64xf32, #tpu.memory_space<vmem>>, vector<1x3x64xf32>
    %76 = vector.shape_cast %75 : vector<1x3x64xf32> to vector<3x64xf32>
    %cst_30 = arith.constant dense<0.000000e+00> : vector<256x64xf32>
    %77 = tpu.matmul %74, %76, %cst_30 {dimension_numbers = #tpu.dot_dimension_numbers<[1], [0], [0], [1], [0, 0, 1, 1], [], []>, precision = #tpu.contract_precision<fp32>} : vector<256x3xf32>, vector<3x64xf32>, vector<256x64xf32> -> vector<256x64xf32>
    %78 = arith.addf %60, %77 : vector<256x64xf32>
    %79 = vector.extract_strided_slice %1 {offsets = [17, 0], sizes = [256, 3], strides = [1, 1]} : vector<290x3xf32> to vector<256x3xf32>
    %c4 = arith.constant 4 : index
    %c0_31 = arith.constant 0 : index
    %c0_32 = arith.constant 0 : index
    %80 = vector.load %arg2[%c4, %c0_31, %c0_32] : memref<9x3x64xf32, #tpu.memory_space<vmem>>, vector<1x3x64xf32>
    %81 = vector.shape_cast %80 : vector<1x3x64xf32> to vector<3x64xf32>
    %cst_33 = arith.constant dense<0.000000e+00> : vector<256x64xf32>
    %82 = tpu.matmul %79, %81, %cst_33 {dimension_numbers = #tpu.dot_dimension_numbers<[1], [0], [0], [1], [0, 0, 1, 1], [], []>, precision = #tpu.contract_precision<fp32>} : vector<256x3xf32>, vector<3x64xf32>, vector<256x64xf32> -> vector<256x64xf32>
    %83 = arith.addf %78, %82 : vector<256x64xf32>
    %84 = vector.extract_strided_slice %1 {offsets = [18, 0], sizes = [256, 3], strides = [1, 1]} : vector<290x3xf32> to vector<256x3xf32>
    %c1_i32_34 = arith.constant 1 : i32
    %85 = vector.broadcast %c1_i32_34 : i32 to vector<256x1xi32>
    %86 = arith.addi %18, %85 : vector<256x1xi32>
    %c0_i32_35 = arith.constant 0 : i32
    %87 = vector.broadcast %c0_i32_35 : i32 to vector<256x1xi32>
    %88 = arith.cmpi sge, %86, %87 : vector<256x1xi32>
    %c1_i32_36 = arith.constant 1 : i32
    %89 = vector.broadcast %c1_i32_36 : i32 to vector<256x1xi32>
    %90 = arith.addi %18, %89 : vector<256x1xi32>
    %c15_i32_37 = arith.constant 15 : i32
    %91 = vector.broadcast %c15_i32_37 : i32 to vector<256x1xi32>
    %92 = arith.cmpi sle, %90, %91 : vector<256x1xi32>
    %93 = arith.andi %88, %92 : vector<256x1xi1>
    %cst_38 = arith.constant 0.000000e+00 : f32
    %94 = vector.shape_cast %93 : vector<256x1xi1> to vector<256x1xi1>
    %95 = vector.broadcast %94 : vector<256x1xi1> to vector<256x3xi1>
    %96 = vector.broadcast %cst_38 : f32 to vector<256x3xf32>
    %97 = arith.select %95, %84, %96 : vector<256x3xi1>, vector<256x3xf32>
    %c5 = arith.constant 5 : index
    %c0_39 = arith.constant 0 : index
    %c0_40 = arith.constant 0 : index
    %98 = vector.load %arg2[%c5, %c0_39, %c0_40] : memref<9x3x64xf32, #tpu.memory_space<vmem>>, vector<1x3x64xf32>
    %99 = vector.shape_cast %98 : vector<1x3x64xf32> to vector<3x64xf32>
    %cst_41 = arith.constant dense<0.000000e+00> : vector<256x64xf32>
    %100 = tpu.matmul %97, %99, %cst_41 {dimension_numbers = #tpu.dot_dimension_numbers<[1], [0], [0], [1], [0, 0, 1, 1], [], []>, precision = #tpu.contract_precision<fp32>} : vector<256x3xf32>, vector<3x64xf32>, vector<256x64xf32> -> vector<256x64xf32>
    %101 = arith.addf %83, %100 : vector<256x64xf32>
    %102 = vector.extract_strided_slice %1 {offsets = [32, 0], sizes = [256, 3], strides = [1, 1]} : vector<290x3xf32> to vector<256x3xf32>
    %c-1_i32_42 = arith.constant -1 : i32
    %103 = vector.broadcast %c-1_i32_42 : i32 to vector<256x1xi32>
    %104 = arith.addi %18, %103 : vector<256x1xi32>
    %c0_i32_43 = arith.constant 0 : i32
    %105 = vector.broadcast %c0_i32_43 : i32 to vector<256x1xi32>
    %106 = arith.cmpi sge, %104, %105 : vector<256x1xi32>
    %c-1_i32_44 = arith.constant -1 : i32
    %107 = vector.broadcast %c-1_i32_44 : i32 to vector<256x1xi32>
    %108 = arith.addi %18, %107 : vector<256x1xi32>
    %c15_i32_45 = arith.constant 15 : i32
    %109 = vector.broadcast %c15_i32_45 : i32 to vector<256x1xi32>
    %110 = arith.cmpi sle, %108, %109 : vector<256x1xi32>
    %111 = arith.andi %106, %110 : vector<256x1xi1>
    %cst_46 = arith.constant 0.000000e+00 : f32
    %112 = vector.shape_cast %111 : vector<256x1xi1> to vector<256x1xi1>
    %113 = vector.broadcast %112 : vector<256x1xi1> to vector<256x3xi1>
    %114 = vector.broadcast %cst_46 : f32 to vector<256x3xf32>
    %115 = arith.select %113, %102, %114 : vector<256x3xi1>, vector<256x3xf32>
    %c6 = arith.constant 6 : index
    %c0_47 = arith.constant 0 : index
    %c0_48 = arith.constant 0 : index
    %116 = vector.load %arg2[%c6, %c0_47, %c0_48] : memref<9x3x64xf32, #tpu.memory_space<vmem>>, vector<1x3x64xf32>
    %117 = vector.shape_cast %116 : vector<1x3x64xf32> to vector<3x64xf32>
    %cst_49 = arith.constant dense<0.000000e+00> : vector<256x64xf32>
    %118 = tpu.matmul %115, %117, %cst_49 {dimension_numbers = #tpu.dot_dimension_numbers<[1], [0], [0], [1], [0, 0, 1, 1], [], []>, precision = #tpu.contract_precision<fp32>} : vector<256x3xf32>, vector<3x64xf32>, vector<256x64xf32> -> vector<256x64xf32>
    %119 = arith.addf %101, %118 : vector<256x64xf32>
    %120 = vector.extract_strided_slice %1 {offsets = [33, 0], sizes = [256, 3], strides = [1, 1]} : vector<290x3xf32> to vector<256x3xf32>
    %c7 = arith.constant 7 : index
    %c0_50 = arith.constant 0 : index
    %c0_51 = arith.constant 0 : index
    %121 = vector.load %arg2[%c7, %c0_50, %c0_51] : memref<9x3x64xf32, #tpu.memory_space<vmem>>, vector<1x3x64xf32>
    %122 = vector.shape_cast %121 : vector<1x3x64xf32> to vector<3x64xf32>
    %cst_52 = arith.constant dense<0.000000e+00> : vector<256x64xf32>
    %123 = tpu.matmul %120, %122, %cst_52 {dimension_numbers = #tpu.dot_dimension_numbers<[1], [0], [0], [1], [0, 0, 1, 1], [], []>, precision = #tpu.contract_precision<fp32>} : vector<256x3xf32>, vector<3x64xf32>, vector<256x64xf32> -> vector<256x64xf32>
    %124 = arith.addf %119, %123 : vector<256x64xf32>
    %125 = vector.extract_strided_slice %1 {offsets = [34, 0], sizes = [256, 3], strides = [1, 1]} : vector<290x3xf32> to vector<256x3xf32>
    %c1_i32_53 = arith.constant 1 : i32
    %126 = vector.broadcast %c1_i32_53 : i32 to vector<256x1xi32>
    %127 = arith.addi %18, %126 : vector<256x1xi32>
    %c0_i32_54 = arith.constant 0 : i32
    %128 = vector.broadcast %c0_i32_54 : i32 to vector<256x1xi32>
    %129 = arith.cmpi sge, %127, %128 : vector<256x1xi32>
    %c1_i32_55 = arith.constant 1 : i32
    %130 = vector.broadcast %c1_i32_55 : i32 to vector<256x1xi32>
    %131 = arith.addi %18, %130 : vector<256x1xi32>
    %c15_i32_56 = arith.constant 15 : i32
    %132 = vector.broadcast %c15_i32_56 : i32 to vector<256x1xi32>
    %133 = arith.cmpi sle, %131, %132 : vector<256x1xi32>
    %134 = arith.andi %129, %133 : vector<256x1xi1>
    %cst_57 = arith.constant 0.000000e+00 : f32
    %135 = vector.shape_cast %134 : vector<256x1xi1> to vector<256x1xi1>
    %136 = vector.broadcast %135 : vector<256x1xi1> to vector<256x3xi1>
    %137 = vector.broadcast %cst_57 : f32 to vector<256x3xf32>
    %138 = arith.select %136, %125, %137 : vector<256x3xi1>, vector<256x3xf32>
    %c8 = arith.constant 8 : index
    %c0_58 = arith.constant 0 : index
    %c0_59 = arith.constant 0 : index
    %139 = vector.load %arg2[%c8, %c0_58, %c0_59] : memref<9x3x64xf32, #tpu.memory_space<vmem>>, vector<1x3x64xf32>
    %140 = vector.shape_cast %139 : vector<1x3x64xf32> to vector<3x64xf32>
    %cst_60 = arith.constant dense<0.000000e+00> : vector<256x64xf32>
    %141 = tpu.matmul %138, %140, %cst_60 {dimension_numbers = #tpu.dot_dimension_numbers<[1], [0], [0], [1], [0, 0, 1, 1], [], []>, precision = #tpu.contract_precision<fp32>} : vector<256x3xf32>, vector<3x64xf32>, vector<256x64xf32> -> vector<256x64xf32>
    %142 = arith.addf %124, %141 : vector<256x64xf32>
    %c0_61 = arith.constant 0 : index
    %c0_62 = arith.constant 0 : index
    %143 = vector.load %arg3[%c0_61, %c0_62] : memref<1x64xf32, #tpu.memory_space<vmem>>, vector<1x64xf32>
    %144 = vector.broadcast %143 : vector<1x64xf32> to vector<256x64xf32>
    %145 = arith.addf %142, %144 : vector<256x64xf32>
    %cst_63 = arith.constant 0.000000e+00 : f32
    %146 = vector.broadcast %cst_63 : f32 to vector<256x64xf32>
    %147 = arith.maximumf %145, %146 : vector<256x64xf32>
    %c0_64 = arith.constant 0 : index
    %c0_65 = arith.constant 0 : index
    %c0_66 = arith.constant 0 : index
    %148 = vector.load %arg4[%c0_64, %c0_65, %c0_66] : memref<1x256x64xf32, #tpu.memory_space<vmem>>, vector<1x256x64xf32>
    %149 = vector.shape_cast %148 : vector<1x256x64xf32> to vector<256x64xf32>
    %150 = vector.shape_cast %147 : vector<256x64xf32> to vector<1x256x64xf32>
    tpu.vector_store %arg4[%c0_64, %c0_65, %c0_66], %150 {strides = array<i32>} : memref<1x256x64xf32, #tpu.memory_space<vmem>>, vector<1x256x64xf32>,
    return
  }
  func.func @transform_0(%arg0: i32) -> (i32, i32, i32) {
    %c0_i32 = arith.constant 0 : i32
    %c0_i32_0 = arith.constant 0 : i32
    %c0_i32_1 = arith.constant 0 : i32
    return %arg0, %c0_i32, %c0_i32_0 : i32, i32, i32
  }
  func.func @transform_1(%arg0: i32) -> (i32, i32, i32) {
    %c0_i32 = arith.constant 0 : i32
    %c0_i32_0 = arith.constant 0 : i32
    %c0_i32_1 = arith.constant 0 : i32
    %c0_i32_2 = arith.constant 0 : i32
    return %c0_i32, %c0_i32_0, %c0_i32_1 : i32, i32, i32
  }
  func.func @transform_2(%arg0: i32) -> (i32, i32) {
    %c0_i32 = arith.constant 0 : i32
    %c0_i32_0 = arith.constant 0 : i32
    %c0_i32_1 = arith.constant 0 : i32
    return %c0_i32, %c0_i32_0 : i32, i32
  }
  func.func @transform_3(%arg0: i32) -> (i32, i32, i32) {
    %c0_i32 = arith.constant 0 : i32
    %c0_i32_0 = arith.constant 0 : i32
    %c0_i32_1 = arith.constant 0 : i32
    return %arg0, %c0_i32, %c0_i32_0 : i32, i32, i32
  }
}

</mosaic_0001>

<bundles_post_ra>
// kernel: tpu_custom_call.1
= control target key start
LH: loop header
LB: loop body
LE: loop exit
PB: predicated region body
PF: predicated region fallthrough
CT: control target
= control target key end

     0   :  { %s24804_s12 = smov 0   ;;  %s29578_s0 = inlined_call_operand.vmem [shape: f32[4,290,3], index: 0, kind: input, shape index: {}]   ;;  %s29579_s1 = inlined_call_operand.vmem [shape: f32[9,3,64], index: 1, kind: input, shape index: {}]   ;;  %s29580_s2 = inlined_call_operand.vmem [shape: f32[1,64], index: 2, kind: input, shape index: {}]   ;;  %s29581_s3 = inlined_call_operand.vmem [shape: f32[4,256,64], index: 3, kind: output, shape index: {}]  }
   0x1 LB: > { %s18510_s13 = sadd.s32 4294967295, %s24782_s12   ;;  %p18514_p0 = scmp.ge.s32.totalorder %s24782_s12, 1  ;;  %s24782_s12 = sphi %s24804_s12, %s13_s12  }
   0x2   : > { %p137_p1 = scmp.lt.s32.totalorder %s24782_s12, 5 }
   0x4   : > { %p138_p2 = pnand %p18514_p0, %p137_p1 }
   0x6   : > { %141 = sbr.rel (%p138_p2) target bundleno = 1983 (0x7bf), region = 32 }
   0xd   : > { %vm1016_vm0 = vcmask 1042432   ;;  %v18521_v0 = vld [vmem:[%s29579_s1 + $0x10] sm:$0x7]  ;;  %p161_p3 = scmp.lt.s32.totalorder %s18510_s13, 3  ;;  %v18518_v2 = vld [vmem:[%s29579_s1 + $0x4] sm:$0x7] }
   0xe   : > { %v8868_v1 = vsel %vm1016_vm0, %v18521_v0, 0  ;;  %v1018_v4 = vsel %vm1016_vm0, %v18518_v2, 0  ;;  %vm29960_vm1 = vcmask 1046528   ;;  %vm951_vm2 = vcmask 23552  }
   0xf   : > { %v24819_v3 = vand.u32 4294901760, %v8868_v1  ;;  %s32234_s13 = smov (!%p161_p3, %s18510_s13), 3  ;;  %v24824_v5 = vand.u32 4294901760, %v1018_v4  ;;  %vm30234_vm3 = vcmask 1045504  }
  0x10   : > { %s24708_s18 = smul.u32 296, %s32234_s13  ;;  %s18529_s11 = sshll.u32 %s32234_s13, 8 }
  0x11   : > { %30644 = vst [vmem:[#allocation2_spill] sm:$0xff] %v24819_v3  ;;  %21662 = vmatprep.subr.mxu0 %v24819_v3  ;;  %v24829_v6 = vsub.f32 %v8868_v1, %v24819_v3  ;;  %20312 = vmatprep.subr.mxu1 %v24824_v5  ;;  %v24834_v7 = vsub.f32 %v1018_v4, %v24824_v5  ;;  %s29478_s16 = scalar_lea.vmem %s29581_s3, %s18529_s11 }
  0x12   : > { %21663 = vmatpush3.msra.mxu0 %v24819_v3  ;;  %s24839_s21 = scalar_lea.vmem %s29578_s0, %s24708_s18  ;;  %20313 = vmatpush3.msra.mxu1 %v24824_v5 }
  0x13   : > { %30645 = vst [vmem:[#allocation3_spill] sm:$0xff] %v24829_v6  ;;  %v24843_v8 = vand.u32 4294901760, %v24829_v6  ;;  %v24846_v9 = vld [vmem:[%s24839_s21 + $0x10] sm:$0xff]  ;;  %v24849_v10 = vld [vmem:[%s24839_s21 + $0x18] sm:$0xff]  ;;  %v24852_v11 = vld [vmem:[%s24839_s21 + $0x20] sm:$0xff]  ;;  %v24855_v12 = vand.u32 4294901760, %v24834_v7 }
  0x14   : > { %30647 = vst [vmem:[#allocation5_spill] sm:$0xff] %v24846_v9  ;;  %30648 = vst [vmem:[#allocation6_spill] sm:$0xff] %v24849_v10  ;;  %v889_v13 = vrot.slane %v24846_v9, 1  ;;  %v891_v14 = vrot.slane %v24849_v10, 1  ;;  %v893_v15 = vrot.slane %v24852_v11, 1  ;;  %v171_v16 = vld [vmem:[%s24839_s21] sm:$0xff] }
  0x15   : > { %30646 = vst [vmem:[#allocation4_spill] sm:$0xff] %v24843_v8  ;;  %30649 = vst [vmem:[#allocation7_spill] sm:$0xff] %v24852_v11  ;;  %v172_v17 = vld [vmem:[%s24839_s21 + $0x8] sm:$0xff]  ;;  %21712 = vmatprep.subr.mxu0 %v24843_v8  ;;  %v886_v19 = vrot.slane %v171_v16, 1  ;;  %v1410_v21 = vsub.f32 %v24834_v7, %v24855_v12  ;;  %v24872_v25 = vld [vmem:[%s24839_s21 + $0x30] sm:$0xff] }
  0x16   : > { %v24863_v18 = vld [vmem:[%s24839_s21 + $0x28] sm:$0xff]  ;;  %v887_v20 = vrot.slane %v172_v17, 1  ;;  %v892_v22 = vsel %vm29960_vm1, %v889_v13, %v891_v14  ;;  %v894_v23 = vsel %vm29960_vm1, %v891_v14, %v893_v15  ;;  %30651 = vst [vmem:[#allocation9_spill] sm:$0xff] %v24872_v25  ;;  %v24886_v34 = vld [vmem:[%s24839_s21 + $0x38] sm:$0xff]  ;;  %v897_v38 = vrot.slane %v24872_v25, 1  ;;  %v24928_v55 = vld [vmem:[%s24839_s21 + $0x40] sm:$0xff] }
  0x17   : > { %30650 = vst [vmem:[#allocation8_spill] sm:$0xff] %v24863_v18  ;;  %v895_v24 = vrot.slane %v24863_v18, 1  ;;  %v956_v26 = vsel %vm951_vm2, %v892_v22, 0  ;;  %v958_v27 = vsel %vm951_vm2, %v894_v23, 0  ;;  %v24877_v29 = vand.u32 4294901760, %v1410_v21  ;;  %30654 = vst [vmem:[#allocation12_spill] sm:$0xff] %v24886_v34 }
  0x18   : > { %v888_v28 = vsel %vm29960_vm1, %v886_v19, %v887_v20  ;;  %v24879_v30 = vand.u32 4294901760, %v956_v26  ;;  %v24881_v31 = vand.u32 4294901760, %v958_v27  ;;  %v890_v37 = vsel %vm29960_vm1, %v887_v20, %v889_v13  ;;  %30662 = vst [vmem:[#allocation20_spill] sm:$0xff] %v24928_v55  ;;  %v24950_v0 = vld [vmem:[%s24839_s21 + $0x48] sm:$0xff]  ;;  %v24953_v1 = vld [vmem:[%s24839_s21 + $0x50] sm:$0xff]  ;;  %v24974_v20 = vld [vmem:[%s24839_s21 + $0x58] sm:$0xff] }
  0x19   : > { %v952_v32 = vsel %vm951_vm2, %v888_v28, 0  ;;  %v896_v33 = vsel %vm29960_vm1, %v893_v15, %v895_v24  ;;  %20362 = vmatprep.subr.mxu1 %v24877_v29  ;;  %v954_v42 = vsel %vm951_vm2, %v890_v37, 0  ;;  %v898_v45 = vsel %vm29960_vm1, %v895_v24, %v897_v38  ;;  %30666 = vst [vmem:[#allocation24_spill] sm:$0xff] %v24950_v0  ;;  %30667 = vst [vmem:[#allocation25_spill] sm:$0xff] %v24953_v1  ;;  %v25293_v25 = vld [vmem:[%s24839_s21 + $0xd8] sm:$0xff]  ;;  %v203_v18 = vld [vmem:[%s24839_s21 + $0x100] sm:$0xff] }
  0x1a   : > { %30652 = vst [vmem:[#allocation10_spill] sm:$0xff] %v24879_v30  ;;  %30653 = vst [vmem:[#allocation11_spill] sm:$0xff] %v24881_v31  ;;  %v24888_v35 = vand.u32 4294901760, %v952_v32  ;;  %v960_v36 = vsel %vm951_vm2, %v896_v33, 0  ;;  %v24895_v39 = vsub.f32 %v956_v26, %v24879_v30  ;;  %v24898_v40 = vsub.f32 %v958_v27, %v24881_v31 }
  0x1b   : > { %v24900_v41 = vand.u32 4294901760, %v960_v36  ;;  %v24906_v44 = vand.u32 4294901760, %v954_v42  ;;  %v899_v46 = vrot.slane %v24886_v34, 1  ;;  %v962_v50 = vsel %vm951_vm2, %v898_v45, 0  ;;  %30672 = vst [vmem:[#allocation30_spill] sm:$0xff] %v24974_v20  ;;  %v24998_v45 = vld [vmem:[%s24839_s21 + $0x68] sm:$0xff] }
  0x1c   : > { %30655 = vst [vmem:[#allocation13_spill] sm:$0xff] %v24895_v39  ;;  %30656 = vst [vmem:[#allocation14_spill] sm:$0xff] %v24898_v40  ;;  %v24904_v43 = vsub.f32 %v952_v32, %v24888_v35  ;;  %v24911_v47 = vand.u32 4294901760, %v24895_v39  ;;  %v24914_v48 = vand.u32 4294901760, %v24898_v40  ;;  %v24924_v53 = vand.u32 4294901760, %v962_v50 }
  0x1d   : > { %30657 = vst [vmem:[#allocation15_spill] sm:$0xff] %v24900_v41  ;;  %v24917_v49 = vsub.f32 %v960_v36, %v24900_v41  ;;  %v24922_v52 = vsub.f32 %v954_v42, %v24906_v44  ;;  %v900_v54 = vsel %vm29960_vm1, %v897_v38, %v899_v46  ;;  %v901_v13 = vrot.slane %v24928_v55, 1  ;;  %v24995_v42 = vld [vmem:[%s24839_s21 + $0x60] sm:$0xff]  ;;  %30677 = vst [vmem:[#allocation35_spill] sm:$0xff] %v24998_v45 }
  0x1e   : > { %30658 = vst [vmem:[#allocation16_spill] sm:$0xff] %v24911_v47  ;;  %30659 = vst [vmem:[#allocation17_spill] sm:$0xff] %v24914_v48  ;;  %v29583_v51 = vand.u32 4294901760, %v24904_v43  ;;  %21664 = vmatprep.mubr.f32.mxu0 %v24911_v47  ;;  %v1109_v57 = vsub.f32 %v24895_v39, %v24911_v47  ;;  %v964_v58 = vsel %vm951_vm2, %v900_v54, 0  ;;  %v1119_v59 = vsub.f32 %v24898_v40, %v24914_v48 }
  0x1f   : > { %30660 = vst [vmem:[#allocation18_spill] sm:$0xff] %v24917_v49  ;;  %30661 = vst [vmem:[#allocation19_spill] sm:$0xff] %v24924_v53  ;;  %v24932_v56 = vand.u32 4294901760, %v24917_v49  ;;  %21665 = vmatmul.mubr.f32.vlgmr.msra.gmra.mrb[0].mxu0 %v24914_v48  ;;  %v29582_v61 = vand.u32 4294901760, %v24922_v52  ;;  %v24945_v62 = vsub.f32 %v962_v50, %v24924_v53  ;;  %v24947_v63 = vand.u32 4294901760, %v964_v58 }
  0x20   : > { %v1089_v60 = vsub.f32 %v24904_v43, %v29583_v51  ;;  %21713 = vmatpush3.msra.mxu0 %v24843_v8  ;;  %v24957_v2 = vand.u32 4294901760, %v1109_v57  ;;  %v24959_v4 = vand.u32 4294901760, %v1119_v59  ;;  %v902_v21 = vsel %vm29960_vm1, %v899_v46, %v901_v13  ;;  %30676 = vst [vmem:[#allocation34_spill] sm:$0xff] %v24995_v42  ;;  %30750 = vst [vmem:[#allocation108_spill] sm:$0xff] %v25293_v25 }
  0x21   : > { %30663 = vst [vmem:[#allocation21_spill] sm:$0xff] %v24932_v56  ;;  %30664 = vst [vmem:[#allocation22_spill] sm:$0xff] %v24945_v62  ;;  %21667 = vmatprep.mubr.f32.mxu0 %v24932_v56  ;;  %v1129_v14 = vsub.f32 %v24917_v49, %v24932_v56  ;;  %v1099_v16 = vsub.f32 %v24922_v52, %v29582_v61  ;;  %v24968_v17 = vand.u32 4294901760, %v24945_v62  ;;  %21762 = vmatprep.subr.mxu0 %v24819_v3  ;;  %v25097_v56 = vld [vmem:[%s24839_s21 + $0x90] sm:$0xff] }
  0x22   : > { %30665 = vst [vmem:[#allocation23_spill] sm:$0xff] %v24947_v63  ;;  %30668 = vst [vmem:[#allocation26_spill] sm:$0xff] %v24957_v2  ;;  %v1090_v15 = vand.u32 4294901760, %v1089_v60  ;;  %v24971_v19 = vsub.f32 %v964_v58, %v24947_v63  ;;  %v903_v23 = vrot.slane %v24950_v0, 1  ;;  %v905_v24 = vrot.slane %v24953_v1, 1  ;;  %v193_v1 = vld [vmem:[%s24839_s21 + $0xb0] sm:$0xff] }
  0x23   : > { %30669 = vst [vmem:[#allocation27_spill] sm:$0xff] %v24959_v4  ;;  %30670 = vst [vmem:[#allocation28_spill] sm:$0xff] %v24968_v17  ;;  %v24978_v22 = vand.u32 4294901760, %v1129_v14  ;;  %v1100_v26 = vand.u32 4294901760, %v1099_v16  ;;  %21668 = vmatmul.mubr.f32.gmra.mrb[2].mxu0 %v24968_v17  ;;  %v966_v28 = vsel %vm951_vm2, %v902_v21, 0  ;;  %v1139_v32 = vsub.f32 %v24945_v62, %v24968_v17  ;;  %v25018_v14 = vld [vmem:[%s24839_s21 + $0x70] sm:$0xff] }
  0x24   : > { %30671 = vst [vmem:[#allocation29_spill] sm:$0xff] %v24971_v19  ;;  %20314 = vmatprep.mubr.f32.mxu1 %v1090_v15  ;;  %v24984_v27 = vand.u32 4294901760, %v24971_v19  ;;  %v24989_v33 = vand.u32 4294901760, %v966_v28  ;;  %v904_v36 = vsel %vm29960_vm1, %v901_v13, %v903_v23  ;;  %v906_v37 = vsel %vm29960_vm1, %v903_v23, %v905_v24  ;;  %30682 = vst [vmem:[#allocation40_spill] sm:$0xff] %v25018_v14  ;;  %v25021_v15 = vld [vmem:[%s24839_s21 + $0x78] sm:$0xff] }
  0x25   : > { %30673 = vst [vmem:[#allocation31_spill] sm:$0xff] %v24978_v22  ;;  %v907_v38 = vrot.slane %v24974_v20, 1  ;;  %20315 = vmatmul.mubr.f32.vlgmr.msra.gmra.mrb[0].mxu1 %v1100_v26  ;;  %v968_v46 = vsel %vm951_vm2, %v904_v36, 0  ;;  %v25002_v50 = vand.u32 4294901760, %v1139_v32  ;;  %v970_v54 = vsel %vm951_vm2, %v906_v37, 0  ;;  %30683 = vst [vmem:[#allocation41_spill] sm:$0xff] %v25021_v15 }
  0x26   : > { %30674 = vst [vmem:[#allocation32_spill] sm:$0xff] %v24984_v27  ;;  %30675 = vst [vmem:[#allocation33_spill] sm:$0xff] %v24989_v33  ;;  %21670 = vmatprep.mubr.f32.mxu0 %v24984_v27  ;;  %v1149_v57 = vsub.f32 %v24971_v19, %v24984_v27  ;;  %20363 = vmatpush3.msra.mxu1 %v24877_v29  ;;  %v25010_v58 = vsub.f32 %v966_v28, %v24989_v33  ;;  %v25012_v59 = vand.u32 4294901760, %v968_v46 }
  0x27   : > { %30678 = vst [vmem:[#allocation36_spill] sm:$0xff] %v25002_v50  ;;  %20317 = vmatprep.mubr.f32.mxu1 %v24957_v2  ;;  %v25014_v60 = vand.u32 4294901760, %v970_v54  ;;  %v908_v13 = vsel %vm29960_vm1, %v905_v24, %v907_v38  ;;  %v909_v29 = vrot.slane %v24995_v42, 1  ;;  %v911_v23 = vrot.slane %v24998_v45, 1  ;;  %20412 = vmatprep.subr.mxu1 %v24834_v7  ;;  %30701 = vst [vmem:[#allocation59_spill] sm:$0xff] %v25097_v56  ;;  %v25155_v45 = vld [vmem:[%s24839_s21 + $0xa0] sm:$0xff] }
  0x28   : > { %30679 = vst [vmem:[#allocation37_spill] sm:$0xff] %v25010_v58  ;;  %30680 = vst [vmem:[#allocation38_spill] sm:$0xff] %v25012_v59  ;;  %v25023_v16 = vand.u32 4294901760, %v1149_v57  ;;  %v972_v21 = vsel %vm951_vm2, %v908_v13, 0  ;;  %v25030_v26 = vand.u32 4294901760, %v25010_v58  ;;  %v25033_v28 = vsub.f32 %v968_v46, %v25012_v59  ;;  %v25158_v42 = vld [vmem:[%s24839_s21 + $0xa8] sm:$0xff] }
  0x29   : > { %30681 = vst [vmem:[#allocation39_spill] sm:$0xff] %v25014_v60  ;;  %v25036_v24 = vsub.f32 %v970_v54, %v25014_v60  ;;  %v25038_v32 = vand.u32 4294901760, %v972_v21  ;;  %20318 = vmatmul.mubr.f32.gmra.mrb[2].mxu1 %v24959_v4  ;;  %v910_v36 = vsel %vm29960_vm1, %v907_v38, %v909_v29  ;;  %v912_v37 = vsel %vm29960_vm1, %v909_v29, %v911_v23 }
  0x2a   : > { %30684 = vst [vmem:[#allocation42_spill] sm:$0xff] %v25023_v16  ;;  %30685 = vst [vmem:[#allocation43_spill] sm:$0xff] %v25030_v26  ;;  %v913_v57 = vrot.slane %v25018_v14, 1  ;;  %v915_v13 = vrot.slane %v25021_v15, 1  ;;  %21671 = vmatmul.mubr.f32.gmra.mrb[4].mxu0 %v25030_v26  ;;  %20320 = vmatprep.mubr.f32.mxu1 %v24978_v22  ;;  %v25048_v46 = vand.u32 4294901760, %v25033_v28  ;;  %v1159_v38 = vsub.f32 %v25010_v58, %v25030_v26  ;;  %v25083_v26 = vld [vmem:[%s24839_s21 + $0x88] sm:$0xff] }
  0x2b   : > { %30686 = vst [vmem:[#allocation44_spill] sm:$0xff] %v25033_v28  ;;  %30687 = vst [vmem:[#allocation45_spill] sm:$0xff] %v25036_v24  ;;  %v25051_v54 = vand.u32 4294901760, %v25036_v24  ;;  %v25054_v61 = vsub.f32 %v972_v21, %v25038_v32  ;;  %v974_v29 = vsel %vm951_vm2, %v910_v36, 0  ;;  %v976_v51 = vsel %vm951_vm2, %v912_v37, 0  ;;  %v25073_v36 = vld [vmem:[%s24839_s21 + $0x80] sm:$0xff] }
  0x2c   : > { %30688 = vst [vmem:[#allocation46_spill] sm:$0xff] %v25038_v32  ;;  %30689 = vst [vmem:[#allocation47_spill] sm:$0xff] %v25048_v46  ;;  %v914_v4 = vsel %vm29960_vm1, %v911_v23, %v913_v57  ;;  %v916_v2 = vsel %vm29960_vm1, %v913_v57, %v915_v13  ;;  %21673 = vmatprep.mubr.f32.mxu0 %v25048_v46  ;;  %v25066_v8 = vand.u32 4294901760, %v1159_v38  ;;  %v25068_v21 = vand.u32 4294901760, %v974_v29  ;;  %v25145_v15 = vld [vmem:[%s24839_s21 + $0x98] sm:$0xff] }
  0x2d   : > { %30690 = vst [vmem:[#allocation48_spill] sm:$0xff] %v25051_v54  ;;  %30691 = vst [vmem:[#allocation49_spill] sm:$0xff] %v25054_v61  ;;  %v25064_v6 = vand.u32 4294901760, %v25054_v61  ;;  %v1169_v22 = vsub.f32 %v25033_v28, %v25048_v46  ;;  %20321 = vmatmul.mubr.f32.gmra.mrb[4].mxu1 %v25002_v50  ;;  %v25076_v23 = vand.u32 4294901760, %v976_v51  ;;  %v1179_v37 = vsub.f32 %v25036_v24, %v25051_v54  ;;  %v202_v24 = vld [vmem:[%s24839_s21 + $0xf8] sm:$0xff] }
  0x2e   : > { %30693 = vst [vmem:[#allocation51_spill] sm:$0xff] %v25066_v8  ;;  %30694 = vst [vmem:[#allocation52_spill] sm:$0xff] %v25068_v21  ;;  %v978_v57 = vsel %vm951_vm2, %v914_v4, 0  ;;  %v980_v38 = vsel %vm951_vm2, %v916_v2, 0  ;;  %21674 = vmatmul.mubr.f32.gmra.mrb[6].mxu0 %v25051_v54  ;;  %20323 = vmatprep.mubr.f32.mxu1 %v25023_v16  ;;  %v25088_v46 = vsub.f32 %v974_v29, %v25068_v21  ;;  %v917_v29 = vrot.slane %v25073_v36, 1 }
  0x2f   : > { %30692 = vst [vmem:[#allocation50_spill] sm:$0xff] %v25064_v6  ;;  %30695 = vst [vmem:[#allocation53_spill] sm:$0xff] %v25073_v36  ;;  %v25090_v27 = vand.u32 4294901760, %v1169_v22  ;;  %v25092_v50 = vand.u32 4294901760, %v978_v57  ;;  %v1189_v17 = vsub.f32 %v25054_v61, %v25064_v6  ;;  %21676 = vmatprep.mubr.f32.mxu0 %v25064_v6  ;;  %v25101_v2 = vsub.f32 %v976_v51, %v25076_v23 }
  0x30   : > { %30696 = vst [vmem:[#allocation54_spill] sm:$0xff] %v25076_v23  ;;  %30697 = vst [vmem:[#allocation55_spill] sm:$0xff] %v25083_v26  ;;  %v25103_v4 = vand.u32 4294901760, %v1179_v37  ;;  %v25105_v16 = vand.u32 4294901760, %v980_v38  ;;  %v25109_v22 = vand.u32 4294901760, %v25088_v46  ;;  %v919_v47 = vrot.slane %v25083_v26, 1 }
  0x31   : > { %30698 = vst [vmem:[#allocation56_spill] sm:$0xff] %v25088_v46  ;;  %30699 = vst [vmem:[#allocation57_spill] sm:$0xff] %v25090_v27  ;;  %v25112_v54 = vsub.f32 %v978_v57, %v25092_v50  ;;  %v25114_v48 = vand.u32 4294901760, %v1189_v17  ;;  %20324 = vmatmul.mubr.f32.gmra.mrb[6].mxu1 %v25066_v8  ;;  %v25119_v51 = vand.u32 4294901760, %v25101_v2  ;;  %v918_v6 = vsel %vm29960_vm1, %v915_v13, %v917_v29 }
  0x32   : > { %30700 = vst [vmem:[#allocation58_spill] sm:$0xff] %v25092_v50  ;;  %30702 = vst [vmem:[#allocation60_spill] sm:$0xff] %v25101_v2  ;;  %v25122_v37 = vsub.f32 %v980_v38, %v25105_v16  ;;  %v921_v36 = vrot.slane %v25097_v56, 1  ;;  %21677 = vmatmul.mubr.f32.gmra.mrb[8].mxu0 %v25109_v22  ;;  %20326 = vmatprep.mubr.f32.mxu1 %v25090_v27  ;;  %v1199_v57 = vsub.f32 %v25088_v46, %v25109_v22 }
  0x33   : > { %30703 = vst [vmem:[#allocation61_spill] sm:$0xff] %v25103_v4  ;;  %30704 = vst [vmem:[#allocation62_spill] sm:$0xff] %v25105_v16  ;;  %v25129_v17 = vand.u32 4294901760, %v25112_v54  ;;  %v982_v8 = vsel %vm951_vm2, %v918_v6, 0  ;;  %v920_v38 = vsel %vm29960_vm1, %v917_v29, %v919_v47  ;;  %21679 = vmatprep.mubr.f32.mxu0 %v25119_v51  ;;  %v1209_v27 = vsub.f32 %v25101_v2, %v25119_v51  ;;  %v25234_v2 = vld [vmem:[%s24839_s21 + $0xc8] sm:$0xff] }
  0x34   : > { %30705 = vst [vmem:[#allocation63_spill] sm:$0xff] %v25109_v22  ;;  %30706 = vst [vmem:[#allocation64_spill] sm:$0xff] %v25112_v54  ;;  %v25137_v13 = vand.u32 4294901760, %v25122_v37  ;;  %v25139_v56 = vand.u32 4294901760, %v982_v8  ;;  %v984_v26 = vsel %vm951_vm2, %v920_v38, 0  ;;  %v25147_v22 = vand.u32 4294901760, %v1199_v57 }
  0x35   : > { %30707 = vst [vmem:[#allocation65_spill] sm:$0xff] %v25114_v48  ;;  %30708 = vst [vmem:[#allocation66_spill] sm:$0xff] %v25119_v51  ;;  %v25149_v6 = vand.u32 4294901760, %v984_v26  ;;  %v1219_v29 = vsub.f32 %v25112_v54, %v25129_v17  ;;  %v922_v14 = vsel %vm29960_vm1, %v919_v47, %v921_v36  ;;  %20327 = vmatmul.mubr.f32.gmra.mrb[8].mxu1 %v25103_v4  ;;  %v25164_v38 = vand.u32 4294901760, %v1209_v27 }
  0x36   : > { %30709 = vst [vmem:[#allocation67_spill] sm:$0xff] %v25122_v37  ;;  %30710 = vst [vmem:[#allocation68_spill] sm:$0xff] %v25129_v17  ;;  %v25162_v51 = vsub.f32 %v982_v8, %v25139_v56  ;;  %v986_v57 = vsel %vm951_vm2, %v922_v14, 0  ;;  %v1229_v20 = vsub.f32 %v25122_v37, %v25137_v13  ;;  %21680 = vmatmul.mubr.f32.gmra.mrb[10].mxu0 %v25129_v17  ;;  %20329 = vmatprep.mubr.f32.mxu1 %v25114_v48 }
  0x37   : > { %30711 = vst [vmem:[#allocation69_spill] sm:$0xff] %v25137_v13  ;;  %30712 = vst [vmem:[#allocation70_spill] sm:$0xff] %v25139_v56  ;;  %v25173_v47 = vsub.f32 %v984_v26, %v25149_v6  ;;  %v25175_v0 = vand.u32 4294901760, %v1219_v29  ;;  %v25177_v4 = vand.u32 4294901760, %v986_v57  ;;  %v923_v8 = vrot.slane %v25145_v15, 1  ;;  %21682 = vmatprep.mubr.f32.mxu0 %v25137_v13 }
  0x38   : > { %30713 = vst [vmem:[#allocation71_spill] sm:$0xff] %v25145_v15  ;;  %30714 = vst [vmem:[#allocation72_spill] sm:$0xff] %v25147_v22  ;;  %v25182_v27 = vand.u32 4294901760, %v25162_v51  ;;  %v25184_v14 = vand.u32 4294901760, %v1229_v20  ;;  %v925_v17 = vrot.slane %v25155_v45, 1  ;;  %v927_v48 = vrot.slane %v25158_v42, 1 }
  0x39   : > { %30715 = vst [vmem:[#allocation73_spill] sm:$0xff] %v25149_v6  ;;  %30716 = vst [vmem:[#allocation74_spill] sm:$0xff] %v25155_v45  ;;  %v25189_v26 = vand.u32 4294901760, %v25173_v47  ;;  %v25192_v29 = vsub.f32 %v986_v57, %v25177_v4  ;;  %v924_v15 = vsel %vm29960_vm1, %v921_v36, %v923_v8  ;;  %v929_v13 = vrot.slane %v193_v1, 1  ;;  %20330 = vmatmul.mubr.f32.gmra.mrb[10].mxu1 %v25147_v22  ;;  %v25212_v22 = vld [vmem:[%s24839_s21 + $0xb8] sm:$0xff] }
  0x3a   : > { %30717 = vst [vmem:[#allocation75_spill] sm:$0xff] %v25158_v42  ;;  %30718 = vst [vmem:[#allocation76_spill] sm:$0xff] %v25162_v51  ;;  %v988_v20 = vsel %vm951_vm2, %v924_v15, 0  ;;  %v1239_v45 = vsub.f32 %v25162_v51, %v25182_v27  ;;  %v926_v42 = vsel %vm29960_vm1, %v923_v8, %v925_v17  ;;  %v928_v37 = vsel %vm29960_vm1, %v925_v17, %v927_v48  ;;  %v25215_v8 = vld [vmem:[%s24839_s21 + $0xc0] sm:$0xff] }
  0x3b   : > { %30719 = vst [vmem:[#allocation77_spill] sm:$0xff] %v25164_v38  ;;  %30720 = vst [vmem:[#allocation78_spill] sm:$0xff] %v25173_v47  ;;  %21683 = vmatmul.mubr.f32.gmra.mrb[12].mxu0 %v25182_v27  ;;  %20332 = vmatprep.mubr.f32.mxu1 %v25164_v38  ;;  %v25204_v57 = vand.u32 4294901760, %v25192_v29  ;;  %v25206_v1 = vand.u32 4294901760, %v988_v20  ;;  %v990_v36 = vsel %vm951_vm2, %v926_v42, 0  ;;  %v1249_v15 = vsub.f32 %v25173_v47, %v25189_v26 }
  0x3c   : > { %30721 = vst [vmem:[#allocation79_spill] sm:$0xff] %v25175_v0  ;;  %30722 = vst [vmem:[#allocation80_spill] sm:$0xff] %v25177_v4  ;;  %21685 = vmatprep.mubr.f32.mxu0 %v25189_v26  ;;  %v25218_v17 = vand.u32 4294901760, %v1239_v45  ;;  %v25220_v38 = vand.u32 4294901760, %v990_v36  ;;  %v930_v51 = vsel %vm29960_vm1, %v927_v48, %v929_v13  ;;  %v931_v48 = vrot.slane %v25212_v22, 1 }
  0x3d   : > { %30723 = vst [vmem:[#allocation81_spill] sm:$0xff] %v25182_v27  ;;  %30724 = vst [vmem:[#allocation82_spill] sm:$0xff] %v25184_v14  ;;  %v992_v27 = vsel %vm951_vm2, %v928_v37, 0  ;;  %v25225_v54 = vsub.f32 %v988_v20, %v25206_v1  ;;  %v25227_v42 = vand.u32 4294901760, %v1249_v15  ;;  %v1259_v55 = vsub.f32 %v25192_v29, %v25204_v57  ;;  %20333 = vmatmul.mubr.f32.gmra.mrb[12].mxu1 %v25175_v0 }
  0x3e   : > { %30725 = vst [vmem:[#allocation83_spill] sm:$0xff] %v25189_v26  ;;  %30726 = vst [vmem:[#allocation84_spill] sm:$0xff] %v25192_v29  ;;  %v25229_v47 = vand.u32 4294901760, %v992_v27  ;;  %v25238_v45 = vsub.f32 %v990_v36, %v25220_v38  ;;  %v994_v37 = vsel %vm951_vm2, %v930_v51, 0  ;;  %v933_v20 = vrot.slane %v25215_v8, 1  ;;  %20335 = vmatprep.mubr.f32.mxu1 %v25184_v14 }
  0x3f   : > { %30727 = vst [vmem:[#allocation85_spill] sm:$0xff] %v25204_v57  ;;  %30728 = vst [vmem:[#allocation86_spill] sm:$0xff] %v25206_v1  ;;  %21686 = vmatmul.mubr.f32.gmra.mrb[14].mxu0 %v25204_v57  ;;  %v25246_v15 = vand.u32 4294901760, %v25225_v54  ;;  %v25251_v0 = vand.u32 4294901760, %v1259_v55  ;;  %v25253_v36 = vand.u32 4294901760, %v994_v37  ;;  %v935_v57 = vrot.slane %v25234_v2, 1 }
  0x40   : > { %30729 = vst [vmem:[#allocation87_spill] sm:$0xff] %v25212_v22  ;;  %30730 = vst [vmem:[#allocation88_spill] sm:$0xff] %v25215_v8  ;;  %v25249_v26 = vsub.f32 %v992_v27, %v25229_v47  ;;  %v25256_v51 = vand.u32 4294901760, %v25238_v45  ;;  %v932_v8 = vsel %vm29960_vm1, %v929_v13, %v931_v48  ;;  %v934_v22 = vsel %vm29960_vm1, %v931_v48, %v933_v20  ;;  %v25272_v13 = vld [vmem:[%s24839_s21 + $0xd0] sm:$0xff] }
  0x41   : > { %30731 = vst [vmem:[#allocation89_spill] sm:$0xff] %v25218_v17  ;;  %30732 = vst [vmem:[#allocation90_spill] sm:$0xff] %v25220_v38  ;;  %21688 = vmatprep.mubr.f32.mxu0 %v25246_v15  ;;  %v25266_v55 = vsub.f32 %v994_v37, %v25253_v36  ;;  %v1269_v27 = vsub.f32 %v25225_v54, %v25246_v15  ;;  %v996_v29 = vsel %vm951_vm2, %v932_v8, 0  ;;  %20336 = vmatmul.mubr.f32.gmra.mrb[14].mxu1 %v25218_v17 }
  0x42   : > { %30733 = vst [vmem:[#allocation91_spill] sm:$0xff] %v25225_v54  ;;  %30734 = vst [vmem:[#allocation92_spill] sm:$0xff] %v25227_v42  ;;  %v25263_v14 = vand.u32 4294901760, %v25249_v26  ;;  %v25275_v48 = vand.u32 4294901760, %v996_v29  ;;  %v998_v46 = vsel %vm951_vm2, %v934_v22, 0  ;;  %v936_v37 = vsel %vm29960_vm1, %v933_v20, %v935_v57  ;;  %20338 = vmatprep.mubr.f32.mxu1 %v25227_v42 }
  0x43   : > { %30735 = vst [vmem:[#allocation93_spill] sm:$0xff] %v25229_v47  ;;  %30736 = vst [vmem:[#allocation94_spill] sm:$0xff] %v25234_v2  ;;  %v1279_v2 = vsub.f32 %v25238_v45, %v25256_v51  ;;  %21689 = vmatmul.mubr.f32.gmra.mrb[16].mxu0 %v25256_v51  ;;  %v25286_v8 = vand.u32 4294901760, %v1269_v27  ;;  %v25288_v54 = vand.u32 4294901760, %v998_v46  ;;  %v1000_v42 = vsel %vm951_vm2, %v936_v37, 0 }
  0x44   : > { %30737 = vst [vmem:[#allocation95_spill] sm:$0xff] %v25238_v45  ;;  %30738 = vst [vmem:[#allocation96_spill] sm:$0xff] %v25246_v15  ;;  %v25284_v15 = vand.u32 4294901760, %v25266_v55  ;;  %v1289_v17 = vsub.f32 %v25249_v26, %v25263_v14  ;;  %v25296_v45 = vld [vmem:[%s24839_s21 + $0xe0] sm:$0xff]  ;;  %21691 = vmatprep.mubr.f32.mxu0 %v25263_v14  ;;  %v25300_v22 = vsub.f32 %v996_v29, %v25275_v48  ;;  %v937_v27 = vrot.slane %v25272_v13, 1 }
  0x45   : > { %30739 = vst [vmem:[#allocation97_spill] sm:$0xff] %v25249_v26  ;;  %30740 = vst [vmem:[#allocation98_spill] sm:$0xff] %v25251_v0  ;;  %v25302_v20 = vand.u32 4294901760, %v1279_v2  ;;  %v25311_v26 = vand.u32 4294901760, %v1000_v42  ;;  %20339 = vmatmul.mubr.f32.gmra.mrb[16].mxu1 %v25251_v0  ;;  %v939_v37 = vrot.slane %v25293_v25, 1  ;;  %v25341_v25 = vld [vmem:[%s24839_s21 + $0xe8] sm:$0xff] }
  0x46   : > { %30741 = vst [vmem:[#allocation99_spill] sm:$0xff] %v25253_v36  ;;  %30742 = vst [vmem:[#allocation100_spill] sm:$0xff] %v25256_v51  ;;  %v25307_v51 = vsub.f32 %v998_v46, %v25288_v54  ;;  %v25309_v34 = vand.u32 4294901760, %v1289_v17  ;;  %v1299_v61 = vsub.f32 %v25266_v55, %v25284_v15  ;;  %v25317_v2 = vand.u32 4294901760, %v25300_v22  ;;  %20341 = vmatprep.mubr.f32.mxu1 %v25286_v8 }
  0x47   : > { %30743 = vst [vmem:[#allocation101_spill] sm:$0xff] %v25263_v14  ;;  %30744 = vst [vmem:[#allocation102_spill] sm:$0xff] %v25266_v55  ;;  %v938_v29 = vsel %vm29960_vm1, %v935_v57, %v937_v27  ;;  %v941_v46 = vrot.slane %v25296_v45, 1  ;;  %21692 = vmatmul.mubr.f32.gmra.mrb[18].mxu0 %v25284_v15  ;;  %v25328_v0 = vsub.f32 %v1000_v42, %v25311_v26  ;;  %v25344_v42 = vld [vmem:[%s24839_s21 + $0xf0] sm:$0xff] }
  0x48   : > { %30745 = vst [vmem:[#allocation103_spill] sm:$0xff] %v25272_v13  ;;  %30746 = vst [vmem:[#allocation104_spill] sm:$0xff] %v25275_v48  ;;  %v25325_v17 = vand.u32 4294901760, %v25307_v51  ;;  %v25330_v14 = vand.u32 4294901760, %v1299_v61  ;;  %v1002_v13 = vsel %vm951_vm2, %v938_v29, 0  ;;  %21694 = vmatprep.mubr.f32.mxu0 %v25317_v2 }
  0x49   : > { %30747 = vst [vmem:[#allocation105_spill] sm:$0xff] %v25284_v15  ;;  %30748 = vst [vmem:[#allocation106_spill] sm:$0xff] %v25286_v8  ;;  %v25334_v57 = vand.u32 4294901760, %v1002_v13  ;;  %v1309_v15 = vsub.f32 %v25300_v22, %v25317_v2  ;;  %v940_v8 = vsel %vm29960_vm1, %v937_v27, %v939_v37  ;;  %v25347_v61 = vand.u32 4294901760, %v25328_v0  ;;  %20342 = vmatmul.mubr.f32.gmra.mrb[18].mxu1 %v25302_v20 }
  0x4a   : > { %30749 = vst [vmem:[#allocation107_spill] sm:$0xff] %v25288_v54  ;;  %30751 = vst [vmem:[#allocation109_spill] sm:$0xff] %v25296_v45  ;;  %v942_v45 = vsel %vm29960_vm1, %v939_v37, %v941_v46  ;;  %v1004_v29 = vsel %vm951_vm2, %v940_v8, 0  ;;  %v1319_v55 = vsub.f32 %v25307_v51, %v25325_v17  ;;  %20344 = vmatprep.mubr.f32.mxu1 %v25309_v34 }
  0x4b   : > { %30752 = vst [vmem:[#allocation110_spill] sm:$0xff] %v25300_v22  ;;  %30753 = vst [vmem:[#allocation111_spill] sm:$0xff] %v25302_v20  ;;  %v1006_v11 = vsel %vm951_vm2, %v942_v45, 0  ;;  %v25356_v27 = vsub.f32 %v1002_v13, %v25334_v57  ;;  %v25358_v37 = vand.u32 4294901760, %v1309_v15  ;;  %21695 = vmatmul.mubr.f32.gmra.mrb[20].mxu0 %v25325_v17  ;;  %v1329_v45 = vsub.f32 %v25328_v0, %v25347_v61 }
  0x4c   : > { %30754 = vst [vmem:[#allocation112_spill] sm:$0xff] %v25307_v51  ;;  %30755 = vst [vmem:[#allocation113_spill] sm:$0xff] %v25309_v34  ;;  %v25362_v22 = vand.u32 4294901760, %v1006_v11  ;;  %v25367_v8 = vand.u32 4294901760, %v1319_v55  ;;  %v943_v20 = vrot.slane %v25341_v25, 1  ;;  %v945_v13 = vrot.slane %v25344_v42, 1  ;;  %21697 = vmatprep.mubr.f32.mxu0 %v25347_v61 }
  0x4d   : > { %30756 = vst [vmem:[#allocation114_spill] sm:$0xff] %v25311_v26  ;;  %30757 = vst [vmem:[#allocation115_spill] sm:$0xff] %v25317_v2  ;;  %v25360_v2 = vand.u32 4294901760, %v1004_v29  ;;  %v25375_v15 = vand.u32 4294901760, %v25356_v27  ;;  %v947_v55 = vrot.slane %v202_v24, 1  ;;  %v25383_v34 = vand.u32 4294901760, %v1329_v45  ;;  %20345 = vmatmul.mubr.f32.gmra.mrb[20].mxu1 %v25330_v14 }
  0x4e   : > { %30758 = vst [vmem:[#allocation116_spill] sm:$0xff] %v25325_v17  ;;  %30759 = vst [vmem:[#allocation117_spill] sm:$0xff] %v25328_v0  ;;  %v25381_v17 = vsub.f32 %v1006_v11, %v25362_v22  ;;  %v944_v0 = vsel %vm29960_vm1, %v941_v46, %v943_v20  ;;  %20347 = vmatprep.mubr.f32.mxu1 %v25358_v37 }
  0x4f   : > { %30760 = vst [vmem:[#allocation118_spill] sm:$0xff] %v25330_v14  ;;  %30761 = vst [vmem:[#allocation119_spill] sm:$0xff] %v25334_v57  ;;  %v25378_v51 = vsub.f32 %v1004_v29, %v25360_v2  ;;  %v1008_v11 = vsel %vm951_vm2, %v944_v0, 0  ;;  %v1339_v24 = vsub.f32 %v25356_v27, %v25375_v15  ;;  %21698 = vmatmul.mubr.f32.gmra.mrb[22].mxu0 %v25375_v15  ;;  %v25405_v14 = vld [vmem:[%s24839_s21 + $0x108] sm:$0xff] }
  0x50   : > { %30762 = vst [vmem:[#allocation120_spill] sm:$0xff] %v25341_v25  ;;  %30763 = vst [vmem:[#allocation121_spill] sm:$0xff] %v25344_v42  ;;  %v946_v25 = vsel %vm29960_vm1, %v943_v20, %v945_v13  ;;  %v949_v42 = vrot.slane %v203_v18, 1  ;;  %v25392_v29 = vand.u32 4294901760, %v25381_v17  ;;  %v25399_v20 = vand.u32 4294901760, %v1008_v11 }
  0x51   : > { %30764 = vst [vmem:[#allocation122_spill] sm:$0xff] %v25347_v61  ;;  %30765 = vst [vmem:[#allocation123_spill] sm:$0xff] %v25356_v27  ;;  %v25389_v61 = vand.u32 4294901760, %v25378_v51  ;;  %v1010_v18 = vsel %vm951_vm2, %v946_v25, 0  ;;  %v948_v46 = vsel %vm29960_vm1, %v945_v13, %v947_v55  ;;  %v25419_v25 = vand.u32 4294901760, %v1339_v24  ;;  %20348 = vmatmul.mubr.f32.gmra.mrb[22].mxu1 %v25367_v8 }
  0x52   : > { %30766 = vst [vmem:[#allocation124_spill] sm:$0xff] %v25358_v37  ;;  %30767 = vst [vmem:[#allocation125_spill] sm:$0xff] %v25360_v2  ;;  %v950_v45 = vsel %vm29960_vm1, %v947_v55, %v949_v42  ;;  %v25408_v0 = vand.u32 4294901760, %v1010_v18  ;;  %v25414_v37 = vld [vmem:[%s24839_s21 + $0x110] sm:$0xff]  ;;  %v25417_v28 = vsub.f32 %v1008_v11, %v25399_v20  ;;  %20350 = vmatprep.mubr.f32.mxu1 %v25383_v34 }
  0x53   : > { %30768 = vst [vmem:[#allocation126_spill] sm:$0xff] %v25362_v22  ;;  %30769 = vst [vmem:[#allocation127_spill] sm:$0xff] %v25367_v8  ;;  %21700 = vmatprep.mubr.f32.mxu0 %v25389_v61  ;;  %v1349_v27 = vsub.f32 %v25378_v51, %v25389_v61  ;;  %v1014_v55 = vsel %vm951_vm2, %v950_v45, 0 }
  0x54   : > { %30770 = vst [vmem:[#allocation128_spill] sm:$0xff] %v25375_v15  ;;  %30771 = vst [vmem:[#allocation129_spill] sm:$0xff] %v25378_v51  ;;  %v1012_v15 = vsel %vm951_vm2, %v948_v46, 0  ;;  %v25426_v58 = vsub.f32 %v1010_v18, %v25408_v0  ;;  %v25430_v46 = vand.u32 4294901760, %v1014_v55  ;;  %v8859_v51 = vrot.slane %v25405_v14, 1  ;;  %21701 = vmatmul.mubr.f32.gmra.mrb[24].mxu0 %v25392_v29 }
  0x55   : > { %30772 = vst [vmem:[#allocation130_spill] sm:$0xff] %v25381_v17  ;;  %30773 = vst [vmem:[#allocation131_spill] sm:$0xff] %v25383_v34  ;;  %v25421_v13 = vand.u32 4294901760, %v1012_v15  ;;  %v25436_v11 = vand.u32 4294901760, %v25417_v28  ;;  %v25438_v24 = vand.u32 4294901760, %v1349_v27  ;;  %v29755_v18 = vrot.slane %v25414_v37, 1  ;;  %20351 = vmatmul.mubr.f32.gmra.mrb[24].mxu1 %v25419_v25 }
  0x56   : > { %30774 = vst [vmem:[#allocation132_spill] sm:$0xff] %v25389_v61  ;;  %30775 = vst [vmem:[#allocation133_spill] sm:$0xff] %v25392_v29  ;;  %v1359_v61 = vsub.f32 %v25381_v17, %v25392_v29  ;;  %v25445_v8 = vand.u32 4294901760, %v25426_v58  ;;  %v25448_v17 = vsub.f32 %v1014_v55, %v25430_v46  ;;  %v8860_v29 = vsel %vm29960_vm1, %v949_v42, %v8859_v51 }
  0x57   : > { %30776 = vst [vmem:[#allocation134_spill] sm:$0xff] %v25399_v20  ;;  %30777 = vst [vmem:[#allocation135_spill] sm:$0xff] %v25405_v14  ;;  %v25441_v45 = vsub.f32 %v1012_v15, %v25421_v13  ;;  %21703 = vmatprep.mubr.f32.mxu0 %v25436_v11  ;;  %v1369_v27 = vsub.f32 %v25417_v28, %v25436_v11  ;;  %v8863_v15 = vsel %vm951_vm2, %v8860_v29, 0  ;;  %20353 = vmatprep.mubr.f32.mxu1 %v25438_v24 }
  0x58   : > { %30778 = vst [vmem:[#allocation136_spill] sm:$0xff] %v25408_v0  ;;  %30779 = vst [vmem:[#allocation137_spill] sm:$0xff] %v25414_v37  ;;  %v8862_v14 = vsel %vm29960_vm1, %v8859_v51, %v29755_v18  ;;  %v25462_v55 = vand.u32 4294901760, %v1359_v61  ;;  %v25464_v10 = vand.u32 4294901760, %v8863_v15  ;;  %v1379_v42 = vsub.f32 %v25426_v58, %v25445_v8  ;;  %21704 = vmatmul.mubr.f32.gmra.mrb[26].mxu0 %v25445_v8 }
  0x59   : > { %30780 = vst [vmem:[#allocation138_spill] sm:$0xff] %v25417_v28  ;;  %30781 = vst [vmem:[#allocation139_spill] sm:$0xff] %v25419_v25  ;;  %v25453_v34 = vand.u32 4294901760, %v25441_v45  ;;  %v8865_v9 = vsel %vm951_vm2, %v8862_v14, 0  ;;  %v25472_v29 = vand.u32 4294901760, %v25448_v17 }
  0x5a   : > { %30782 = vst [vmem:[#allocation140_spill] sm:$0xff] %v25421_v13  ;;  %30783 = vst [vmem:[#allocation141_spill] sm:$0xff] %v25426_v58  ;;  %v25476_v51 = vand.u32 4294901760, %v8865_v9  ;;  %v25482_v18 = vsub.f32 %v8863_v15, %v25464_v10  ;;  %20354 = vmatmul.mubr.f32.gmra.mrb[26].mxu1 %v25462_v55 }
  0x5b   : > { %30784 = vst [vmem:[#allocation142_spill] sm:$0xff] %v25430_v46  ;;  %30785 = vst [vmem:[#allocation143_spill] sm:$0xff] %v25436_v11  ;;  %v25474_v11 = vand.u32 4294901760, %v1369_v27  ;;  %v1389_v61 = vsub.f32 %v25441_v45, %v25453_v34  ;;  %21706 = vmatprep.mubr.f32.mxu0 %v25453_v34  ;;  %v25491_v27 = vand.u32 4294901760, %v1379_v42  ;;  %v1399_v25 = vsub.f32 %v25448_v17, %v25472_v29 }
  0x5c   : > { %30786 = vst [vmem:[#allocation144_spill] sm:$0xff] %v25438_v24  ;;  %30787 = vst [vmem:[#allocation145_spill] sm:$0xff] %v25441_v45  ;;  %v25485_v14 = vsub.f32 %v8865_v9, %v25476_v51  ;;  %v25489_v24 = vand.u32 4294901760, %v25482_v18  ;;  %21707 = vmatmul.mubr.f32.gmra.mrb[28].mxu0 %v25472_v29  ;;  %v18522_v9 = vld [vmem:[%s29579_s1 + $0x14] sm:$0x7] }
  0x5d   : > { %30788 = vst [vmem:[#allocation146_spill] sm:$0xff] %v25445_v8  ;;  %30789 = vst [vmem:[#allocation147_spill] sm:$0xff] %v25448_v17  ;;  %20356 = vmatprep.mubr.f32.mxu1 %v25474_v11  ;;  %v25507_v42 = vand.u32 4294901760, %v1399_v25 }
  0x5e   : > { %30790 = vst [vmem:[#allocation148_spill] sm:$0xff] %v25453_v34  ;;  %30791 = vst [vmem:[#allocation149_spill] sm:$0xff] %v25462_v55  ;;  %v25498_v15 = vand.u32 4294901760, %v25485_v14  ;;  %v25500_v34 = vand.u32 4294901760, %v1389_v61  ;;  %21709 = vmatprep.mubr.f32.mxu0 %v25489_v24  ;;  %20357 = vmatmul.mubr.f32.gmra.mrb[28].mxu1 %v25491_v27  ;;  %v30810_v55 = vld [vmem:[#allocation45_spill] sm:$0xff] }
  0x5f   : > { %30792 = vst [vmem:[#allocation150_spill] sm:$0xff] %v25464_v10  ;;  %30793 = vst [vmem:[#allocation151_spill] sm:$0xff] %v25472_v29 }
  0x60   : > { %30794 = vst [vmem:[#allocation152_spill] sm:$0xff] %v25474_v11  ;;  %30795 = vst [vmem:[#allocation153_spill] sm:$0xff] %v25476_v51  ;;  %21710 = vmatmul.mubr.f32.gmra.mrb[30].mxu0 %v25498_v15  ;;  %20359 = vmatprep.mubr.f32.mxu1 %v25500_v34 }
  0x61   : > { %30796 = vst [vmem:[#allocation154_spill] sm:$0xff] %v25482_v18  ;;  %30797 = vst [vmem:[#allocation155_spill] sm:$0xff] %v25485_v14  ;;  %v10818_v18 = vsel %vm1016_vm0, %v18522_v9, 0  ;;  %21714 = vmatprep.mubr.f32.mxu0 %v24879_v30 }
  0x62   : > { %30798 = vst [vmem:[#allocation156_spill] sm:$0xff] %v25489_v24  ;;  %30799 = vst [vmem:[#allocation157_spill] sm:$0xff] %v25491_v27  ;;  %v25513_v61 = vand.u32 4294901760, %v10818_v18  ;;  %20360 = vmatmul.mubr.f32.gmra.mrb[30].mxu1 %v25507_v42 }
  0x63   : > { %30800 = vst [vmem:[#allocation158_spill] sm:$0xff] %v25498_v15  ;;  %30801 = vst [vmem:[#allocation159_spill] sm:$0xff] %v25500_v34  ;;  %20364 = vmatprep.mubr.f32.mxu1 %v24888_v35  ;;  %v30806_v34 = vld [vmem:[#allocation6_spill] sm:$0xff]  ;;  %v30807_v15 = vld [vmem:[#allocation37_spill] sm:$0xff] }
  0x64   : > { %30802 = vst [vmem:[#allocation160_spill] sm:$0xff] %v25507_v42  ;;  %21715 = vmatmul.mubr.f32.vlgmr.msra.gmra.mrb[0].mxu0 %v24881_v31 }
  0x65   : > { %21717 = vmatprep.mubr.f32.mxu0 %v24900_v41  ;;  %21763 = vmatpush3.msra.mxu0 %v24819_v3 }
  0x66   : > { %21812 = vmatprep.subr.mxu0 %v25513_v61  ;;  %20365 = vmatmul.mubr.f32.vlgmr.msra.gmra.mrb[0].mxu1 %v24906_v44 }
  0x67   : > { %20413 = vmatpush3.msra.mxu1 %v24834_v7  ;;  %20367 = vmatprep.mubr.f32.mxu1 %v24879_v30  ;;  %v25572_v7 = vsub.f32 %v10818_v18, %v25513_v61 }
  0x68   : > { %21718 = vmatmul.mubr.f32.gmra.mrb[2].mxu0 %v24924_v53  ;;  %20462 = vmatprep.subr.mxu1 %v24824_v5 }
  0x69   : > { %21720 = vmatprep.mubr.f32.mxu0 %v24947_v63  ;;  %v25579_v25 = vand.u32 4294901760, %v25572_v7 }
  0x6a   : > { %20368 = vmatmul.mubr.f32.gmra.mrb[2].mxu1 %v24881_v31 }
  0x6b   : > { %20370 = vmatprep.mubr.f32.mxu1 %v24900_v41  ;;  %30803 = vst [vmem:[#allocation161_spill] sm:$0xff] %v25579_v25  ;;  %v11210_v18 = vsub.f32 %v25572_v7, %v25579_v25  ;;  %v30811_v25 = vld [vmem:[#allocation7_spill] sm:$0xff] }
  0x6c   : > { %21721 = vmatmul.mubr.f32.gmra.mrb[4].mxu0 %v24989_v33 }
  0x6d   : > { %21723 = vmatprep.mubr.f32.mxu0 %v25012_v59  ;;  %v25591_v9 = vand.u32 4294901760, %v11210_v18  ;;  %v208_v18 = vlaneseq }
  0x6e   : > { %20371 = vmatmul.mubr.f32.gmra.mrb[4].mxu1 %v24924_v53 }
  0x6f   : > { %20373 = vmatprep.mubr.f32.mxu1 %v24947_v63  ;;  %v25609_v3 = vshrl.u32 %v208_v18, 7  ;;  %v30808_v18 = vld [vmem:[#allocation44_spill] sm:$0xff] }
  0x70   : > { %21724 = vmatmul.mubr.f32.gmra.mrb[6].mxu0 %v25014_v60 }
  0x71   : > { %21726 = vmatprep.mubr.f32.mxu0 %v25038_v32  ;;  %30804 = vst [vmem:[#allocation162_spill] sm:$0xff] %v25609_v3  ;;  %v210_v14 = vadd.s32 8, %v25609_v3  ;;  %v214_v11 = vadd.s32 40, %v25609_v3 }
  0x72   : > { %20374 = vmatmul.mubr.f32.gmra.mrb[6].mxu1 %v24989_v33 }
  0x73   : > { %20376 = vmatprep.mubr.f32.mxu1 %v25012_v59 }
  0x74   : > { %21727 = vmatmul.mubr.f32.gmra.mrb[8].mxu0 %v25068_v21 }
  0x75   : > { %21729 = vmatprep.mubr.f32.mxu0 %v25076_v23 }
  0x76   : > { %20377 = vmatmul.mubr.f32.gmra.mrb[8].mxu1 %v25014_v60 }
  0x77   : > { %20379 = vmatprep.mubr.f32.mxu1 %v25038_v32 }
  0x78   : > { %21730 = vmatmul.mubr.f32.gmra.mrb[10].mxu0 %v25092_v50 }
  0x79   : > { %21732 = vmatprep.mubr.f32.mxu0 %v25105_v16 }
  0x7a   : > { %20380 = vmatmul.mubr.f32.gmra.mrb[10].mxu1 %v25068_v21 }
  0x7b   : > { %20382 = vmatprep.mubr.f32.mxu1 %v25076_v23 }
  0x7c   : > { %21733 = vmatmul.mubr.f32.gmra.mrb[12].mxu0 %v25139_v56 }
  0x7d   : > { %21735 = vmatprep.mubr.f32.mxu0 %v25149_v6 }
  0x7e   : > { %20383 = vmatmul.mubr.f32.gmra.mrb[12].mxu1 %v25092_v50 }
  0x7f   : > { %20385 = vmatprep.mubr.f32.mxu1 %v25105_v16 }
  0x80   : > { %21736 = vmatmul.mubr.f32.gmra.mrb[14].mxu0 %v25177_v4 }
  0x81   : > { %21738 = vmatprep.mubr.f32.mxu0 %v25206_v1 }
  0x82   : > { %20386 = vmatmul.mubr.f32.gmra.mrb[14].mxu1 %v25139_v56 }
  0x83   : > { %20388 = vmatprep.mubr.f32.mxu1 %v25149_v6 }
  0x84   : > { %21739 = vmatmul.mubr.f32.gmra.mrb[16].mxu0 %v25220_v38 }
  0x85   : > { %21741 = vmatprep.mubr.f32.mxu0 %v25229_v47 }
  0x86   : > { %20389 = vmatmul.mubr.f32.gmra.mrb[16].mxu1 %v25177_v4 }
  0x87   : > { %20391 = vmatprep.mubr.f32.mxu1 %v25206_v1 }
  0x88   : > { %21742 = vmatmul.mubr.f32.gmra.mrb[18].mxu0 %v25253_v36 }
  0x89   : > { %21744 = vmatprep.mubr.f32.mxu0 %v25275_v48 }
  0x8a   : > { %20392 = vmatmul.mubr.f32.gmra.mrb[18].mxu1 %v25220_v38 }
  0x8b   : > { %20394 = vmatprep.mubr.f32.mxu1 %v25229_v47 }
  0x8c   : > { %21745 = vmatmul.mubr.f32.gmra.mrb[20].mxu0 %v25288_v54 }
  0x8d   : > { %21747 = vmatprep.mubr.f32.mxu0 %v25311_v26 }
  0x8e   : > { %20395 = vmatmul.mubr.f32.gmra.mrb[20].mxu1 %v25253_v36 }
  0x8f   : > { %20397 = vmatprep.mubr.f32.mxu1 %v25275_v48 }
  0x90   : > { %21748 = vmatmul.mubr.f32.gmra.mrb[22].mxu0 %v25334_v57 }
  0x91   : > { %21750 = vmatprep.mubr.f32.mxu0 %v25360_v2 }
  0x92   : > { %20398 = vmatmul.mubr.f32.gmra.mrb[22].mxu1 %v25288_v54 }
  0x93   : > { %20400 = vmatprep.mubr.f32.mxu1 %v25311_v26 }
  0x94   : > { %21751 = vmatmul.mubr.f32.gmra.mrb[24].mxu0 %v25362_v22 }
  0x95   : > { %21753 = vmatprep.mubr.f32.mxu0 %v25399_v20 }
  0x96   : > { %20401 = vmatmul.mubr.f32.gmra.mrb[24].mxu1 %v25334_v57 }
  0x97   : > { %20403 = vmatprep.mubr.f32.mxu1 %v25360_v2 }
  0x98   : > { %21754 = vmatmul.mubr.f32.gmra.mrb[26].mxu0 %v25408_v0 }
  0x99   : > { %21756 = vmatprep.mubr.f32.mxu0 %v25421_v13 }
  0x9a   : > { %20404 = vmatmul.mubr.f32.gmra.mrb[26].mxu1 %v25362_v22 }
  0x9b   : > { %20406 = vmatprep.mubr.f32.mxu1 %v25399_v20 }
  0x9c   : > { %21757 = vmatmul.mubr.f32.gmra.mrb[28].mxu0 %v25430_v46 }
  0x9d   : > { %21759 = vmatprep.mubr.f32.mxu0 %v25464_v10 }
  0x9e   : > { %20407 = vmatmul.mubr.f32.gmra.mrb[28].mxu1 %v25408_v0 }
  0x9f   : > { %20409 = vmatprep.mubr.f32.mxu1 %v25421_v13 }
  0xa0   : > { %21760 = vmatmul.mubr.f32.gmra.mrb[30].mxu0 %v25476_v51 }
  0xa1   : > { %21764 = vmatprep.mubr.f32.mxu0 %v24879_v30 }
  0xa2   : > { %20410 = vmatmul.mubr.f32.gmra.mrb[30].mxu1 %v25430_v46 }
  0xa3   : > { %20414 = vmatprep.mubr.f32.mxu1 %v24904_v43 }
  0xa4   : > { %21765 = vmatmul.mubr.f32.vlgmr.msra.gmra.mrb[0].mxu0 %v24881_v31 }
  0xa5   : > { %21767 = vmatprep.mubr.f32.mxu0 %v24900_v41  ;;  %21813 = vmatpush3.msra.mxu0 %v25513_v61 }
  0xa6   : > { %21862 = vmatprep.subr.mxu0 %v25591_v9  ;;  %20415 = vmatmul.mubr.f32.vlgmr.msra.gmra.mrb[0].mxu1 %v24922_v52 }
  0xa7   : > { %20463 = vmatpush3.msra.mxu1 %v24824_v5  ;;  %20417 = vmatprep.mubr.f32.mxu1 %v24895_v39  ;;  %v30805_v39 = vld [vmem:[#allocation5_spill] sm:$0xff] }
  0xa8   : > { %21768 = vmatmul.mubr.f32.gmra.mrb[2].mxu0 %v24924_v53  ;;  %20512 = vmatprep.subr.mxu1 %v24855_v12  ;;  %v29797_v42 = vrot.slane %v30805_v39, 2 }
  0xa9   : > { %21770 = vmatprep.mubr.f32.mxu0 %v24947_v63 }
  0xaa   : > { %20418 = vmatmul.mubr.f32.gmra.mrb[2].mxu1 %v24898_v40  ;;  %v4875_v40 = vrot.slane %v30806_v34, 2  ;;  %v252_v34 = vand.u32 15, %v210_v14  ;;  %v30814_v14 = vld [vmem:[#allocation9_spill] sm:$0xff] }
  0xab   : > { %20420 = vmatprep.mubr.f32.mxu1 %v24917_v49  ;;  %v212_v49 = vadd.s32 24, %v25609_v3 }
  0xac   : > { %21771 = vmatmul.mubr.f32.gmra.mrb[4].mxu0 %v24989_v33  ;;  %v30846_v33 = vld [vmem:[#allocation95_spill] sm:$0xff] }
  0xad   : > { %21773 = vmatprep.mubr.f32.mxu0 %v25012_v59  ;;  %v266_v24 = vand.u32 15, %v212_v49  ;;  %v4881_v49 = vrot.slane %v30814_v14, 2 }
  0xae   : > { %20421 = vmatmul.mubr.f32.gmra.mrb[4].mxu1 %v24945_v62  ;;  %v30809_v62 = vld [vmem:[#allocation8_spill] sm:$0xff] }
  0xaf   : > { %20423 = vmatprep.mubr.f32.mxu1 %v24971_v19  ;;  %v4876_v19 = vsel %vm30234_vm3, %v29797_v42, %v4875_v40  ;;  %v4879_v27 = vrot.slane %v30809_v62, 2  ;;  %v25637_v42 = vadd.s32 1, %v252_v34 }
  0xb0   : > { %21774 = vmatmul.mubr.f32.gmra.mrb[6].mxu0 %v25014_v60  ;;  %v30844_v60 = vld [vmem:[#allocation34_spill] sm:$0xff] }
  0xb1   : > { %21776 = vmatprep.mubr.f32.mxu0 %v25038_v32  ;;  %30815 = vst [vmem:[#allocation6_spill] sm:$0xff] %v25637_v42  ;;  %v25639_v32 = vadd.s32 1, %v266_v24  ;;  %v25653_v24 = vsel %vm30234_vm3, %v4879_v27, %v4881_v49  ;;  %vm30220_vm4 = vcmp.le.s32.totalorder %v25637_v42, 15  ;;  %v30834_v42 = vld [vmem:[#allocation24_spill] sm:$0xff]  ;;  %v4893_v59 = vrot.slane %v30844_v60, 2  ;;  %v30850_v60 = vld [vmem:[#allocation97_spill] sm:$0xff] }
  0xb2   : > { %20424 = vmatmul.mubr.f32.gmra.mrb[6].mxu1 %v30807_v15  ;;  %v4877_v15 = vrot.slane %v30811_v25, 2  ;;  %v30817_v25 = vld [vmem:[#allocation56_spill] sm:$0xff]  ;;  %30821 = vst [vmem:[#allocation9_spill] sm:$0xff] %v25653_v24 }
  0xb3   : > { %20426 = vmatprep.mubr.f32.mxu1 %v30808_v18  ;;  %v5008_v18 = vsel %vm951_vm2, %v4876_v19, 0  ;;  %30816 = vst [vmem:[#allocation8_spill] sm:$0xff] %v25639_v32  ;;  %v30819_v19 = vld [vmem:[#allocation60_spill] sm:$0xff]  ;;  %vm30210_vm5 = vcmp.le.s32.totalorder %v25639_v32, 15 }
  0xb4   : > { %21777 = vmatmul.mubr.f32.gmra.mrb[8].mxu0 %v25068_v21  ;;  %v30812_v21 = vld [vmem:[#allocation49_spill] sm:$0xff]  ;;  %v4880_v62 = vsel %vm30234_vm3, %v4877_v15, %v4879_v27  ;;  %v25650_v34 = vsel %vm30234_vm3, %v4875_v40, %v4877_v15  ;;  %v30827_v15 = vld [vmem:[#allocation67_spill] sm:$0xff] }
  0xb5   : > { %21779 = vmatprep.mubr.f32.mxu0 %v25076_v23  ;;  %v30813_v23 = vld [vmem:[#allocation12_spill] sm:$0xff] }
  0xb6   : > { %20427 = vmatmul.mubr.f32.gmra.mrb[8].mxu1 %v30810_v55  ;;  %v4883_v39 = vrot.slane %v30813_v23, 2  ;;  %v280_v55 = vand.u32 15, %v214_v11  ;;  %v5014_v23 = vsel %vm951_vm2, %v4880_v62, 0  ;;  %30820 = vst [vmem:[#allocation12_spill] sm:$0xff] %v25650_v34  ;;  %v216_v11 = vadd.s32 56, %v25609_v3 }
  0xb7   : > { %20429 = vmatprep.mubr.f32.mxu1 %v30812_v21  ;;  %v25665_v40 = vand.u32 4294901760, %v5014_v23 }
  0xb8   : > { %21780 = vmatmul.mubr.f32.gmra.mrb[10].mxu0 %v25092_v50  ;;  %v25642_v50 = vand.u32 4294901760, %v5008_v18  ;;  %v4884_v21 = vsel %vm30234_vm3, %v4881_v49, %v4883_v39  ;;  %v25658_v14 = vadd.s32 1, %v280_v55  ;;  %v10688_v55 = vsel %vm30220_vm4, %v25650_v34, 0.0 }
  0xb9   : > { %21782 = vmatprep.mubr.f32.mxu0 %v25105_v16  ;;  %30826 = vst [vmem:[#allocation164_spill] sm:$0xff] %v25665_v40  ;;  %v5020_v27 = vsel %vm951_vm2, %v4884_v21, 0  ;;  %v10690_v49 = vsel %vm30210_vm5, %v25653_v24, 0.0  ;;  %v25689_v34 = vsub.f32 %v5014_v23, %v25665_v40  ;;  %v10725_v24 = vsel %vm951_vm2, %v10688_v55, 0  ;;  %v30836_v23 = vld [vmem:[#allocation25_spill] sm:$0xff] }
  0xba   : > { %20430 = vmatmul.mubr.f32.gmra.mrb[10].mxu1 %v30817_v25  ;;  %30818 = vst [vmem:[#allocation7_spill] sm:$0xff] %v25642_v50  ;;  %30822 = vst [vmem:[#allocation163_spill] sm:$0xff] %v25658_v14  ;;  %v30824_v25 = vld [vmem:[#allocation64_spill] sm:$0xff]  ;;  %vm30196_vm6 = vcmp.le.s32.totalorder %v25658_v14, 15  ;;  %v10731_v32 = vsel %vm951_vm2, %v10690_v49, 0  ;;  %v220_v55 = vadd.s32 88, %v25609_v3 }
  0xbb   : > { %20432 = vmatprep.mubr.f32.mxu1 %v30819_v19  ;;  %v30823_v19 = vld [vmem:[#allocation20_spill] sm:$0xff]  ;;  %30832 = vst [vmem:[#allocation168_spill] sm:$0xff] %v25689_v34  ;;  %v222_v49 = vadd.s32 104, %v25609_v3  ;;  %v30841_v14 = vld [vmem:[#allocation30_spill] sm:$0xff] }
  0xbc   : > { %21783 = vmatmul.mubr.f32.gmra.mrb[12].mxu0 %v25139_v56  ;;  %v4885_v62 = vrot.slane %v30823_v19, 2  ;;  %v218_v19 = vadd.s32 72, %v25609_v3  ;;  %v4889_v56 = vrot.slane %v30836_v23, 2 }
  0xbd   : > { %21785 = vmatprep.mubr.f32.mxu0 %v25149_v6  ;;  %v25663_v6 = vsub.f32 %v5008_v18, %v25642_v50  ;;  %v294_v18 = vand.u32 15, %v216_v11  ;;  %v30833_v11 = vld [vmem:[#allocation78_spill] sm:$0xff] }
  0xbe   : > { %20433 = vmatmul.mubr.f32.gmra.mrb[12].mxu1 %v30824_v25  ;;  %v25678_v25 = vand.u32 4294901760, %v5020_v27  ;;  %v25682_v21 = vsel %vm30234_vm3, %v4883_v39, %v4885_v62  ;;  %v308_v16 = vand.u32 15, %v218_v19 }
  0xbf   : > { %30825 = vst [vmem:[#allocation20_spill] sm:$0xff] %v25663_v6  ;;  %20435 = vmatprep.mubr.f32.mxu1 %v30827_v15  ;;  %30829 = vst [vmem:[#allocation166_spill] sm:$0xff] %v25682_v21  ;;  %v30830_v15 = vld [vmem:[#allocation76_spill] sm:$0xff]  ;;  %v10692_v39 = vsel %vm30196_vm6, %v25682_v21, 0.0  ;;  %v25716_v21 = vand.u32 4294901760, %v10731_v32 }
  0xc0   : > { %21786 = vmatmul.mubr.f32.gmra.mrb[14].mxu0 %v25177_v4  ;;  %30828 = vst [vmem:[#allocation165_spill] sm:$0xff] %v25678_v25  ;;  %v4887_v4 = vrot.slane %v30834_v42, 2  ;;  %v10737_v19 = vsel %vm951_vm2, %v10692_v39, 0  ;;  %v336_v39 = vand.u32 15, %v222_v49 }
  0xc1   : > { %21788 = vmatprep.mubr.f32.mxu0 %v25206_v1  ;;  %v25686_v1 = vand.u32 4294901760, %v25663_v6 }
  0xc2   : > { %20436 = vmatmul.mubr.f32.gmra.mrb[14].mxu1 %v30830_v15  ;;  %v25700_v15 = vadd.s32 1, %v294_v18  ;;  %v25714_v18 = vand.u32 4294901760, %v25689_v34  ;;  %v4888_v23 = vsel %vm30234_vm3, %v4885_v62, %v4887_v4  ;;  %v25764_v63 = vadd.s32 1, %v336_v39 }
  0xc3   : > { %30831 = vst [vmem:[#allocation167_spill] sm:$0xff] %v25686_v1  ;;  %20438 = vmatprep.mubr.f32.mxu1 %v30833_v11  ;;  %v30838_v11 = vld [vmem:[#allocation84_spill] sm:$0xff]  ;;  %v5189_v42 = vsub.f32 %v25663_v6, %v25686_v1  ;;  %v25726_v1 = vsel %vm30234_vm3, %v4887_v4, %v4889_v56  ;;  %v25728_v6 = vadd.s32 1, %v308_v16  ;;  %v25743_v16 = vsub.f32 %v10731_v32, %v25716_v21 }
  0xc4   : > { %21789 = vmatmul.mubr.f32.gmra.mrb[16].mxu0 %v25220_v38  ;;  %30835 = vst [vmem:[#allocation24_spill] sm:$0xff] %v25700_v15  ;;  %v25704_v38 = vsub.f32 %v5020_v27, %v25678_v25  ;;  %30839 = vst [vmem:[#allocation169_spill] sm:$0xff] %v25714_v18  ;;  %v30840_v27 = vld [vmem:[#allocation91_spill] sm:$0xff]  ;;  %vm30183_vm7 = vcmp.le.s32.totalorder %v25700_v15, 15  ;;  %v5209_v4 = vsub.f32 %v25689_v34, %v25714_v18  ;;  %vm30139_vm10 = vcmp.le.s32.totalorder %v25764_v63, 15 }
  0xc5   : > { %21791 = vmatprep.mubr.f32.mxu0 %v25229_v47  ;;  %v25711_v47 = vand.u32 4294901760, %v10725_v24  ;;  %30842 = vst [vmem:[#allocation30_spill] sm:$0xff] %v25726_v1  ;;  %30843 = vst [vmem:[#allocation170_spill] sm:$0xff] %v25728_v6  ;;  %v25735_v62 = vand.u32 4294901760, %v5189_v42  ;;  %v10694_v49 = vsel %vm30183_vm7, %v25726_v1, 0.0  ;;  %vm30179_vm8 = vcmp.le.s32.totalorder %v25728_v6, 15 }
  0xc6   : > { %30837 = vst [vmem:[#allocation25_spill] sm:$0xff] %v25704_v38  ;;  %20439 = vmatmul.mubr.f32.gmra.mrb[16].mxu1 %v30838_v11  ;;  %v4891_v11 = vrot.slane %v30841_v14, 2  ;;  %30849 = vst [vmem:[#allocation173_spill] sm:$0xff] %v25743_v16  ;;  %v30852_v42 = vld [vmem:[#allocation35_spill] sm:$0xff]  ;;  %v30857_v1 = vld [vmem:[#allocation53_spill] sm:$0xff]  ;;  %v25769_v53 = vand.u32 4294901760, %v5209_v4 }
  0xc7   : > { %20441 = vmatprep.mubr.f32.mxu1 %v30840_v27  ;;  %v322_v27 = vand.u32 15, %v220_v55  ;;  %30847 = vst [vmem:[#allocation171_spill] sm:$0xff] %v25735_v62  ;;  %v25738_v14 = vsub.f32 %v10725_v24, %v25711_v47  ;;  %v5026_v55 = vsel %vm951_vm2, %v4888_v23, 0  ;;  %v30855_v23 = vld [vmem:[#allocation41_spill] sm:$0xff]  ;;  %v4901_v15 = vrot.slane %v30857_v1, 2 }
  0xc8   : > { %21792 = vmatmul.mubr.f32.gmra.mrb[18].mxu0 %v25253_v36  ;;  %v25732_v36 = vand.u32 4294901760, %v25704_v38  ;;  %v4892_v24 = vsel %vm30234_vm3, %v4889_v56, %v4891_v11  ;;  %v25757_v32 = vsel %vm30234_vm3, %v4891_v11, %v4893_v59  ;;  %v30858_v56 = vld [vmem:[#allocation102_spill] sm:$0xff]  ;;  %30859 = vst [vmem:[#allocation41_spill] sm:$0xff] %v25769_v53  ;;  %v10743_v39 = vsel %vm951_vm2, %v10694_v49, 0 }
  0xc9   : > { %21794 = vmatprep.mubr.f32.mxu0 %v25275_v48  ;;  %30848 = vst [vmem:[#allocation172_spill] sm:$0xff] %v25738_v14  ;;  %v25747_v48 = vand.u32 4294901760, %v10737_v19  ;;  %30851 = vst [vmem:[#allocation174_spill] sm:$0xff] %v25757_v32  ;;  %v25761_v34 = vadd.s32 1, %v322_v27  ;;  %v30860_v27 = vld [vmem:[#allocation110_spill] sm:$0xff]  ;;  %v5032_v1 = vsel %vm951_vm2, %v4892_v24, 0 }
  0xca   : > { %30845 = vst [vmem:[#allocation34_spill] sm:$0xff] %v25732_v36  ;;  %20442 = vmatmul.mubr.f32.gmra.mrb[18].mxu1 %v30846_v33  ;;  %v4895_v33 = vrot.slane %v30852_v42, 2  ;;  %v5229_v42 = vsub.f32 %v25704_v38, %v25732_v36  ;;  %v10696_v4 = vsel %vm30179_vm8, %v25757_v32, 0.0  ;;  %v30865_v24 = vld [vmem:[#allocation55_spill] sm:$0xff]  ;;  %v30866_v32 = vld [vmem:[#allocation112_spill] sm:$0xff]  ;;  %v25801_v6 = vand.u32 4294901760, %v10743_v39 }
  0xcb   : > { %20444 = vmatprep.mubr.f32.mxu1 %v30850_v60  ;;  %v30853_v60 = vld [vmem:[#allocation40_spill] sm:$0xff]  ;;  %30854 = vst [vmem:[#allocation35_spill] sm:$0xff] %v25761_v34  ;;  %vm30160_vm9 = vcmp.le.s32.totalorder %v25761_v34, 15  ;;  %v30870_v36 = vld [vmem:[#allocation117_spill] sm:$0xff]  ;;  %v30871_v38 = vand.u32 4294901760, %v25738_v14  ;;  %v30880_v34 = vld [vmem:[#allocation71_spill] sm:$0xff] }
  0xcc   : > { %21795 = vmatmul.mubr.f32.gmra.mrb[20].mxu0 %v25288_v54  ;;  %v4897_v18 = vrot.slane %v30853_v60, 2  ;;  %v4899_v54 = vrot.slane %v30855_v23, 2  ;;  %30856 = vst [vmem:[#allocation40_spill] sm:$0xff] %v25764_v63  ;;  %v25776_v60 = vand.u32 4294901760, %v5026_v55  ;;  %v25785_v23 = vsub.f32 %v10737_v19, %v25747_v48  ;;  %30868 = vst [vmem:[#allocation178_spill] sm:$0xff] %v25801_v6 }
  0xcd   : > { %21797 = vmatprep.mubr.f32.mxu0 %v25311_v26  ;;  %v4896_v11 = vsel %vm30234_vm3, %v4893_v59, %v4895_v33  ;;  %v25799_v19 = vand.u32 4294901760, %v5229_v42  ;;  %v25803_v59 = vand.u32 4294901760, %v5032_v1 }
  0xce   : > { %20445 = vmatmul.mubr.f32.gmra.mrb[20].mxu1 %v30858_v56  ;;  %30861 = vst [vmem:[#allocation53_spill] sm:$0xff] %v25776_v60  ;;  %30862 = vst [vmem:[#allocation175_spill] sm:$0xff] %v25785_v23  ;;  %v25789_v26 = vsel %vm30234_vm3, %v4895_v33, %v4897_v18  ;;  %v25795_v49 = vsel %vm30234_vm3, %v4899_v54, %v4901_v15  ;;  %v4903_v56 = vrot.slane %v30865_v24, 2  ;;  %v10749_v33 = vsel %vm951_vm2, %v10696_v4, 0 }
  0xcf   : > { %20447 = vmatprep.mubr.f32.mxu1 %v30860_v27  ;;  %30863 = vst [vmem:[#allocation176_spill] sm:$0xff] %v25789_v26  ;;  %v224_v27 = vadd.s32 120, %v25609_v3  ;;  %30864 = vst [vmem:[#allocation177_spill] sm:$0xff] %v25795_v49  ;;  %v30872_v24 = vand.u32 4294901760, %v25743_v16  ;;  %v10698_v4 = vsel %vm30160_vm9, %v25789_v26, 0.0  ;;  %v25837_v26 = vsub.f32 %v10743_v39, %v25801_v6 }
  0xd0   : > { %21798 = vmatmul.mubr.f32.gmra.mrb[22].mxu0 %v25334_v57  ;;  %30867 = vst [vmem:[#allocation55_spill] sm:$0xff] %v25799_v19  ;;  %30869 = vst [vmem:[#allocation179_spill] sm:$0xff] %v25803_v59  ;;  %v4900_v57 = vsel %vm30234_vm3, %v4897_v18, %v4899_v54  ;;  %v4904_v54 = vsel %vm30234_vm3, %v4901_v15, %v4903_v56  ;;  %v30875_v18 = vld [vmem:[#allocation123_spill] sm:$0xff]  ;;  %v25840_v63 = vsub.f32 %v5032_v1, %v25803_v59 }
  0xd1   : > { %21800 = vmatprep.mubr.f32.mxu0 %v25360_v2  ;;  %v25811_v2 = vsub.f32 %v25738_v14, %v30871_v38  ;;  %v25816_v42 = vsub.f32 %v25743_v16, %v30872_v24  ;;  %v10700_v38 = vsel %vm30139_vm10, %v25795_v49, 0.0  ;;  %v226_v14 = vadd.s32 136, %v25609_v3  ;;  %30876 = vst [vmem:[#allocation182_spill] sm:$0xff] %v25837_v26 }
  0xd2   : > { %20448 = vmatmul.mubr.f32.gmra.mrb[22].mxu1 %v30866_v32  ;;  %v5038_v32 = vsel %vm951_vm2, %v4896_v11, 0  ;;  %v25830_v16 = vsub.f32 %v5026_v55, %v25776_v60  ;;  %v25832_v11 = vand.u32 4294901760, %v10749_v33  ;;  %30877 = vst [vmem:[#allocation183_spill] sm:$0xff] %v25840_v63  ;;  %v5044_v49 = vsel %vm951_vm2, %v4900_v57, 0  ;;  %v30879_v55 = vld [vmem:[#allocation129_spill] sm:$0xff] }
  0xd3   : > { %20450 = vmatprep.mubr.f32.mxu1 %v30870_v36  ;;  %v350_v36 = vand.u32 15, %v224_v27  ;;  %v25842_v27 = vand.u32 4294901760, %v5038_v32  ;;  %v10900_v24 = vand.u32 4294901760, %v25811_v2  ;;  %v10755_v15 = vsel %vm951_vm2, %v10698_v4, 0 }
  0xd4   : > { %21801 = vmatmul.mubr.f32.gmra.mrb[24].mxu0 %v25362_v22  ;;  %30873 = vst [vmem:[#allocation180_spill] sm:$0xff] %v25830_v16  ;;  %30874 = vst [vmem:[#allocation181_spill] sm:$0xff] %v25832_v11  ;;  %v4907_v39 = vrot.slane %v30880_v34, 2  ;;  %v5050_v1 = vsel %vm951_vm2, %v4904_v54, 0  ;;  %v30882_v22 = vld [vmem:[#allocation59_spill] sm:$0xff]  ;;  %v364_v59 = vand.u32 15, %v226_v14  ;;  %v25865_v4 = vsub.f32 %v10749_v33, %v25832_v11 }
  0xd5   : > { %21803 = vmatprep.mubr.f32.mxu0 %v25399_v20  ;;  %30878 = vst [vmem:[#allocation184_spill] sm:$0xff] %v25842_v27  ;;  %v25853_v20 = vadd.s32 1, %v350_v36  ;;  %v4905_v57 = vrot.slane %v30882_v22, 2  ;;  %v25862_v2 = vand.u32 4294901760, %v25830_v16  ;;  %v25867_v34 = vand.u32 4294901760, %v5044_v49 }
  0xd6   : > { %20451 = vmatmul.mubr.f32.gmra.mrb[24].mxu1 %v30875_v18  ;;  %v10761_v18 = vsel %vm951_vm2, %v10700_v38, 0  ;;  %30885 = vst [vmem:[#allocation185_spill] sm:$0xff] %v25865_v4  ;;  %v30887_v38 = vld [vmem:[#allocation130_spill] sm:$0xff]  ;;  %v25873_v14 = vand.u32 4294901760, %v25840_v63  ;;  %v25880_v33 = vand.u32 4294901760, %v10755_v15 }
  0xd7   : > { %20453 = vmatprep.mubr.f32.mxu1 %v30879_v55  ;;  %30881 = vst [vmem:[#allocation71_spill] sm:$0xff] %v25853_v20  ;;  %30884 = vst [vmem:[#allocation59_spill] sm:$0xff] %v25862_v2  ;;  %v25882_v54 = vand.u32 4294901760, %v10761_v18  ;;  %v4908_v36 = vsel %vm30234_vm3, %v4905_v57, %v4907_v39  ;;  %vm30129_vm11 = vcmp.le.s32.totalorder %v25853_v20, 15  ;;  %v25890_v22 = vsel %vm30234_vm3, %v4903_v56, %v4905_v57 }
  0xd8   : > { %21804 = vmatmul.mubr.f32.gmra.mrb[26].mxu0 %v25408_v0  ;;  %v30883_v0 = vand.u32 4294901760, %v25785_v23  ;;  %30886 = vst [vmem:[#allocation186_spill] sm:$0xff] %v25867_v34  ;;  %30888 = vst [vmem:[#allocation187_spill] sm:$0xff] %v25873_v14  ;;  %v25900_v11 = vsub.f32 %v5044_v49, %v25867_v34  ;;  %v5056_v57 = vsel %vm951_vm2, %v4908_v36, 0 }
  0xd9   : > { %21806 = vmatprep.mubr.f32.mxu0 %v25421_v13  ;;  %30890 = vst [vmem:[#allocation189_spill] sm:$0xff] %v25880_v33  ;;  %30891 = vst [vmem:[#allocation190_spill] sm:$0xff] %v25882_v54  ;;  %v5249_v13 = vsub.f32 %v25830_v16, %v25862_v2  ;;  %v25926_v36 = vsub.f32 %v10761_v18, %v25882_v54  ;;  %v25945_v18 = vand.u32 4294901760, %v5056_v57  ;;  %v30909_v2 = vand.u32 4294901760, %v24904_v43 }
  0xda   : > { %v25859_v55 = vsub.f32 %v25785_v23, %v30883_v0  ;;  %20454 = vmatmul.mubr.f32.gmra.mrb[26].mxu1 %v30887_v38  ;;  %v25876_v0 = vsub.f32 %v5038_v32, %v25842_v27  ;;  %v25884_v23 = vand.u32 4294901760, %v5050_v1  ;;  %30893 = vst [vmem:[#allocation192_spill] sm:$0xff] %v25890_v22  ;;  %v25892_v32 = vadd.s32 1, %v364_v59  ;;  %v30895_v38 = vld [vmem:[#allocation74_spill] sm:$0xff] }
  0xdb   : > { %20456 = vmatprep.mubr.f32.mxu1 %v25417_v28  ;;  %30896 = vst [vmem:[#allocation74_spill] sm:$0xff] %v25900_v11  ;;  %v5269_v59 = vsub.f32 %v25840_v63, %v25873_v14  ;;  %v25918_v28 = vsub.f32 %v10755_v15, %v25880_v33  ;;  %v230_v27 = vadd.s32 168, %v25609_v3  ;;  %30900 = vst [vmem:[#allocation196_spill] sm:$0xff] %v25926_v36  ;;  %v25935_v15 = vand.u32 4294901760, %v5249_v13 }
  0xdc   : > { %30889 = vst [vmem:[#allocation188_spill] sm:$0xff] %v25876_v0  ;;  %21807 = vmatmul.mubr.f32.gmra.mrb[28].mxu0 %v25430_v46  ;;  %30892 = vst [vmem:[#allocation191_spill] sm:$0xff] %v25884_v23  ;;  %v4909_v46 = vrot.slane %v30895_v38, 2  ;;  %v228_v38 = vadd.s32 152, %v25609_v3  ;;  %v25915_v49 = vand.u32 4294901760, %v25876_v0  ;;  %vm30125_vm12 = vcmp.le.s32.totalorder %v25892_v32, 15 }
  0xdd   : > { %21809 = vmatprep.mubr.f32.mxu0 %v25464_v10  ;;  %30894 = vst [vmem:[#allocation193_spill] sm:$0xff] %v25892_v32  ;;  %v30897_v10 = vand.u32 4294901760, %v25837_v26  ;;  %30899 = vst [vmem:[#allocation195_spill] sm:$0xff] %v25918_v28  ;;  %v392_v63 = vand.u32 15, %v230_v27  ;;  %v30915_v32 = vand.u32 4294901760, %v25816_v42  ;;  %v30922_v42 = vand.u32 4294901760, %v25926_v36 }
  0xde   : > { %20457 = vmatmul.mubr.f32.gmra.mrb[28].mxu1 %v25426_v58  ;;  %30898 = vst [vmem:[#allocation194_spill] sm:$0xff] %v25915_v49  ;;  %v25929_v58 = vsub.f32 %v5050_v1, %v25884_v23  ;;  %30903 = vst [vmem:[#allocation199_spill] sm:$0xff] %v25935_v15  ;;  %v25948_v1 = vand.u32 4294901760, %v5269_v59  ;;  %v378_v13 = vand.u32 15, %v228_v38  ;;  %v24717_v38 = vld [vmem:[%s24839_s21 + $0xb0] sm:$0xff] }
  0xdf   : > { %v25906_v56 = vsub.f32 %v25837_v26, %v30897_v10  ;;  %20459 = vmatprep.mubr.f32.mxu1 %v25441_v45  ;;  %v10702_v10 = vsel %vm30129_vm11, %v25890_v22, 0.0  ;;  %v25933_v45 = vsel %vm30234_vm3, %v4907_v39, %v4909_v46  ;;  %30906 = vst [vmem:[#allocation201_spill] sm:$0xff] %v25945_v18  ;;  %v30908_v39 = vld [vmem:[#allocation75_spill] sm:$0xff]  ;;  %v240_v26 = vadd.s32 248, %v25609_v3 }
  0xe0   : > { %21810 = vmatmul.mubr.f32.gmra.mrb[30].mxu0 %v25476_v51  ;;  %30901 = vst [vmem:[#allocation197_spill] sm:$0xff] %v25929_v58  ;;  %30902 = vst [vmem:[#allocation198_spill] sm:$0xff] %v25933_v45  ;;  %v30904_v51 = vand.u32 4294901760, %v25865_v4  ;;  %v10767_v20 = vsel %vm951_vm2, %v10702_v10, 0  ;;  %v4911_v14 = vrot.slane %v30908_v39, 2  ;;  %v25966_v59 = vand.u32 4294901760, %v25929_v58 }
  0xe1   : > { %21814 = vmatprep.mubr.f32.mxu0 %v25735_v62  ;;  %v25943_v62 = vand.u32 4294901760, %v25900_v11  ;;  %30907 = vst [vmem:[#allocation202_spill] sm:$0xff] %v25948_v1  ;;  %v25971_v10 = vand.u32 4294901760, %v10767_v20  ;;  %v25974_v39 = vsub.f32 %v5056_v57, %v25945_v18  ;;  %v25981_v43 = vadd.s32 1, %v378_v13  ;;  %v30916_v57 = vld [vmem:[#allocation87_spill] sm:$0xff] }
  0xe2   : > { %v25940_v22 = vsub.f32 %v25865_v4, %v30904_v51  ;;  %20460 = vmatmul.mubr.f32.gmra.mrb[30].mxu1 %v25448_v17  ;;  %v10704_v4 = vsel %vm30125_vm12, %v25933_v45, 0.0  ;;  %v232_v17 = vadd.s32 184, %v25609_v3  ;;  %30910 = vst [vmem:[#allocation75_spill] sm:$0xff] %v25966_v59  ;;  %v4913_v45 = vrot.slane %v24717_v38, 2 }
  0xe3   : > { %30905 = vst [vmem:[#allocation200_spill] sm:$0xff] %v25943_v62  ;;  %20464 = vmatprep.mubr.f32.mxu1 %v30909_v2  ;;  %v5309_v27 = vsub.f32 %v25900_v11, %v25943_v62  ;;  %30911 = vst [vmem:[#allocation203_spill] sm:$0xff] %v25971_v10  ;;  %v10773_v51 = vsel %vm951_vm2, %v10704_v4, 0  ;;  %v4912_v2 = vsel %vm30234_vm3, %v4909_v46, %v4911_v14  ;;  %v25988_v62 = vadd.s32 1, %v392_v63  ;;  %v30919_v11 = vld [vmem:[#allocation16_spill] sm:$0xff] }
  0xe4   : > { %21815 = vmatmul.mubr.f32.vlgmr.msra.gmra.mrb[0].mxu0 %v10900_v24  ;;  %v5289_v24 = vsub.f32 %v25876_v0, %v25915_v49  ;;  %30912 = vst [vmem:[#allocation204_spill] sm:$0xff] %v25974_v39  ;;  %30914 = vst [vmem:[#allocation205_spill] sm:$0xff] %v25981_v43  ;;  %v30918_v49 = vld [vmem:[#allocation88_spill] sm:$0xff]  ;;  %v30921_v4 = vand.u32 4294901760, %v25918_v28  ;;  %v5329_v63 = vsub.f32 %v25929_v58, %v25966_v59  ;;  %v234_v13 = vadd.s32 200, %v25609_v3  ;;  %v30933_v59 = vld [vmem:[#allocation103_spill] sm:$0xff] }
  0xe5   : > { %21817 = vmatprep.mubr.f32.mxu0 %v25769_v53  ;;  %21863 = vmatpush3.msra.mxu0 %v25591_v9  ;;  %v30913_v9 = vand.u32 4294901760, %v24922_v52  ;;  %v4915_v53 = vrot.slane %v30916_v57, 2  ;;  %30917 = vst [vmem:[#allocation87_spill] sm:$0xff] %v25988_v62  ;;  %v4917_v52 = vrot.slane %v30918_v49, 2  ;;  %v5062_v49 = vsel %vm951_vm2, %v4912_v2, 0 }
  0xe6   : > { %21912 = vmatprep.subr.mxu0 %v25572_v7  ;;  %v25993_v46 = vand.u32 4294901760, %v5289_v24  ;;  %v30925_v24 = vld [vmem:[#allocation17_spill] sm:$0xff]  ;;  %v26017_v38 = vand.u32 4294901760, %v10773_v51  ;;  %vm30119_vm13 = vcmp.le.s32.totalorder %v25981_v43, 15  ;;  %v26021_v57 = vsel %vm30234_vm3, %v4911_v14, %v4913_v45  ;;  %v30946_v43 = vld [vmem:[#allocation43_spill] sm:$0xff] }
  0xe7   : > { %20465 = vmatmul.mubr.f32.vlgmr.msra.gmra.mrb[0].mxu1 %v30913_v9  ;;  %v406_v9 = vand.u32 15, %v232_v17  ;;  %v26008_v17 = vsub.f32 %v10767_v20, %v25971_v10  ;;  %30927 = vst [vmem:[#allocation207_spill] sm:$0xff] %v26021_v57  ;;  %v30928_v20 = vld [vmem:[#allocation94_spill] sm:$0xff]  ;;  %vm30108_vm14 = vcmp.le.s32.totalorder %v25988_v62, 15  ;;  %v26029_v2 = vsel %vm30234_vm3, %v4915_v53, %v4917_v52  ;;  %v30945_v62 = vld [vmem:[#allocation109_spill] sm:$0xff] }
  0xe8   : > { %20513 = vmatpush3.msra.mxu1 %v24855_v12  ;;  %21818 = vmatmul.mubr.f32.gmra.mrb[2].mxu0 %v30915_v32  ;;  %30920 = vst [vmem:[#allocation88_spill] sm:$0xff] %v25993_v46  ;;  %v25998_v12 = vsub.f32 %v25918_v28, %v30921_v4  ;;  %v26003_v32 = vsub.f32 %v25926_v36, %v30922_v42  ;;  %30926 = vst [vmem:[#allocation17_spill] sm:$0xff] %v26017_v38  ;;  %v4919_v4 = vrot.slane %v30928_v20, 2 }
  0xe9   : > { %20467 = vmatprep.mubr.f32.mxu1 %v30919_v11  ;;  %21820 = vmatprep.mubr.f32.mxu0 %v25799_v19  ;;  %30923 = vst [vmem:[#allocation16_spill] sm:$0xff] %v26008_v17  ;;  %v26011_v11 = vand.u32 4294901760, %v25974_v39  ;;  %v30929_v42 = vand.u32 4294901760, %v25859_v55  ;;  %v30930_v19 = vld [vmem:[#allocation21_spill] sm:$0xff]  ;;  %30931 = vst [vmem:[#allocation94_spill] sm:$0xff] %v26029_v2  ;;  %v4921_v58 = vrot.slane %v30933_v59, 2 }
  0xea   : > { %20562 = vmatprep.subr.mxu1 %v24824_v5  ;;  %v11000_v14 = vand.u32 4294901760, %v25998_v12  ;;  %v26036_v36 = vand.u32 4294901760, %v5309_v27  ;;  %v26039_v20 = vand.u32 4294901760, %v5062_v49  ;;  %v420_v28 = vand.u32 15, %v234_v13  ;;  %v30937_v59 = vld [vmem:[#allocation28_spill] sm:$0xff] }
  0xeb   : > { %30924 = vst [vmem:[#allocation206_spill] sm:$0xff] %v26011_v11  ;;  %20468 = vmatmul.mubr.f32.gmra.mrb[2].mxu1 %v30925_v24  ;;  %v26031_v24 = vadd.s32 1, %v406_v9  ;;  %v4916_v9 = vsel %vm30234_vm3, %v4913_v45, %v4915_v53  ;;  %v5349_v12 = vsub.f32 %v25974_v39, %v26011_v11  ;;  %v10708_v27 = vsel %vm30108_vm14, %v26029_v2, 0.0  ;;  %v30958_v11 = vld [vmem:[#allocation48_spill] sm:$0xff]  ;;  %v30960_v39 = vld [vmem:[#allocation121_spill] sm:$0xff] }
  0xec   : > { %21821 = vmatmul.mubr.f32.gmra.mrb[4].mxu0 %v30929_v42  ;;  %20470 = vmatprep.mubr.f32.mxu1 %v30930_v19  ;;  %30934 = vst [vmem:[#allocation103_spill] sm:$0xff] %v26036_v36  ;;  %30935 = vst [vmem:[#allocation209_spill] sm:$0xff] %v26039_v20  ;;  %v26041_v42 = vand.u32 4294901760, %v5329_v63  ;;  %v10706_v19 = vsel %vm30119_vm13, %v26021_v57, 0.0  ;;  %v4920_v55 = vsel %vm30234_vm3, %v4917_v52, %v4919_v4  ;;  %v236_v63 = vadd.s32 216, %v25609_v3  ;;  %v30939_v57 = vld [vmem:[#allocation32_spill] sm:$0xff] }
  0xed   : > { %30932 = vst [vmem:[#allocation208_spill] sm:$0xff] %v26031_v24  ;;  %21823 = vmatprep.mubr.f32.mxu0 %v25935_v15  ;;  %v30938_v15 = vand.u32 4294901760, %v25906_v56  ;;  %v26060_v45 = vsub.f32 %v10773_v51, %v26017_v38  ;;  %vm29981_vm15 = vcmp.le.s32.totalorder %v26031_v24, 15  ;;  %v26064_v13 = vsel %vm30234_vm3, %v4919_v4, %v4921_v58 }
  0xee   : > { %30936 = vst [vmem:[#allocation210_spill] sm:$0xff] %v26041_v42  ;;  %30941 = vst [vmem:[#allocation212_spill] sm:$0xff] %v26064_v13  ;;  %v26068_v52 = vsub.f32 %v5062_v49, %v26039_v20  ;;  %v10779_v56 = vsel %vm951_vm2, %v10706_v19, 0  ;;  %v10785_v53 = vsel %vm951_vm2, %v10708_v27, 0  ;;  %v5074_v51 = vsel %vm951_vm2, %v4920_v55, 0  ;;  %v30949_v27 = vld [vmem:[#allocation47_spill] sm:$0xff] }
  0xef   : > { %20471 = vmatmul.mubr.f32.gmra.mrb[4].mxu1 %v30937_v59  ;;  %30940 = vst [vmem:[#allocation211_spill] sm:$0xff] %v26060_v45  ;;  %v26075_v2 = vadd.s32 1, %v420_v28  ;;  %v4925_v4 = vrot.slane %v30945_v62, 2  ;;  %v10710_v19 = vsel %vm29981_vm15, %v26064_v13, 0.0  ;;  %v434_v49 = vand.u32 15, %v236_v63  ;;  %v30957_v55 = vld [vmem:[#allocation120_spill] sm:$0xff] }
  0xf0   : > { %21824 = vmatmul.mubr.f32.gmra.mrb[6].mxu0 %v30938_v15  ;;  %20473 = vmatprep.mubr.f32.mxu1 %v30939_v57  ;;  %30942 = vst [vmem:[#allocation213_spill] sm:$0xff] %v26068_v52  ;;  %v5068_v15 = vsel %vm951_vm2, %v4916_v9, 0  ;;  %v30943_v57 = vld [vmem:[#allocation108_spill] sm:$0xff]  ;;  %v238_v9 = vadd.s32 232, %v25609_v3  ;;  %v30950_v28 = vand.u32 4294901760, %v26008_v17  ;;  %v26098_v63 = vand.u32 4294901760, %v26068_v52 }
  0xf1   : > { %21826 = vmatprep.mubr.f32.mxu0 %v25948_v1  ;;  %v4923_v59 = vrot.slane %v30943_v57, 2  ;;  %30944 = vst [vmem:[#allocation108_spill] sm:$0xff] %v26075_v2  ;;  %v26079_v1 = vand.u32 4294901760, %v5349_v12  ;;  %v30948_v57 = vand.u32 4294901760, %v25940_v22  ;;  %v26092_v12 = vand.u32 4294901760, %v10779_v56 }
  0xf2   : > { %v11039_v62 = vsub.f32 %v26008_v17, %v30950_v28  ;;  %30953 = vst [vmem:[#allocation216_spill] sm:$0xff] %v26098_v63  ;;  %v26100_v13 = vand.u32 4294901760, %v10785_v53  ;;  %v26102_v22 = vand.u32 4294901760, %v5074_v51  ;;  %vm29988_vm1 = vcmp.le.s32.totalorder %v26075_v2, 15  ;;  %v30976_v2 = vld [vmem:[#allocation135_spill] sm:$0xff] }
  0xf3   : > { %20474 = vmatmul.mubr.f32.gmra.mrb[6].mxu1 %v30946_v43  ;;  %30947 = vst [vmem:[#allocation109_spill] sm:$0xff] %v26079_v1  ;;  %30951 = vst [vmem:[#allocation214_spill] sm:$0xff] %v26092_v12  ;;  %v26094_v43 = vand.u32 4294901760, %v5068_v15  ;;  %v26108_v28 = vsel %vm30234_vm3, %v4923_v59, %v4925_v4  ;;  %v4927_v24 = vrot.slane %v30957_v55, 2  ;;  %v4929_v17 = vrot.slane %v30960_v39, 2 }
  0xf4   : > { %21827 = vmatmul.mubr.f32.gmra.mrb[8].mxu0 %v30948_v57  ;;  %20476 = vmatprep.mubr.f32.mxu1 %v30949_v27  ;;  %30954 = vst [vmem:[#allocation217_spill] sm:$0xff] %v26100_v13  ;;  %30955 = vst [vmem:[#allocation218_spill] sm:$0xff] %v26102_v22  ;;  %v4924_v57 = vsel %vm30234_vm3, %v4921_v58, %v4923_v59  ;;  %v10791_v27 = vsel %vm951_vm2, %v10710_v19, 0  ;;  %v448_v0 = vand.u32 15, %v238_v9  ;;  %v30961_v58 = vld [vmem:[#allocation50_spill] sm:$0xff]  ;;  %v11040_v19 = vand.u32 4294901760, %v11039_v62 }
  0xf5   : > { %30952 = vst [vmem:[#allocation215_spill] sm:$0xff] %v26094_v43  ;;  %21829 = vmatprep.mubr.f32.mxu0 %v25993_v46  ;;  %30956 = vst [vmem:[#allocation219_spill] sm:$0xff] %v26108_v28  ;;  %v26112_v46 = vadd.s32 1, %v434_v49  ;;  %v30962_v59 = vand.u32 4294901760, %v26060_v45  ;;  %v26121_v55 = vsub.f32 %v10779_v56, %v26092_v12  ;;  %v26124_v49 = vsub.f32 %v5068_v15, %v26094_v43  ;;  %v24718_v15 = vld [vmem:[%s24839_s21 + $0xf8] sm:$0xff] }
  0xf6   : > { %v26128_v39 = vsub.f32 %v10785_v53, %v26100_v13  ;;  %v26133_v9 = vand.u32 4294901760, %v10791_v27  ;;  %v5080_v62 = vsel %vm951_vm2, %v4924_v57, 0  ;;  %v10712_v56 = vsel %vm29988_vm1, %v26108_v28, 0.0  ;;  %v30970_v28 = vld [vmem:[#allocation66_spill] sm:$0xff] }
  0xf7   : > { %20477 = vmatmul.mubr.f32.gmra.mrb[8].mxu1 %v30958_v11  ;;  %30959 = vst [vmem:[#allocation120_spill] sm:$0xff] %v26112_v46  ;;  %v11059_v16 = vsub.f32 %v26060_v45, %v30962_v59  ;;  %30963 = vst [vmem:[#allocation121_spill] sm:$0xff] %v26124_v49  ;;  %v4928_v59 = vsel %vm30234_vm3, %v4925_v4, %v4927_v24  ;;  %v24719_v11 = vld [vmem:[%s24839_s21 + $0x100] sm:$0xff]  ;;  %v30966_v45 = vld [vmem:[#allocation63_spill] sm:$0xff]  ;;  %vm30003_vm15 = vcmp.le.s32.totalorder %v26112_v46, 15  ;;  %v462_v57 = vand.u32 15, %v240_v26 }
  0xf8   : > { %21830 = vmatmul.mubr.f32.gmra.mrb[10].mxu0 %v11000_v14  ;;  %20479 = vmatprep.mubr.f32.mxu1 %v30961_v58  ;;  %v26131_v14 = vsub.f32 %v5074_v51, %v26102_v22  ;;  %30965 = vst [vmem:[#allocation221_spill] sm:$0xff] %v26133_v9  ;;  %v4931_v58 = vrot.slane %v24718_v15, 2  ;;  %v26145_v53 = vsel %vm30234_vm3, %v4927_v24, %v4929_v17  ;;  %v26147_v51 = vadd.s32 1, %v448_v0  ;;  %v30975_v0 = vld [vmem:[#allocation68_spill] sm:$0xff] }
  0xf9   : > { %21832 = vmatprep.mubr.f32.mxu0 %v26036_v36  ;;  %v4933_v36 = vrot.slane %v24719_v11, 2  ;;  %30967 = vst [vmem:[#allocation222_spill] sm:$0xff] %v26145_v53  ;;  %v30969_v3 = vand.u32 4294901760, %v26003_v32  ;;  %v5369_v4 = vsub.f32 %v26068_v52, %v26098_v63  ;;  %v26156_v15 = vand.u32 4294901760, %v26124_v49 }
  0xfa   : > { %30964 = vst [vmem:[#allocation220_spill] sm:$0xff] %v26131_v14  ;;  %30968 = vst [vmem:[#allocation223_spill] sm:$0xff] %v26147_v51  ;;  %v26163_v26 = vand.u32 4294901760, %v26131_v14  ;;  %v10797_v32 = vsel %vm951_vm2, %v10712_v56, 0  ;;  %v5086_v24 = vsel %vm951_vm2, %v4928_v59, 0  ;;  %v10714_v11 = vsel %vm30003_vm15, %v26145_v53, 0.0 }
  0xfb   : > { %20480 = vmatmul.mubr.f32.gmra.mrb[10].mxu1 %v30966_v45  ;;  %30971 = vst [vmem:[#allocation224_spill] sm:$0xff] %v26156_v15  ;;  %v26158_v45 = vand.u32 4294901760, %v5080_v62  ;;  %vm30101_vm1 = vcmp.le.s32.totalorder %v26147_v51, 15  ;;  %v26180_v63 = vadd.s32 1, %v462_v57  ;;  %v30978_v59 = vld [vmem:[#allocation69_spill] sm:$0xff]  ;;  %v11060_v46 = vand.u32 4294901760, %v11059_v16 }
  0xfc   : > { %21833 = vmatmul.mubr.f32.gmra.mrb[12].mxu0 %v30969_v3  ;;  %20482 = vmatprep.mubr.f32.mxu1 %v30970_v28  ;;  %30973 = vst [vmem:[#allocation226_spill] sm:$0xff] %v26163_v26  ;;  %v26166_v3 = vsub.f32 %v10791_v27, %v26133_v9  ;;  %v4932_v28 = vsel %vm30234_vm3, %v4929_v17, %v4931_v58  ;;  %v10681_v27 = vrot.slane %v30976_v2, 2  ;;  %v30979_v53 = vand.u32 4294901760, %v26121_v55 }
  0xfd   : > { %30972 = vst [vmem:[#allocation225_spill] sm:$0xff] %v26158_v45  ;;  %21835 = vmatprep.mubr.f32.mxu0 %v26041_v42  ;;  %v26175_v42 = vsel %vm30234_vm3, %v4931_v58, %v4933_v36  ;;  %30977 = vst [vmem:[#allocation135_spill] sm:$0xff] %v26180_v63  ;;  %v26188_v58 = vsub.f32 %v5080_v62, %v26158_v45  ;;  %v26193_v2 = vand.u32 4294901760, %v5369_v4  ;;  %v10803_v16 = vsel %vm951_vm2, %v10714_v11, 0 }
  0xfe   : > { %30974 = vst [vmem:[#allocation227_spill] sm:$0xff] %v26175_v42  ;;  %v11079_v17 = vsub.f32 %v26121_v55, %v30979_v53  ;;  %v5389_v57 = vsub.f32 %v26124_v49, %v26156_v15  ;;  %v30984_v56 = vand.u32 4294901760, %v26128_v39  ;;  %v5409_v62 = vsub.f32 %v26131_v14, %v26163_v26  ;;  %v30988_v26 = vld [vmem:[#allocation83_spill] sm:$0xff] }
  0xff   : > { %20483 = vmatmul.mubr.f32.gmra.mrb[12].mxu1 %v30975_v0  ;;  %30980 = vst [vmem:[#allocation228_spill] sm:$0xff] %v26188_v58  ;;  %v26190_v0 = vand.u32 4294901760, %v10797_v32  ;;  %30982 = vst [vmem:[#allocation230_spill] sm:$0xff] %v26193_v2  ;;  %v10716_v4 = vsel %vm30101_vm1, %v26175_v42, 0.0  ;;  %v10682_v49 = vsel %vm30234_vm3, %v4933_v36, %v10681_v27  ;;  %vm30097_vm15 = vcmp.le.s32.totalorder %v26180_v63, 15 }
 0x100   : > { %21836 = vmatmul.mubr.f32.gmra.mrb[14].mxu0 %v11040_v19  ;;  %20485 = vmatprep.mubr.f32.mxu1 %v30978_v59  ;;  %v26197_v19 = vand.u32 4294901760, %v5086_v24  ;;  %v11099_v53 = vsub.f32 %v26128_v39, %v30984_v56  ;;  %v5092_v59 = vsel %vm951_vm2, %v4932_v28, 0  ;;  %v30986_v11 = vrot.slane %v25414_v37, 2 }
 0x101   : > { %30981 = vst [vmem:[#allocation229_spill] sm:$0xff] %v26190_v0  ;;  %21838 = vmatprep.mubr.f32.mxu0 %v26079_v1  ;;  %v30985_v1 = vld [vmem:[#allocation81_spill] sm:$0xff]  ;;  %v11080_v28 = vand.u32 4294901760, %v11079_v17  ;;  %v26220_v51 = vand.u32 4294901760, %v26188_v58  ;;  %v26225_v15 = vand.u32 4294901760, %v10803_v16  ;;  %v26228_v36 = vand.u32 4294901760, %v5389_v57 }
 0x102   : > { %30983 = vst [vmem:[#allocation231_spill] sm:$0xff] %v26197_v19  ;;  %v26216_v56 = vsel %vm30234_vm3, %v10681_v27, %v30986_v11  ;;  %v26231_v37 = vsub.f32 %v5086_v24, %v26197_v19  ;;  %v26233_v27 = vand.u32 4294901760, %v5092_v59  ;;  %v10812_v17 = vsel %vm951_vm2, %v10682_v49, 0  ;;  %v30994_v11 = vld [vmem:[#allocation85_spill] sm:$0xff] }
 0x103   : > { %20486 = vmatmul.mubr.f32.gmra.mrb[14].mxu1 %v30985_v1  ;;  %30987 = vst [vmem:[#allocation232_spill] sm:$0xff] %v26216_v56  ;;  %30989 = vst [vmem:[#allocation233_spill] sm:$0xff] %v26220_v51  ;;  %v26223_v1 = vsub.f32 %v10797_v32, %v26190_v0  ;;  %v10718_v32 = vsel %vm30097_vm15, %v26216_v56, 0.0  ;;  %v26241_v42 = vand.u32 4294901760, %v5409_v62  ;;  %v30996_v57 = vand.u32 4294901760, %v26166_v3 }
 0x104   : > { %21839 = vmatmul.mubr.f32.gmra.mrb[16].mxu0 %v11060_v46  ;;  %20488 = vmatprep.mubr.f32.mxu1 %v30988_v26  ;;  %30990 = vst [vmem:[#allocation234_spill] sm:$0xff] %v26225_v15  ;;  %30991 = vst [vmem:[#allocation235_spill] sm:$0xff] %v26228_v36  ;;  %v10809_v46 = vsel %vm951_vm2, %v10716_v4, 0  ;;  %v11100_v26 = vand.u32 4294901760, %v11099_v53  ;;  %v5429_v4 = vsub.f32 %v26188_v58, %v26220_v51  ;;  %v26257_v53 = vand.u32 4294901760, %v26231_v37 }
 0x105   : > { %21841 = vmatprep.mubr.f32.mxu0 %v26193_v2  ;;  %30992 = vst [vmem:[#allocation236_spill] sm:$0xff] %v26231_v37  ;;  %30993 = vst [vmem:[#allocation237_spill] sm:$0xff] %v26233_v27  ;;  %v11119_v24 = vsub.f32 %v26166_v3, %v30996_v57  ;;  %v30997_v2 = vld [vmem:[#allocation96_spill] sm:$0xff]  ;;  %v26251_v63 = vsub.f32 %v10803_v16, %v26225_v15  ;;  %v26253_v56 = vand.u32 4294901760, %v10809_v46  ;;  %v10815_v57 = vsel %vm951_vm2, %v10718_v32, 0  ;;  %v31003_v16 = vld [vmem:[#allocation101_spill] sm:$0xff] }
 0x106   : > { %30995 = vst [vmem:[#allocation238_spill] sm:$0xff] %v26241_v42  ;;  %30999 = vst [vmem:[#allocation240_spill] sm:$0xff] %v26257_v53  ;;  %v26260_v62 = vsub.f32 %v5092_v59, %v26233_v27  ;;  %v26274_v59 = vand.u32 4294901760, %v10815_v57  ;;  %v26277_v32 = vand.u32 4294901760, %v5429_v4 }
 0x107   : > { %20489 = vmatmul.mubr.f32.gmra.mrb[16].mxu1 %v30994_v11  ;;  %30998 = vst [vmem:[#allocation239_spill] sm:$0xff] %v26253_v56  ;;  %v11120_v49 = vand.u32 4294901760, %v11119_v24  ;;  %v31004_v11 = vand.u32 4294901760, %v26223_v1  ;;  %v26272_v58 = vsub.f32 %v10809_v46, %v26253_v56  ;;  %v31010_v46 = vld [vmem:[#allocation115_spill] sm:$0xff] }
 0x108   : > { %21842 = vmatmul.mubr.f32.gmra.mrb[18].mxu0 %v11080_v28  ;;  %20491 = vmatprep.mubr.f32.mxu1 %v30997_v2  ;;  %31000 = vst [vmem:[#allocation241_spill] sm:$0xff] %v26260_v62  ;;  %v26262_v28 = vand.u32 4294901760, %v10812_v17  ;;  %v31002_v2 = vld [vmem:[#allocation100_spill] sm:$0xff]  ;;  %31005 = vst [vmem:[#allocation243_spill] sm:$0xff] %v26274_v59  ;;  %v26282_v24 = vand.u32 4294901760, %v26260_v62 }
 0x109   : > { %21844 = vmatprep.mubr.f32.mxu0 %v26228_v36  ;;  %v11139_v36 = vsub.f32 %v26223_v1, %v31004_v11  ;;  %31006 = vst [vmem:[#allocation244_spill] sm:$0xff] %v26277_v32  ;;  %v31009_v11 = vld [vmem:[#allocation105_spill] sm:$0xff] }
 0x10a   : > { %31001 = vst [vmem:[#allocation242_spill] sm:$0xff] %v26262_v28  ;;  %31007 = vst [vmem:[#allocation245_spill] sm:$0xff] %v26282_v24 }
 0x10b   : > { %20492 = vmatmul.mubr.f32.gmra.mrb[18].mxu1 %v31002_v2  ;;  %v11140_v51 = vand.u32 4294901760, %v11139_v36  ;;  %v31011_v2 = vand.u32 4294901760, %v26251_v63  ;;  %v31014_v36 = vld [vmem:[#allocation116_spill] sm:$0xff] }
 0x10c   : > { %21845 = vmatmul.mubr.f32.gmra.mrb[20].mxu0 %v11100_v26  ;;  %20494 = vmatprep.mubr.f32.mxu1 %v31003_v16  ;;  %v5449_v26 = vsub.f32 %v26231_v37, %v26257_v53  ;;  %v26285_v16 = vsub.f32 %v10812_v17, %v26262_v28  ;;  %v26294_v53 = vsub.f32 %v10815_v57, %v26274_v59 }
 0x10d   : > { %21847 = vmatprep.mubr.f32.mxu0 %v26241_v42  ;;  %v11159_v4 = vsub.f32 %v26251_v63, %v31011_v2  ;;  %v30033_v42 = vand.u32 4294901760, %v26272_v58  ;;  %v5469_v17 = vsub.f32 %v26260_v62, %v26282_v24  ;;  %v31017_v24 = vld [vmem:[#allocation128_spill] sm:$0xff] }
 0x10e   : > { %31008 = vst [vmem:[#allocation246_spill] sm:$0xff] %v26285_v16  ;;  %v26297_v37 = vand.u32 4294901760, %v5449_v26 }
 0x10f   : > { %20495 = vmatmul.mubr.f32.gmra.mrb[20].mxu1 %v31009_v11  ;;  %v11160_v2 = vand.u32 4294901760, %v11159_v4  ;;  %v11179_v57 = vsub.f32 %v26272_v58, %v30033_v42  ;;  %v30036_v11 = vand.u32 4294901760, %v26294_v53  ;;  %v26311_v26 = vand.u32 4294901760, %v5469_v17  ;;  %v31021_v17 = vld [vmem:[#allocation143_spill] sm:$0xff] }
 0x110   : > { %21848 = vmatmul.mubr.f32.gmra.mrb[22].mxu0 %v11120_v49  ;;  %20497 = vmatprep.mubr.f32.mxu1 %v31010_v46  ;;  %31012 = vst [vmem:[#allocation247_spill] sm:$0xff] %v26297_v37  ;;  %v26302_v49 = vand.u32 4294901760, %v26285_v16  ;;  %v31015_v46 = vld [vmem:[#allocation122_spill] sm:$0xff] }
 0x111   : > { %21850 = vmatprep.mubr.f32.mxu0 %v26277_v32  ;;  %31016 = vst [vmem:[#allocation249_spill] sm:$0xff] %v26311_v26  ;;  %v11199_v4 = vsub.f32 %v26294_v53, %v30036_v11  ;;  %v31028_v11 = vld [vmem:[#allocation38_spill] sm:$0xff] }
 0x112   : > { %31013 = vst [vmem:[#allocation248_spill] sm:$0xff] %v26302_v49  ;;  %v11189_v32 = vsub.f32 %v26285_v16, %v26302_v49 }
 0x113   : > { %20498 = vmatmul.mubr.f32.gmra.mrb[22].mxu1 %v31014_v36  ;;  %v31020_v36 = vld [vmem:[#allocation133_spill] sm:$0xff] }
 0x114   : > { %21851 = vmatmul.mubr.f32.gmra.mrb[24].mxu0 %v11140_v51  ;;  %20500 = vmatprep.mubr.f32.mxu1 %v31015_v46  ;;  %v31018_v51 = vld [vmem:[#allocation132_spill] sm:$0xff]  ;;  %v11180_v46 = vand.u32 4294901760, %v11179_v57  ;;  %v26321_v42 = vand.u32 4294901760, %v11189_v32  ;;  %v849_v57 = vld [vmem:[%s29579_s1] sm:$0x7] }
 0x115   : > { %21853 = vmatprep.mubr.f32.mxu0 %v26297_v37  ;;  %v11200_v37 = vand.u32 4294901760, %v11199_v4  ;;  %v2896_v32 = vsel %vm1016_vm0, %v849_v57, 0  ;;  %v31026_v4 = vld [vmem:[#allocation33_spill] sm:$0xff] }
 0x116   : > { %31019 = vst [vmem:[#allocation250_spill] sm:$0xff] %v26321_v42  ;;  %v31027_v57 = vld [vmem:[#allocation181_spill] sm:$0xff] }
 0x117   : > { %20501 = vmatmul.mubr.f32.gmra.mrb[24].mxu1 %v31017_v24  ;;  %v31036_v24 = vld [vmem:[#allocation70_spill] sm:$0xff] }
 0x118   : > { %21854 = vmatmul.mubr.f32.gmra.mrb[26].mxu0 %v11160_v2  ;;  %20503 = vmatprep.mubr.f32.mxu1 %v31018_v51  ;;  %v31022_v2 = vld [vmem:[#allocation148_spill] sm:$0xff]  ;;  %v31035_v51 = vld [vmem:[#allocation62_spill] sm:$0xff] }
 0x119   : > { %21856 = vmatprep.mubr.f32.mxu0 %v26311_v26  ;;  %v31037_v26 = vld [vmem:[#allocation73_spill] sm:$0xff] }
 0x11b   : > { %20504 = vmatmul.mubr.f32.gmra.mrb[26].mxu1 %v31020_v36  ;;  %v31034_v36 = vld [vmem:[#allocation58_spill] sm:$0xff] }
 0x11c   : > { %21857 = vmatmul.mubr.f32.gmra.mrb[28].mxu0 %v11180_v46  ;;  %20506 = vmatprep.mubr.f32.mxu1 %v31021_v17  ;;  %v31025_v46 = vld [vmem:[#allocation179_spill] sm:$0xff]  ;;  %v31033_v17 = vld [vmem:[#allocation54_spill] sm:$0xff] }
 0x11d   : > { %21859 = vmatprep.mubr.f32.mxu0 %v26321_v42  ;;  %v31029_v42 = vld [vmem:[#allocation184_spill] sm:$0xff] }
 0x11f   : > { %20507 = vmatmul.mubr.f32.gmra.mrb[28].mxu1 %v25445_v8  ;;  %v31032_v8 = vld [vmem:[#allocation52_spill] sm:$0xff] }
 0x120   : > { %21860 = vmatmul.mubr.f32.gmra.mrb[30].mxu0 %v11200_v37  ;;  %20509 = vmatprep.mubr.f32.mxu1 %v31022_v2  ;;  %v26338_v37 = vand.u32 4294901760, %v2896_v32  ;;  %v31031_v2 = vld [vmem:[#allocation46_spill] sm:$0xff] }
 0x121   : > { %21864 = vmatprep.mubr.f32.mxu0 %v25642_v50 }
 0x123   : > { %20510 = vmatmul.mubr.f32.gmra.mrb[30].mxu1 %v25472_v29  ;;  %v31030_v29 = vld [vmem:[#allocation39_spill] sm:$0xff] }
 0x124   : > { %21865 = vmatmul.mubr.f32.vlgmr.msra.gmra.mrb[0].mxu0 %v25711_v47  ;;  %20514 = vmatprep.mubr.f32.mxu1 %v24888_v35 }
 0x125   : > { %21867 = vmatprep.mubr.f32.mxu0 %v25665_v40  ;;  %21913 = vmatpush3.msra.mxu0 %v25572_v7  ;;  %v31023_v7 = vld [vmem:[#allocation19_spill] sm:$0xff] }
 0x126   : > { %21962 = vmatprep.subr.mxu0 %v25513_v61 }
 0x127   : > { %20515 = vmatmul.mubr.f32.vlgmr.msra.gmra.mrb[0].mxu1 %v24906_v44 }
 0x128   : > { %20563 = vmatpush3.msra.mxu1 %v24824_v5  ;;  %21868 = vmatmul.mubr.f32.gmra.mrb[2].mxu0 %v25716_v21  ;;  %v31024_v5 = vld [vmem:[#allocation23_spill] sm:$0xff] }
 0x129   : > { %20517 = vmatprep.mubr.f32.mxu1 %v24879_v30  ;;  %21870 = vmatprep.mubr.f32.mxu0 %v25678_v25 }
 0x12a   : > { %20612 = vmatprep.subr.mxu1 %v26338_v37 }
 0x12b   : > { %20518 = vmatmul.mubr.f32.gmra.mrb[2].mxu1 %v24881_v31 }
 0x12c   : > { %21871 = vmatmul.mubr.f32.gmra.mrb[4].mxu0 %v25747_v48  ;;  %20520 = vmatprep.mubr.f32.mxu1 %v24900_v41 }
 0x12d   : > { %21873 = vmatprep.mubr.f32.mxu0 %v25776_v60 }
 0x12f   : > { %20521 = vmatmul.mubr.f32.gmra.mrb[4].mxu1 %v31023_v7 }
 0x130   : > { %21874 = vmatmul.mubr.f32.gmra.mrb[6].mxu0 %v25801_v6  ;;  %20523 = vmatprep.mubr.f32.mxu1 %v31024_v5  ;;  %v24730_v6 = vld [vmem:[%s24839_s21 + $0x48] sm:$0xff] }
 0x131   : > { %21876 = vmatprep.mubr.f32.mxu0 %v31025_v46  ;;  %v26538_v46 = vld [vmem:[%s24839_s21 + $0x30] sm:$0xff] }
 0x132   : > { %31090 = vst [vmem:[#allocation254_spill] sm:$0xff] %v26538_v46 }
 0x133   : > { %20524 = vmatmul.mubr.f32.gmra.mrb[6].mxu1 %v31026_v4 }
 0x134   : > { %21877 = vmatmul.mubr.f32.gmra.mrb[8].mxu0 %v31027_v57  ;;  %20526 = vmatprep.mubr.f32.mxu1 %v31028_v11 }
 0x135   : > { %21879 = vmatprep.mubr.f32.mxu0 %v31029_v42 }
 0x137   : > { %20527 = vmatmul.mubr.f32.gmra.mrb[8].mxu1 %v31030_v29 }
 0x138   : > { %21880 = vmatmul.mubr.f32.gmra.mrb[10].mxu0 %v25880_v33  ;;  %20529 = vmatprep.mubr.f32.mxu1 %v31031_v2  ;;  %v31054_v33 = vld [vmem:[#allocation142_spill] sm:$0xff] }
 0x139   : > { %21882 = vmatprep.mubr.f32.mxu0 %v25867_v34  ;;  %v31051_v34 = vld [vmem:[#allocation136_spill] sm:$0xff] }
 0x13b   : > { %20530 = vmatmul.mubr.f32.gmra.mrb[10].mxu1 %v31032_v8 }
 0x13c   : > { %21883 = vmatmul.mubr.f32.gmra.mrb[12].mxu0 %v25882_v54  ;;  %20532 = vmatprep.mubr.f32.mxu1 %v31033_v17  ;;  %v31038_v54 = vld [vmem:[#allocation80_spill] sm:$0xff] }
 0x13d   : > { %21885 = vmatprep.mubr.f32.mxu0 %v25884_v23  ;;  %v31039_v23 = vld [vmem:[#allocation86_spill] sm:$0xff] }
 0x13f   : > { %20533 = vmatmul.mubr.f32.gmra.mrb[12].mxu1 %v31034_v36 }
 0x140   : > { %21886 = vmatmul.mubr.f32.gmra.mrb[14].mxu0 %v25971_v10  ;;  %20535 = vmatprep.mubr.f32.mxu1 %v31035_v51  ;;  %v31040_v10 = vld [vmem:[#allocation90_spill] sm:$0xff] }
 0x141   : > { %21888 = vmatprep.mubr.f32.mxu0 %v25945_v18  ;;  %v31041_v18 = vld [vmem:[#allocation93_spill] sm:$0xff] }
 0x143   : > { %20536 = vmatmul.mubr.f32.gmra.mrb[14].mxu1 %v31036_v24 }
 0x144   : > { %21889 = vmatmul.mubr.f32.gmra.mrb[16].mxu0 %v26017_v38  ;;  %20538 = vmatprep.mubr.f32.mxu1 %v31037_v26  ;;  %v31042_v38 = vld [vmem:[#allocation99_spill] sm:$0xff] }
 0x145   : > { %21891 = vmatprep.mubr.f32.mxu0 %v26039_v20  ;;  %v31043_v20 = vld [vmem:[#allocation104_spill] sm:$0xff] }
 0x147   : > { %20539 = vmatmul.mubr.f32.gmra.mrb[16].mxu1 %v31038_v54 }
 0x148   : > { %21892 = vmatmul.mubr.f32.gmra.mrb[18].mxu0 %v26092_v12  ;;  %20541 = vmatprep.mubr.f32.mxu1 %v31039_v23  ;;  %v31044_v12 = vld [vmem:[#allocation107_spill] sm:$0xff] }
 0x149   : > { %21894 = vmatprep.mubr.f32.mxu0 %v26094_v43  ;;  %v31045_v43 = vld [vmem:[#allocation114_spill] sm:$0xff] }
 0x14b   : > { %20542 = vmatmul.mubr.f32.gmra.mrb[18].mxu1 %v31040_v10 }
 0x14c   : > { %21895 = vmatmul.mubr.f32.gmra.mrb[20].mxu0 %v26100_v13  ;;  %20544 = vmatprep.mubr.f32.mxu1 %v31041_v18  ;;  %v31046_v13 = vld [vmem:[#allocation119_spill] sm:$0xff] }
 0x14d   : > { %21897 = vmatprep.mubr.f32.mxu0 %v26102_v22  ;;  %v31047_v22 = vld [vmem:[#allocation125_spill] sm:$0xff] }
 0x14f   : > { %20545 = vmatmul.mubr.f32.gmra.mrb[20].mxu1 %v31042_v38 }
 0x150   : > { %21898 = vmatmul.mubr.f32.gmra.mrb[22].mxu0 %v26133_v9  ;;  %20547 = vmatprep.mubr.f32.mxu1 %v31043_v20  ;;  %v26396_v9 = vsub.f32 %v2896_v32, %v26338_v37 }
 0x151   : > { %21900 = vmatprep.mubr.f32.mxu0 %v26158_v45  ;;  %v31048_v45 = vld [vmem:[#allocation126_spill] sm:$0xff] }
 0x153   : > { %20548 = vmatmul.mubr.f32.gmra.mrb[22].mxu1 %v31044_v12 }
 0x154   : > { %21901 = vmatmul.mubr.f32.gmra.mrb[24].mxu0 %v26190_v0  ;;  %20550 = vmatprep.mubr.f32.mxu1 %v31045_v43  ;;  %v31049_v0 = vld [vmem:[#allocation134_spill] sm:$0xff] }
 0x155   : > { %21903 = vmatprep.mubr.f32.mxu0 %v26197_v19  ;;  %v26403_v19 = vand.u32 4294901760, %v26396_v9 }
 0x157   : > { %20551 = vmatmul.mubr.f32.gmra.mrb[24].mxu1 %v31046_v13  ;;  %31050 = vst [vmem:[#allocation251_spill] sm:$0xff] %v26403_v19  ;;  %v3288_v32 = vsub.f32 %v26396_v9, %v26403_v19  ;;  %v31059_v19 = vld [vmem:[#allocation25_spill] sm:$0xff] }
 0x158   : > { %21904 = vmatmul.mubr.f32.gmra.mrb[26].mxu0 %v26225_v15  ;;  %20553 = vmatprep.mubr.f32.mxu1 %v31047_v22  ;;  %v31052_v15 = vld [vmem:[#allocation140_spill] sm:$0xff] }
 0x159   : > { %21906 = vmatprep.mubr.f32.mxu0 %v26233_v27  ;;  %v31053_v27 = vld [vmem:[#allocation20_spill] sm:$0xff]  ;;  %v26416_v42 = vand.u32 4294901760, %v3288_v32 }
 0x15a   : > { %v31061_v32 = vld [vmem:[#allocation180_spill] sm:$0xff] }
 0x15b   : > { %20554 = vmatmul.mubr.f32.gmra.mrb[26].mxu1 %v31048_v45 }
 0x15c   : > { %21907 = vmatmul.mubr.f32.gmra.mrb[28].mxu0 %v26253_v56  ;;  %20556 = vmatprep.mubr.f32.mxu1 %v31049_v0  ;;  %v31055_v56 = vld [vmem:[#allocation172_spill] sm:$0xff] }
 0x15d   : > { %21909 = vmatprep.mubr.f32.mxu0 %v26262_v28  ;;  %v31056_v28 = vld [vmem:[#allocation168_spill] sm:$0xff] }
 0x15f   : > { %20557 = vmatmul.mubr.f32.gmra.mrb[28].mxu1 %v31051_v34 }
 0x160   : > { %21910 = vmatmul.mubr.f32.gmra.mrb[30].mxu0 %v26274_v59  ;;  %20559 = vmatprep.mubr.f32.mxu1 %v31052_v15  ;;  %v31057_v59 = vld [vmem:[#allocation161_spill] sm:$0xff] }
 0x161   : > { %21914 = vmatprep.mubr.f32.mxu0 %v31053_v27  ;;  %v31058_v27 = vld [vmem:[#allocation173_spill] sm:$0xff] }
 0x163   : > { %20560 = vmatmul.mubr.f32.gmra.mrb[30].mxu1 %v31054_v33 }
 0x164   : > { %21915 = vmatmul.mubr.f32.vlgmr.msra.gmra.mrb[0].mxu0 %v31055_v56  ;;  %20564 = vmatprep.mubr.f32.mxu1 %v24888_v35  ;;  %v31060_v35 = vld [vmem:[#allocation175_spill] sm:$0xff] }
 0x165   : > { %21917 = vmatprep.mubr.f32.mxu0 %v31056_v28  ;;  %21963 = vmatpush3.msra.mxu0 %v25513_v61  ;;  %v31063_v28 = vld [vmem:[#allocation183_spill] sm:$0xff] }
 0x166   : > { %22012 = vmatprep.subr.mxu0 %v31057_v59 }
 0x167   : > { %20565 = vmatmul.mubr.f32.vlgmr.msra.gmra.mrb[0].mxu1 %v24906_v44  ;;  %v31062_v44 = vld [vmem:[#allocation182_spill] sm:$0xff] }
 0x168   : > { %20613 = vmatpush3.msra.mxu1 %v26338_v37  ;;  %21918 = vmatmul.mubr.f32.gmra.mrb[2].mxu0 %v31058_v27 }
 0x169   : > { %20567 = vmatprep.mubr.f32.mxu1 %v24879_v30  ;;  %21920 = vmatprep.mubr.f32.mxu0 %v31059_v19  ;;  %v31064_v30 = vld [vmem:[#allocation185_spill] sm:$0xff] }
 0x16a   : > { %20662 = vmatprep.subr.mxu1 %v26416_v42 }
 0x16b   : > { %20568 = vmatmul.mubr.f32.gmra.mrb[2].mxu1 %v24881_v31  ;;  %v31065_v31 = vld [vmem:[#allocation188_spill] sm:$0xff] }
 0x16c   : > { %21921 = vmatmul.mubr.f32.gmra.mrb[4].mxu0 %v31060_v35  ;;  %20570 = vmatprep.mubr.f32.mxu1 %v24900_v41  ;;  %v31066_v41 = vld [vmem:[#allocation195_spill] sm:$0xff] }
 0x16d   : > { %21923 = vmatprep.mubr.f32.mxu0 %v31061_v32  ;;  %v31068_v32 = vld [vmem:[#allocation162_spill] sm:$0xff] }
 0x16f   : > { %20571 = vmatmul.mubr.f32.gmra.mrb[4].mxu1 %v31023_v7  ;;  %v31067_v7 = vld [vmem:[#allocation74_spill] sm:$0xff] }
 0x170   : > { %21924 = vmatmul.mubr.f32.gmra.mrb[6].mxu0 %v31062_v44  ;;  %20573 = vmatprep.mubr.f32.mxu1 %v31024_v5  ;;  %v245_v5 = vand.u32 15, %v31068_v32 }
 0x171   : > { %21926 = vmatprep.mubr.f32.mxu0 %v31063_v28  ;;  %v31069_v28 = vld [vmem:[#allocation196_spill] sm:$0xff] }
 0x173   : > { %20574 = vmatmul.mubr.f32.gmra.mrb[6].mxu1 %v31026_v4  ;;  %v211_v4 = vadd.s32 16, %v31068_v32 }
 0x174   : > { %21927 = vmatmul.mubr.f32.gmra.mrb[8].mxu0 %v31064_v30  ;;  %20576 = vmatprep.mubr.f32.mxu1 %v31028_v11  ;;  %v31070_v11 = vld [vmem:[#allocation197_spill] sm:$0xff] }
 0x175   : > { %21929 = vmatprep.mubr.f32.mxu0 %v31065_v31  ;;  %v31072_v31 = vld [vmem:[#allocation16_spill] sm:$0xff] }
 0x177   : > { %20577 = vmatmul.mubr.f32.gmra.mrb[8].mxu1 %v31030_v29  ;;  %v26447_v29 = vadd.s32 4294967295, %v245_v5  ;;  %v31075_v5 = vld [vmem:[#allocation211_spill] sm:$0xff] }
 0x178   : > { %21930 = vmatmul.mubr.f32.gmra.mrb[10].mxu0 %v31066_v41  ;;  %20579 = vmatprep.mubr.f32.mxu1 %v31031_v2  ;;  %v259_v2 = vand.u32 15, %v211_v4  ;;  %v24720_v4 = vld [vmem:[%s24839_s21] sm:$0xff] }
 0x179   : > { %21932 = vmatprep.mubr.f32.mxu0 %v31067_v7  ;;  %31071 = vst [vmem:[#allocation172_spill] sm:$0xff] %v26447_v29  ;;  %v31073_v7 = vld [vmem:[#allocation204_spill] sm:$0xff]  ;;  %vm657_vm15 = vcmp.ge.s32.totalorder %v26447_v29, 0 }
 0x17b   : > { %20580 = vmatmul.mubr.f32.gmra.mrb[10].mxu1 %v31032_v8  ;;  %v213_v8 = vadd.s32 32, %v31068_v32 }
 0x17c   : > { %21933 = vmatmul.mubr.f32.gmra.mrb[12].mxu0 %v31069_v28  ;;  %20582 = vmatprep.mubr.f32.mxu1 %v31033_v17  ;;  %v26456_v17 = vadd.s32 4294967295, %v259_v2 }
 0x17d   : > { %21935 = vmatprep.mubr.f32.mxu0 %v31070_v11 }
 0x17e   : > { %31074 = vst [vmem:[#allocation161_spill] sm:$0xff] %v26456_v17  ;;  %vm659_vm1 = vcmp.ge.s32.totalorder %v26456_v17, 0  ;;  %v31081_v17 = vld [vmem:[#allocation228_spill] sm:$0xff] }
 0x17f   : > { %20583 = vmatmul.mubr.f32.gmra.mrb[12].mxu1 %v31034_v36  ;;  %v273_v36 = vand.u32 15, %v213_v8 }
 0x180   : > { %21936 = vmatmul.mubr.f32.gmra.mrb[14].mxu0 %v31072_v31  ;;  %20585 = vmatprep.mubr.f32.mxu1 %v31035_v51  ;;  %v817_v51 = vsel %vm657_vm15, %v24720_v4, 0.0  ;;  %v24722_v4 = vld [vmem:[%s24839_s21 + $0x8] sm:$0xff] }
 0x181   : > { %21938 = vmatprep.mubr.f32.mxu0 %v31073_v7  ;;  %v2800_v2 = vsel %vm951_vm2, %v817_v51, 0  ;;  %v24721_v7 = vld [vmem:[%s24839_s21 + $0x10] sm:$0xff]  ;;  %v219_v51 = vadd.s32 80, %v31068_v32 }
 0x182   : > { %v819_v8 = vsel %vm659_vm1, %v24721_v7, 0.0  ;;  %v26479_v11 = vand.u32 4294901760, %v2800_v2 }
 0x183   : > { %20586 = vmatmul.mubr.f32.gmra.mrb[14].mxu1 %v31036_v24  ;;  %v215_v24 = vadd.s32 48, %v31068_v32 }
 0x184   : > { %21939 = vmatmul.mubr.f32.gmra.mrb[16].mxu0 %v31075_v5  ;;  %20588 = vmatprep.mubr.f32.mxu1 %v31037_v26  ;;  %v31076_v26 = vld [vmem:[#allocation121_spill] sm:$0xff] }
 0x185   : > { %21941 = vmatprep.mubr.f32.mxu0 %v26068_v52  ;;  %v26471_v52 = vadd.s32 4294967295, %v273_v36  ;;  %v287_v19 = vand.u32 15, %v215_v24  ;;  %v2806_v36 = vsel %vm951_vm2, %v819_v8, 0  ;;  %v26492_v24 = vsub.f32 %v2800_v2, %v26479_v11 }
 0x186   : > { %v26500_v8 = vand.u32 4294901760, %v2806_v36  ;;  %v221_v2 = vadd.s32 96, %v31068_v32 }
 0x187   : > { %20589 = vmatmul.mubr.f32.gmra.mrb[16].mxu1 %v31038_v54  ;;  %31077 = vst [vmem:[#allocation173_spill] sm:$0xff] %v26471_v52  ;;  %v2803_v54 = vsel %vm951_vm2, %v24722_v4, 0  ;;  %vm661_vm14 = vcmp.ge.s32.totalorder %v26471_v52, 0  ;;  %31078 = vst [vmem:[#allocation175_spill] sm:$0xff] %v26492_v24  ;;  %v24723_v4 = vld [vmem:[%s24839_s21 + $0x18] sm:$0xff] }
 0x188   : > { %21942 = vmatmul.mubr.f32.gmra.mrb[18].mxu0 %v26121_v55  ;;  %20591 = vmatprep.mubr.f32.mxu1 %v31039_v23  ;;  %v217_v23 = vadd.s32 64, %v31068_v32  ;;  %v26488_v7 = vand.u32 4294901760, %v2803_v54 }
 0x189   : > { %21944 = vmatprep.mubr.f32.mxu0 %v31076_v26  ;;  %v26496_v26 = vadd.s32 4294967295, %v287_v19  ;;  %v315_v19 = vand.u32 15, %v219_v51  ;;  %v329_v51 = vand.u32 15, %v221_v2  ;;  %v24727_v2 = vld [vmem:[%s24839_s21 + $0x38] sm:$0xff] }
 0x18b   : > { %20592 = vmatmul.mubr.f32.gmra.mrb[18].mxu1 %v31040_v10  ;;  %v2809_v10 = vsel %vm951_vm2, %v24723_v4, 0  ;;  %31079 = vst [vmem:[#allocation182_spill] sm:$0xff] %v26496_v26  ;;  %vm663_vm13 = vcmp.ge.s32.totalorder %v26496_v26, 0 }
 0x18c   : > { %21945 = vmatmul.mubr.f32.gmra.mrb[20].mxu0 %v26128_v39  ;;  %20594 = vmatprep.mubr.f32.mxu1 %v31041_v18  ;;  %v301_v18 = vand.u32 15, %v217_v23  ;;  %v26511_v23 = vsub.f32 %v2803_v54, %v26488_v7  ;;  %v26513_v4 = vand.u32 4294901760, %v2809_v10  ;;  %v26524_v54 = vsub.f32 %v2806_v36, %v26500_v8 }
 0x18d   : > { %21947 = vmatprep.mubr.f32.mxu0 %v26131_v14  ;;  %v26503_v14 = vld [vmem:[%s24839_s21 + $0x20] sm:$0xff]  ;;  %v823_v36 = vsel %vm663_vm13, %v26538_v46, 0.0 }
 0x18e   : > { %31080 = vst [vmem:[#allocation185_spill] sm:$0xff] %v26503_v14  ;;  %31082 = vst [vmem:[#allocation195_spill] sm:$0xff] %v26511_v23  ;;  %v26519_v52 = vadd.s32 4294967295, %v301_v18  ;;  %v26533_v18 = vsub.f32 %v2809_v10, %v26513_v4 }
 0x18f   : > { %20595 = vmatmul.mubr.f32.gmra.mrb[20].mxu1 %v31042_v38  ;;  %v821_v38 = vsel %vm661_vm14, %v26503_v14, 0.0  ;;  %31083 = vst [vmem:[#allocation162_spill] sm:$0xff] %v26513_v4  ;;  %31085 = vst [vmem:[#allocation16_spill] sm:$0xff] %v26524_v54  ;;  %v26529_v14 = vadd.s32 4294967295, %v315_v19 }
 0x190   : > { %21948 = vmatmul.mubr.f32.gmra.mrb[22].mxu0 %v26166_v3  ;;  %20597 = vmatprep.mubr.f32.mxu1 %v31043_v20  ;;  %v2812_v29 = vsel %vm951_vm2, %v821_v38, 0  ;;  %31084 = vst [vmem:[#allocation196_spill] sm:$0xff] %v26519_v52  ;;  %v223_v38 = vadd.s32 112, %v31068_v32  ;;  %31088 = vst [vmem:[#allocation252_spill] sm:$0xff] %v26533_v18  ;;  %vm665_vm12 = vcmp.ge.s32.totalorder %v26519_v52, 0  ;;  %v26566_v46 = vand.u32 4294901760, %v26533_v18 }
 0x191   : > { %21950 = vmatprep.mubr.f32.mxu0 %v31081_v17  ;;  %v31086_v17 = vld [vmem:[#allocation236_spill] sm:$0xff]  ;;  %31087 = vst [vmem:[#allocation211_spill] sm:$0xff] %v26529_v14  ;;  %v26535_v57 = vand.u32 4294901760, %v2812_v29  ;;  %vm667_vm11 = vcmp.ge.s32.totalorder %v26529_v14, 0 }
 0x192   : > { %v343_v10 = vand.u32 15, %v223_v38  ;;  %31095 = vst [vmem:[#allocation258_spill] sm:$0xff] %v26566_v46  ;;  %v2997_v14 = vsub.f32 %v26533_v18, %v26566_v46  ;;  %v227_v46 = vadd.s32 144, %v31068_v32 }
 0x193   : > { %20598 = vmatmul.mubr.f32.gmra.mrb[22].mxu1 %v31044_v12  ;;  %v24725_v12 = vld [vmem:[%s24839_s21 + $0x28] sm:$0xff]  ;;  %31089 = vst [vmem:[#allocation253_spill] sm:$0xff] %v26535_v57 }
 0x194   : > { %21951 = vmatmul.mubr.f32.gmra.mrb[24].mxu0 %v26223_v1  ;;  %20600 = vmatprep.mubr.f32.mxu1 %v31045_v43  ;;  %v2815_v20 = vsel %vm951_vm2, %v24725_v12, 0  ;;  %v2821_v43 = vsel %vm951_vm2, %v24727_v2, 0  ;;  %v31091_v12 = vand.u32 4294901760, %v26492_v24  ;;  %v26558_v2 = vadd.s32 4294967295, %v329_v51 }
 0x195   : > { %21953 = vmatprep.mubr.f32.mxu0 %v31086_v17  ;;  %v26556_v26 = vand.u32 4294901760, %v2815_v20  ;;  %v26572_v17 = vld [vmem:[%s24839_s21 + $0x40] sm:$0xff] }
 0x196   : > { %v26549_v19 = vsub.f32 %v26492_v24, %v31091_v12  ;;  %31093 = vst [vmem:[#allocation256_spill] sm:$0xff] %v26558_v2  ;;  %v26562_v12 = vand.u32 4294901760, %v2821_v43  ;;  %31097 = vst [vmem:[#allocation260_spill] sm:$0xff] %v26572_v17  ;;  %v825_v51 = vsel %vm665_vm12, %v26572_v17, 0.0  ;;  %v225_v24 = vadd.s32 128, %v31068_v32 }
 0x197   : > { %20601 = vmatmul.mubr.f32.gmra.mrb[24].mxu1 %v31046_v13  ;;  %31092 = vst [vmem:[#allocation255_spill] sm:$0xff] %v26556_v26  ;;  %v2818_v13 = vsel %vm951_vm2, %v823_v36, 0  ;;  %vm669_vm10 = vcmp.ge.s32.totalorder %v26558_v2, 0  ;;  %v2824_v17 = vsel %vm951_vm2, %v825_v51, 0 }
 0x198   : > { %21954 = vmatmul.mubr.f32.gmra.mrb[26].mxu0 %v26251_v63  ;;  %20603 = vmatprep.mubr.f32.mxu1 %v31047_v22  ;;  %31094 = vst [vmem:[#allocation257_spill] sm:$0xff] %v26562_v12  ;;  %v26569_v22 = vsub.f32 %v2812_v29, %v26535_v57  ;;  %v2968_v36 = vand.u32 4294901760, %v26549_v19  ;;  %v26588_v29 = vsub.f32 %v2815_v20, %v26556_v26  ;;  %v26590_v52 = vand.u32 4294901760, %v2818_v13  ;;  %v24731_v26 = vld [vmem:[%s24839_s21 + $0x58] sm:$0xff] }
 0x199   : > { %21956 = vmatprep.mubr.f32.mxu0 %v26260_v62  ;;  %v31098_v62 = vand.u32 4294901760, %v26511_v23  ;;  %v31102_v19 = vand.u32 4294901760, %v26524_v54  ;;  %v26606_v20 = vsub.f32 %v2821_v43, %v26562_v12  ;;  %v2833_v60 = vsel %vm951_vm2, %v24731_v26, 0 }
 0x19a   : > { %31096 = vst [vmem:[#allocation259_spill] sm:$0xff] %v26569_v22  ;;  %31099 = vst [vmem:[#allocation261_spill] sm:$0xff] %v26588_v29  ;;  %v357_v51 = vand.u32 15, %v225_v24  ;;  %v26631_v26 = vand.u32 4294901760, %v26588_v29  ;;  %v26651_v18 = vand.u32 4294901760, %v2833_v60  ;;  %v371_v12 = vand.u32 15, %v227_v46 }
 0x19b   : > { %20604 = vmatmul.mubr.f32.gmra.mrb[26].mxu1 %v31048_v45  ;;  %v26582_v38 = vsub.f32 %v26511_v23, %v31098_v62  ;;  %31100 = vst [vmem:[#allocation262_spill] sm:$0xff] %v26590_v52  ;;  %v26593_v45 = vld [vmem:[%s24839_s21 + $0x50] sm:$0xff]  ;;  %31103 = vst [vmem:[#allocation264_spill] sm:$0xff] %v26606_v20  ;;  %v26609_v23 = vadd.s32 4294967295, %v343_v10  ;;  %v26641_v2 = vand.u32 4294901760, %v26606_v20  ;;  %v31117_v57 = vand.u32 4294901760, %v31055_v56 }
 0x19c   : > { %21957 = vmatmul.mubr.f32.gmra.mrb[28].mxu0 %v26272_v58  ;;  %20606 = vmatprep.mubr.f32.mxu1 %v31049_v0  ;;  %31101 = vst [vmem:[#allocation263_spill] sm:$0xff] %v26593_v45  ;;  %v827_v62 = vsel %vm667_vm11, %v26593_v45, 0.0  ;;  %v26603_v0 = vsub.f32 %v26524_v54, %v31102_v19  ;;  %v26621_v19 = vld [vmem:[%s24839_s21 + $0x60] sm:$0xff]  ;;  %31106 = vst [vmem:[#allocation267_spill] sm:$0xff] %v26631_v26  ;;  %v26636_v45 = vand.u32 4294901760, %v2824_v17  ;;  %v26657_v54 = vadd.s32 4294967295, %v357_v51 }
 0x19d   : > { %21959 = vmatprep.mubr.f32.mxu0 %v26285_v16  ;;  %31104 = vst [vmem:[#allocation265_spill] sm:$0xff] %v26609_v23  ;;  %v2827_v16 = vsel %vm951_vm2, %v24730_v6, 0  ;;  %v2830_v43 = vsel %vm951_vm2, %v827_v62, 0  ;;  %31105 = vst [vmem:[#allocation266_spill] sm:$0xff] %v26621_v19  ;;  %v829_v10 = vsel %vm669_vm10, %v26621_v19, 0.0  ;;  %v2978_v6 = vand.u32 4294901760, %v26582_v38 }
 0x19e   : > { %v26634_v62 = vsub.f32 %v2818_v13, %v26590_v52  ;;  %31108 = vst [vmem:[#allocation269_spill] sm:$0xff] %v26636_v45  ;;  %v2988_v24 = vand.u32 4294901760, %v26603_v0  ;;  %31110 = vst [vmem:[#allocation270_spill] sm:$0xff] %v26641_v2  ;;  %v26643_v19 = vand.u32 4294901760, %v2827_v16  ;;  %vm671_vm9 = vcmp.ge.s32.totalorder %v26609_v23, 0  ;;  %v31120_v51 = vld [vmem:[#allocation169_spill] sm:$0xff] }
 0x19f   : > { %20607 = vmatmul.mubr.f32.gmra.mrb[28].mxu1 %v31051_v34  ;;  %v31109_v34 = vld [vmem:[#allocation167_spill] sm:$0xff]  ;;  %v31112_v38 = vand.u32 4294901760, %v26569_v22  ;;  %v26649_v13 = vand.u32 4294901760, %v2830_v43  ;;  %31114 = vst [vmem:[#allocation273_spill] sm:$0xff] %v26651_v18  ;;  %v26655_v0 = vand.u32 4294901760, %v2997_v14  ;;  %31116 = vst [vmem:[#allocation275_spill] sm:$0xff] %v26657_v54  ;;  %v3037_v56 = vsub.f32 %v26606_v20, %v26641_v2 }
 0x1a0   : > { %21960 = vmatmul.mubr.f32.gmra.mrb[30].mxu0 %v26294_v53  ;;  %20609 = vmatprep.mubr.f32.mxu1 %v31052_v15  ;;  %31107 = vst [vmem:[#allocation268_spill] sm:$0xff] %v26634_v62  ;;  %31111 = vst [vmem:[#allocation271_spill] sm:$0xff] %v26643_v19  ;;  %v229_v52 = vadd.s32 160, %v31068_v32  ;;  %v26669_v14 = vld [vmem:[%s24839_s21 + $0x70] sm:$0xff]  ;;  %v26689_v23 = vsub.f32 %v2833_v60, %v26651_v18  ;;  %vm673_vm8 = vcmp.ge.s32.totalorder %v26657_v54, 0  ;;  %v31138_v54 = vand.u32 4294901760, %v31060_v35 }
 0x1a1   : > { %21964 = vmatprep.mubr.f32.mxu0 %v31109_v34  ;;  %v3007_v15 = vsub.f32 %v26569_v22, %v31112_v38  ;;  %31113 = vst [vmem:[#allocation272_spill] sm:$0xff] %v26649_v13  ;;  %v2836_v34 = vsel %vm951_vm2, %v829_v10, 0  ;;  %31115 = vst [vmem:[#allocation274_spill] sm:$0xff] %v26655_v0  ;;  %v3017_v38 = vsub.f32 %v26588_v29, %v26631_v26  ;;  %v831_v46 = vsel %vm671_vm9, %v26669_v14, 0.0 }
 0x1a2   : > { %v26666_v10 = vsub.f32 %v2824_v17, %v26636_v45  ;;  %31119 = vst [vmem:[#allocation277_spill] sm:$0xff] %v26669_v14  ;;  %v24734_v17 = vld [vmem:[%s24839_s21 + $0x68] sm:$0xff]  ;;  %v26686_v26 = vsub.f32 %v2830_v43, %v26649_v13  ;;  %31124 = vst [vmem:[#allocation281_spill] sm:$0xff] %v26689_v23  ;;  %v31126_v43 = vand.u32 4294901760, %v31058_v27  ;;  %v26709_v14 = vand.u32 4294901760, %v3037_v56  ;;  %v24735_v27 = vld [vmem:[%s24839_s21 + $0x78] sm:$0xff] }
 0x1a3   : > { %20610 = vmatmul.mubr.f32.gmra.mrb[30].mxu1 %v31054_v33  ;;  %v2839_v22 = vsel %vm951_vm2, %v24734_v17, 0  ;;  %v3008_v33 = vand.u32 4294901760, %v3007_v15  ;;  %v385_v15 = vand.u32 15, %v229_v52  ;;  %v26700_v60 = vand.u32 4294901760, %v3017_v38 }
 0x1a4   : > { %21965 = vmatmul.mubr.f32.vlgmr.msra.gmra.mrb[0].mxu0 %v31117_v57  ;;  %20614 = vmatprep.mubr.f32.mxu1 %v2968_v36  ;;  %31118 = vst [vmem:[#allocation276_spill] sm:$0xff] %v26666_v10  ;;  %v26679_v57 = vsub.f32 %v2827_v16, %v26643_v19  ;;  %v26681_v36 = vand.u32 4294901760, %v2836_v34  ;;  %31123 = vst [vmem:[#allocation280_spill] sm:$0xff] %v26686_v26  ;;  %v2842_v16 = vsel %vm951_vm2, %v831_v46, 0  ;;  %v31128_v17 = vand.u32 4294901760, %v26634_v62 }
 0x1a5   : > { %21967 = vmatprep.mubr.f32.mxu0 %v31120_v51  ;;  %22013 = vmatpush3.msra.mxu0 %v31057_v59  ;;  %v231_v59 = vadd.s32 176, %v31068_v32  ;;  %v26695_v51 = vadd.s32 4294967295, %v371_v12  ;;  %31127 = vst [vmem:[#allocation283_spill] sm:$0xff] %v26700_v60  ;;  %v26706_v46 = vand.u32 4294901760, %v2839_v22  ;;  %v31130_v12 = vld [vmem:[#allocation34_spill] sm:$0xff]  ;;  %31131 = vst [vmem:[#allocation285_spill] sm:$0xff] %v26709_v14 }
 0x1a6   : > { %31121 = vst [vmem:[#allocation278_spill] sm:$0xff] %v26679_v57  ;;  %31122 = vst [vmem:[#allocation279_spill] sm:$0xff] %v26681_v36  ;;  %22062 = vmatprep.subr.mxu0 %v25513_v61  ;;  %v26715_v52 = vsub.f32 %v2836_v34, %v26681_v36  ;;  %v2845_v38 = vsel %vm951_vm2, %v24735_v27, 0  ;;  %v233_v56 = vadd.s32 192, %v31068_v32  ;;  %v26732_v27 = vand.u32 4294901760, %v26689_v23 }
 0x1a7   : > { %20615 = vmatmul.mubr.f32.vlgmr.msra.gmra.mrb[0].mxu1 %v2978_v6  ;;  %31125 = vst [vmem:[#allocation282_spill] sm:$0xff] %v26695_v51  ;;  %v3027_v6 = vsub.f32 %v26634_v62, %v31128_v17  ;;  %31129 = vst [vmem:[#allocation284_spill] sm:$0xff] %v26706_v46  ;;  %v26722_v17 = vld [vmem:[%s24839_s21 + $0x80] sm:$0xff]  ;;  %v399_v2 = vand.u32 15, %v231_v59  ;;  %vm675_vm7 = vcmp.ge.s32.totalorder %v26695_v51, 0  ;;  %v26745_v34 = vand.u32 4294901760, %v2845_v38 }
 0x1a8   : > { %20663 = vmatpush3.msra.mxu1 %v26416_v42  ;;  %21968 = vmatmul.mubr.f32.gmra.mrb[2].mxu0 %v31126_v43  ;;  %v26712_v42 = vand.u32 4294901760, %v26679_v57  ;;  %31133 = vst [vmem:[#allocation287_spill] sm:$0xff] %v26715_v52  ;;  %v26719_v43 = vand.u32 4294901760, %v2842_v16  ;;  %31135 = vst [vmem:[#allocation289_spill] sm:$0xff] %v26722_v17  ;;  %v31142_v62 = vld [vmem:[#allocation59_spill] sm:$0xff] }
 0x1a9   : > { %20617 = vmatprep.mubr.f32.mxu1 %v2988_v24  ;;  %21970 = vmatprep.mubr.f32.mxu0 %v31130_v12  ;;  %v833_v24 = vsel %vm673_vm8, %v26722_v17, 0.0  ;;  %31136 = vst [vmem:[#allocation290_spill] sm:$0xff] %v26732_v27  ;;  %v26735_v12 = vadd.s32 4294967295, %v385_v15  ;;  %v3028_v59 = vand.u32 4294901760, %v3027_v6  ;;  %v31139_v17 = vand.u32 4294901760, %v26666_v10  ;;  %31141 = vst [vmem:[#allocation293_spill] sm:$0xff] %v26745_v34 }
 0x1aa   : > { %31132 = vst [vmem:[#allocation286_spill] sm:$0xff] %v26712_v42  ;;  %31134 = vst [vmem:[#allocation288_spill] sm:$0xff] %v26719_v43  ;;  %20712 = vmatprep.subr.mxu1 %v26396_v9  ;;  %v3057_v15 = vsub.f32 %v26679_v57, %v26712_v42  ;;  %v2848_v35 = vsel %vm951_vm2, %v833_v24, 0  ;;  %v26755_v6 = vsub.f32 %v2842_v16, %v26719_v43  ;;  %v31146_v24 = vand.u32 4294901760, %v26686_v26 }
 0x1ab   : > { %20618 = vmatmul.mubr.f32.gmra.mrb[2].mxu1 %v26655_v0  ;;  %31137 = vst [vmem:[#allocation291_spill] sm:$0xff] %v26735_v12  ;;  %v3047_v20 = vsub.f32 %v26666_v10, %v31139_v17  ;;  %v26743_v0 = vsub.f32 %v2839_v22, %v26706_v46  ;;  %v26758_v17 = vld [vmem:[%s24839_s21 + $0x90] sm:$0xff]  ;;  %v413_v10 = vand.u32 15, %v233_v56  ;;  %v3077_v16 = vsub.f32 %v26689_v23, %v26732_v27 }
 0x1ac   : > { %21971 = vmatmul.mubr.f32.gmra.mrb[4].mxu0 %v31138_v54  ;;  %20620 = vmatprep.mubr.f32.mxu1 %v3008_v33  ;;  %v24737_v33 = vld [vmem:[%s24839_s21 + $0x88] sm:$0xff]  ;;  %31143 = vst [vmem:[#allocation294_spill] sm:$0xff] %v26755_v6  ;;  %31144 = vst [vmem:[#allocation295_spill] sm:$0xff] %v26758_v17  ;;  %v835_v22 = vsel %vm675_vm7, %v26758_v17, 0.0  ;;  %v3067_v29 = vsub.f32 %v26686_v26, %v31146_v24  ;;  %vm677_vm6 = vcmp.ge.s32.totalorder %v26735_v12, 0  ;;  %v31147_v42 = vand.u32 4294901760, %v31062_v44 }
 0x1ad   : > { %31140 = vst [vmem:[#allocation292_spill] sm:$0xff] %v26743_v0  ;;  %21973 = vmatprep.mubr.f32.mxu0 %v31142_v62  ;;  %v2851_v54 = vsel %vm951_vm2, %v24737_v33, 0  ;;  %v26763_v62 = vadd.s32 4294967295, %v399_v2  ;;  %v235_v33 = vadd.s32 208, %v31068_v32  ;;  %v3048_v2 = vand.u32 4294901760, %v3047_v20  ;;  %v26794_v26 = vld [vmem:[%s24839_s21 + $0xa0] sm:$0xff] }
 0x1ae   : > { %v26776_v56 = vand.u32 4294901760, %v26743_v0  ;;  %v26779_v51 = vsub.f32 %v2845_v38, %v26745_v34  ;;  %v26781_v24 = vand.u32 4294901760, %v2848_v35  ;;  %v31152_v27 = vand.u32 4294901760, %v26715_v52  ;;  %31154 = vst [vmem:[#allocation301_spill] sm:$0xff] %v26794_v26 }
 0x1af   : > { %31145 = vst [vmem:[#allocation296_spill] sm:$0xff] %v26763_v62  ;;  %20621 = vmatmul.mubr.f32.gmra.mrb[4].mxu1 %v26700_v60  ;;  %v31151_v60 = vld [vmem:[#allocation187_spill] sm:$0xff]  ;;  %v26787_v23 = vand.u32 4294901760, %v2851_v54  ;;  %v2854_v44 = vsel %vm951_vm2, %v835_v22, 0  ;;  %v837_v38 = vsel %vm677_vm6, %v26794_v26, 0.0  ;;  %vm30373_vm5 = vcmp.ge.s32.totalorder %v26763_v62, 0 }
 0x1b0   : > { %21974 = vmatmul.mubr.f32.gmra.mrb[6].mxu0 %v31147_v42  ;;  %20623 = vmatprep.mubr.f32.mxu1 %v3028_v59  ;;  %31148 = vst [vmem:[#allocation297_spill] sm:$0xff] %v26776_v56  ;;  %31149 = vst [vmem:[#allocation298_spill] sm:$0xff] %v26779_v51  ;;  %v3087_v17 = vsub.f32 %v26715_v52, %v31152_v27  ;;  %v24739_v42 = vld [vmem:[%s24839_s21 + $0x98] sm:$0xff]  ;;  %v26803_v27 = vand.u32 4294901760, %v3057_v15  ;;  %v3068_v22 = vand.u32 4294901760, %v3067_v29  ;;  %v427_v52 = vand.u32 15, %v235_v33 }
 0x1b1   : > { %31150 = vst [vmem:[#allocation299_spill] sm:$0xff] %v26781_v24  ;;  %21976 = vmatprep.mubr.f32.mxu0 %v31151_v60  ;;  %31153 = vst [vmem:[#allocation300_spill] sm:$0xff] %v26787_v23  ;;  %v2857_v20 = vsel %vm951_vm2, %v24739_v42, 0  ;;  %v26800_v60 = vadd.s32 4294967295, %v413_v10  ;;  %v237_v42 = vadd.s32 224, %v31068_v32  ;;  %v31157_v59 = vand.u32 4294901760, %v31064_v30 }
 0x1b2   : > { %31156 = vst [vmem:[#allocation303_spill] sm:$0xff] %v26803_v27  ;;  %v26808_v12 = vand.u32 4294901760, %v3077_v16  ;;  %v26811_v26 = vand.u32 4294901760, %v26779_v51  ;;  %v26814_v10 = vsub.f32 %v2848_v35, %v26781_v24  ;;  %v31162_v15 = vld [vmem:[#allocation194_spill] sm:$0xff]  ;;  %v26820_v29 = vsub.f32 %v2851_v54, %v26787_v23  ;;  %v24742_v54 = vld [vmem:[%s24839_s21 + $0xa8] sm:$0xff] }
 0x1b3   : > { %31155 = vst [vmem:[#allocation302_spill] sm:$0xff] %v26800_v60  ;;  %20624 = vmatmul.mubr.f32.gmra.mrb[6].mxu1 %v26709_v14  ;;  %v26816_v14 = vand.u32 4294901760, %v2854_v44  ;;  %v26822_v33 = vand.u32 4294901760, %v2857_v20  ;;  %v2860_v30 = vsel %vm951_vm2, %v837_v38, 0  ;;  %v3097_v35 = vsub.f32 %v26743_v0, %v26776_v56  ;;  %v31181_v0 = vld [vmem:[#allocation75_spill] sm:$0xff] }
 0x1b4   : > { %21977 = vmatmul.mubr.f32.gmra.mrb[8].mxu0 %v31157_v59  ;;  %20626 = vmatprep.mubr.f32.mxu1 %v3048_v2  ;;  %31158 = vst [vmem:[#allocation304_spill] sm:$0xff] %v26808_v12  ;;  %31159 = vst [vmem:[#allocation305_spill] sm:$0xff] %v26811_v26  ;;  %v26826_v2 = vld [vmem:[%s24839_s21 + $0xb0] sm:$0xff]  ;;  %v3088_v59 = vand.u32 4294901760, %v3087_v17  ;;  %v31166_v57 = vand.u32 4294901760, %v26755_v6  ;;  %vm30244_vm4 = vcmp.ge.s32.totalorder %v26800_v60, 0 }
 0x1b5   : > { %31160 = vst [vmem:[#allocation306_spill] sm:$0xff] %v26814_v10  ;;  %31161 = vst [vmem:[#allocation307_spill] sm:$0xff] %v26816_v14  ;;  %21979 = vmatprep.mubr.f32.mxu0 %v31162_v15  ;;  %v839_v16 = vsel %vm30373_vm5, %v26826_v2, 0.0  ;;  %v2863_v38 = vsel %vm951_vm2, %v24742_v54, 0  ;;  %v26840_v23 = vadd.s32 4294967295, %v427_v52  ;;  %v441_v62 = vand.u32 15, %v237_v42 }
 0x1b6   : > { %31163 = vst [vmem:[#allocation308_spill] sm:$0xff] %v26820_v29  ;;  %31164 = vst [vmem:[#allocation309_spill] sm:$0xff] %v26822_v33  ;;  %v3107_v15 = vsub.f32 %v26755_v6, %v31166_v57  ;;  %v239_v17 = vadd.s32 240, %v31068_v32  ;;  %v26847_v56 = vsub.f32 %v2854_v44, %v26816_v14  ;;  %v2866_v6 = vsel %vm951_vm2, %v839_v16, 0  ;;  %v31170_v54 = vld [vmem:[#allocation200_spill] sm:$0xff]  ;;  %v24744_v57 = vld [vmem:[%s24839_s21 + $0xb8] sm:$0xff] }
 0x1b7   : > { %31165 = vst [vmem:[#allocation310_spill] sm:$0xff] %v26826_v2  ;;  %20627 = vmatmul.mubr.f32.gmra.mrb[8].mxu1 %v26803_v27  ;;  %31167 = vst [vmem:[#allocation311_spill] sm:$0xff] %v26840_v23  ;;  %v31168_v2 = vand.u32 4294901760, %v31066_v41  ;;  %v26849_v27 = vand.u32 4294901760, %v2860_v30  ;;  %v3117_v52 = vsub.f32 %v26779_v51, %v26811_v26  ;;  %v26856_v32 = vand.u32 4294901760, %v26820_v29 }
 0x1b8   : > { %20629 = vmatprep.mubr.f32.mxu1 %v3068_v22  ;;  %v26859_v41 = vsub.f32 %v2857_v20, %v26822_v33  ;;  %v26862_v22 = vld [vmem:[%s24839_s21 + $0xc0] sm:$0xff]  ;;  %v26867_v42 = vand.u32 4294901760, %v3097_v35  ;;  %v26869_v16 = vand.u32 4294901760, %v2863_v38  ;;  %v26874_v26 = vand.u32 4294901760, %v2866_v6 }
 0x1b9   : > { %21980 = vmatmul.mubr.f32.gmra.mrb[10].mxu0 %v31168_v2  ;;  %31169 = vst [vmem:[#allocation312_spill] sm:$0xff] %v26849_v27  ;;  %31171 = vst [vmem:[#allocation313_spill] sm:$0xff] %v26856_v32  ;;  %v841_v44 = vsel %vm30244_vm4, %v26862_v22, 0.0  ;;  %v3108_v2 = vand.u32 4294901760, %v3107_v15  ;;  %vm30256_vm3 = vcmp.ge.s32.totalorder %v26840_v23, 0  ;;  %v26877_v20 = vadd.s32 4294967295, %v441_v62 }
 0x1ba   : > { %21982 = vmatprep.mubr.f32.mxu0 %v31170_v54  ;;  %31172 = vst [vmem:[#allocation314_spill] sm:$0xff] %v26859_v41  ;;  %31173 = vst [vmem:[#allocation315_spill] sm:$0xff] %v26862_v22  ;;  %v2869_v54 = vsel %vm951_vm2, %v24744_v57, 0  ;;  %v455_v60 = vand.u32 15, %v239_v17  ;;  %v31178_v35 = vand.u32 4294901760, %v31069_v28  ;;  %v31179_v15 = vand.u32 4294901760, %v26814_v10 }
 0x1bb   : > { %31174 = vst [vmem:[#allocation316_spill] sm:$0xff] %v26867_v42  ;;  %31175 = vst [vmem:[#allocation317_spill] sm:$0xff] %v26869_v16  ;;  %20630 = vmatmul.mubr.f32.gmra.mrb[10].mxu1 %v26808_v12  ;;  %v26886_v12 = vsub.f32 %v2860_v30, %v26849_v27  ;;  %v2872_v51 = vsel %vm951_vm2, %v841_v44, 0  ;;  %v26890_v62 = vand.u32 4294901760, %v3117_v52  ;;  %v3137_v28 = vsub.f32 %v26820_v29, %v26856_v32  ;;  %v26905_v57 = vld [vmem:[%s24839_s21 + $0xd0] sm:$0xff]  ;;  %v31191_v29 = vld [vmem:[#allocation206_spill] sm:$0xff] }
 0x1bc   : > { %31176 = vst [vmem:[#allocation318_spill] sm:$0xff] %v26874_v26  ;;  %31177 = vst [vmem:[#allocation319_spill] sm:$0xff] %v26877_v20  ;;  %20632 = vmatprep.mubr.f32.mxu1 %v3088_v59  ;;  %v3127_v22 = vsub.f32 %v26814_v10, %v31179_v15  ;;  %v26895_v59 = vand.u32 4294901760, %v26859_v41  ;;  %v26898_v17 = vsub.f32 %v2863_v38, %v26869_v16  ;;  %v24745_v15 = vld [vmem:[%s24839_s21 + $0xc8] sm:$0xff]  ;;  %v843_v52 = vsel %vm30256_vm3, %v26905_v57, 0.0 }
 0x1bd   : > { %21983 = vmatmul.mubr.f32.gmra.mrb[12].mxu0 %v31178_v35  ;;  %31180 = vst [vmem:[#allocation320_spill] sm:$0xff] %v26886_v12  ;;  %31182 = vst [vmem:[#allocation321_spill] sm:$0xff] %v26890_v62  ;;  %v26900_v35 = vand.u32 4294901760, %v2869_v54  ;;  %v2875_v30 = vsel %vm951_vm2, %v24745_v15, 0  ;;  %v26912_v44 = vsub.f32 %v2866_v6, %v26874_v26  ;;  %vm30434_vm4 = vcmp.ge.s32.totalorder %v26877_v20, 0 }
 0x1be   : > { %21985 = vmatprep.mubr.f32.mxu0 %v31181_v0  ;;  %31183 = vst [vmem:[#allocation322_spill] sm:$0xff] %v26895_v59  ;;  %31184 = vst [vmem:[#allocation323_spill] sm:$0xff] %v26898_v17  ;;  %v26914_v0 = vand.u32 4294901760, %v2872_v51  ;;  %v26917_v38 = vadd.s32 4294967295, %v455_v60  ;;  %v31189_v15 = vand.u32 4294901760, %v31072_v31  ;;  %v3128_v32 = vand.u32 4294901760, %v3127_v22 }
 0x1bf   : > { %31185 = vst [vmem:[#allocation324_spill] sm:$0xff] %v26900_v35  ;;  %31186 = vst [vmem:[#allocation325_spill] sm:$0xff] %v26905_v57  ;;  %20633 = vmatmul.mubr.f32.gmra.mrb[12].mxu1 %v26867_v42  ;;  %v31190_v23 = vand.u32 4294901760, %v26847_v56  ;;  %v26926_v6 = vand.u32 4294901760, %v3137_v28  ;;  %v2878_v10 = vsel %vm951_vm2, %v843_v52, 0  ;;  %v26930_v60 = vand.u32 4294901760, %v26898_v17 }
 0x1c0   : > { %31187 = vst [vmem:[#allocation326_spill] sm:$0xff] %v26914_v0  ;;  %31188 = vst [vmem:[#allocation327_spill] sm:$0xff] %v26917_v38  ;;  %20635 = vmatprep.mubr.f32.mxu1 %v3108_v2  ;;  %v26933_v31 = vsub.f32 %v2869_v54, %v26900_v35  ;;  %v26935_v22 = vand.u32 4294901760, %v2875_v30  ;;  %v26938_v2 = vld [vmem:[%s24839_s21 + $0xe0] sm:$0xff]  ;;  %v3157_v28 = vsub.f32 %v26859_v41, %v26895_v59  ;;  %vm30431_vm3 = vcmp.ge.s32.totalorder %v26917_v38, 0  ;;  %v24748_v59 = vld [vmem:[%s24839_s21 + $0xd8] sm:$0xff] }
 0x1c1   : > { %21986 = vmatmul.mubr.f32.gmra.mrb[14].mxu0 %v31189_v15  ;;  %v3147_v57 = vsub.f32 %v26847_v56, %v31190_v23  ;;  %31192 = vst [vmem:[#allocation328_spill] sm:$0xff] %v26926_v6  ;;  %31193 = vst [vmem:[#allocation329_spill] sm:$0xff] %v26930_v60  ;;  %v845_v23 = vsel %vm30434_vm4, %v26938_v2, 0.0  ;;  %v26948_v15 = vsub.f32 %v2872_v51, %v26914_v0  ;;  %v31197_v54 = vand.u32 4294901760, %v31075_v5  ;;  %v31200_v52 = vld [vmem:[#allocation216_spill] sm:$0xff] }
 0x1c2   : > { %21988 = vmatprep.mubr.f32.mxu0 %v31191_v29  ;;  %31194 = vst [vmem:[#allocation330_spill] sm:$0xff] %v26933_v31  ;;  %31195 = vst [vmem:[#allocation331_spill] sm:$0xff] %v26935_v22  ;;  %v31198_v29 = vand.u32 4294901760, %v26886_v12  ;;  %v2884_v51 = vsel %vm951_vm2, %v845_v23, 0  ;;  %v3177_v5 = vsub.f32 %v26898_v17, %v26930_v60  ;;  %v31205_v23 = vand.u32 4294901760, %v26912_v44  ;;  %v31209_v41 = vld [vmem:[#allocation224_spill] sm:$0xff] }
 0x1c3   : > { %31196 = vst [vmem:[#allocation332_spill] sm:$0xff] %v26938_v2  ;;  %20636 = vmatmul.mubr.f32.gmra.mrb[14].mxu1 %v26890_v62  ;;  %v3148_v42 = vand.u32 4294901760, %v3147_v57  ;;  %v26956_v62 = vand.u32 4294901760, %v2878_v10  ;;  %v2881_v2 = vsel %vm951_vm2, %v24748_v59, 0  ;;  %v26968_v57 = vsub.f32 %v2875_v30, %v26935_v22 }
 0x1c4   : > { %20638 = vmatprep.mubr.f32.mxu1 %v3128_v32  ;;  %v3167_v20 = vsub.f32 %v26886_v12, %v31198_v29  ;;  %v26965_v32 = vand.u32 4294901760, %v26933_v31  ;;  %v26971_v29 = vld [vmem:[%s24839_s21 + $0xf0] sm:$0xff]  ;;  %v26983_v17 = vand.u32 4294901760, %v2881_v2  ;;  %v31207_v30 = vand.u32 4294901760, %v26121_v55 }
 0x1c5   : > { %21989 = vmatmul.mubr.f32.gmra.mrb[16].mxu0 %v31197_v54  ;;  %31199 = vst [vmem:[#allocation333_spill] sm:$0xff] %v26956_v62  ;;  %31202 = vst [vmem:[#allocation335_spill] sm:$0xff] %v26968_v57  ;;  %v847_v59 = vsel %vm30431_vm3, %v26971_v29, 0.0  ;;  %v26977_v54 = vand.u32 4294901760, %v3157_v28  ;;  %v26988_v38 = vsub.f32 %v2878_v10, %v26956_v62  ;;  %v24750_v28 = vld [vmem:[%s24839_s21 + $0xe8] sm:$0xff]  ;;  %v26996_v60 = vand.u32 4294901760, %v3177_v5 }
 0x1c6   : > { %21991 = vmatprep.mubr.f32.mxu0 %v31200_v52  ;;  %31201 = vst [vmem:[#allocation334_spill] sm:$0xff] %v26965_v32  ;;  %31203 = vst [vmem:[#allocation336_spill] sm:$0xff] %v26971_v29  ;;  %v3187_v52 = vsub.f32 %v26912_v44, %v31205_v23  ;;  %v3168_v12 = vand.u32 4294901760, %v3167_v20  ;;  %v26990_v29 = vand.u32 4294901760, %v2884_v51  ;;  %v2890_v23 = vsel %vm951_vm2, %v847_v59, 0 }
 0x1c7   : > { %20639 = vmatmul.mubr.f32.gmra.mrb[16].mxu1 %v26926_v6  ;;  %31204 = vst [vmem:[#allocation337_spill] sm:$0xff] %v26977_v54  ;;  %31206 = vst [vmem:[#allocation338_spill] sm:$0xff] %v26983_v17  ;;  %v2887_v6 = vsel %vm951_vm2, %v24750_v28, 0  ;;  %v3197_v55 = vsub.f32 %v26933_v31, %v26965_v32  ;;  %v31212_v20 = vand.u32 4294901760, %v26948_v15  ;;  %v27008_v28 = vsub.f32 %v2881_v2, %v26983_v17 }
 0x1c8   : > { %20641 = vmatprep.mubr.f32.mxu1 %v3148_v42  ;;  %31208 = vst [vmem:[#allocation339_spill] sm:$0xff] %v26990_v29  ;;  %31210 = vst [vmem:[#allocation340_spill] sm:$0xff] %v26996_v60  ;;  %v27001_v42 = vand.u32 4294901760, %v26968_v57  ;;  %v3188_v10 = vand.u32 4294901760, %v3187_v52  ;;  %v31215_v5 = vand.u32 4294901760, %v26128_v39  ;;  %v27016_v32 = vsub.f32 %v2884_v51, %v26990_v29  ;;  %v24751_v52 = vld [vmem:[%s24839_s21 + $0xf8] sm:$0xff] }
 0x1c9   : > { %21992 = vmatmul.mubr.f32.gmra.mrb[18].mxu0 %v31207_v30  ;;  %v3207_v30 = vsub.f32 %v26948_v15, %v31212_v20  ;;  %31213 = vst [vmem:[#allocation342_spill] sm:$0xff] %v27008_v28  ;;  %v2893_v31 = vsel %vm951_vm2, %v24751_v52, 0  ;;  %v31217_v20 = vld [vmem:[#allocation226_spill] sm:$0xff]  ;;  %v27023_v2 = vand.u32 4294901760, %v3197_v55  ;;  %v31222_v59 = vand.u32 4294901760, %v26166_v3 }
 0x1ca   : > { %21994 = vmatprep.mubr.f32.mxu0 %v31209_v41  ;;  %31211 = vst [vmem:[#allocation341_spill] sm:$0xff] %v27001_v42  ;;  %v27010_v41 = vand.u32 4294901760, %v2887_v6  ;;  %v3217_v39 = vsub.f32 %v26968_v57, %v27001_v42  ;;  %v31223_v55 = vand.u32 4294901760, %v26988_v38  ;;  %v31224_v57 = vld [vmem:[#allocation233_spill] sm:$0xff] }
 0x1cb   : > { %20642 = vmatmul.mubr.f32.gmra.mrb[18].mxu1 %v26977_v54  ;;  %v27018_v54 = vand.u32 4294901760, %v2890_v23  ;;  %31218 = vst [vmem:[#allocation345_spill] sm:$0xff] %v27023_v2  ;;  %v3208_v52 = vand.u32 4294901760, %v3207_v30 }
 0x1cc   : > { %31214 = vst [vmem:[#allocation343_spill] sm:$0xff] %v27010_v41  ;;  %20644 = vmatprep.mubr.f32.mxu1 %v3168_v12  ;;  %v27029_v12 = vand.u32 4294901760, %v27008_v28  ;;  %v27032_v51 = vsub.f32 %v2887_v6, %v27010_v41  ;;  %v27047_v6 = vand.u32 4294901760, %v3217_v39 }
 0x1cd   : > { %21995 = vmatmul.mubr.f32.gmra.mrb[20].mxu0 %v31215_v5  ;;  %31216 = vst [vmem:[#allocation344_spill] sm:$0xff] %v27018_v54  ;;  %v27034_v5 = vand.u32 4294901760, %v2893_v31  ;;  %v27043_v42 = vsub.f32 %v2890_v23, %v27018_v54 }
 0x1ce   : > { %21997 = vmatprep.mubr.f32.mxu0 %v31217_v20  ;;  %31219 = vst [vmem:[#allocation346_spill] sm:$0xff] %v27029_v12  ;;  %31220 = vst [vmem:[#allocation347_spill] sm:$0xff] %v27032_v51  ;;  %v3227_v20 = vsub.f32 %v26988_v38, %v31223_v55  ;;  %v3237_v3 = vsub.f32 %v27008_v28, %v27029_v12 }
 0x1cf   : > { %20645 = vmatmul.mubr.f32.gmra.mrb[20].mxu1 %v26996_v60  ;;  %31221 = vst [vmem:[#allocation348_spill] sm:$0xff] %v27034_v5  ;;  %v30291_v60 = vand.u32 4294901760, %v27016_v32  ;;  %31225 = vst [vmem:[#allocation349_spill] sm:$0xff] %v27047_v6  ;;  %v27055_v30 = vsub.f32 %v2893_v31, %v27034_v5  ;;  %v30294_v39 = vand.u32 4294901760, %v27043_v42 }
 0x1d0   : > { %20647 = vmatprep.mubr.f32.mxu1 %v3188_v10  ;;  %v27052_v10 = vand.u32 4294901760, %v27032_v51  ;;  %v3228_v23 = vand.u32 4294901760, %v3227_v20  ;;  %v27065_v12 = vand.u32 4294901760, %v3237_v3  ;;  %v31232_v20 = vand.u32 4294901760, %v26251_v63 }
 0x1d1   : > { %21998 = vmatmul.mubr.f32.gmra.mrb[22].mxu0 %v31222_v59  ;;  %31227 = vst [vmem:[#allocation351_spill] sm:$0xff] %v27055_v30  ;;  %v31228_v59 = vand.u32 4294901760, %v26223_v1  ;;  %v3247_v55 = vsub.f32 %v27016_v32, %v30291_v60  ;;  %v27070_v1 = vand.u32 4294901760, %v27055_v30  ;;  %v31233_v60 = vld [vmem:[#allocation245_spill] sm:$0xff] }
 0x1d2   : > { %22000 = vmatprep.mubr.f32.mxu0 %v31224_v57  ;;  %31226 = vst [vmem:[#allocation350_spill] sm:$0xff] %v27052_v10  ;;  %v31229_v57 = vld [vmem:[#allocation240_spill] sm:$0xff]  ;;  %31230 = vst [vmem:[#allocation352_spill] sm:$0xff] %v27065_v12  ;;  %v3257_v31 = vsub.f32 %v27032_v51, %v27052_v10  ;;  %v31235_v10 = vand.u32 4294901760, %v26272_v58 }
 0x1d3   : > { %20648 = vmatmul.mubr.f32.gmra.mrb[22].mxu1 %v27023_v2  ;;  %31231 = vst [vmem:[#allocation353_spill] sm:$0xff] %v27070_v1 }
 0x1d4   : > { %20650 = vmatprep.mubr.f32.mxu1 %v3208_v52  ;;  %v3248_v52 = vand.u32 4294901760, %v3247_v55  ;;  %v27079_v3 = vand.u32 4294901760, %v3257_v31 }
 0x1d5   : > { %22001 = vmatmul.mubr.f32.gmra.mrb[24].mxu0 %v31228_v59  ;;  %v3267_v59 = vsub.f32 %v27043_v42, %v30294_v39  ;;  %v31248_v39 = vld [vmem:[#allocation186_spill] sm:$0xff] }
 0x1d6   : > { %22003 = vmatprep.mubr.f32.mxu0 %v31229_v57  ;;  %31234 = vst [vmem:[#allocation354_spill] sm:$0xff] %v27079_v3  ;;  %v3277_v57 = vsub.f32 %v27055_v30, %v27070_v1 }
 0x1d7   : > { %20651 = vmatmul.mubr.f32.gmra.mrb[24].mxu1 %v27047_v6  ;;  %v3268_v63 = vand.u32 4294901760, %v3267_v59  ;;  %v31244_v59 = vld [vmem:[#allocation257_spill] sm:$0xff] }
 0x1d8   : > { %20653 = vmatprep.mubr.f32.mxu1 %v3228_v23  ;;  %v18523_v23 = vld [vmem:[%s29579_s1 + $0x18] sm:$0x7]  ;;  %v27090_v55 = vand.u32 4294901760, %v3277_v57  ;;  %v31240_v57 = vld [vmem:[#allocation255_spill] sm:$0xff] }
 0x1d9   : > { %22004 = vmatmul.mubr.f32.gmra.mrb[26].mxu0 %v31232_v20  ;;  %v12762_v31 = vsel %vm1016_vm0, %v18523_v23, 0  ;;  %v31237_v20 = vand.u32 4294901760, %v26294_v53  ;;  %v31238_v53 = vld [vmem:[#allocation253_spill] sm:$0xff]  ;;  %v31246_v23 = vld [vmem:[#allocation184_spill] sm:$0xff] }
 0x1da   : > { %22006 = vmatprep.mubr.f32.mxu0 %v31233_v60  ;;  %31236 = vst [vmem:[#allocation355_spill] sm:$0xff] %v27090_v55  ;;  %v27096_v58 = vand.u32 4294901760, %v12762_v31  ;;  %v31250_v60 = vld [vmem:[#allocation191_spill] sm:$0xff] }
 0x1db   : > { %20654 = vmatmul.mubr.f32.gmra.mrb[26].mxu1 %v27065_v12 }
 0x1dc   : > { %20656 = vmatprep.mubr.f32.mxu1 %v3248_v52  ;;  %v31243_v52 = vld [vmem:[#allocation179_spill] sm:$0xff] }
 0x1dd   : > { %22007 = vmatmul.mubr.f32.gmra.mrb[28].mxu0 %v31235_v10  ;;  %v31241_v10 = vld [vmem:[#allocation178_spill] sm:$0xff] }
 0x1de   : > { %22009 = vmatprep.mubr.f32.mxu0 %v26302_v49  ;;  %v31249_v49 = vld [vmem:[#allocation190_spill] sm:$0xff] }
 0x1df   : > { %20657 = vmatmul.mubr.f32.gmra.mrb[28].mxu1 %v27079_v3 }
 0x1e0   : > { %20659 = vmatprep.mubr.f32.mxu1 %v3268_v63  ;;  %v31245_v63 = vld [vmem:[#allocation181_spill] sm:$0xff] }
 0x1e1   : > { %22010 = vmatmul.mubr.f32.gmra.mrb[30].mxu0 %v31237_v20  ;;  %v31247_v20 = vld [vmem:[#allocation189_spill] sm:$0xff] }
 0x1e2   : > { %22014 = vmatprep.mubr.f32.mxu0 %v25642_v50 }
 0x1e3   : > { %20660 = vmatmul.mubr.f32.gmra.mrb[30].mxu1 %v27090_v55 }
 0x1e4   : > { %20664 = vmatprep.mubr.f32.mxu1 %v26479_v11 }
 0x1e5   : > { %22015 = vmatmul.mubr.f32.vlgmr.msra.gmra.mrb[0].mxu0 %v25711_v47 }
 0x1e6   : > { %22017 = vmatprep.mubr.f32.mxu0 %v25665_v40  ;;  %22063 = vmatpush3.msra.mxu0 %v25513_v61  ;;  %v31239_v61 = vld [vmem:[#allocation53_spill] sm:$0xff] }
 0x1e7   : > { %22112 = vmatprep.subr.mxu0 %v27096_v58  ;;  %20665 = vmatmul.mubr.f32.vlgmr.msra.gmra.mrb[0].mxu1 %v26488_v7 }
 0x1e8   : > { %20713 = vmatpush3.msra.mxu1 %v26396_v9  ;;  %20667 = vmatprep.mubr.f32.mxu1 %v26500_v8  ;;  %v31242_v9 = vld [vmem:[#allocation262_spill] sm:$0xff] }
 0x1e9   : > { %22018 = vmatmul.mubr.f32.gmra.mrb[2].mxu0 %v25716_v21  ;;  %20762 = vmatprep.subr.mxu1 %v26338_v37 }
 0x1ea   : > { %22020 = vmatprep.mubr.f32.mxu0 %v25678_v25 }
 0x1eb   : > { %20668 = vmatmul.mubr.f32.gmra.mrb[2].mxu1 %v26513_v4 }
 0x1ec   : > { %20670 = vmatprep.mubr.f32.mxu1 %v31238_v53  ;;  %v31255_v53 = vld [vmem:[#allocation300_spill] sm:$0xff] }
 0x1ed   : > { %22021 = vmatmul.mubr.f32.gmra.mrb[4].mxu0 %v25747_v48 }
 0x1ee   : > { %22023 = vmatprep.mubr.f32.mxu0 %v31239_v61 }
 0x1ef   : > { %20671 = vmatmul.mubr.f32.gmra.mrb[4].mxu1 %v31240_v57 }
 0x1f0   : > { %20673 = vmatprep.mubr.f32.mxu1 %v31242_v9  ;;  %v31252_v9 = vld [vmem:[#allocation201_spill] sm:$0xff] }
 0x1f1   : > { %22024 = vmatmul.mubr.f32.gmra.mrb[6].mxu0 %v31241_v10 }
 0x1f2   : > { %22026 = vmatprep.mubr.f32.mxu0 %v31243_v52 }
 0x1f3   : > { %20674 = vmatmul.mubr.f32.gmra.mrb[6].mxu1 %v31244_v59 }
 0x1f4   : > { %20676 = vmatprep.mubr.f32.mxu1 %v26636_v45  ;;  %v31251_v45 = vld [vmem:[#allocation203_spill] sm:$0xff] }
 0x1f5   : > { %22027 = vmatmul.mubr.f32.gmra.mrb[8].mxu0 %v31245_v63 }
 0x1f6   : > { %22029 = vmatprep.mubr.f32.mxu0 %v31246_v23 }
 0x1f7   : > { %20677 = vmatmul.mubr.f32.gmra.mrb[8].mxu1 %v26643_v19 }
 0x1f8   : > { %20679 = vmatprep.mubr.f32.mxu1 %v26649_v13  ;;  %v31253_v13 = vld [vmem:[#allocation17_spill] sm:$0xff] }
 0x1f9   : > { %22030 = vmatmul.mubr.f32.gmra.mrb[10].mxu0 %v31247_v20 }
 0x1fa   : > { %22032 = vmatprep.mubr.f32.mxu0 %v31248_v39 }
 0x1fb   : > { %20680 = vmatmul.mubr.f32.gmra.mrb[10].mxu1 %v26651_v18  ;;  %v31254_v18 = vld [vmem:[#allocation209_spill] sm:$0xff] }
 0x1fc   : > { %20682 = vmatprep.mubr.f32.mxu1 %v26681_v36  ;;  %v31256_v36 = vld [vmem:[#allocation214_spill] sm:$0xff] }
 0x1fd   : > { %22033 = vmatmul.mubr.f32.gmra.mrb[12].mxu0 %v31249_v49 }
 0x1fe   : > { %22035 = vmatprep.mubr.f32.mxu0 %v31250_v60 }
 0x1ff   : > { %20683 = vmatmul.mubr.f32.gmra.mrb[12].mxu1 %v26706_v46  ;;  %v31257_v46 = vld [vmem:[#allocation215_spill] sm:$0xff] }
 0x200   : > { %20685 = vmatprep.mubr.f32.mxu1 %v26719_v43  ;;  %v31258_v43 = vld [vmem:[#allocation217_spill] sm:$0xff] }
 0x201   : > { %22036 = vmatmul.mubr.f32.gmra.mrb[14].mxu0 %v31251_v45 }
 0x202   : > { %22038 = vmatprep.mubr.f32.mxu0 %v31252_v9 }
 0x203   : > { %20686 = vmatmul.mubr.f32.gmra.mrb[14].mxu1 %v26745_v34  ;;  %v31259_v34 = vld [vmem:[#allocation218_spill] sm:$0xff] }
 0x204   : > { %20688 = vmatprep.mubr.f32.mxu1 %v26781_v24  ;;  %v31260_v24 = vld [vmem:[#allocation221_spill] sm:$0xff] }
 0x205   : > { %22039 = vmatmul.mubr.f32.gmra.mrb[16].mxu0 %v31253_v13 }
 0x206   : > { %22041 = vmatprep.mubr.f32.mxu0 %v31254_v18 }
 0x207   : > { %20689 = vmatmul.mubr.f32.gmra.mrb[16].mxu1 %v31255_v53  ;;  %v31261_v53 = vld [vmem:[#allocation225_spill] sm:$0xff] }
 0x208   : > { %20691 = vmatprep.mubr.f32.mxu1 %v26816_v14  ;;  %v31262_v14 = vld [vmem:[#allocation229_spill] sm:$0xff] }
 0x209   : > { %22042 = vmatmul.mubr.f32.gmra.mrb[18].mxu0 %v31256_v36 }
 0x20a   : > { %22044 = vmatprep.mubr.f32.mxu0 %v31257_v46 }
 0x20b   : > { %20692 = vmatmul.mubr.f32.gmra.mrb[18].mxu1 %v26822_v33  ;;  %v31263_v33 = vld [vmem:[#allocation231_spill] sm:$0xff] }
 0x20c   : > { %20694 = vmatprep.mubr.f32.mxu1 %v26849_v27  ;;  %v27155_v27 = vsub.f32 %v12762_v31, %v27096_v58 }
 0x20d   : > { %22045 = vmatmul.mubr.f32.gmra.mrb[20].mxu0 %v31258_v43 }
 0x20e   : > { %22047 = vmatprep.mubr.f32.mxu0 %v31259_v34  ;;  %v27162_v19 = vand.u32 4294901760, %v27155_v27 }
 0x20f   : > { %20695 = vmatmul.mubr.f32.gmra.mrb[20].mxu1 %v26869_v16  ;;  %v31264_v16 = vld [vmem:[#allocation234_spill] sm:$0xff] }
 0x210   : > { %20697 = vmatprep.mubr.f32.mxu1 %v26874_v26  ;;  %v31265_v26 = vld [vmem:[#allocation237_spill] sm:$0xff]  ;;  %31266 = vst [vmem:[#allocation178_spill] sm:$0xff] %v27162_v19  ;;  %v13154_v31 = vsub.f32 %v27155_v27, %v27162_v19  ;;  %v31271_v19 = vld [vmem:[#allocation195_spill] sm:$0xff] }
 0x211   : > { %22048 = vmatmul.mubr.f32.gmra.mrb[22].mxu0 %v31260_v24 }
 0x212   : > { %22050 = vmatprep.mubr.f32.mxu0 %v31261_v53 }
 0x213   : > { %20698 = vmatmul.mubr.f32.gmra.mrb[22].mxu1 %v26900_v35  ;;  %v31267_v35 = vld [vmem:[#allocation239_spill] sm:$0xff] }
 0x214   : > { %20700 = vmatprep.mubr.f32.mxu1 %v26914_v0  ;;  %v31268_v0 = vld [vmem:[#allocation242_spill] sm:$0xff] }
 0x215   : > { %22051 = vmatmul.mubr.f32.gmra.mrb[24].mxu0 %v31262_v14 }
 0x216   : > { %22053 = vmatprep.mubr.f32.mxu0 %v31263_v33 }
 0x217   : > { %20701 = vmatmul.mubr.f32.gmra.mrb[24].mxu1 %v26935_v22  ;;  %v31269_v22 = vld [vmem:[#allocation243_spill] sm:$0xff] }
 0x218   : > { %20703 = vmatprep.mubr.f32.mxu1 %v26956_v62  ;;  %v27174_v62 = vand.u32 4294901760, %v13154_v31  ;;  %v31272_v31 = vld [vmem:[#allocation16_spill] sm:$0xff] }
 0x219   : > { %22054 = vmatmul.mubr.f32.gmra.mrb[26].mxu0 %v31264_v16 }
 0x21a   : > { %22056 = vmatprep.mubr.f32.mxu0 %v31265_v26 }
 0x21b   : > { %20704 = vmatmul.mubr.f32.gmra.mrb[26].mxu1 %v26983_v17 }
 0x21c   : > { %20706 = vmatprep.mubr.f32.mxu1 %v26990_v29  ;;  %v31270_v29 = vld [vmem:[#allocation175_spill] sm:$0xff] }
 0x21d   : > { %22057 = vmatmul.mubr.f32.gmra.mrb[28].mxu0 %v31267_v35 }
 0x21e   : > { %22059 = vmatprep.mubr.f32.mxu0 %v31268_v0 }
 0x21f   : > { %20707 = vmatmul.mubr.f32.gmra.mrb[28].mxu1 %v27010_v41 }
 0x220   : > { %20709 = vmatprep.mubr.f32.mxu1 %v27018_v54  ;;  %v31276_v54 = vld [vmem:[#allocation261_spill] sm:$0xff] }
 0x221   : > { %22060 = vmatmul.mubr.f32.gmra.mrb[30].mxu0 %v31269_v22 }
 0x222   : > { %22064 = vmatprep.mubr.f32.mxu0 %v25642_v50  ;;  %v31273_v50 = vld [vmem:[#allocation251_spill] sm:$0xff] }
 0x223   : > { %20710 = vmatmul.mubr.f32.gmra.mrb[30].mxu1 %v27034_v5  ;;  %v31277_v5 = vld [vmem:[#allocation268_spill] sm:$0xff] }
 0x224   : > { %20714 = vmatprep.mubr.f32.mxu1 %v31270_v29 }
 0x225   : > { %22065 = vmatmul.mubr.f32.vlgmr.msra.gmra.mrb[0].mxu0 %v25711_v47  ;;  %v31274_v47 = vld [vmem:[#allocation252_spill] sm:$0xff] }
 0x226   : > { %22067 = vmatprep.mubr.f32.mxu0 %v25665_v40  ;;  %22113 = vmatpush3.msra.mxu0 %v27096_v58  ;;  %v31275_v40 = vld [vmem:[#allocation259_spill] sm:$0xff] }
 0x227   : > { %22162 = vmatprep.subr.mxu0 %v27174_v62  ;;  %20715 = vmatmul.mubr.f32.vlgmr.msra.gmra.mrb[0].mxu1 %v31271_v19 }
 0x228   : > { %20763 = vmatpush3.msra.mxu1 %v26338_v37  ;;  %20717 = vmatprep.mubr.f32.mxu1 %v31272_v31 }
 0x229   : > { %22068 = vmatmul.mubr.f32.gmra.mrb[2].mxu0 %v25716_v21  ;;  %20812 = vmatprep.subr.mxu1 %v31273_v50  ;;  %v31278_v21 = vld [vmem:[#allocation264_spill] sm:$0xff] }
 0x22a   : > { %22070 = vmatprep.mubr.f32.mxu0 %v25678_v25  ;;  %v31279_v25 = vld [vmem:[#allocation276_spill] sm:$0xff] }
 0x22b   : > { %20718 = vmatmul.mubr.f32.gmra.mrb[2].mxu1 %v31274_v47  ;;  %v31281_v47 = vld [vmem:[#allocation280_spill] sm:$0xff] }
 0x22c   : > { %20720 = vmatprep.mubr.f32.mxu1 %v31275_v40 }
 0x22d   : > { %22071 = vmatmul.mubr.f32.gmra.mrb[4].mxu0 %v25747_v48  ;;  %v31280_v48 = vld [vmem:[#allocation278_spill] sm:$0xff] }
 0x22e   : > { %22073 = vmatprep.mubr.f32.mxu0 %v31239_v61  ;;  %v31289_v61 = vld [vmem:[#allocation185_spill] sm:$0xff] }
 0x22f   : > { %20721 = vmatmul.mubr.f32.gmra.mrb[4].mxu1 %v31276_v54 }
 0x230   : > { %20723 = vmatprep.mubr.f32.mxu1 %v31277_v5 }
 0x231   : > { %22074 = vmatmul.mubr.f32.gmra.mrb[6].mxu0 %v31241_v10  ;;  %v31282_v10 = vld [vmem:[#allocation281_spill] sm:$0xff] }
 0x232   : > { %22076 = vmatprep.mubr.f32.mxu0 %v31243_v52  ;;  %v31283_v52 = vld [vmem:[#allocation287_spill] sm:$0xff] }
 0x233   : > { %20724 = vmatmul.mubr.f32.gmra.mrb[6].mxu1 %v31278_v21 }
 0x234   : > { %20726 = vmatprep.mubr.f32.mxu1 %v31279_v25 }
 0x235   : > { %22077 = vmatmul.mubr.f32.gmra.mrb[8].mxu0 %v31245_v63  ;;  %v31284_v63 = vld [vmem:[#allocation292_spill] sm:$0xff] }
 0x236   : > { %22079 = vmatprep.mubr.f32.mxu0 %v31246_v23  ;;  %v31285_v23 = vld [vmem:[#allocation294_spill] sm:$0xff] }
 0x237   : > { %20727 = vmatmul.mubr.f32.gmra.mrb[8].mxu1 %v31280_v48 }
 0x238   : > { %20729 = vmatprep.mubr.f32.mxu1 %v31281_v47 }
 0x239   : > { %22080 = vmatmul.mubr.f32.gmra.mrb[10].mxu0 %v31247_v20  ;;  %v31286_v20 = vld [vmem:[#allocation298_spill] sm:$0xff] }
 0x23a   : > { %22082 = vmatprep.mubr.f32.mxu0 %v31248_v39  ;;  %v31287_v39 = vld [vmem:[#allocation306_spill] sm:$0xff] }
 0x23b   : > { %20730 = vmatmul.mubr.f32.gmra.mrb[10].mxu1 %v31282_v10  ;;  %v31293_v10 = vld [vmem:[#allocation314_spill] sm:$0xff] }
 0x23c   : > { %20732 = vmatprep.mubr.f32.mxu1 %v31283_v52 }
 0x23d   : > { %22083 = vmatmul.mubr.f32.gmra.mrb[12].mxu0 %v31249_v49  ;;  %v31288_v49 = vld [vmem:[#allocation308_spill] sm:$0xff] }
 0x23e   : > { %22085 = vmatprep.mubr.f32.mxu0 %v31250_v60  ;;  %v31295_v60 = vld [vmem:[#allocation260_spill] sm:$0xff] }
 0x23f   : > { %20733 = vmatmul.mubr.f32.gmra.mrb[12].mxu1 %v31284_v63  ;;  %v12631_v63 = vsel %vm657_vm15, %v31289_v61, 0.0 }
 0x240   : > { %20735 = vmatprep.mubr.f32.mxu1 %v31285_v23 }
 0x241   : > { %22086 = vmatmul.mubr.f32.gmra.mrb[14].mxu0 %v31251_v45  ;;  %v12666_v45 = vsel %vm951_vm2, %v12631_v63, 0  ;;  %v12635_v63 = vsel %vm661_vm14, %v31295_v60, 0.0 }
 0x242   : > { %22088 = vmatprep.mubr.f32.mxu0 %v31252_v9  ;;  %v31291_v9 = vld [vmem:[#allocation254_spill] sm:$0xff]  ;;  %v27231_v61 = vand.u32 4294901760, %v12666_v45 }
 0x243   : > { %20736 = vmatmul.mubr.f32.gmra.mrb[14].mxu1 %v31286_v20  ;;  %v12633_v20 = vsel %vm659_vm1, %v31291_v9, 0.0 }
 0x244   : > { %20738 = vmatprep.mubr.f32.mxu1 %v31287_v39 }
 0x245   : > { %22089 = vmatmul.mubr.f32.gmra.mrb[16].mxu0 %v31253_v13  ;;  %v12678_v13 = vsel %vm951_vm2, %v12635_v63, 0 }
 0x246   : > { %22091 = vmatprep.mubr.f32.mxu0 %v31254_v18  ;;  %v31294_v18 = vld [vmem:[#allocation320_spill] sm:$0xff] }
 0x247   : > { %20739 = vmatmul.mubr.f32.gmra.mrb[16].mxu1 %v31288_v49  ;;  %v31297_v49 = vld [vmem:[#allocation323_spill] sm:$0xff] }
 0x248   : > { %20741 = vmatprep.mubr.f32.mxu1 %v26847_v56 }
 0x249   : > { %22092 = vmatmul.mubr.f32.gmra.mrb[18].mxu0 %v31256_v36  ;;  %v12672_v36 = vsel %vm951_vm2, %v12633_v20, 0  ;;  %v31299_v20 = vld [vmem:[#allocation330_spill] sm:$0xff] }
 0x24a   : > { %22094 = vmatprep.mubr.f32.mxu0 %v31257_v46  ;;  %v27240_v9 = vand.u32 4294901760, %v12672_v36 }
 0x24b   : > { %20742 = vmatmul.mubr.f32.gmra.mrb[18].mxu1 %v31293_v10 }
 0x24c   : > { %20744 = vmatprep.mubr.f32.mxu1 %v31294_v18  ;;  %31298 = vst [vmem:[#allocation257_spill] sm:$0xff] %v27240_v9 }
 0x24d   : > { %22095 = vmatmul.mubr.f32.gmra.mrb[20].mxu0 %v31258_v43  ;;  %v27244_v43 = vsub.f32 %v12666_v45, %v27231_v61 }
 0x24e   : > { %22097 = vmatprep.mubr.f32.mxu0 %v31259_v34  ;;  %v31300_v34 = vld [vmem:[#allocation263_spill] sm:$0xff] }
 0x24f   : > { %20745 = vmatmul.mubr.f32.gmra.mrb[20].mxu1 %v31297_v49  ;;  %v12637_v60 = vsel %vm663_vm13, %v31300_v34, 0.0  ;;  %v27256_v49 = vand.u32 4294901760, %v12678_v13  ;;  %v30357_v45 = vand.u32 4294901760, %v27244_v43 }
 0x250   : > { %20747 = vmatprep.mubr.f32.mxu1 %v26912_v44  ;;  %v12684_v63 = vsel %vm951_vm2, %v12637_v60, 0 }
 0x251   : > { %22098 = vmatmul.mubr.f32.gmra.mrb[22].mxu0 %v31260_v24  ;;  %v27254_v24 = vsub.f32 %v12672_v36, %v27240_v9  ;;  %31302 = vst [vmem:[#allocation181_spill] sm:$0xff] %v27256_v49  ;;  %v27269_v36 = vsub.f32 %v12678_v13, %v27256_v49  ;;  %v12833_v60 = vsub.f32 %v27244_v43, %v30357_v45 }
 0x252   : > { %22100 = vmatprep.mubr.f32.mxu0 %v31261_v53  ;;  %v31303_v53 = vld [vmem:[#allocation335_spill] sm:$0xff] }
 0x253   : > { %20748 = vmatmul.mubr.f32.gmra.mrb[22].mxu1 %v31299_v20  ;;  %v31304_v20 = vld [vmem:[#allocation266_spill] sm:$0xff]  ;;  %v30365_v45 = vand.u32 4294901760, %v27269_v36 }
 0x254   : > { %20750 = vmatprep.mubr.f32.mxu1 %v26948_v15  ;;  %v12639_v34 = vsel %vm665_vm12, %v31304_v20, 0.0  ;;  %v31310_v20 = vld [vmem:[#allocation289_spill] sm:$0xff] }
 0x255   : > { %22101 = vmatmul.mubr.f32.gmra.mrb[24].mxu0 %v31262_v14  ;;  %v30361_v14 = vand.u32 4294901760, %v27254_v24  ;;  %v12690_v46 = vsel %vm951_vm2, %v12639_v34, 0  ;;  %v12643_v10 = vsel %vm669_vm10, %v31310_v20, 0.0 }
 0x256   : > { %22103 = vmatprep.mubr.f32.mxu0 %v31263_v33  ;;  %v27275_v33 = vand.u32 4294901760, %v12684_v63  ;;  %v12702_v20 = vsel %vm951_vm2, %v12643_v10, 0 }
 0x257   : > { %20751 = vmatmul.mubr.f32.gmra.mrb[24].mxu1 %v31303_v53  ;;  %v12853_v13 = vsub.f32 %v27254_v24, %v30361_v14 }
 0x258   : > { %20753 = vmatprep.mubr.f32.mxu1 %v26988_v38  ;;  %31306 = vst [vmem:[#allocation189_spill] sm:$0xff] %v27275_v33  ;;  %v27290_v34 = vsub.f32 %v12684_v63, %v27275_v33  ;;  %v12873_v63 = vsub.f32 %v27269_v36, %v30365_v45  ;;  %v31317_v45 = vand.u32 4294901760, %v31270_v29  ;;  %v31321_v29 = vand.u32 4294901760, %v31271_v19 }
 0x259   : > { %22104 = vmatmul.mubr.f32.gmra.mrb[26].mxu0 %v31264_v16  ;;  %v31307_v16 = vld [vmem:[#allocation277_spill] sm:$0xff]  ;;  %v12854_v14 = vand.u32 4294901760, %v12853_v13  ;;  %v31316_v13 = vld [vmem:[#allocation283_spill] sm:$0xff] }
 0x25a   : > { %22106 = vmatprep.mubr.f32.mxu0 %v31265_v26  ;;  %v12641_v53 = vsel %vm667_vm11, %v31307_v16, 0.0  ;;  %v12834_v26 = vand.u32 4294901760, %v12833_v60  ;;  %v27318_v60 = vand.u32 4294901760, %v12702_v20 }
 0x25b   : > { %20754 = vmatmul.mubr.f32.gmra.mrb[26].mxu1 %v27008_v28  ;;  %v27292_v28 = vand.u32 4294901760, %v12690_v46  ;;  %v12696_v16 = vsel %vm951_vm2, %v12641_v53, 0 }
 0x25c   : > { %20756 = vmatprep.mubr.f32.mxu1 %v27016_v32  ;;  %31318 = vst [vmem:[#allocation214_spill] sm:$0xff] %v27318_v60 }
 0x25d   : > { %22107 = vmatmul.mubr.f32.gmra.mrb[28].mxu0 %v31267_v35  ;;  %31309 = vst [vmem:[#allocation190_spill] sm:$0xff] %v27292_v28  ;;  %v27306_v53 = vsub.f32 %v12690_v46, %v27292_v28  ;;  %v31314_v35 = vld [vmem:[#allocation295_spill] sm:$0xff]  ;;  %v31319_v46 = vand.u32 4294901760, %v27290_v34 }
 0x25e   : > { %22109 = vmatprep.mubr.f32.mxu0 %v31268_v0  ;;  %v27308_v0 = vand.u32 4294901760, %v12696_v16 }
 0x25f   : > { %20757 = vmatmul.mubr.f32.gmra.mrb[28].mxu1 %v27032_v51  ;;  %31312 = vst [vmem:[#allocation203_spill] sm:$0xff] %v27306_v53  ;;  %v12893_v10 = vsub.f32 %v27290_v34, %v31319_v46  ;;  %v27338_v46 = vsub.f32 %v12702_v20, %v27318_v60  ;;  %v31327_v19 = vand.u32 4294901760, %v27306_v53  ;;  %v31329_v20 = vld [vmem:[#allocation310_spill] sm:$0xff] }
 0x260   : > { %20759 = vmatprep.mubr.f32.mxu1 %v27043_v42  ;;  %31313 = vst [vmem:[#allocation17_spill] sm:$0xff] %v27308_v0 }
 0x261   : > { %22110 = vmatmul.mubr.f32.gmra.mrb[30].mxu0 %v31269_v22  ;;  %v12645_v22 = vsel %vm671_vm9, %v31314_v35, 0.0  ;;  %v27326_v35 = vsub.f32 %v12696_v16, %v27308_v0  ;;  %v12894_v51 = vand.u32 4294901760, %v12893_v10  ;;  %v31338_v10 = vld [vmem:[#allocation304_spill] sm:$0xff] }
 0x262   : > { %22114 = vmatprep.mubr.f32.mxu0 %v12834_v26  ;;  %v12874_v26 = vand.u32 4294901760, %v12873_v63  ;;  %v31324_v63 = vld [vmem:[#allocation285_spill] sm:$0xff] }
 0x263   : > { %20760 = vmatmul.mubr.f32.gmra.mrb[30].mxu1 %v27055_v30  ;;  %31320 = vst [vmem:[#allocation217_spill] sm:$0xff] %v27326_v35  ;;  %v12649_v30 = vsel %vm675_vm7, %v31329_v20, 0.0 }
 0x264   : > { %20764 = vmatprep.mubr.f32.mxu1 %v31317_v45  ;;  %v31322_v45 = vld [vmem:[#allocation301_spill] sm:$0xff]  ;;  %v12720_v20 = vsel %vm951_vm2, %v12649_v30, 0 }
 0x265   : > { %22115 = vmatmul.mubr.f32.vlgmr.msra.gmra.mrb[0].mxu0 %v31316_v13  ;;  %v12708_v13 = vsel %vm951_vm2, %v12645_v22, 0  ;;  %v31326_v22 = vand.u32 4294901760, %v31272_v31  ;;  %v31331_v31 = vld [vmem:[#allocation303_spill] sm:$0xff] }
 0x266   : > { %22117 = vmatprep.mubr.f32.mxu0 %v12854_v14  ;;  %22163 = vmatpush3.msra.mxu0 %v27174_v62  ;;  %v12647_v62 = vsel %vm673_vm8, %v31322_v45, 0.0  ;;  %v27340_v16 = vand.u32 4294901760, %v12708_v13  ;;  %v30368_v45 = vand.u32 4294901760, %v27326_v35  ;;  %v31335_v14 = vld [vmem:[#allocation267_spill] sm:$0xff] }
 0x267   : > { %22212 = vmatprep.subr.mxu0 %v27155_v27  ;;  %20765 = vmatmul.mubr.f32.vlgmr.msra.gmra.mrb[0].mxu1 %v31321_v29  ;;  %v12913_v29 = vsub.f32 %v27306_v53, %v31327_v19  ;;  %v31346_v53 = vld [vmem:[#allocation316_spill] sm:$0xff] }
 0x268   : > { %20813 = vmatpush3.msra.mxu1 %v31273_v50  ;;  %31325 = vst [vmem:[#allocation221_spill] sm:$0xff] %v27340_v16  ;;  %20767 = vmatprep.mubr.f32.mxu1 %v31326_v22  ;;  %v12714_v50 = vsel %vm951_vm2, %v12647_v62, 0  ;;  %v27359_v22 = vsub.f32 %v12708_v13, %v27340_v16  ;;  %v12933_v19 = vsub.f32 %v27326_v35, %v30368_v45  ;;  %v31339_v13 = vand.u32 4294901760, %v31277_v5 }
 0x269   : > { %22118 = vmatmul.mubr.f32.gmra.mrb[2].mxu0 %v31324_v63  ;;  %20862 = vmatprep.subr.mxu1 %v26338_v37  ;;  %v31328_v63 = vld [vmem:[#allocation258_spill] sm:$0xff]  ;;  %v12914_v62 = vand.u32 4294901760, %v12913_v29 }
 0x26a   : > { %22120 = vmatprep.mubr.f32.mxu0 %v12874_v26  ;;  %v31332_v26 = vand.u32 4294901760, %v31275_v40  ;;  %31333 = vst [vmem:[#allocation229_spill] sm:$0xff] %v27359_v22  ;;  %v30374_v45 = vand.u32 4294901760, %v27359_v22  ;;  %v12934_v35 = vand.u32 4294901760, %v12933_v19  ;;  %v31343_v40 = vld [vmem:[#allocation325_spill] sm:$0xff] }
 0x26b   : > { %20768 = vmatmul.mubr.f32.gmra.mrb[2].mxu1 %v31328_v63  ;;  %v27364_v63 = vand.u32 4294901760, %v12714_v50  ;;  %v12653_v5 = vsel %vm30373_vm5, %v31343_v40, 0.0 }
 0x26c   : > { %20770 = vmatprep.mubr.f32.mxu1 %v31332_v26  ;;  %v12732_v40 = vsel %vm951_vm2, %v12653_v5, 0 }
 0x26d   : > { %22121 = vmatmul.mubr.f32.gmra.mrb[4].mxu0 %v31331_v31  ;;  %31334 = vst [vmem:[#allocation234_spill] sm:$0xff] %v27364_v63  ;;  %v31336_v31 = vld [vmem:[#allocation315_spill] sm:$0xff]  ;;  %v27379_v30 = vsub.f32 %v12714_v50, %v27364_v63  ;;  %v12973_v50 = vsub.f32 %v27359_v22, %v30374_v45  ;;  %v31355_v45 = vand.u32 4294901760, %v31281_v47  ;;  %v27408_v19 = vand.u32 4294901760, %v12732_v40  ;;  %v31360_v47 = vld [vmem:[#allocation336_spill] sm:$0xff] }
 0x26e   : > { %22123 = vmatprep.mubr.f32.mxu0 %v12894_v51  ;;  %v12651_v26 = vsel %vm677_vm6, %v31336_v31, 0.0  ;;  %v31340_v51 = vand.u32 4294901760, %v27338_v46 }
 0x26f   : > { %20771 = vmatmul.mubr.f32.gmra.mrb[4].mxu1 %v31335_v14  ;;  %31341 = vst [vmem:[#allocation239_spill] sm:$0xff] %v27379_v30  ;;  %v27381_v14 = vand.u32 4294901760, %v12720_v20  ;;  %v12726_v31 = vsel %vm951_vm2, %v12651_v26, 0  ;;  %31356 = vst [vmem:[#allocation16_spill] sm:$0xff] %v27408_v19 }
 0x270   : > { %20773 = vmatprep.mubr.f32.mxu1 %v31339_v13  ;;  %v12953_v29 = vsub.f32 %v27338_v46, %v31340_v51  ;;  %v31345_v13 = vld [vmem:[#allocation270_spill] sm:$0xff]  ;;  %v31347_v51 = vand.u32 4294901760, %v31279_v25 }
 0x271   : > { %22124 = vmatmul.mubr.f32.gmra.mrb[6].mxu0 %v31338_v10  ;;  %31342 = vst [vmem:[#allocation243_spill] sm:$0xff] %v27381_v14  ;;  %v27396_v26 = vsub.f32 %v12720_v20, %v27381_v14  ;;  %v27398_v10 = vand.u32 4294901760, %v12726_v31  ;;  %v31357_v20 = vand.u32 4294901760, %v27379_v30 }
 0x272   : > { %22126 = vmatprep.mubr.f32.mxu0 %v12914_v62  ;;  %v12954_v62 = vand.u32 4294901760, %v12953_v29  ;;  %v31354_v29 = vld [vmem:[#allocation321_spill] sm:$0xff] }
 0x273   : > { %20774 = vmatmul.mubr.f32.gmra.mrb[6].mxu1 %v31345_v13  ;;  %31348 = vst [vmem:[#allocation175_spill] sm:$0xff] %v27396_v26  ;;  %31349 = vst [vmem:[#allocation195_spill] sm:$0xff] %v27398_v10  ;;  %v31350_v13 = vld [vmem:[#allocation332_spill] sm:$0xff]  ;;  %v12993_v22 = vsub.f32 %v27379_v30, %v31357_v20  ;;  %v27426_v20 = vsub.f32 %v12732_v40, %v27408_v19  ;;  %v31370_v30 = vld [vmem:[#allocation337_spill] sm:$0xff] }
 0x274   : > { %20776 = vmatprep.mubr.f32.mxu1 %v31347_v51  ;;  %v31353_v51 = vld [vmem:[#allocation286_spill] sm:$0xff] }
 0x275   : > { %22127 = vmatmul.mubr.f32.gmra.mrb[8].mxu0 %v31346_v53  ;;  %v31351_v53 = vld [vmem:[#allocation302_spill] sm:$0xff]  ;;  %31365 = vst [vmem:[#allocation259_spill] sm:$0xff] %v27426_v20 }
 0x276   : > { %22129 = vmatprep.mubr.f32.mxu0 %v12934_v35  ;;  %vm31352_vm5 = vcmp.ge.s32.totalorder %v31351_v53, 0  ;;  %v12974_v35 = vand.u32 4294901760, %v12973_v50 }
 0x277   : > { %v12655_v25 = vsel %vm31352_vm5, %v31350_v13, 0.0  ;;  %20777 = vmatmul.mubr.f32.gmra.mrb[8].mxu1 %v31353_v51  ;;  %v27415_v13 = vsub.f32 %v12726_v31, %v27398_v10  ;;  %v31363_v51 = vld [vmem:[#allocation328_spill] sm:$0xff]  ;;  %v12994_v31 = vand.u32 4294901760, %v12993_v22 }
 0x278   : > { %20779 = vmatprep.mubr.f32.mxu1 %v31355_v45  ;;  %v12738_v53 = vsel %vm951_vm2, %v12655_v25, 0  ;;  %v31361_v45 = vld [vmem:[#allocation311_spill] sm:$0xff]  ;;  %v31367_v25 = vand.u32 4294901760, %v27396_v26 }
 0x279   : > { %22130 = vmatmul.mubr.f32.gmra.mrb[10].mxu0 %v31354_v29  ;;  %31358 = vst [vmem:[#allocation251_spill] sm:$0xff] %v27415_v13  ;;  %v31359_v29 = vld [vmem:[#allocation290_spill] sm:$0xff]  ;;  %vm31362_vm5 = vcmp.ge.s32.totalorder %v31361_v45, 0  ;;  %v27428_v5 = vand.u32 4294901760, %v12738_v53 }
 0x27a   : > { %22132 = vmatprep.mubr.f32.mxu0 %v12954_v62  ;;  %v12657_v50 = vsel %vm31362_vm5, %v31360_v47, 0.0  ;;  %v31364_v62 = vand.u32 4294901760, %v31283_v52  ;;  %v24752_v52 = vld [vmem:[%s24839_s21 + $0x100] sm:$0xff]  ;;  %vm31439_vm5 = vcmask 1045504  }
 0x27b   : > { %20780 = vmatmul.mubr.f32.gmra.mrb[10].mxu1 %v31359_v29  ;;  %31366 = vst [vmem:[#allocation268_spill] sm:$0xff] %v27428_v5  ;;  %v13013_v29 = vsub.f32 %v27396_v26, %v31367_v25  ;;  %v12744_v47 = vsel %vm951_vm2, %v12657_v50, 0  ;;  %v12659_v40 = vsel %vm30434_vm4, %v24752_v52, 0.0  ;;  %v27444_v25 = vsub.f32 %v12738_v53, %v27428_v5  ;;  %v31376_v53 = vld [vmem:[#allocation340_spill] sm:$0xff] }
 0x27c   : > { %20782 = vmatprep.mubr.f32.mxu1 %v31364_v62  ;;  %v31372_v50 = vand.u32 4294901760, %v27415_v13  ;;  %v27449_v26 = vand.u32 4294901760, %v12744_v47  ;;  %v12750_v52 = vsel %vm951_vm2, %v12659_v40, 0 }
 0x27d   : > { %22133 = vmatmul.mubr.f32.gmra.mrb[12].mxu0 %v31363_v51  ;;  %v31368_v51 = vld [vmem:[#allocation297_spill] sm:$0xff]  ;;  %v13014_v45 = vand.u32 4294901760, %v13013_v29  ;;  %v31378_v29 = vand.u32 4294901760, %v27426_v20  ;;  %v30386_v62 = vand.u32 4294901760, %v27444_v25 }
 0x27e   : > { %22135 = vmatprep.mubr.f32.mxu0 %v12974_v35  ;;  %v31371_v35 = vand.u32 4294901760, %v31285_v23  ;;  %31373 = vst [vmem:[#allocation276_spill] sm:$0xff] %v27449_v26  ;;  %v24753_v23 = vld [vmem:[%s24839_s21 + $0x110] sm:$0xff]  ;;  %v27464_v40 = vsub.f32 %v12744_v47, %v27449_v26 }
 0x27f   : > { %20783 = vmatmul.mubr.f32.gmra.mrb[12].mxu1 %v31368_v51  ;;  %v13033_v51 = vsub.f32 %v27415_v13, %v31372_v50  ;;  %v12661_v22 = vsel %vm30431_vm3, %v24753_v23, 0.0  ;;  %v13053_v50 = vsub.f32 %v27426_v20, %v31378_v29  ;;  %v31381_v29 = vand.u32 4294901760, %v26847_v56  ;;  %vm31442_vm3 = vmmov %vm31439_vm5 }
 0x280   : > { %20785 = vmatprep.mubr.f32.mxu1 %v31371_v35  ;;  %v24754_v35 = vld [vmem:[%s24839_s21 + $0x108] sm:$0xff]  ;;  %v31385_v56 = vand.u32 4294901760, %v31294_v18  ;;  %v31389_v18 = vand.u32 4294901760, %v26912_v44  ;;  %v31392_v44 = vand.u32 4294901760, %v26948_v15 }
 0x281   : > { %22136 = vmatmul.mubr.f32.gmra.mrb[14].mxu0 %v31370_v30  ;;  %v31374_v30 = vld [vmem:[#allocation305_spill] sm:$0xff]  ;;  %v13034_v13 = vand.u32 4294901760, %v13033_v51  ;;  %v7039_v23 = vsel %vm951_vm2, %v24754_v35, 0  ;;  %v13073_v51 = vsub.f32 %v27444_v25, %v30386_v62  ;;  %v30388_v35 = vand.u32 4294901760, %v27464_v40 }
 0x282   : > { %22138 = vmatprep.mubr.f32.mxu0 %v12994_v31  ;;  %v31377_v31 = vand.u32 4294901760, %v31287_v39  ;;  %v206_v39 = vld [vmem:[%s24839_s21 + $0x118] sm:$0xff]  ;;  %v27479_v47 = vand.u32 4294901760, %v7039_v23 }
 0x283   : > { %20786 = vmatmul.mubr.f32.gmra.mrb[14].mxu1 %v31374_v30  ;;  %v27466_v30 = vand.u32 4294901760, %v12750_v52 }
 0x284   : > { %20788 = vmatprep.mubr.f32.mxu1 %v31377_v31  ;;  %v31380_v31 = vld [vmem:[#allocation313_spill] sm:$0xff]  ;;  %31382 = vst [vmem:[#allocation287_spill] sm:$0xff] %v27479_v47 }
 0x285   : > { %22139 = vmatmul.mubr.f32.gmra.mrb[16].mxu0 %v31376_v53  ;;  %31379 = vst [vmem:[#allocation280_spill] sm:$0xff] %v27466_v30  ;;  %v12756_v53 = vsel %vm951_vm2, %v12661_v22, 0  ;;  %v27483_v22 = vsub.f32 %v12750_v52, %v27466_v30  ;;  %v13093_v52 = vsub.f32 %v27464_v40, %v30388_v35  ;;  %v31391_v35 = vld [vmem:[#allocation334_spill] sm:$0xff] }
 0x286   : > { %22141 = vmatprep.mubr.f32.mxu0 %v13014_v45  ;;  %v13054_v45 = vand.u32 4294901760, %v13053_v50  ;;  %v27485_v20 = vand.u32 4294901760, %v12756_v53  ;;  %v27493_v50 = vsub.f32 %v7039_v23, %v27479_v47 }
 0x287   : > { %20789 = vmatmul.mubr.f32.gmra.mrb[16].mxu1 %v31380_v31  ;;  %v31384_v31 = vld [vmem:[#allocation322_spill] sm:$0xff] }
 0x288   : > { %20791 = vmatprep.mubr.f32.mxu1 %v31381_v29  ;;  %31383 = vst [vmem:[#allocation294_spill] sm:$0xff] %v27485_v20  ;;  %31386 = vst [vmem:[#allocation306_spill] sm:$0xff] %v27493_v50  ;;  %v13074_v29 = vand.u32 4294901760, %v13073_v51  ;;  %v27502_v62 = vsub.f32 %v12756_v53, %v27485_v20  ;;  %v27509_v23 = vand.u32 4294901760, %v27493_v50  ;;  %v13094_v51 = vand.u32 4294901760, %v13093_v52 }
 0x289   : > { %22142 = vmatmul.mubr.f32.gmra.mrb[18].mxu0 %v27023_v2  ;;  %v12759_v2 = vsel %vm951_vm2, %v206_v39, 0  ;;  %v30389_v39 = vand.u32 4294901760, %v27483_v22 }
 0x28a   : > { %22144 = vmatprep.mubr.f32.mxu0 %v13034_v13  ;;  %v27495_v13 = vand.u32 4294901760, %v12759_v2  ;;  %31390 = vst [vmem:[#allocation254_spill] sm:$0xff] %v27509_v23 }
 0x28b   : > { %20792 = vmatmul.mubr.f32.gmra.mrb[18].mxu1 %v31384_v31  ;;  %v13113_v53 = vsub.f32 %v27483_v22, %v30389_v39  ;;  %v31393_v39 = vld [vmem:[#allocation341_spill] sm:$0xff] }
 0x28c   : > { %20794 = vmatprep.mubr.f32.mxu1 %v31385_v56  ;;  %31387 = vst [vmem:[#allocation185_spill] sm:$0xff] %v27495_v13  ;;  %v30391_v56 = vand.u32 4294901760, %v27502_v62 }
 0x28d   : > { %22145 = vmatmul.mubr.f32.gmra.mrb[20].mxu0 %v27047_v6  ;;  %v31388_v6 = vld [vmem:[#allocation329_spill] sm:$0xff] }
 0x28e   : > { %22147 = vmatprep.mubr.f32.mxu0 %v13054_v45  ;;  %v27512_v45 = vsub.f32 %v12759_v2, %v27495_v13  ;;  %v13133_v52 = vsub.f32 %v27502_v62, %v30391_v56  ;;  %v31397_v56 = vand.u32 4294901760, %v27016_v32 }
 0x28f   : > { %20795 = vmatmul.mubr.f32.gmra.mrb[20].mxu1 %v31388_v6 }
 0x290   : > { %20797 = vmatprep.mubr.f32.mxu1 %v31389_v18  ;;  %v7423_v18 = vsub.f32 %v27493_v50, %v27509_v23  ;;  %v30394_v2 = vand.u32 4294901760, %v27512_v45 }
 0x291   : > { %22148 = vmatmul.mubr.f32.gmra.mrb[22].mxu0 %v27065_v12 }
 0x292   : > { %22150 = vmatprep.mubr.f32.mxu0 %v13074_v29  ;;  %v13114_v29 = vand.u32 4294901760, %v13113_v53  ;;  %v27532_v15 = vand.u32 4294901760, %v7423_v18  ;;  %v31396_v53 = vld [vmem:[#allocation346_spill] sm:$0xff] }
 0x293   : > { %20798 = vmatmul.mubr.f32.gmra.mrb[22].mxu1 %v31391_v35 }
 0x294   : > { %20800 = vmatprep.mubr.f32.mxu1 %v31392_v44  ;;  %31395 = vst [vmem:[#allocation320_spill] sm:$0xff] %v27532_v15  ;;  %v13143_v44 = vsub.f32 %v27512_v45, %v30394_v2  ;;  %v31411_v2 = vld [vmem:[#allocation288_spill] sm:$0xff] }
 0x295   : > { %22151 = vmatmul.mubr.f32.gmra.mrb[24].mxu0 %v27079_v3  ;;  %v31394_v3 = vand.u32 4294901760, %v26988_v38  ;;  %v31399_v38 = vand.u32 4294901760, %v27043_v42  ;;  %v31400_v42 = vld [vmem:[#allocation271_spill] sm:$0xff] }
 0x296   : > { %22153 = vmatprep.mubr.f32.mxu0 %v13094_v51  ;;  %v13134_v51 = vand.u32 4294901760, %v13133_v52  ;;  %v13144_v12 = vand.u32 4294901760, %v13143_v44  ;;  %v31406_v52 = vld [vmem:[#allocation293_spill] sm:$0xff]  ;;  %v31407_v44 = vld [vmem:[#allocation272_spill] sm:$0xff] }
 0x297   : > { %20801 = vmatmul.mubr.f32.gmra.mrb[24].mxu1 %v31393_v39 }
 0x298   : > { %20803 = vmatprep.mubr.f32.mxu1 %v31394_v3  ;;  %v18519_v3 = vld [vmem:[%s29579_s1 + $0x8] sm:$0x7] }
 0x299   : > { %22154 = vmatmul.mubr.f32.gmra.mrb[26].mxu0 %v27090_v55  ;;  %v31398_v55 = vld [vmem:[#allocation350_spill] sm:$0xff]  ;;  %v5098_v18 = vsel %vm1016_vm0, %v18519_v3, 0  ;;  %v31410_v3 = vld [vmem:[#allocation309_spill] sm:$0xff] }
 0x29a   : > { %22156 = vmatprep.mubr.f32.mxu0 %v13114_v29  ;;  %v27554_v32 = vand.u32 4294901760, %v5098_v18  ;;  %v31405_v29 = vld [vmem:[#allocation269_spill] sm:$0xff] }
 0x29b   : > { %20804 = vmatmul.mubr.f32.gmra.mrb[26].mxu1 %v31396_v53 }
 0x29c   : > { %20806 = vmatprep.mubr.f32.mxu1 %v31397_v56  ;;  %v31404_v56 = vld [vmem:[#allocation284_spill] sm:$0xff] }
 0x29d   : > { %22157 = vmatmul.mubr.f32.gmra.mrb[28].mxu0 %v27532_v15  ;;  %v31412_v15 = vld [vmem:[#allocation317_spill] sm:$0xff] }
 0x29e   : > { %22159 = vmatprep.mubr.f32.mxu0 %v13134_v51  ;;  %v31408_v51 = vld [vmem:[#allocation300_spill] sm:$0xff] }
 0x29f   : > { %20807 = vmatmul.mubr.f32.gmra.mrb[28].mxu1 %v31398_v55 }
 0x2a0   : > { %20809 = vmatprep.mubr.f32.mxu1 %v31399_v38  ;;  %v31409_v38 = vld [vmem:[#allocation279_spill] sm:$0xff] }
 0x2a1   : > { %22160 = vmatmul.mubr.f32.gmra.mrb[30].mxu0 %v13144_v12  ;;  %v31402_v12 = vld [vmem:[#allocation273_spill] sm:$0xff] }
 0x2a2   : > { %22164 = vmatprep.mubr.f32.mxu0 %v27231_v61 }
 0x2a3   : > { %20810 = vmatmul.mubr.f32.gmra.mrb[30].mxu1 %v27070_v1 }
 0x2a4   : > { %20814 = vmatprep.mubr.f32.mxu1 %v26479_v11 }
 0x2a5   : > { %22165 = vmatmul.mubr.f32.vlgmr.msra.gmra.mrb[0].mxu0 %v31240_v57 }
 0x2a6   : > { %22167 = vmatprep.mubr.f32.mxu0 %v27240_v9  ;;  %22213 = vmatpush3.msra.mxu0 %v27155_v27  ;;  %v31401_v27 = vld [vmem:[#allocation253_spill] sm:$0xff]  ;;  %v31424_v9 = vld [vmem:[#allocation344_spill] sm:$0xff] }
 0x2a7   : > { %22262 = vmatprep.subr.mxu0 %v27096_v58  ;;  %20815 = vmatmul.mubr.f32.vlgmr.msra.gmra.mrb[0].mxu1 %v26488_v7 }
 0x2a8   : > { %20863 = vmatpush3.msra.mxu1 %v26338_v37  ;;  %20817 = vmatprep.mubr.f32.mxu1 %v26500_v8  ;;  %v31403_v37 = vld [vmem:[#allocation262_spill] sm:$0xff] }
 0x2a9   : > { %22168 = vmatmul.mubr.f32.gmra.mrb[2].mxu0 %v31244_v59  ;;  %20912 = vmatprep.subr.mxu1 %v27554_v32 }
 0x2aa   : > { %22170 = vmatprep.mubr.f32.mxu0 %v27256_v49  ;;  %v27612_v49 = vsub.f32 %v5098_v18, %v27554_v32 }
 0x2ab   : > { %20818 = vmatmul.mubr.f32.gmra.mrb[2].mxu1 %v26513_v4 }
 0x2ac   : > { %20820 = vmatprep.mubr.f32.mxu1 %v31401_v27 }
 0x2ad   : > { %22171 = vmatmul.mubr.f32.gmra.mrb[4].mxu0 %v31400_v42 }
 0x2ae   : > { %22173 = vmatprep.mubr.f32.mxu0 %v27275_v33  ;;  %v31420_v33 = vld [vmem:[#allocation348_spill] sm:$0xff] }
 0x2af   : > { %20821 = vmatmul.mubr.f32.gmra.mrb[4].mxu1 %v31240_v57 }
 0x2b0   : > { %20823 = vmatprep.mubr.f32.mxu1 %v31403_v37 }
 0x2b1   : > { %22174 = vmatmul.mubr.f32.gmra.mrb[6].mxu0 %v31402_v12 }
 0x2b2   : > { %22176 = vmatprep.mubr.f32.mxu0 %v27292_v28  ;;  %v31416_v28 = vld [vmem:[#allocation331_spill] sm:$0xff] }
 0x2b3   : > { %20824 = vmatmul.mubr.f32.gmra.mrb[6].mxu1 %v31244_v59 }
 0x2b4   : > { %20826 = vmatprep.mubr.f32.mxu1 %v31405_v29 }
 0x2b5   : > { %22177 = vmatmul.mubr.f32.gmra.mrb[8].mxu0 %v31404_v56 }
 0x2b6   : > { %22179 = vmatprep.mubr.f32.mxu0 %v27308_v0  ;;  %v31414_v0 = vld [vmem:[#allocation324_spill] sm:$0xff] }
 0x2b7   : > { %20827 = vmatmul.mubr.f32.gmra.mrb[8].mxu1 %v31400_v42 }
 0x2b8   : > { %20829 = vmatprep.mubr.f32.mxu1 %v31407_v44 }
 0x2b9   : > { %22180 = vmatmul.mubr.f32.gmra.mrb[10].mxu0 %v31406_v52 }
 0x2ba   : > { %22182 = vmatprep.mubr.f32.mxu0 %v27318_v60  ;;  %v31413_v60 = vld [vmem:[#allocation299_spill] sm:$0xff] }
 0x2bb   : > { %20830 = vmatmul.mubr.f32.gmra.mrb[10].mxu1 %v31402_v12 }
 0x2bc   : > { %20832 = vmatprep.mubr.f32.mxu1 %v31409_v38 }
 0x2bd   : > { %22183 = vmatmul.mubr.f32.gmra.mrb[12].mxu0 %v31408_v51 }
 0x2be   : > { %22185 = vmatprep.mubr.f32.mxu0 %v27340_v16  ;;  %v31415_v16 = vld [vmem:[#allocation307_spill] sm:$0xff] }
 0x2bf   : > { %20833 = vmatmul.mubr.f32.gmra.mrb[12].mxu1 %v31404_v56 }
 0x2c0   : > { %20835 = vmatprep.mubr.f32.mxu1 %v31411_v2 }
 0x2c1   : > { %22186 = vmatmul.mubr.f32.gmra.mrb[14].mxu0 %v31410_v3 }
 0x2c2   : > { %22188 = vmatprep.mubr.f32.mxu0 %v27364_v63  ;;  %v31417_v63 = vld [vmem:[#allocation312_spill] sm:$0xff] }
 0x2c3   : > { %20836 = vmatmul.mubr.f32.gmra.mrb[14].mxu1 %v31406_v52 }
 0x2c4   : > { %20838 = vmatprep.mubr.f32.mxu1 %v31413_v60 }
 0x2c5   : > { %22189 = vmatmul.mubr.f32.gmra.mrb[16].mxu0 %v31412_v15 }
 0x2c6   : > { %22191 = vmatprep.mubr.f32.mxu0 %v27381_v14  ;;  %v31418_v14 = vld [vmem:[#allocation318_spill] sm:$0xff] }
 0x2c7   : > { %20839 = vmatmul.mubr.f32.gmra.mrb[16].mxu1 %v31408_v51 }
 0x2c8   : > { %20841 = vmatprep.mubr.f32.mxu1 %v31415_v16 }
 0x2c9   : > { %22192 = vmatmul.mubr.f32.gmra.mrb[18].mxu0 %v31414_v0 }
 0x2ca   : > { %22194 = vmatprep.mubr.f32.mxu0 %v27398_v10  ;;  %v31419_v10 = vld [vmem:[#allocation326_spill] sm:$0xff] }
 0x2cb   : > { %20842 = vmatmul.mubr.f32.gmra.mrb[18].mxu1 %v31410_v3 }
 0x2cc   : > { %20844 = vmatprep.mubr.f32.mxu1 %v31417_v63 }
 0x2cd   : > { %22195 = vmatmul.mubr.f32.gmra.mrb[20].mxu0 %v31416_v28 }
 0x2ce   : > { %22197 = vmatprep.mubr.f32.mxu0 %v27408_v19  ;;  %v31421_v19 = vld [vmem:[#allocation333_spill] sm:$0xff] }
 0x2cf   : > { %20845 = vmatmul.mubr.f32.gmra.mrb[20].mxu1 %v31412_v15 }
 0x2d0   : > { %20847 = vmatprep.mubr.f32.mxu1 %v31418_v14 }
 0x2d1   : > { %22198 = vmatmul.mubr.f32.gmra.mrb[22].mxu0 %v26983_v17 }
 0x2d2   : > { %22200 = vmatprep.mubr.f32.mxu0 %v27428_v5  ;;  %v31422_v5 = vld [vmem:[#allocation339_spill] sm:$0xff] }
 0x2d3   : > { %20848 = vmatmul.mubr.f32.gmra.mrb[22].mxu1 %v31414_v0 }
 0x2d4   : > { %20850 = vmatprep.mubr.f32.mxu1 %v31419_v10 }
 0x2d5   : > { %22201 = vmatmul.mubr.f32.gmra.mrb[24].mxu0 %v27010_v41 }
 0x2d6   : > { %22203 = vmatprep.mubr.f32.mxu0 %v27449_v26  ;;  %v27619_v26 = vand.u32 4294901760, %v27612_v49 }
 0x2d7   : > { %20851 = vmatmul.mubr.f32.gmra.mrb[24].mxu1 %v31416_v28 }
 0x2d8   : > { %20853 = vmatprep.mubr.f32.mxu1 %v31421_v19  ;;  %31423 = vst [vmem:[#allocation260_spill] sm:$0xff] %v27619_v26  ;;  %v5490_v18 = vsub.f32 %v27612_v49, %v27619_v26  ;;  %v31443_v26 = vld [vmem:[#allocation335_spill] sm:$0xff] }
 0x2d9   : > { %22204 = vmatmul.mubr.f32.gmra.mrb[26].mxu0 %v31420_v33 }
 0x2da   : > { %22206 = vmatprep.mubr.f32.mxu0 %v27466_v30 }
 0x2db   : > { %20854 = vmatmul.mubr.f32.gmra.mrb[26].mxu1 %v26983_v17 }
 0x2dc   : > { %20856 = vmatprep.mubr.f32.mxu1 %v31422_v5 }
 0x2dd   : > { %22207 = vmatmul.mubr.f32.gmra.mrb[28].mxu0 %v27479_v47 }
 0x2de   : > { %22209 = vmatprep.mubr.f32.mxu0 %v27485_v20  ;;  %v27632_v20 = vand.u32 4294901760, %v5490_v18  ;;  %v31429_v18 = vld [vmem:[#allocation217_spill] sm:$0xff] }
 0x2df   : > { %20857 = vmatmul.mubr.f32.gmra.mrb[28].mxu1 %v27010_v41 }
 0x2e0   : > { %20859 = vmatprep.mubr.f32.mxu1 %v31424_v9 }
 0x2e1   : > { %22210 = vmatmul.mubr.f32.gmra.mrb[30].mxu0 %v27495_v13  ;;  %v31425_v13 = vld [vmem:[#allocation178_spill] sm:$0xff] }
 0x2e2   : > { %22214 = vmatprep.mubr.f32.mxu0 %v27244_v43 }
 0x2e3   : > { %20860 = vmatmul.mubr.f32.gmra.mrb[30].mxu1 %v31420_v33 }
 0x2e4   : > { %20864 = vmatprep.mubr.f32.mxu1 %v26479_v11  ;;  %v31426_v11 = vld [vmem:[#allocation281_spill] sm:$0xff] }
 0x2e5   : > { %22215 = vmatmul.mubr.f32.vlgmr.msra.gmra.mrb[0].mxu0 %v31276_v54  ;;  %v31437_v54 = vld [vmem:[#allocation330_spill] sm:$0xff] }
 0x2e6   : > { %22217 = vmatprep.mubr.f32.mxu0 %v27254_v24  ;;  %22263 = vmatpush3.msra.mxu0 %v27096_v58 }
 0x2e7   : > { %22312 = vmatprep.subr.mxu0 %v31425_v13  ;;  %20865 = vmatmul.mubr.f32.vlgmr.msra.gmra.mrb[0].mxu1 %v26488_v7  ;;  %v31427_v7 = vld [vmem:[#allocation203_spill] sm:$0xff] }
 0x2e8   : > { %20913 = vmatpush3.msra.mxu1 %v27554_v32  ;;  %20867 = vmatprep.mubr.f32.mxu1 %v26500_v8  ;;  %v31428_v8 = vld [vmem:[#allocation292_spill] sm:$0xff] }
 0x2e9   : > { %22218 = vmatmul.mubr.f32.gmra.mrb[2].mxu0 %v31278_v21  ;;  %20962 = vmatprep.subr.mxu1 %v27632_v20 }
 0x2ea   : > { %22220 = vmatprep.mubr.f32.mxu0 %v27269_v36 }
 0x2eb   : > { %20868 = vmatmul.mubr.f32.gmra.mrb[2].mxu1 %v26513_v4  ;;  %v31440_v4 = vld [vmem:[#allocation5_spill] sm:$0xff] }
 0x2ec   : > { %20870 = vmatprep.mubr.f32.mxu1 %v31401_v27  ;;  %v31430_v27 = vld [vmem:[#allocation298_spill] sm:$0xff] }
 0x2ed   : > { %22221 = vmatmul.mubr.f32.gmra.mrb[4].mxu0 %v31280_v48  ;;  %v24756_v48 = vld [vmem:[%s24839_s21 + $0x8] sm:$0xff] }
 0x2ee   : > { %22223 = vmatprep.mubr.f32.mxu0 %v27290_v34  ;;  %v4871_v21 = vrot.slane %v24756_v48, 2  ;;  %v31444_v48 = vld [vmem:[#allocation259_spill] sm:$0xff] }
 0x2ef   : > { %20871 = vmatmul.mubr.f32.gmra.mrb[4].mxu1 %v31240_v57 }
 0x2f0   : > { %20873 = vmatprep.mubr.f32.mxu1 %v31403_v37  ;;  %v31431_v37 = vld [vmem:[#allocation308_spill] sm:$0xff] }
 0x2f1   : > { %22224 = vmatmul.mubr.f32.gmra.mrb[6].mxu0 %v31426_v11  ;;  %v31436_v11 = vld [vmem:[#allocation175_spill] sm:$0xff] }
 0x2f2   : > { %22226 = vmatprep.mubr.f32.mxu0 %v31427_v7 }
 0x2f3   : > { %20874 = vmatmul.mubr.f32.gmra.mrb[6].mxu1 %v31244_v59 }
 0x2f4   : > { %20876 = vmatprep.mubr.f32.mxu1 %v31405_v29  ;;  %v31433_v29 = vld [vmem:[#allocation314_spill] sm:$0xff] }
 0x2f5   : > { %22227 = vmatmul.mubr.f32.gmra.mrb[8].mxu0 %v31428_v8  ;;  %v31432_v8 = vld [vmem:[#allocation229_spill] sm:$0xff] }
 0x2f6   : > { %22229 = vmatprep.mubr.f32.mxu0 %v31429_v18 }
 0x2f7   : > { %20877 = vmatmul.mubr.f32.gmra.mrb[8].mxu1 %v31400_v42 }
 0x2f8   : > { %20879 = vmatprep.mubr.f32.mxu1 %v31407_v44  ;;  %v31435_v44 = vld [vmem:[#allocation323_spill] sm:$0xff] }
 0x2f9   : > { %22230 = vmatmul.mubr.f32.gmra.mrb[10].mxu0 %v31430_v27  ;;  %v31434_v27 = vld [vmem:[#allocation239_spill] sm:$0xff] }
 0x2fa   : > { %22232 = vmatprep.mubr.f32.mxu0 %v27338_v46 }
 0x2fb   : > { %20880 = vmatmul.mubr.f32.gmra.mrb[10].mxu1 %v31402_v12 }
 0x2fc   : > { %20882 = vmatprep.mubr.f32.mxu1 %v31409_v38 }
 0x2fd   : > { %22233 = vmatmul.mubr.f32.gmra.mrb[12].mxu0 %v31431_v37  ;;  %v24755_v37 = vld [vmem:[%s24839_s21] sm:$0xff] }
 0x2fe   : > { %22235 = vmatprep.mubr.f32.mxu0 %v31432_v8  ;;  %v4870_v38 = vrot.slane %v24755_v37, 2 }
 0x2ff   : > { %20883 = vmatmul.mubr.f32.gmra.mrb[12].mxu1 %v31404_v56 }
 0x300   : > { %20885 = vmatprep.mubr.f32.mxu1 %v31411_v2  ;;  %v31438_v2 = vld [vmem:[#allocation251_spill] sm:$0xff] }
 0x301   : > { %22236 = vmatmul.mubr.f32.gmra.mrb[14].mxu0 %v31433_v29  ;;  %v4872_v29 = vsel %vm31439_vm5, %v4870_v38, %v4871_v21  ;;  %v31447_v38 = vld [vmem:[#allocation342_spill] sm:$0xff] }
 0x302   : > { %22238 = vmatprep.mubr.f32.mxu0 %v31434_v27  ;;  %v5002_v37 = vsel %vm951_vm2, %v4872_v29, 0 }
 0x303   : > { %20886 = vmatmul.mubr.f32.gmra.mrb[14].mxu1 %v31406_v52 }
 0x304   : > { %20888 = vmatprep.mubr.f32.mxu1 %v31413_v60 }
 0x305   : > { %22239 = vmatmul.mubr.f32.gmra.mrb[16].mxu0 %v31435_v44  ;;  %v31441_v44 = vrot.slane %v31440_v4, 2  ;;  %v27689_v4 = vand.u32 4294901760, %v5002_v37 }
 0x306   : > { %22241 = vmatprep.mubr.f32.mxu0 %v31436_v11 }
 0x307   : > { %20889 = vmatmul.mubr.f32.gmra.mrb[16].mxu1 %v31408_v51  ;;  %v4874_v60 = vsel %vm31442_vm3, %v4871_v21, %v31441_v44  ;;  %v31448_v44 = vld [vmem:[#allocation12_spill] sm:$0xff] }
 0x308   : > { %20891 = vmatprep.mubr.f32.mxu1 %v31415_v16 }
 0x309   : > { %22242 = vmatmul.mubr.f32.gmra.mrb[18].mxu0 %v31437_v54  ;;  %v31445_v54 = vld [vmem:[#allocation6_spill] sm:$0xff] }
 0x30a   : > { %22244 = vmatprep.mubr.f32.mxu0 %v31438_v2  ;;  %vm31446_vm4 = vcmp.le.s32.totalorder %v31445_v54, 15  ;;  %v31451_v54 = vld [vmem:[#allocation347_spill] sm:$0xff] }
 0x30b   : > { %20892 = vmatmul.mubr.f32.gmra.mrb[18].mxu1 %v31410_v3  ;;  %v4968_v16 = vsel %vm31446_vm4, %v4874_v60, 0.0 }
 0x30c   : > { %20894 = vmatprep.mubr.f32.mxu1 %v31417_v63  ;;  %v5005_v21 = vsel %vm951_vm2, %v4968_v16, 0  ;;  %v31453_v16 = vld [vmem:[#allocation9_spill] sm:$0xff] }
 0x30d   : > { %22245 = vmatmul.mubr.f32.gmra.mrb[20].mxu0 %v31443_v26  ;;  %v31449_v26 = vld [vmem:[#allocation8_spill] sm:$0xff]  ;;  %v27697_v29 = vand.u32 4294901760, %v5005_v21 }
 0x30e   : > { %22247 = vmatprep.mubr.f32.mxu0 %v31444_v48  ;;  %vm31450_vm3 = vcmp.le.s32.totalorder %v31449_v26, 15 }
 0x30f   : > { %20895 = vmatmul.mubr.f32.gmra.mrb[20].mxu1 %v31412_v15  ;;  %v4970_v63 = vsel %vm31450_vm3, %v31448_v44, 0.0  ;;  %v27713_v47 = vsub.f32 %v5005_v21, %v27697_v29 }
 0x310   : > { %20897 = vmatprep.mubr.f32.mxu1 %v31418_v14  ;;  %v5011_v60 = vsel %vm951_vm2, %v4970_v63, 0  ;;  %v27703_v14 = vsub.f32 %v5002_v37, %v27689_v4  ;;  %v31458_v37 = vld [vmem:[#allocation166_spill] sm:$0xff] }
 0x311   : > { %22248 = vmatmul.mubr.f32.gmra.mrb[22].mxu0 %v31447_v38  ;;  %v31454_v38 = vld [vmem:[#allocation163_spill] sm:$0xff]  ;;  %v27709_v44 = vand.u32 4294901760, %v5011_v60  ;;  %31456 = vst [vmem:[#allocation266_spill] sm:$0xff] %v27713_v47 }
 0x312   : > { %22250 = vmatprep.mubr.f32.mxu0 %v27444_v25  ;;  %31452 = vst [vmem:[#allocation263_spill] sm:$0xff] %v27703_v14  ;;  %vm31455_vm4 = vcmp.le.s32.totalorder %v31454_v38, 15  ;;  %v31459_v38 = vld [vmem:[#allocation24_spill] sm:$0xff] }
 0x313   : > { %20898 = vmatmul.mubr.f32.gmra.mrb[22].mxu1 %v31414_v0  ;;  %v4972_v26 = vsel %vm31455_vm4, %v31453_v16, 0.0  ;;  %vm31460_vm5 = vcmp.le.s32.totalorder %v31459_v38, 15  ;;  %v27724_v30 = vsub.f32 %v5011_v60, %v27709_v44  ;;  %v31461_v60 = vld [vmem:[#allocation30_spill] sm:$0xff] }
 0x314   : > { %20900 = vmatprep.mubr.f32.mxu1 %v31419_v10  ;;  %v5017_v63 = vsel %vm951_vm2, %v4972_v26, 0  ;;  %v30441_v10 = vand.u32 4294901760, %v27703_v14  ;;  %v4974_v16 = vsel %vm31460_vm5, %v31458_v37, 0.0  ;;  %v31466_v37 = vand.u32 4294901760, %v27244_v43  ;;  %v31472_v43 = vld [vmem:[#allocation267_spill] sm:$0xff] }
 0x315   : > { %22251 = vmatmul.mubr.f32.gmra.mrb[24].mxu0 %v31451_v54  ;;  %v31457_v54 = vld [vmem:[#allocation351_spill] sm:$0xff]  ;;  %v5023_v21 = vsel %vm951_vm2, %v4974_v16, 0 }
 0x316   : > { %22253 = vmatprep.mubr.f32.mxu0 %v27464_v40 }
 0x317   : > { %20901 = vmatmul.mubr.f32.gmra.mrb[24].mxu1 %v31416_v28  ;;  %v27726_v28 = vand.u32 4294901760, %v5017_v63 }
 0x318   : > { %20903 = vmatprep.mubr.f32.mxu1 %v31421_v19  ;;  %v5169_v19 = vsub.f32 %v27703_v14, %v30441_v10  ;;  %v27748_v10 = vand.u32 4294901760, %v5023_v21 }
 0x319   : > { %22254 = vmatmul.mubr.f32.gmra.mrb[26].mxu0 %v31457_v54  ;;  %v31462_v54 = vld [vmem:[#allocation170_spill] sm:$0xff]  ;;  %v27742_v26 = vsub.f32 %v5017_v63, %v27726_v28 }
 0x31a   : > { %22256 = vmatprep.mubr.f32.mxu0 %v27483_v22  ;;  %vm31463_vm3 = vcmp.le.s32.totalorder %v31462_v54, 15  ;;  %v5170_v16 = vand.u32 4294901760, %v5169_v19  ;;  %v31467_v63 = vld [vmem:[#allocation174_spill] sm:$0xff]  ;;  %v31473_v19 = vld [vmem:[#allocation176_spill] sm:$0xff] }
 0x31b   : > { %20904 = vmatmul.mubr.f32.gmra.mrb[26].mxu1 %v26983_v17  ;;  %v4976_v38 = vsel %vm31463_vm3, %v31461_v60, 0.0  ;;  %31464 = vst [vmem:[#allocation277_spill] sm:$0xff] %v27742_v26  ;;  %v31468_v60 = vld [vmem:[#allocation35_spill] sm:$0xff] }
 0x31c   : > { %20906 = vmatprep.mubr.f32.mxu1 %v31422_v5  ;;  %v31465_v5 = vand.u32 4294901760, %v27713_v47  ;;  %v5029_v54 = vsel %vm951_vm2, %v4976_v38, 0  ;;  %vm31469_vm4 = vcmp.le.s32.totalorder %v31468_v60, 15  ;;  %v31474_v60 = vld [vmem:[#allocation40_spill] sm:$0xff] }
 0x31d   : > { %22257 = vmatmul.mubr.f32.gmra.mrb[28].mxu0 %v27493_v50  ;;  %v4978_v14 = vsel %vm31469_vm4, %v31467_v63, 0.0  ;;  %v27766_v38 = vand.u32 4294901760, %v5029_v54  ;;  %vm31475_vm5 = vcmp.le.s32.totalorder %v31474_v60, 15  ;;  %v31483_v60 = vld [vmem:[#allocation171_spill] sm:$0xff] }
 0x31e   : > { %22259 = vmatprep.mubr.f32.mxu0 %v27502_v62  ;;  %v5179_v50 = vsub.f32 %v27713_v47, %v31465_v5  ;;  %v30450_v47 = vand.u32 4294901760, %v27742_v26  ;;  %v4980_v63 = vsel %vm31475_vm5, %v31473_v19, 0.0 }
 0x31f   : > { %20907 = vmatmul.mubr.f32.gmra.mrb[28].mxu1 %v27010_v41  ;;  %v31470_v41 = vand.u32 4294901760, %v27724_v30 }
 0x320   : > { %20909 = vmatprep.mubr.f32.mxu1 %v31424_v9  ;;  %v5180_v17 = vand.u32 4294901760, %v5179_v50  ;;  %v27764_v9 = vsub.f32 %v5023_v21, %v27748_v10  ;;  %v5219_v21 = vsub.f32 %v27742_v26, %v30450_v47 }
 0x321   : > { %22260 = vmatmul.mubr.f32.gmra.mrb[30].mxu0 %v27512_v45  ;;  %v5199_v5 = vsub.f32 %v27724_v30, %v31470_v41  ;;  %v31476_v41 = vand.u32 4294901760, %v27254_v24  ;;  %v5041_v24 = vsel %vm951_vm2, %v4980_v63, 0 }
 0x322   : > { %22264 = vmatprep.mubr.f32.mxu0 %v31466_v37  ;;  %31471 = vst [vmem:[#allocation289_spill] sm:$0xff] %v27764_v9  ;;  %v5035_v37 = vsel %vm951_vm2, %v4978_v14, 0  ;;  %v27782_v14 = vsub.f32 %v5029_v54, %v27766_v38  ;;  %v27795_v54 = vand.u32 4294901760, %v5041_v24  ;;  %v31486_v63 = vand.u32 4294901760, %v27764_v9 }
 0x323   : > { %20910 = vmatmul.mubr.f32.gmra.mrb[30].mxu1 %v31420_v33  ;;  %v5200_v50 = vand.u32 4294901760, %v5199_v5  ;;  %v31480_v5 = vld [vmem:[#allocation177_spill] sm:$0xff] }
 0x324   : > { %20914 = vmatprep.mubr.f32.mxu1 %v5170_v16  ;;  %31477 = vst [vmem:[#allocation295_spill] sm:$0xff] %v27782_v14  ;;  %v5220_v16 = vand.u32 4294901760, %v5219_v21  ;;  %31485 = vst [vmem:[#allocation310_spill] sm:$0xff] %v27795_v54  ;;  %v31490_v21 = vand.u32 4294901760, %v27290_v34  ;;  %v31497_v34 = vld [vmem:[#allocation55_spill] sm:$0xff] }
 0x325   : > { %22265 = vmatmul.mubr.f32.vlgmr.msra.gmra.mrb[0].mxu0 %v31472_v43  ;;  %v27784_v43 = vand.u32 4294901760, %v5035_v37 }
 0x326   : > { %22267 = vmatprep.mubr.f32.mxu0 %v31476_v41  ;;  %22313 = vmatpush3.msra.mxu0 %v31425_v13  ;;  %v31479_v13 = vld [vmem:[#allocation270_spill] sm:$0xff]  ;;  %v31481_v41 = vld [vmem:[#allocation71_spill] sm:$0xff] }
 0x327   : > { %22362 = vmatprep.subr.mxu0 %v27096_v58  ;;  %20915 = vmatmul.mubr.f32.vlgmr.msra.gmra.mrb[0].mxu1 %v5180_v17  ;;  %31478 = vst [vmem:[#allocation301_spill] sm:$0xff] %v27784_v43  ;;  %vm31482_vm3 = vcmp.le.s32.totalorder %v31481_v41, 15  ;;  %v31484_v17 = vand.u32 4294901760, %v27269_v36  ;;  %v27803_v41 = vsub.f32 %v5035_v37, %v27784_v43  ;;  %v31489_v36 = vld [vmem:[#allocation41_spill] sm:$0xff] }
 0x328   : > { %20963 = vmatpush3.msra.mxu1 %v27632_v20  ;;  %v4982_v47 = vsel %vm31482_vm3, %v31480_v5, 0.0  ;;  %20917 = vmatprep.mubr.f32.mxu1 %v31483_v60  ;;  %v5239_v20 = vsub.f32 %v27764_v9, %v31486_v63  ;;  %v31488_v5 = vld [vmem:[#allocation286_spill] sm:$0xff]  ;;  %v27814_v63 = vsub.f32 %v5041_v24, %v27795_v54 }
 0x329   : > { %22268 = vmatmul.mubr.f32.gmra.mrb[2].mxu0 %v31479_v13  ;;  %21012 = vmatprep.subr.mxu1 %v27612_v49  ;;  %31487 = vst [vmem:[#allocation315_spill] sm:$0xff] %v27803_v41  ;;  %v5047_v60 = vsel %vm951_vm2, %v4982_v47, 0  ;;  %v31495_v47 = vand.u32 4294901760, %v27782_v14  ;;  %v31496_v9 = vld [vmem:[#allocation290_spill] sm:$0xff] }
 0x32a   : > { %22270 = vmatprep.mubr.f32.mxu0 %v31484_v17  ;;  %v31491_v17 = vld [vmem:[#allocation192_spill] sm:$0xff]  ;;  %v27816_v13 = vand.u32 4294901760, %v5047_v60  ;;  %v5240_v37 = vand.u32 4294901760, %v5239_v20  ;;  %v31499_v24 = vld [vmem:[#allocation198_spill] sm:$0xff]  ;;  %v31507_v20 = vld [vmem:[#allocation207_spill] sm:$0xff] }
 0x32b   : > { %20918 = vmatmul.mubr.f32.gmra.mrb[2].mxu1 %v5200_v50  ;;  %v31492_v50 = vld [vmem:[#allocation193_spill] sm:$0xff] }
 0x32c   : > { %20920 = vmatprep.mubr.f32.mxu1 %v31489_v36  ;;  %vm31493_vm4 = vcmp.le.s32.totalorder %v31492_v50, 15  ;;  %31494 = vst [vmem:[#allocation325_spill] sm:$0xff] %v27816_v13  ;;  %v30455_v36 = vand.u32 4294901760, %v27803_v41  ;;  %v31498_v50 = vand.u32 4294901760, %v31427_v7  ;;  %v27832_v26 = vsub.f32 %v5047_v60, %v27816_v13  ;;  %v31505_v7 = vld [vmem:[#allocation199_spill] sm:$0xff] }
 0x32d   : > { %22271 = vmatmul.mubr.f32.gmra.mrb[4].mxu0 %v31488_v5  ;;  %v4984_v19 = vsel %vm31493_vm4, %v31491_v17, 0.0  ;;  %v5259_v5 = vsub.f32 %v27782_v14, %v31495_v47  ;;  %v31500_v17 = vld [vmem:[#allocation205_spill] sm:$0xff]  ;;  %v31508_v60 = vld [vmem:[#allocation87_spill] sm:$0xff] }
 0x32e   : > { %22273 = vmatprep.mubr.f32.mxu0 %v31490_v21  ;;  %v5053_v21 = vsel %vm951_vm2, %v4984_v19, 0  ;;  %vm31501_vm5 = vcmp.le.s32.totalorder %v31500_v17, 15  ;;  %31502 = vst [vmem:[#allocation332_spill] sm:$0xff] %v27832_v26  ;;  %v31504_v19 = vld [vmem:[#allocation297_spill] sm:$0xff]  ;;  %v31506_v17 = vand.u32 4294901760, %v31429_v18  ;;  %vm31509_vm3 = vcmp.le.s32.totalorder %v31508_v60, 15 }
 0x32f   : > { %20921 = vmatmul.mubr.f32.gmra.mrb[4].mxu1 %v5220_v16  ;;  %v4986_v16 = vsel %vm31501_vm5, %v31499_v24, 0.0  ;;  %v5260_v47 = vand.u32 4294901760, %v5259_v5  ;;  %v31510_v5 = vand.u32 4294901760, %v27814_v63  ;;  %v31513_v18 = vld [vmem:[#allocation202_spill] sm:$0xff] }
 0x330   : > { %20923 = vmatprep.mubr.f32.mxu1 %v31497_v34  ;;  %v27837_v34 = vand.u32 4294901760, %v5053_v21  ;;  %v31514_v60 = vld [vmem:[#allocation94_spill] sm:$0xff] }
 0x331   : > { %22274 = vmatmul.mubr.f32.gmra.mrb[6].mxu0 %v31496_v9  ;;  %v5279_v9 = vsub.f32 %v27803_v41, %v30455_v36  ;;  %v5299_v24 = vsub.f32 %v27814_v63, %v31510_v5  ;;  %v30460_v36 = vand.u32 4294901760, %v27832_v26  ;;  %v31517_v5 = vand.u32 4294901760, %v27338_v46 }
 0x332   : > { %22276 = vmatprep.mubr.f32.mxu0 %v31498_v50  ;;  %31503 = vst [vmem:[#allocation336_spill] sm:$0xff] %v27837_v34  ;;  %v5059_v50 = vsel %vm951_vm2, %v4986_v16, 0  ;;  %v31512_v16 = vld [vmem:[#allocation305_spill] sm:$0xff]  ;;  %v31521_v46 = vand.u32 4294901760, %v31432_v8  ;;  %v31526_v8 = vld [vmem:[#allocation103_spill] sm:$0xff] }
 0x333   : > { %20924 = vmatmul.mubr.f32.gmra.mrb[6].mxu1 %v5240_v37  ;;  %v4988_v37 = vsel %vm31509_vm3, %v31507_v20, 0.0  ;;  %v5280_v41 = vand.u32 4294901760, %v5279_v9  ;;  %v31515_v20 = vld [vmem:[#allocation208_spill] sm:$0xff]  ;;  %v5319_v9 = vsub.f32 %v27832_v26, %v30460_v36 }
 0x334   : > { %20926 = vmatprep.mubr.f32.mxu1 %v31505_v7  ;;  %v27854_v7 = vand.u32 4294901760, %v5059_v50  ;;  %vm31516_vm4 = vcmp.le.s32.totalorder %v31515_v20, 15  ;;  %v31519_v20 = vld [vmem:[#allocation313_spill] sm:$0xff] }
 0x335   : > { %22277 = vmatmul.mubr.f32.gmra.mrb[8].mxu0 %v31504_v19  ;;  %v27852_v19 = vsub.f32 %v5053_v21, %v27837_v34  ;;  %v4990_v14 = vsel %vm31516_vm4, %v31514_v60, 0.0  ;;  %v31520_v60 = vld [vmem:[#allocation88_spill] sm:$0xff] }
 0x336   : > { %22279 = vmatprep.mubr.f32.mxu0 %v31506_v17  ;;  %31511 = vst [vmem:[#allocation253_spill] sm:$0xff] %v27854_v7  ;;  %v5065_v17 = vsel %vm951_vm2, %v4988_v37, 0  ;;  %v5071_v37 = vsel %vm951_vm2, %v4990_v14, 0 }
 0x337   : > { %20927 = vmatmul.mubr.f32.gmra.mrb[8].mxu1 %v5260_v47  ;;  %v5300_v47 = vand.u32 4294901760, %v5299_v24  ;;  %v30463_v21 = vand.u32 4294901760, %v27852_v19  ;;  %v31522_v24 = vld [vmem:[#allocation212_spill] sm:$0xff]  ;;  %v27881_v36 = vand.u32 4294901760, %v5071_v37 }
 0x338   : > { %20929 = vmatprep.mubr.f32.mxu1 %v31513_v18  ;;  %v27871_v18 = vand.u32 4294901760, %v5065_v17 }
 0x339   : > { %22280 = vmatmul.mubr.f32.gmra.mrb[10].mxu0 %v31512_v16  ;;  %v27869_v16 = vsub.f32 %v5059_v50, %v27854_v7  ;;  %31525 = vst [vmem:[#allocation269_spill] sm:$0xff] %v27881_v36  ;;  %v5320_v50 = vand.u32 4294901760, %v5319_v9  ;;  %v5339_v26 = vsub.f32 %v27852_v19, %v30463_v21  ;;  %v31529_v9 = vld [vmem:[#allocation120_spill] sm:$0xff]  ;;  %v27899_v21 = vsub.f32 %v5071_v37, %v27881_v36  ;;  %v31535_v37 = vld [vmem:[#allocation222_spill] sm:$0xff] }
 0x33a   : > { %22282 = vmatprep.mubr.f32.mxu0 %v31517_v5  ;;  %31518 = vst [vmem:[#allocation262_spill] sm:$0xff] %v27871_v18  ;;  %v31523_v5 = vld [vmem:[#allocation108_spill] sm:$0xff]  ;;  %vm31530_vm3 = vcmp.le.s32.totalorder %v31529_v9, 15 }
 0x33b   : > { %20930 = vmatmul.mubr.f32.gmra.mrb[10].mxu1 %v5280_v41  ;;  %vm31524_vm5 = vcmp.le.s32.totalorder %v31523_v5, 15  ;;  %v31527_v5 = vand.u32 4294901760, %v31434_v27  ;;  %v5340_v14 = vand.u32 4294901760, %v5339_v26  ;;  %v31533_v27 = vld [vmem:[#allocation210_spill] sm:$0xff] }
 0x33c   : > { %20932 = vmatprep.mubr.f32.mxu1 %v31520_v60  ;;  %v4992_v41 = vsel %vm31524_vm5, %v31522_v24, 0.0 }
 0x33d   : > { %22283 = vmatmul.mubr.f32.gmra.mrb[12].mxu0 %v31519_v20  ;;  %v27888_v20 = vsub.f32 %v5065_v17, %v27871_v18  ;;  %v31531_v17 = vand.u32 4294901760, %v27869_v16 }
 0x33e   : > { %22285 = vmatprep.mubr.f32.mxu0 %v31521_v46  ;;  %v5077_v46 = vsel %vm951_vm2, %v4992_v41, 0  ;;  %v31534_v41 = vand.u32 4294901760, %v31436_v11  ;;  %v31538_v11 = vld [vmem:[#allocation109_spill] sm:$0xff] }
 0x33f   : > { %20933 = vmatmul.mubr.f32.gmra.mrb[12].mxu1 %v5300_v47  ;;  %v31528_v47 = vld [vmem:[#allocation219_spill] sm:$0xff]  ;;  %v27905_v60 = vand.u32 4294901760, %v5077_v46 }
 0x340   : > { %20935 = vmatprep.mubr.f32.mxu1 %v31526_v8  ;;  %v4994_v24 = vsel %vm31530_vm3, %v31528_v47, 0.0  ;;  %v30466_v8 = vand.u32 4294901760, %v27888_v20  ;;  %vm31651_vm3 = vcmask 1046528  }
 0x341   : > { %22286 = vmatmul.mubr.f32.gmra.mrb[14].mxu0 %v31384_v31  ;;  %v5359_v31 = vsub.f32 %v27869_v16, %v31531_v17  ;;  %31532 = vst [vmem:[#allocation272_spill] sm:$0xff] %v27905_v60 }
 0x342   : > { %22288 = vmatprep.mubr.f32.mxu0 %v31527_v5  ;;  %v5083_v5 = vsel %vm951_vm2, %v4994_v24, 0  ;;  %v5379_v47 = vsub.f32 %v27888_v20, %v30466_v8  ;;  %v31543_v8 = vand.u32 4294901760, %v27899_v21 }
 0x343   : > { %20936 = vmatmul.mubr.f32.gmra.mrb[14].mxu1 %v5320_v50  ;;  %v31536_v50 = vld [vmem:[#allocation223_spill] sm:$0xff]  ;;  %v5360_v17 = vand.u32 4294901760, %v5359_v31 }
 0x344   : > { %20938 = vmatprep.mubr.f32.mxu1 %v31533_v27  ;;  %vm31537_vm4 = vcmp.le.s32.totalorder %v31536_v50, 15  ;;  %v27922_v27 = vand.u32 4294901760, %v5083_v5  ;;  %v31541_v31 = vld [vmem:[#allocation135_spill] sm:$0xff]  ;;  %v5380_v50 = vand.u32 4294901760, %v5379_v47 }
 0x345   : > { %22289 = vmatmul.mubr.f32.gmra.mrb[16].mxu0 %v31388_v6  ;;  %v4996_v26 = vsel %vm31537_vm4, %v31535_v37, 0.0  ;;  %v27920_v6 = vsub.f32 %v5077_v46, %v27905_v60  ;;  %vm31542_vm5 = vcmp.le.s32.totalorder %v31541_v31, 15  ;;  %v5399_v46 = vsub.f32 %v27899_v21, %v31543_v8  ;;  %vm31655_vm4 = vmmov %vm31651_vm3 }
 0x346   : > { %22291 = vmatprep.mubr.f32.mxu0 %v31534_v41  ;;  %v5089_v24 = vsel %vm951_vm2, %v4996_v26, 0  ;;  %v31539_v41 = vand.u32 4294901760, %v31438_v2  ;;  %v31544_v2 = vld [vmem:[#allocation230_spill] sm:$0xff] }
 0x347   : > { %20939 = vmatmul.mubr.f32.gmra.mrb[16].mxu1 %v5340_v14  ;;  %v31540_v14 = vld [vmem:[#allocation227_spill] sm:$0xff]  ;;  %v30469_v37 = vand.u32 4294901760, %v27920_v6  ;;  %v5400_v31 = vand.u32 4294901760, %v5399_v46 }
 0x348   : > { %20941 = vmatprep.mubr.f32.mxu1 %v31538_v11  ;;  %v4998_v9 = vsel %vm31542_vm5, %v31540_v14, 0.0  ;;  %v27939_v11 = vand.u32 4294901760, %v5089_v24  ;;  %v31578_v14 = vld [vmem:[#allocation16_spill] sm:$0xff] }
 0x349   : > { %22292 = vmatmul.mubr.f32.gmra.mrb[18].mxu0 %v31391_v35  ;;  %v27937_v35 = vsub.f32 %v5083_v5, %v27922_v27  ;;  %v5095_v26 = vsel %vm951_vm2, %v4998_v9, 0  ;;  %v5419_v8 = vsub.f32 %v27920_v6, %v30469_v37  ;;  %v31550_v37 = vand.u32 4294901760, %v27464_v40 }
 0x34a   : > { %22294 = vmatprep.mubr.f32.mxu0 %v31539_v41  ;;  %v31545_v41 = vand.u32 4294901760, %v31444_v48  ;;  %v27951_v5 = vsub.f32 %v5089_v24, %v27939_v11  ;;  %v31548_v48 = vand.u32 4294901760, %v27444_v25 }
 0x34b   : > { %20942 = vmatmul.mubr.f32.gmra.mrb[18].mxu1 %v5360_v17  ;;  %v30470_v47 = vand.u32 4294901760, %v27937_v35  ;;  %v27953_v17 = vand.u32 4294901760, %v5095_v26  ;;  %v5420_v9 = vand.u32 4294901760, %v5419_v8 }
 0x34c   : > { %20944 = vmatprep.mubr.f32.mxu1 %v31544_v2  ;;  %v30472_v46 = vand.u32 4294901760, %v27951_v5  ;;  %v31577_v2 = vld [vmem:[#allocation209_spill] sm:$0xff] }
 0x34d   : > { %22295 = vmatmul.mubr.f32.gmra.mrb[20].mxu0 %v31393_v39  ;;  %31546 = vst [vmem:[#allocation279_spill] sm:$0xff] %v27953_v17  ;;  %v31547_v39 = vld [vmem:[#allocation235_spill] sm:$0xff]  ;;  %v27964_v24 = vsub.f32 %v5095_v26, %v27953_v17  ;;  %v31552_v26 = vand.u32 4294901760, %v27483_v22 }
 0x34e   : > { %22297 = vmatprep.mubr.f32.mxu0 %v31545_v41  ;;  %v31549_v41 = vld [vmem:[#allocation238_spill] sm:$0xff] }
 0x34f   : > { %20945 = vmatmul.mubr.f32.gmra.mrb[20].mxu1 %v5380_v50  ;;  %v5439_v50 = vsub.f32 %v27937_v35, %v30470_v47  ;;  %v30471_v8 = vand.u32 4294901760, %v27964_v24 }
 0x350   : > { %20947 = vmatprep.mubr.f32.mxu1 %v31547_v39  ;;  %v31576_v39 = vld [vmem:[#allocation331_spill] sm:$0xff] }
 0x351   : > { %22298 = vmatmul.mubr.f32.gmra.mrb[22].mxu0 %v31396_v53  ;;  %v5440_v25 = vand.u32 4294901760, %v5439_v50  ;;  %v5479_v40 = vsub.f32 %v27964_v24, %v30471_v8  ;;  %v31554_v50 = vand.u32 4294901760, %v27502_v62  ;;  %v31557_v62 = vld [vmem:[#allocation257_spill] sm:$0xff]  ;;  %v31571_v53 = vld [vmem:[#allocation234_spill] sm:$0xff] }
 0x352   : > { %22300 = vmatprep.mubr.f32.mxu0 %v31548_v48  ;;  %v31551_v48 = vld [vmem:[#allocation244_spill] sm:$0xff] }
 0x353   : > { %20948 = vmatmul.mubr.f32.gmra.mrb[22].mxu1 %v5400_v31  ;;  %v5459_v31 = vsub.f32 %v27951_v5, %v30472_v46  ;;  %v5480_v22 = vand.u32 4294901760, %v5479_v40  ;;  %v31560_v40 = vld [vmem:[#allocation164_spill] sm:$0xff]  ;;  %v31567_v46 = vld [vmem:[#allocation214_spill] sm:$0xff] }
 0x354   : > { %20950 = vmatprep.mubr.f32.mxu1 %v31549_v41  ;;  %v31575_v41 = vld [vmem:[#allocation195_spill] sm:$0xff] }
 0x355   : > { %22301 = vmatmul.mubr.f32.gmra.mrb[24].mxu0 %v31398_v55  ;;  %v5460_v47 = vand.u32 4294901760, %v5459_v31  ;;  %v31555_v31 = vand.u32 4294901760, %v27512_v45  ;;  %v31558_v45 = vld [vmem:[#allocation7_spill] sm:$0xff]  ;;  %v31570_v55 = vld [vmem:[#allocation186_spill] sm:$0xff] }
 0x356   : > { %22303 = vmatprep.mubr.f32.mxu0 %v31550_v37  ;;  %v31553_v37 = vld [vmem:[#allocation247_spill] sm:$0xff] }
 0x357   : > { %20951 = vmatmul.mubr.f32.gmra.mrb[24].mxu1 %v5420_v9  ;;  %v18524_v9 = vld [vmem:[%s29579_s1 + $0x1c] sm:$0x7] }
 0x358   : > { %20953 = vmatprep.mubr.f32.mxu1 %v31551_v48  ;;  %v31574_v48 = vld [vmem:[#allocation201_spill] sm:$0xff] }
 0x359   : > { %22304 = vmatmul.mubr.f32.gmra.mrb[26].mxu0 %v27070_v1  ;;  %v31569_v1 = vld [vmem:[#allocation221_spill] sm:$0xff] }
 0x35a   : > { %22306 = vmatprep.mubr.f32.mxu0 %v31552_v26  ;;  %v31556_v26 = vld [vmem:[#allocation249_spill] sm:$0xff] }
 0x35b   : > { %20954 = vmatmul.mubr.f32.gmra.mrb[26].mxu1 %v5440_v25  ;;  %v14588_v25 = vsel %vm1016_vm0, %v18524_v9, 0  ;;  %v31563_v9 = vld [vmem:[#allocation190_spill] sm:$0xff] }
 0x35c   : > { %20956 = vmatprep.mubr.f32.mxu1 %v31553_v37  ;;  %v27993_v8 = vand.u32 4294901760, %v14588_v25  ;;  %v31573_v37 = vld [vmem:[#allocation243_spill] sm:$0xff] }
 0x35d   : > { %22307 = vmatmul.mubr.f32.gmra.mrb[28].mxu0 %v27509_v23  ;;  %v31568_v23 = vld [vmem:[#allocation184_spill] sm:$0xff] }
 0x35e   : > { %22309 = vmatprep.mubr.f32.mxu0 %v31554_v50  ;;  %v31564_v50 = vld [vmem:[#allocation53_spill] sm:$0xff] }
 0x35f   : > { %20957 = vmatmul.mubr.f32.gmra.mrb[28].mxu1 %v5460_v47  ;;  %v31559_v47 = vld [vmem:[#allocation181_spill] sm:$0xff] }
 0x360   : > { %20959 = vmatprep.mubr.f32.mxu1 %v31556_v26  ;;  %v31572_v26 = vld [vmem:[#allocation191_spill] sm:$0xff] }
 0x361   : > { %22310 = vmatmul.mubr.f32.gmra.mrb[30].mxu0 %v31555_v31  ;;  %v31566_v31 = vld [vmem:[#allocation179_spill] sm:$0xff] }
 0x362   : > { %22314 = vmatprep.mubr.f32.mxu0 %v27231_v61 }
 0x363   : > { %20960 = vmatmul.mubr.f32.gmra.mrb[30].mxu1 %v5480_v22  ;;  %v31565_v22 = vld [vmem:[#allocation17_spill] sm:$0xff] }
 0x364   : > { %20964 = vmatprep.mubr.f32.mxu1 %v27689_v4 }
 0x365   : > { %22315 = vmatmul.mubr.f32.vlgmr.msra.gmra.mrb[0].mxu0 %v31240_v57 }
 0x366   : > { %22317 = vmatprep.mubr.f32.mxu0 %v31557_v62  ;;  %22363 = vmatpush3.msra.mxu0 %v27096_v58  ;;  %v31561_v58 = vld [vmem:[#allocation189_spill] sm:$0xff] }
 0x367   : > { %22412 = vmatprep.subr.mxu0 %v27993_v8  ;;  %20965 = vmatmul.mubr.f32.vlgmr.msra.gmra.mrb[0].mxu1 %v27697_v29 }
 0x368   : > { %21013 = vmatpush3.msra.mxu1 %v27612_v49  ;;  %20967 = vmatprep.mubr.f32.mxu1 %v31558_v45  ;;  %v31562_v49 = vld [vmem:[#allocation165_spill] sm:$0xff] }
 0x369   : > { %22318 = vmatmul.mubr.f32.gmra.mrb[2].mxu0 %v31244_v59  ;;  %21062 = vmatprep.subr.mxu1 %v27554_v32 }
 0x36a   : > { %22320 = vmatprep.mubr.f32.mxu0 %v31559_v47 }
 0x36b   : > { %20968 = vmatmul.mubr.f32.gmra.mrb[2].mxu1 %v27709_v44 }
 0x36c   : > { %20970 = vmatprep.mubr.f32.mxu1 %v31560_v40 }
 0x36d   : > { %22321 = vmatmul.mubr.f32.gmra.mrb[4].mxu0 %v31400_v42 }
 0x36e   : > { %22323 = vmatprep.mubr.f32.mxu0 %v31561_v58 }
 0x36f   : > { %20971 = vmatmul.mubr.f32.gmra.mrb[4].mxu1 %v27726_v28 }
 0x370   : > { %20973 = vmatprep.mubr.f32.mxu1 %v31562_v49 }
 0x371   : > { %22324 = vmatmul.mubr.f32.gmra.mrb[6].mxu0 %v31402_v12 }
 0x372   : > { %22326 = vmatprep.mubr.f32.mxu0 %v31563_v9 }
 0x373   : > { %20974 = vmatmul.mubr.f32.gmra.mrb[6].mxu1 %v27748_v10 }
 0x374   : > { %20976 = vmatprep.mubr.f32.mxu1 %v31564_v50 }
 0x375   : > { %22327 = vmatmul.mubr.f32.gmra.mrb[8].mxu0 %v31404_v56 }
 0x376   : > { %22329 = vmatprep.mubr.f32.mxu0 %v31565_v22 }
 0x377   : > { %20977 = vmatmul.mubr.f32.gmra.mrb[8].mxu1 %v27766_v38 }
 0x378   : > { %20979 = vmatprep.mubr.f32.mxu1 %v31566_v31 }
 0x379   : > { %22330 = vmatmul.mubr.f32.gmra.mrb[10].mxu0 %v31406_v52 }
 0x37a   : > { %22332 = vmatprep.mubr.f32.mxu0 %v31567_v46 }
 0x37b   : > { %20980 = vmatmul.mubr.f32.gmra.mrb[10].mxu1 %v27784_v43 }
 0x37c   : > { %20982 = vmatprep.mubr.f32.mxu1 %v31568_v23  ;;  %v31590_v23 = vld [vmem:[#allocation294_spill] sm:$0xff] }
 0x37d   : > { %22333 = vmatmul.mubr.f32.gmra.mrb[12].mxu0 %v31408_v51 }
 0x37e   : > { %22335 = vmatprep.mubr.f32.mxu0 %v31569_v1 }
 0x37f   : > { %20983 = vmatmul.mubr.f32.gmra.mrb[12].mxu1 %v27795_v54 }
 0x380   : > { %20985 = vmatprep.mubr.f32.mxu1 %v31570_v55  ;;  %v31583_v55 = vld [vmem:[#allocation218_spill] sm:$0xff] }
 0x381   : > { %22336 = vmatmul.mubr.f32.gmra.mrb[14].mxu0 %v31410_v3 }
 0x382   : > { %22338 = vmatprep.mubr.f32.mxu0 %v31571_v53 }
 0x383   : > { %20986 = vmatmul.mubr.f32.gmra.mrb[14].mxu1 %v27816_v13  ;;  %v31580_v13 = vld [vmem:[#allocation215_spill] sm:$0xff] }
 0x384   : > { %20988 = vmatprep.mubr.f32.mxu1 %v31572_v26  ;;  %v31579_v26 = vld [vmem:[#allocation338_spill] sm:$0xff] }
 0x385   : > { %22339 = vmatmul.mubr.f32.gmra.mrb[16].mxu0 %v31412_v15 }
 0x386   : > { %22341 = vmatprep.mubr.f32.mxu0 %v31573_v37 }
 0x387   : > { %20989 = vmatmul.mubr.f32.gmra.mrb[16].mxu1 %v27837_v34  ;;  %v31581_v34 = vld [vmem:[#allocation268_spill] sm:$0xff] }
 0x388   : > { %20991 = vmatprep.mubr.f32.mxu1 %v31574_v48  ;;  %v31582_v48 = vld [vmem:[#allocation343_spill] sm:$0xff] }
 0x389   : > { %22342 = vmatmul.mubr.f32.gmra.mrb[18].mxu0 %v31414_v0 }
 0x38a   : > { %22344 = vmatprep.mubr.f32.mxu0 %v31575_v41 }
 0x38b   : > { %20992 = vmatmul.mubr.f32.gmra.mrb[18].mxu1 %v27854_v7  ;;  %v31584_v7 = vld [vmem:[#allocation276_spill] sm:$0xff] }
 0x38c   : > { %20994 = vmatprep.mubr.f32.mxu1 %v31577_v2  ;;  %v28051_v2 = vsub.f32 %v14588_v25, %v27993_v8 }
 0x38d   : > { %22345 = vmatmul.mubr.f32.gmra.mrb[20].mxu0 %v31576_v39 }
 0x38e   : > { %22347 = vmatprep.mubr.f32.mxu0 %v31578_v14  ;;  %v28058_v54 = vand.u32 4294901760, %v28051_v2 }
 0x38f   : > { %20995 = vmatmul.mubr.f32.gmra.mrb[20].mxu1 %v27871_v18  ;;  %v31585_v18 = vld [vmem:[#allocation225_spill] sm:$0xff] }
 0x390   : > { %20997 = vmatprep.mubr.f32.mxu1 %v31580_v13  ;;  %v31586_v13 = vld [vmem:[#allocation280_spill] sm:$0xff]  ;;  %31587 = vst [vmem:[#allocation288_spill] sm:$0xff] %v28058_v54  ;;  %v14980_v25 = vsub.f32 %v28051_v2, %v28058_v54  ;;  %v31594_v54 = vld [vmem:[#allocation266_spill] sm:$0xff] }
 0x391   : > { %22348 = vmatmul.mubr.f32.gmra.mrb[22].mxu0 %v31579_v26 }
 0x392   : > { %22350 = vmatprep.mubr.f32.mxu0 %v31581_v34  ;;  %v28070_v43 = vand.u32 4294901760, %v14980_v25  ;;  %v31596_v25 = vld [vmem:[#allocation260_spill] sm:$0xff] }
 0x393   : > { %20998 = vmatmul.mubr.f32.gmra.mrb[22].mxu1 %v27881_v36  ;;  %v31588_v36 = vld [vmem:[#allocation287_spill] sm:$0xff] }
 0x394   : > { %21000 = vmatprep.mubr.f32.mxu1 %v31583_v55  ;;  %v31589_v55 = vld [vmem:[#allocation231_spill] sm:$0xff] }
 0x395   : > { %22351 = vmatmul.mubr.f32.gmra.mrb[24].mxu0 %v31582_v48 }
 0x396   : > { %22353 = vmatprep.mubr.f32.mxu0 %v31584_v7 }
 0x397   : > { %21001 = vmatmul.mubr.f32.gmra.mrb[24].mxu1 %v27905_v60  ;;  %v31591_v60 = vld [vmem:[#allocation185_spill] sm:$0xff] }
 0x398   : > { %21003 = vmatprep.mubr.f32.mxu1 %v31585_v18  ;;  %v31592_v18 = vld [vmem:[#allocation237_spill] sm:$0xff] }
 0x399   : > { %22354 = vmatmul.mubr.f32.gmra.mrb[26].mxu0 %v31420_v33 }
 0x39a   : > { %22356 = vmatprep.mubr.f32.mxu0 %v31586_v13 }
 0x39b   : > { %21004 = vmatmul.mubr.f32.gmra.mrb[26].mxu1 %v27922_v27 }
 0x39c   : > { %21006 = vmatprep.mubr.f32.mxu1 %v31589_v55  ;;  %v31593_v55 = vld [vmem:[#allocation263_spill] sm:$0xff] }
 0x39d   : > { %22357 = vmatmul.mubr.f32.gmra.mrb[28].mxu0 %v31588_v36 }
 0x39e   : > { %22359 = vmatprep.mubr.f32.mxu0 %v31590_v23 }
 0x39f   : > { %21007 = vmatmul.mubr.f32.gmra.mrb[28].mxu1 %v27939_v11 }
 0x3a0   : > { %21009 = vmatprep.mubr.f32.mxu1 %v31592_v18 }
 0x3a1   : > { %22360 = vmatmul.mubr.f32.gmra.mrb[30].mxu0 %v31591_v60 }
 0x3a2   : > { %22364 = vmatprep.mubr.f32.mxu0 %v27231_v61  ;;  %v31595_v61 = vld [vmem:[#allocation20_spill] sm:$0xff] }
 0x3a3   : > { %21010 = vmatmul.mubr.f32.gmra.mrb[30].mxu1 %v27953_v17  ;;  %v31599_v17 = vld [vmem:[#allocation25_spill] sm:$0xff] }
 0x3a4   : > { %21014 = vmatprep.mubr.f32.mxu1 %v31593_v55 }
 0x3a5   : > { %22365 = vmatmul.mubr.f32.vlgmr.msra.gmra.mrb[0].mxu0 %v31240_v57  ;;  %v31598_v57 = vld [vmem:[#allocation277_spill] sm:$0xff] }
 0x3a6   : > { %22367 = vmatprep.mubr.f32.mxu0 %v31557_v62  ;;  %22413 = vmatpush3.msra.mxu0 %v27993_v8  ;;  %v31597_v62 = vld [vmem:[#allocation168_spill] sm:$0xff] }
 0x3a7   : > { %22462 = vmatprep.subr.mxu0 %v28070_v43  ;;  %21015 = vmatmul.mubr.f32.vlgmr.msra.gmra.mrb[0].mxu1 %v31594_v54 }
 0x3a8   : > { %21063 = vmatpush3.msra.mxu1 %v27554_v32  ;;  %21017 = vmatprep.mubr.f32.mxu1 %v31595_v61  ;;  %v31600_v61 = vld [vmem:[#allocation289_spill] sm:$0xff] }
 0x3a9   : > { %22368 = vmatmul.mubr.f32.gmra.mrb[2].mxu0 %v31244_v59  ;;  %21112 = vmatprep.subr.mxu1 %v31596_v25 }
 0x3aa   : > { %22370 = vmatprep.mubr.f32.mxu0 %v31559_v47  ;;  %v31601_v47 = vld [vmem:[#allocation180_spill] sm:$0xff] }
 0x3ab   : > { %21018 = vmatmul.mubr.f32.gmra.mrb[2].mxu1 %v27724_v30 }
 0x3ac   : > { %21020 = vmatprep.mubr.f32.mxu1 %v31597_v62  ;;  %v31604_v62 = vld [vmem:[#allocation315_spill] sm:$0xff] }
 0x3ad   : > { %22371 = vmatmul.mubr.f32.gmra.mrb[4].mxu0 %v31400_v42  ;;  %v31602_v42 = vld [vmem:[#allocation295_spill] sm:$0xff] }
 0x3ae   : > { %22373 = vmatprep.mubr.f32.mxu0 %v31561_v58  ;;  %v31603_v58 = vld [vmem:[#allocation183_spill] sm:$0xff] }
 0x3af   : > { %21021 = vmatmul.mubr.f32.gmra.mrb[4].mxu1 %v31598_v57 }
 0x3b0   : > { %21023 = vmatprep.mubr.f32.mxu1 %v31599_v17  ;;  %v31712_v17 = vld [vmem:[#allocation104_spill] sm:$0xff] }
 0x3b1   : > { %22374 = vmatmul.mubr.f32.gmra.mrb[6].mxu0 %v31402_v12 }
 0x3b2   : > { %22376 = vmatprep.mubr.f32.mxu0 %v31563_v9  ;;  %v31605_v9 = vld [vmem:[#allocation188_spill] sm:$0xff] }
 0x3b3   : > { %21024 = vmatmul.mubr.f32.gmra.mrb[6].mxu1 %v31600_v61 }
 0x3b4   : > { %21026 = vmatprep.mubr.f32.mxu1 %v31601_v47  ;;  %v31607_v47 = vld [vmem:[#allocation332_spill] sm:$0xff] }
 0x3b5   : > { %22377 = vmatmul.mubr.f32.gmra.mrb[8].mxu0 %v31404_v56 }
 0x3b6   : > { %22379 = vmatprep.mubr.f32.mxu0 %v31565_v22  ;;  %v31606_v22 = vld [vmem:[#allocation74_spill] sm:$0xff] }
 0x3b7   : > { %21027 = vmatmul.mubr.f32.gmra.mrb[8].mxu1 %v31602_v42 }
 0x3b8   : > { %21029 = vmatprep.mubr.f32.mxu1 %v31603_v58  ;;  %v31711_v58 = vld [vmem:[#allocation191_spill] sm:$0xff] }
 0x3b9   : > { %22380 = vmatmul.mubr.f32.gmra.mrb[10].mxu0 %v31406_v52  ;;  %v31730_v52 = vld [vmem:[#allocation142_spill] sm:$0xff] }
 0x3ba   : > { %22382 = vmatprep.mubr.f32.mxu0 %v31567_v46  ;;  %v31608_v46 = vld [vmem:[#allocation197_spill] sm:$0xff] }
 0x3bb   : > { %21030 = vmatmul.mubr.f32.gmra.mrb[10].mxu1 %v31604_v62 }
 0x3bc   : > { %21032 = vmatprep.mubr.f32.mxu1 %v31605_v9  ;;  %v31710_v9 = vld [vmem:[#allocation99_spill] sm:$0xff] }
 0x3bd   : > { %22383 = vmatmul.mubr.f32.gmra.mrb[12].mxu0 %v31408_v51  ;;  %v31724_v51 = vld [vmem:[#allocation134_spill] sm:$0xff] }
 0x3be   : > { %22385 = vmatprep.mubr.f32.mxu0 %v31569_v1  ;;  %v31609_v1 = vld [vmem:[#allocation204_spill] sm:$0xff] }
 0x3bf   : > { %21033 = vmatmul.mubr.f32.gmra.mrb[12].mxu1 %v27814_v63 }
 0x3c0   : > { %21035 = vmatprep.mubr.f32.mxu1 %v31606_v22  ;;  %v31709_v22 = vld [vmem:[#allocation325_spill] sm:$0xff] }
 0x3c1   : > { %22386 = vmatmul.mubr.f32.gmra.mrb[14].mxu0 %v31410_v3  ;;  %v31721_v3 = vld [vmem:[#allocation262_spill] sm:$0xff] }
 0x3c2   : > { %22388 = vmatprep.mubr.f32.mxu0 %v31571_v53  ;;  %v31610_v53 = vld [vmem:[#allocation213_spill] sm:$0xff] }
 0x3c3   : > { %21036 = vmatmul.mubr.f32.gmra.mrb[14].mxu1 %v31607_v47 }
 0x3c4   : > { %21038 = vmatprep.mubr.f32.mxu1 %v31608_v46  ;;  %v31708_v46 = vld [vmem:[#allocation93_spill] sm:$0xff] }
 0x3c5   : > { %22389 = vmatmul.mubr.f32.gmra.mrb[16].mxu0 %v31412_v15  ;;  %v31720_v15 = vld [vmem:[#allocation125_spill] sm:$0xff] }
 0x3c6   : > { %22391 = vmatprep.mubr.f32.mxu0 %v31573_v37  ;;  %v31611_v37 = vld [vmem:[#allocation121_spill] sm:$0xff] }
 0x3c7   : > { %21039 = vmatmul.mubr.f32.gmra.mrb[16].mxu1 %v27852_v19 }
 0x3c8   : > { %21041 = vmatprep.mubr.f32.mxu1 %v31609_v1  ;;  %v31707_v1 = vld [vmem:[#allocation186_spill] sm:$0xff] }
 0x3c9   : > { %22392 = vmatmul.mubr.f32.gmra.mrb[18].mxu0 %v31414_v0  ;;  %v31719_v0 = vld [vmem:[#allocation209_spill] sm:$0xff] }
 0x3ca   : > { %22394 = vmatprep.mubr.f32.mxu0 %v31575_v41  ;;  %v31612_v41 = vld [vmem:[#allocation220_spill] sm:$0xff] }
 0x3cb   : > { %21042 = vmatmul.mubr.f32.gmra.mrb[18].mxu1 %v27869_v16 }
 0x3cc   : > { %21044 = vmatprep.mubr.f32.mxu1 %v31610_v53  ;;  %v31706_v53 = vld [vmem:[#allocation90_spill] sm:$0xff] }
 0x3cd   : > { %22395 = vmatmul.mubr.f32.gmra.mrb[20].mxu0 %v31576_v39  ;;  %v31718_v39 = vld [vmem:[#allocation119_spill] sm:$0xff] }
 0x3ce   : > { %22397 = vmatprep.mubr.f32.mxu0 %v31578_v14  ;;  %v31613_v14 = vld [vmem:[#allocation228_spill] sm:$0xff] }
 0x3cf   : > { %21045 = vmatmul.mubr.f32.gmra.mrb[20].mxu1 %v27888_v20 }
 0x3d0   : > { %21047 = vmatprep.mubr.f32.mxu1 %v31611_v37  ;;  %v31619_v37 = vld [vmem:[#allocation42_spill] sm:$0xff] }
 0x3d1   : > { %22398 = vmatmul.mubr.f32.gmra.mrb[22].mxu0 %v31579_v26  ;;  %v31717_v26 = vld [vmem:[#allocation253_spill] sm:$0xff] }
 0x3d2   : > { %22400 = vmatprep.mubr.f32.mxu0 %v31581_v34  ;;  %v31614_v34 = vld [vmem:[#allocation236_spill] sm:$0xff] }
 0x3d3   : > { %21048 = vmatmul.mubr.f32.gmra.mrb[22].mxu1 %v27899_v21 }
 0x3d4   : > { %21050 = vmatprep.mubr.f32.mxu1 %v31612_v41  ;;  %v31616_v41 = vld [vmem:[#allocation31_spill] sm:$0xff] }
 0x3d5   : > { %22401 = vmatmul.mubr.f32.gmra.mrb[24].mxu0 %v31582_v48  ;;  %v31716_v48 = vld [vmem:[#allocation114_spill] sm:$0xff] }
 0x3d6   : > { %22403 = vmatprep.mubr.f32.mxu0 %v31584_v7  ;;  %v31615_v7 = vld [vmem:[#allocation241_spill] sm:$0xff] }
 0x3d7   : > { %21051 = vmatmul.mubr.f32.gmra.mrb[24].mxu1 %v27920_v6 }
 0x3d8   : > { %21053 = vmatprep.mubr.f32.mxu1 %v31613_v14  ;;  %v31617_v14 = vld [vmem:[#allocation36_spill] sm:$0xff] }
 0x3d9   : > { %22404 = vmatmul.mubr.f32.gmra.mrb[26].mxu0 %v31420_v33  ;;  %v31715_v33 = vld [vmem:[#allocation201_spill] sm:$0xff] }
 0x3da   : > { %22406 = vmatprep.mubr.f32.mxu0 %v31586_v13  ;;  %v31618_v13 = vand.u32 4294901760, %v31593_v55  ;;  %v31624_v55 = vand.u32 4294901760, %v27724_v30  ;;  %v31633_v30 = vld [vmem:[#allocation79_spill] sm:$0xff] }
 0x3db   : > { %21054 = vmatmul.mubr.f32.gmra.mrb[26].mxu1 %v27937_v35 }
 0x3dc   : > { %21056 = vmatprep.mubr.f32.mxu1 %v31614_v34  ;;  %v31705_v34 = vld [vmem:[#allocation310_spill] sm:$0xff] }
 0x3dd   : > { %22407 = vmatmul.mubr.f32.gmra.mrb[28].mxu0 %v31588_v36  ;;  %v31714_v36 = vld [vmem:[#allocation107_spill] sm:$0xff] }
 0x3de   : > { %22409 = vmatprep.mubr.f32.mxu0 %v31590_v23  ;;  %v31620_v23 = vand.u32 4294901760, %v31594_v54  ;;  %v31628_v54 = vand.u32 4294901760, %v31598_v57  ;;  %v31636_v57 = vand.u32 4294901760, %v31602_v42  ;;  %v31644_v42 = vand.u32 4294901760, %v27814_v63  ;;  %v31654_v63 = vld [vmem:[#allocation124_spill] sm:$0xff] }
 0x3df   : > { %21057 = vmatmul.mubr.f32.gmra.mrb[28].mxu1 %v27951_v5 }
 0x3e0   : > { %21059 = vmatprep.mubr.f32.mxu1 %v31615_v7  ;;  %v31623_v7 = vld [vmem:[#allocation57_spill] sm:$0xff] }
 0x3e1   : > { %22410 = vmatmul.mubr.f32.gmra.mrb[30].mxu0 %v31591_v60  ;;  %v31621_v60 = vld [vmem:[#allocation51_spill] sm:$0xff] }
 0x3e2   : > { %22414 = vmatprep.mubr.f32.mxu0 %v31616_v41  ;;  %v31622_v41 = vld [vmem:[#allocation167_spill] sm:$0xff] }
 0x3e3   : > { %21060 = vmatmul.mubr.f32.gmra.mrb[30].mxu1 %v27964_v24 }
 0x3e4   : > { %21064 = vmatprep.mubr.f32.mxu1 %v31618_v13  ;;  %v31625_v13 = vld [vmem:[#allocation61_spill] sm:$0xff] }
 0x3e5   : > { %22415 = vmatmul.mubr.f32.vlgmr.msra.gmra.mrb[0].mxu0 %v31617_v14  ;;  %v31652_v14 = vld [vmem:[#allocation118_spill] sm:$0xff] }
 0x3e6   : > { %22417 = vmatprep.mubr.f32.mxu0 %v31619_v37  ;;  %22463 = vmatpush3.msra.mxu0 %v28070_v43  ;;  %v31626_v43 = vld [vmem:[#allocation169_spill] sm:$0xff] }
 0x3e7   : > { %22512 = vmatprep.subr.mxu0 %v28051_v2  ;;  %21065 = vmatmul.mubr.f32.vlgmr.msra.gmra.mrb[0].mxu1 %v31620_v23  ;;  %v31627_v37 = vld [vmem:[#allocation65_spill] sm:$0xff] }
 0x3e8   : > { %21113 = vmatpush3.msra.mxu1 %v31596_v25  ;;  %21067 = vmatprep.mubr.f32.mxu1 %v31622_v41  ;;  %v31629_v25 = vld [vmem:[#allocation72_spill] sm:$0xff]  ;;  %v31630_v41 = vld [vmem:[#allocation34_spill] sm:$0xff]  ;;  %v31631_v23 = vld [vmem:[#allocation77_spill] sm:$0xff] }
 0x3e9   : > { %22418 = vmatmul.mubr.f32.gmra.mrb[2].mxu0 %v31621_v60  ;;  %21162 = vmatprep.subr.mxu1 %v27554_v32  ;;  %v24757_v60 = vld [vmem:[%s24839_s21 + $0x118] sm:$0xff] }
 0x3ea   : > { %22420 = vmatprep.mubr.f32.mxu0 %v31623_v7  ;;  %v31632_v7 = vand.u32 4294901760, %v31600_v61  ;;  %v31641_v61 = vld [vmem:[#allocation98_spill] sm:$0xff] }
 0x3eb   : > { %21068 = vmatmul.mubr.f32.gmra.mrb[2].mxu1 %v31624_v55  ;;  %v31634_v55 = vld [vmem:[#allocation59_spill] sm:$0xff] }
 0x3ec   : > { %21070 = vmatprep.mubr.f32.mxu1 %v31626_v43  ;;  %v31704_v43 = vld [vmem:[#allocation86_spill] sm:$0xff] }
 0x3ed   : > { %22421 = vmatmul.mubr.f32.gmra.mrb[4].mxu0 %v31625_v13  ;;  %v31635_v13 = vld [vmem:[#allocation82_spill] sm:$0xff] }
 0x3ee   : > { %22423 = vmatprep.mubr.f32.mxu0 %v31627_v37  ;;  %v31639_v37 = vld [vmem:[#allocation92_spill] sm:$0xff] }
 0x3ef   : > { %21071 = vmatmul.mubr.f32.gmra.mrb[4].mxu1 %v31628_v54  ;;  %v31637_v54 = vld [vmem:[#allocation89_spill] sm:$0xff] }
 0x3f0   : > { %21073 = vmatprep.mubr.f32.mxu1 %v31630_v41 }
 0x3f1   : > { %22424 = vmatmul.mubr.f32.gmra.mrb[6].mxu0 %v31629_v25  ;;  %v31638_v25 = vld [vmem:[#allocation187_spill] sm:$0xff] }
 0x3f2   : > { %22426 = vmatprep.mubr.f32.mxu0 %v31631_v23  ;;  %v31640_v23 = vand.u32 4294901760, %v31604_v62 }
 0x3f3   : > { %21074 = vmatmul.mubr.f32.gmra.mrb[6].mxu1 %v31632_v7  ;;  %v31642_v7 = vld [vmem:[#allocation194_spill] sm:$0xff] }
 0x3f4   : > { %21076 = vmatprep.mubr.f32.mxu1 %v31634_v55 }
 0x3f5   : > { %22427 = vmatmul.mubr.f32.gmra.mrb[8].mxu0 %v31633_v30  ;;  %v31643_v30 = vld [vmem:[#allocation106_spill] sm:$0xff] }
 0x3f6   : > { %22429 = vmatprep.mubr.f32.mxu0 %v31635_v13  ;;  %v14579_v13 = vrot.slane %v24757_v60, 1  ;;  %v31653_v60 = vld [vmem:[#allocation75_spill] sm:$0xff] }
 0x3f7   : > { %21077 = vmatmul.mubr.f32.gmra.mrb[8].mxu1 %v31636_v57  ;;  %v207_v57 = vld [vmem:[%s24839_s21 + $0x120] sm:$0x3] }
 0x3f8   : > { %21079 = vmatprep.mubr.f32.mxu1 %v31638_v25  ;;  %v31646_v25 = vld [vmem:[#allocation200_spill] sm:$0xff]  ;;  %v14581_v62 = vrot.slane %v207_v57, 1  ;;  %v31657_v57 = vld [vmem:[#allocation127_spill] sm:$0xff] }
 0x3f9   : > { %22430 = vmatmul.mubr.f32.gmra.mrb[10].mxu0 %v31637_v54  ;;  %v31645_v54 = vld [vmem:[#allocation111_spill] sm:$0xff] }
 0x3fa   : > { %22432 = vmatprep.mubr.f32.mxu0 %v31639_v37  ;;  %v31647_v37 = vld [vmem:[#allocation113_spill] sm:$0xff] }
 0x3fb   : > { %21080 = vmatmul.mubr.f32.gmra.mrb[10].mxu1 %v31640_v23  ;;  %v31648_v23 = vand.u32 4294901760, %v31607_v47  ;;  %v31658_v47 = vld [vmem:[#allocation206_spill] sm:$0xff] }
 0x3fc   : > { %21082 = vmatprep.mubr.f32.mxu1 %v31642_v7 }
 0x3fd   : > { %22433 = vmatmul.mubr.f32.gmra.mrb[12].mxu0 %v31641_v61  ;;  %v31649_v61 = vld [vmem:[#allocation137_spill] sm:$0xff] }
 0x3fe   : > { %22435 = vmatprep.mubr.f32.mxu0 %v31643_v30  ;;  %v31650_v7 = vrot.slane %v31649_v61, 1  ;;  %v31713_v61 = vld [vmem:[#allocation336_spill] sm:$0xff] }
 0x3ff   : > { %21083 = vmatmul.mubr.f32.gmra.mrb[12].mxu1 %v31644_v42 }
 0x400   : > { %21085 = vmatprep.mubr.f32.mxu1 %v31646_v25  ;;  %v14580_v30 = vsel %vm31651_vm3, %v31650_v7, %v14579_v13  ;;  %v31677_v25 = vld [vmem:[#allocation159_spill] sm:$0xff] }
 0x401   : > { %22436 = vmatmul.mubr.f32.gmra.mrb[14].mxu0 %v31645_v54  ;;  %v14583_v42 = vsel %vm951_vm2, %v14580_v30, 0  ;;  %v14582_v54 = vsel %vm31655_vm4, %v14579_v13, %v14581_v62  ;;  %v31663_v30 = vld [vmem:[#allocation216_spill] sm:$0xff]  ;;  %v31666_v62 = vand.u32 4294901760, %v27888_v20  ;;  %v31674_v20 = vld [vmem:[#allocation226_spill] sm:$0xff] }
 0x402   : > { %22438 = vmatprep.mubr.f32.mxu0 %v31647_v37  ;;  %v31656_v37 = vand.u32 4294901760, %v27852_v19  ;;  %v28201_v7 = vand.u32 4294901760, %v14583_v42  ;;  %v31665_v19 = vld [vmem:[#allocation144_spill] sm:$0xff] }
 0x403   : > { %21086 = vmatmul.mubr.f32.gmra.mrb[14].mxu1 %v31648_v23  ;;  %v31659_v23 = vld [vmem:[#allocation131_spill] sm:$0xff] }
 0x404   : > { %21088 = vmatprep.mubr.f32.mxu1 %v31653_v60  ;;  %31660 = vst [vmem:[#allocation299_spill] sm:$0xff] %v28201_v7  ;;  %v31661_v60 = vand.u32 4294901760, %v27869_v16 }
 0x405   : > { %22439 = vmatmul.mubr.f32.gmra.mrb[16].mxu0 %v31652_v14  ;;  %v14585_v14 = vsel %vm951_vm2, %v14582_v54, 0  ;;  %v31668_v54 = vld [vmem:[#allocation224_spill] sm:$0xff] }
 0x406   : > { %22441 = vmatprep.mubr.f32.mxu0 %v31654_v63  ;;  %v31662_v63 = vld [vmem:[#allocation139_spill] sm:$0xff]  ;;  %v28208_v13 = vand.u32 4294901760, %v14585_v14 }
 0x407   : > { %21089 = vmatmul.mubr.f32.gmra.mrb[16].mxu1 %v31656_v37  ;;  %v28212_v37 = vsub.f32 %v14583_v42, %v28201_v7  ;;  %v31672_v42 = vand.u32 4294901760, %v27899_v21  ;;  %v31679_v21 = vand.u32 4294901760, %v27920_v6  ;;  %v31684_v6 = vld [vmem:[#allocation240_spill] sm:$0xff] }
 0x408   : > { %21091 = vmatprep.mubr.f32.mxu1 %v31658_v47  ;;  %31664 = vst [vmem:[#allocation307_spill] sm:$0xff] %v28208_v13  ;;  %v28219_v16 = vsub.f32 %v14585_v14, %v28208_v13  ;;  %v31673_v47 = vld [vmem:[#allocation157_spill] sm:$0xff] }
 0x409   : > { %22442 = vmatmul.mubr.f32.gmra.mrb[18].mxu0 %v31657_v57  ;;  %v31671_v57 = vld [vmem:[#allocation154_spill] sm:$0xff] }
 0x40a   : > { %22444 = vmatprep.mubr.f32.mxu0 %v31659_v23  ;;  %v31667_v23 = vld [vmem:[#allocation149_spill] sm:$0xff]  ;;  %v30500_v14 = vand.u32 4294901760, %v28219_v16 }
 0x40b   : > { %21092 = vmatmul.mubr.f32.gmra.mrb[18].mxu1 %v31661_v60  ;;  %v31669_v60 = vld [vmem:[#allocation152_spill] sm:$0xff] }
 0x40c   : > { %21094 = vmatprep.mubr.f32.mxu1 %v31663_v30  ;;  %v14969_v41 = vsub.f32 %v28219_v16, %v30500_v14  ;;  %v18520_v14 = vld [vmem:[%s29579_s1 + $0xc] sm:$0x7] }
 0x40d   : > { %22445 = vmatmul.mubr.f32.gmra.mrb[20].mxu0 %v31662_v63  ;;  %v31670_v63 = vld [vmem:[#allocation156_spill] sm:$0xff] }
 0x40e   : > { %22447 = vmatprep.mubr.f32.mxu0 %v31665_v19  ;;  %v9239_v30 = vsub.f32 %v31671_v57, %v31670_v63  ;;  %v30499_v19 = vand.u32 4294901760, %v28212_v37 }
 0x40f   : > { %21095 = vmatmul.mubr.f32.gmra.mrb[20].mxu1 %v31666_v62  ;;  %v31675_v62 = vld [vmem:[#allocation158_spill] sm:$0xff] }
 0x410   : > { %21097 = vmatprep.mubr.f32.mxu1 %v31668_v54  ;;  %v14959_v55 = vsub.f32 %v28212_v37, %v30499_v19  ;;  %v31685_v19 = vand.u32 4294901760, %v27951_v5  ;;  %v31690_v5 = vld [vmem:[#allocation23_spill] sm:$0xff] }
 0x411   : > { %22448 = vmatmul.mubr.f32.gmra.mrb[22].mxu0 %v31667_v23  ;;  %v31676_v23 = vld [vmem:[#allocation155_spill] sm:$0xff] }
 0x412   : > { %22450 = vmatprep.mubr.f32.mxu0 %v31669_v60  ;;  %v9249_v54 = vsub.f32 %v31676_v23, %v31675_v62  ;;  %v28233_v60 = vand.u32 4294901760, %v9239_v30  ;;  %v14960_v30 = vand.u32 4294901760, %v14959_v55  ;;  %v31687_v55 = vld [vmem:[#allocation15_spill] sm:$0xff] }
 0x413   : > { %21098 = vmatmul.mubr.f32.gmra.mrb[22].mxu1 %v31672_v42  ;;  %v31680_v42 = vld [vmem:[#allocation160_spill] sm:$0xff] }
 0x414   : > { %21100 = vmatprep.mubr.f32.mxu1 %v31674_v20  ;;  %31678 = vst [vmem:[#allocation312_spill] sm:$0xff] %v28233_v60  ;;  %v28242_v20 = vand.u32 4294901760, %v9249_v54  ;;  %v31686_v54 = vld [vmem:[#allocation245_spill] sm:$0xff] }
 0x415   : > { %22451 = vmatmul.mubr.f32.gmra.mrb[24].mxu0 %v31673_v47  ;;  %v31681_v47 = vld [vmem:[#allocation233_spill] sm:$0xff] }
 0x416   : > { %22453 = vmatprep.mubr.f32.mxu0 %v31677_v25  ;;  %31682 = vst [vmem:[#allocation318_spill] sm:$0xff] %v28242_v20  ;;  %v31683_v25 = vand.u32 4294901760, %v27937_v35  ;;  %v31688_v35 = vand.u32 4294901760, %v27964_v24  ;;  %v31691_v24 = vld [vmem:[#allocation33_spill] sm:$0xff] }
 0x417   : > { %21101 = vmatmul.mubr.f32.gmra.mrb[24].mxu1 %v31679_v21  ;;  %v14970_v21 = vand.u32 4294901760, %v14969_v41 }
 0x418   : > { %21103 = vmatprep.mubr.f32.mxu1 %v31681_v47  ;;  %v31703_v47 = vld [vmem:[#allocation184_spill] sm:$0xff] }
 0x419   : > { %22454 = vmatmul.mubr.f32.gmra.mrb[26].mxu0 %v31680_v42  ;;  %v31700_v42 = vld [vmem:[#allocation73_spill] sm:$0xff] }
 0x41a   : > { %22456 = vmatprep.mubr.f32.mxu0 %v28233_v60  ;;  %v31699_v60 = vld [vmem:[#allocation70_spill] sm:$0xff] }
 0x41b   : > { %21104 = vmatmul.mubr.f32.gmra.mrb[26].mxu1 %v31683_v25  ;;  %v7042_v25 = vsel %vm1016_vm0, %v18520_v14, 0  ;;  %v31693_v14 = vld [vmem:[#allocation39_spill] sm:$0xff] }
 0x41c   : > { %21106 = vmatprep.mubr.f32.mxu1 %v31684_v6  ;;  %v28266_v41 = vand.u32 4294901760, %v7042_v25  ;;  %v31702_v6 = vld [vmem:[#allocation80_spill] sm:$0xff] }
 0x41d   : > { %22457 = vmatmul.mubr.f32.gmra.mrb[28].mxu0 %v28242_v20  ;;  %v31689_v20 = vld [vmem:[#allocation19_spill] sm:$0xff] }
 0x41e   : > { %22459 = vmatprep.mubr.f32.mxu0 %v14960_v30  ;;  %v31695_v30 = vld [vmem:[#allocation52_spill] sm:$0xff] }
 0x41f   : > { %21107 = vmatmul.mubr.f32.gmra.mrb[28].mxu1 %v31685_v19  ;;  %v31692_v19 = vld [vmem:[#allocation38_spill] sm:$0xff] }
 0x420   : > { %21109 = vmatprep.mubr.f32.mxu1 %v31686_v54  ;;  %v31701_v54 = vld [vmem:[#allocation301_spill] sm:$0xff] }
 0x421   : > { %22460 = vmatmul.mubr.f32.gmra.mrb[30].mxu0 %v14970_v21  ;;  %v31697_v21 = vld [vmem:[#allocation58_spill] sm:$0xff] }
 0x422   : > { %22464 = vmatprep.mubr.f32.mxu0 %v31687_v55 }
 0x423   : > { %21110 = vmatmul.mubr.f32.gmra.mrb[30].mxu1 %v31688_v35  ;;  %v31698_v35 = vld [vmem:[#allocation62_spill] sm:$0xff] }
 0x424   : > { %21114 = vmatprep.mubr.f32.mxu1 %v27689_v4 }
 0x425   : > { %22465 = vmatmul.mubr.f32.vlgmr.msra.gmra.mrb[0].mxu0 %v31689_v20 }
 0x426   : > { %22467 = vmatprep.mubr.f32.mxu0 %v31690_v5  ;;  %22513 = vmatpush3.msra.mxu0 %v28051_v2  ;;  %v31694_v2 = vld [vmem:[#allocation46_spill] sm:$0xff] }
 0x427   : > { %22562 = vmatprep.subr.mxu0 %v27993_v8  ;;  %21115 = vmatmul.mubr.f32.vlgmr.msra.gmra.mrb[0].mxu1 %v27697_v29 }
 0x428   : > { %21163 = vmatpush3.msra.mxu1 %v27554_v32  ;;  %21117 = vmatprep.mubr.f32.mxu1 %v31558_v45  ;;  %v31696_v32 = vld [vmem:[#allocation54_spill] sm:$0xff] }
 0x429   : > { %22468 = vmatmul.mubr.f32.gmra.mrb[2].mxu0 %v31691_v24  ;;  %21212 = vmatprep.subr.mxu1 %v28266_v41 }
 0x42a   : > { %22470 = vmatprep.mubr.f32.mxu0 %v31692_v19 }
 0x42b   : > { %21118 = vmatmul.mubr.f32.gmra.mrb[2].mxu1 %v27709_v44 }
 0x42c   : > { %21120 = vmatprep.mubr.f32.mxu1 %v31560_v40 }
 0x42d   : > { %22471 = vmatmul.mubr.f32.gmra.mrb[4].mxu0 %v31693_v14 }
 0x42e   : > { %22473 = vmatprep.mubr.f32.mxu0 %v31694_v2 }
 0x42f   : > { %21121 = vmatmul.mubr.f32.gmra.mrb[4].mxu1 %v27726_v28 }
 0x430   : > { %21123 = vmatprep.mubr.f32.mxu1 %v31562_v49 }
 0x431   : > { %22474 = vmatmul.mubr.f32.gmra.mrb[6].mxu0 %v31695_v30 }
 0x432   : > { %22476 = vmatprep.mubr.f32.mxu0 %v31696_v32 }
 0x433   : > { %21124 = vmatmul.mubr.f32.gmra.mrb[6].mxu1 %v27748_v10 }
 0x434   : > { %21126 = vmatprep.mubr.f32.mxu1 %v31564_v50 }
 0x435   : > { %22477 = vmatmul.mubr.f32.gmra.mrb[8].mxu0 %v31697_v21 }
 0x436   : > { %22479 = vmatprep.mubr.f32.mxu0 %v31698_v35 }
 0x437   : > { %21127 = vmatmul.mubr.f32.gmra.mrb[8].mxu1 %v27766_v38 }
 0x438   : > { %21129 = vmatprep.mubr.f32.mxu1 %v31566_v31 }
 0x439   : > { %22480 = vmatmul.mubr.f32.gmra.mrb[10].mxu0 %v31699_v60 }
 0x43a   : > { %22482 = vmatprep.mubr.f32.mxu0 %v31700_v42 }
 0x43b   : > { %21130 = vmatmul.mubr.f32.gmra.mrb[10].mxu1 %v31701_v54 }
 0x43c   : > { %21132 = vmatprep.mubr.f32.mxu1 %v31703_v47 }
 0x43d   : > { %22483 = vmatmul.mubr.f32.gmra.mrb[12].mxu0 %v31702_v6 }
 0x43e   : > { %22485 = vmatprep.mubr.f32.mxu0 %v31704_v43  ;;  %v31732_v43 = vld [vmem:[#allocation150_spill] sm:$0xff] }
 0x43f   : > { %21133 = vmatmul.mubr.f32.gmra.mrb[12].mxu1 %v31705_v34 }
 0x440   : > { %21135 = vmatprep.mubr.f32.mxu1 %v31707_v1 }
 0x441   : > { %22486 = vmatmul.mubr.f32.gmra.mrb[14].mxu0 %v31706_v53  ;;  %v31728_v53 = vld [vmem:[#allocation140_spill] sm:$0xff] }
 0x442   : > { %22488 = vmatprep.mubr.f32.mxu0 %v31708_v46  ;;  %v31726_v46 = vld [vmem:[#allocation136_spill] sm:$0xff] }
 0x443   : > { %21136 = vmatmul.mubr.f32.gmra.mrb[14].mxu1 %v31709_v22 }
 0x444   : > { %21138 = vmatprep.mubr.f32.mxu1 %v31711_v58 }
 0x445   : > { %22489 = vmatmul.mubr.f32.gmra.mrb[16].mxu0 %v31710_v9  ;;  %v31722_v9 = vld [vmem:[#allocation126_spill] sm:$0xff] }
 0x446   : > { %22491 = vmatprep.mubr.f32.mxu0 %v31712_v17  ;;  %v31723_v17 = vld [vmem:[#allocation215_spill] sm:$0xff] }
 0x447   : > { %21139 = vmatmul.mubr.f32.gmra.mrb[16].mxu1 %v31713_v61 }
 0x448   : > { %21141 = vmatprep.mubr.f32.mxu1 %v31715_v33 }
 0x449   : > { %22492 = vmatmul.mubr.f32.gmra.mrb[18].mxu0 %v31714_v36  ;;  %v31725_v36 = vld [vmem:[#allocation269_spill] sm:$0xff] }
 0x44a   : > { %22494 = vmatprep.mubr.f32.mxu0 %v31716_v48  ;;  %v31727_v48 = vld [vmem:[#allocation218_spill] sm:$0xff] }
 0x44b   : > { %21142 = vmatmul.mubr.f32.gmra.mrb[18].mxu1 %v31717_v26 }
 0x44c   : > { %21144 = vmatprep.mubr.f32.mxu1 %v31719_v0 }
 0x44d   : > { %22495 = vmatmul.mubr.f32.gmra.mrb[20].mxu0 %v31718_v39  ;;  %v31729_v39 = vld [vmem:[#allocation272_spill] sm:$0xff] }
 0x44e   : > { %22497 = vmatprep.mubr.f32.mxu0 %v31720_v15  ;;  %v31731_v15 = vld [vmem:[#allocation225_spill] sm:$0xff] }
 0x44f   : > { %21145 = vmatmul.mubr.f32.gmra.mrb[20].mxu1 %v31721_v3 }
 0x450   : > { %21147 = vmatprep.mubr.f32.mxu1 %v31723_v17 }
 0x451   : > { %22498 = vmatmul.mubr.f32.gmra.mrb[22].mxu0 %v31722_v9  ;;  %v28324_v9 = vsub.f32 %v7042_v25, %v28266_v41 }
 0x452   : > { %22500 = vmatprep.mubr.f32.mxu0 %v31724_v51  ;;  %v31733_v51 = vld [vmem:[#allocation153_spill] sm:$0xff] }
 0x453   : > { %21148 = vmatmul.mubr.f32.gmra.mrb[22].mxu1 %v31725_v36 }
 0x454   : > { %21150 = vmatprep.mubr.f32.mxu1 %v31727_v48 }
 0x455   : > { %22501 = vmatmul.mubr.f32.gmra.mrb[24].mxu0 %v31726_v46  ;;  %v31734_v46 = vld [vmem:[#allocation231_spill] sm:$0xff] }
 0x456   : > { %22503 = vmatprep.mubr.f32.mxu0 %v31728_v53  ;;  %v28331_v53 = vand.u32 4294901760, %v28324_v9 }
 0x457   : > { %21151 = vmatmul.mubr.f32.gmra.mrb[24].mxu1 %v31729_v39 }
 0x458   : > { %21153 = vmatprep.mubr.f32.mxu1 %v31731_v15  ;;  %31735 = vst [vmem:[#allocation326_spill] sm:$0xff] %v28331_v53  ;;  %v7434_v25 = vsub.f32 %v28324_v9, %v28331_v53  ;;  %v31742_v53 = vld [vmem:[#allocation44_spill] sm:$0xff] }
 0x459   : > { %22504 = vmatmul.mubr.f32.gmra.mrb[26].mxu0 %v31730_v52  ;;  %v31737_v52 = vld [vmem:[#allocation279_spill] sm:$0xff] }
 0x45a   : > { %22506 = vmatprep.mubr.f32.mxu0 %v31732_v43  ;;  %v31736_v43 = vld [vmem:[#allocation18_spill] sm:$0xff]  ;;  %v28344_v6 = vand.u32 4294901760, %v7434_v25  ;;  %v31744_v25 = vld [vmem:[#allocation49_spill] sm:$0xff] }
 0x45b   : > { %21154 = vmatmul.mubr.f32.gmra.mrb[26].mxu1 %v27922_v27 }
 0x45c   : > { %21156 = vmatprep.mubr.f32.mxu1 %v31734_v46 }
 0x45d   : > { %22507 = vmatmul.mubr.f32.gmra.mrb[28].mxu0 %v31733_v51  ;;  %v31738_v51 = vld [vmem:[#allocation22_spill] sm:$0xff] }
 0x45e   : > { %22509 = vmatprep.mubr.f32.mxu0 %v28201_v7  ;;  %v31739_v7 = vld [vmem:[#allocation29_spill] sm:$0xff] }
 0x45f   : > { %21157 = vmatmul.mubr.f32.gmra.mrb[28].mxu1 %v27939_v11 }
 0x460   : > { %21159 = vmatprep.mubr.f32.mxu1 %v31592_v18 }
 0x461   : > { %22510 = vmatmul.mubr.f32.gmra.mrb[30].mxu0 %v28208_v13  ;;  %v31740_v13 = vld [vmem:[#allocation288_spill] sm:$0xff] }
 0x462   : > { %22514 = vmatprep.mubr.f32.mxu0 %v31736_v43  ;;  %v31741_v43 = vld [vmem:[#allocation37_spill] sm:$0xff] }
 0x463   : > { %21160 = vmatmul.mubr.f32.gmra.mrb[30].mxu1 %v31737_v52 }
 0x464   : > { %21164 = vmatprep.mubr.f32.mxu1 %v27689_v4  ;;  %v31743_v4 = vld [vmem:[#allocation45_spill] sm:$0xff] }
 0x465   : > { %22515 = vmatmul.mubr.f32.vlgmr.msra.gmra.mrb[0].mxu0 %v31738_v51 }
 0x466   : > { %22517 = vmatprep.mubr.f32.mxu0 %v31739_v7  ;;  %22563 = vmatpush3.msra.mxu0 %v27993_v8 }
 0x467   : > { %22612 = vmatprep.subr.mxu0 %v31740_v13  ;;  %21165 = vmatmul.mubr.f32.vlgmr.msra.gmra.mrb[0].mxu1 %v27697_v29  ;;  %v31745_v29 = vld [vmem:[#allocation56_spill] sm:$0xff] }
 0x468   : > { %21213 = vmatpush3.msra.mxu1 %v28266_v41  ;;  %21167 = vmatprep.mubr.f32.mxu1 %v31558_v45  ;;  %v31747_v45 = vld [vmem:[#allocation64_spill] sm:$0xff] }
 0x469   : > { %22518 = vmatmul.mubr.f32.gmra.mrb[2].mxu0 %v31741_v43  ;;  %21262 = vmatprep.subr.mxu1 %v28344_v6  ;;  %v31746_v43 = vld [vmem:[#allocation60_spill] sm:$0xff] }
 0x46a   : > { %22520 = vmatprep.mubr.f32.mxu0 %v31742_v53  ;;  %v31776_v53 = vld [vmem:[#allocation28_spill] sm:$0xff] }
 0x46b   : > { %21168 = vmatmul.mubr.f32.gmra.mrb[2].mxu1 %v27709_v44  ;;  %v31748_v44 = vld [vmem:[#allocation67_spill] sm:$0xff] }
 0x46c   : > { %21170 = vmatprep.mubr.f32.mxu1 %v31560_v40  ;;  %v31830_v40 = vld [vmem:[#allocation115_spill] sm:$0xff] }
 0x46d   : > { %22521 = vmatmul.mubr.f32.gmra.mrb[4].mxu0 %v31743_v4  ;;  %v31749_v4 = vld [vmem:[#allocation76_spill] sm:$0xff] }
 0x46e   : > { %22523 = vmatprep.mubr.f32.mxu0 %v31744_v25 }
 0x46f   : > { %21171 = vmatmul.mubr.f32.gmra.mrb[4].mxu1 %v27726_v28  ;;  %v31750_v28 = vld [vmem:[#allocation78_spill] sm:$0xff] }
 0x470   : > { %21173 = vmatprep.mubr.f32.mxu1 %v31562_v49 }
 0x471   : > { %22524 = vmatmul.mubr.f32.gmra.mrb[6].mxu0 %v31745_v29  ;;  %v31751_v29 = vld [vmem:[#allocation84_spill] sm:$0xff] }
 0x472   : > { %22526 = vmatprep.mubr.f32.mxu0 %v31746_v43 }
 0x473   : > { %21174 = vmatmul.mubr.f32.gmra.mrb[6].mxu1 %v27748_v10  ;;  %v31752_v10 = vld [vmem:[#allocation91_spill] sm:$0xff] }
 0x474   : > { %21176 = vmatprep.mubr.f32.mxu1 %v31564_v50 }
 0x475   : > { %22527 = vmatmul.mubr.f32.gmra.mrb[8].mxu0 %v31747_v45 }
 0x476   : > { %22529 = vmatprep.mubr.f32.mxu0 %v31748_v44  ;;  %v31753_v44 = vld [vmem:[#allocation95_spill] sm:$0xff] }
 0x477   : > { %21177 = vmatmul.mubr.f32.gmra.mrb[8].mxu1 %v27766_v38  ;;  %v31754_v38 = vld [vmem:[#allocation97_spill] sm:$0xff] }
 0x478   : > { %21179 = vmatprep.mubr.f32.mxu1 %v31566_v31 }
 0x479   : > { %22530 = vmatmul.mubr.f32.gmra.mrb[10].mxu0 %v31749_v4  ;;  %v31763_v4 = vld [vmem:[#allocation130_spill] sm:$0xff] }
 0x47a   : > { %22532 = vmatprep.mubr.f32.mxu0 %v31750_v28  ;;  %v31755_v28 = vld [vmem:[#allocation102_spill] sm:$0xff] }
 0x47b   : > { %21180 = vmatmul.mubr.f32.gmra.mrb[10].mxu1 %v31701_v54  ;;  %v31756_v54 = vld [vmem:[#allocation110_spill] sm:$0xff] }
 0x47c   : > { %21182 = vmatprep.mubr.f32.mxu1 %v31703_v47  ;;  %v31818_v47 = vld [vmem:[#allocation311_spill] sm:$0xff] }
 0x47d   : > { %22533 = vmatmul.mubr.f32.gmra.mrb[12].mxu0 %v31751_v29 }
 0x47e   : > { %22535 = vmatprep.mubr.f32.mxu0 %v31752_v10  ;;  %v31757_v10 = vld [vmem:[#allocation112_spill] sm:$0xff] }
 0x47f   : > { %21183 = vmatmul.mubr.f32.gmra.mrb[12].mxu1 %v31705_v34  ;;  %v31758_v34 = vld [vmem:[#allocation117_spill] sm:$0xff] }
 0x480   : > { %21185 = vmatprep.mubr.f32.mxu1 %v31707_v1 }
 0x481   : > { %22536 = vmatmul.mubr.f32.gmra.mrb[14].mxu0 %v31753_v44  ;;  %v24758_v44 = vld [vmem:[%s24839_s21 + $0x10] sm:$0xff] }
 0x482   : > { %22538 = vmatprep.mubr.f32.mxu0 %v31754_v38  ;;  %v24760_v38 = vld [vmem:[%s24839_s21 + $0x30] sm:$0xff] }
 0x483   : > { %21186 = vmatmul.mubr.f32.gmra.mrb[14].mxu1 %v31709_v22  ;;  %v6911_v22 = vsel %vm657_vm15, %v24758_v44, 0.0  ;;  %v31764_v44 = vld [vmem:[#allocation138_spill] sm:$0xff] }
 0x484   : > { %21188 = vmatprep.mubr.f32.mxu1 %v31711_v58 }
 0x485   : > { %22539 = vmatmul.mubr.f32.gmra.mrb[16].mxu0 %v31755_v28  ;;  %v31760_v28 = vld [vmem:[#allocation123_spill] sm:$0xff] }
 0x486   : > { %22541 = vmatprep.mubr.f32.mxu0 %v31756_v54  ;;  %v31761_v54 = vld [vmem:[#allocation129_spill] sm:$0xff] }
 0x487   : > { %21189 = vmatmul.mubr.f32.gmra.mrb[16].mxu1 %v31713_v61  ;;  %v6946_v61 = vsel %vm951_vm2, %v6911_v22, 0 }
 0x488   : > { %21191 = vmatprep.mubr.f32.mxu1 %v31715_v33  ;;  %v31805_v33 = vld [vmem:[#allocation304_spill] sm:$0xff] }
 0x489   : > { %22542 = vmatmul.mubr.f32.gmra.mrb[18].mxu0 %v31757_v10  ;;  %v24759_v10 = vld [vmem:[%s24839_s21 + $0x20] sm:$0xff] }
 0x48a   : > { %22544 = vmatprep.mubr.f32.mxu0 %v31758_v34  ;;  %v6913_v34 = vsel %vm659_vm1, %v24759_v10, 0.0 }
 0x48b   : > { %21192 = vmatmul.mubr.f32.gmra.mrb[18].mxu1 %v31717_v26  ;;  %v28399_v26 = vand.u32 4294901760, %v6946_v61  ;;  %v6952_v22 = vsel %vm951_vm2, %v6913_v34, 0 }
 0x48c   : > { %21194 = vmatprep.mubr.f32.mxu1 %v31719_v0  ;;  %v31803_v0 = vld [vmem:[#allocation296_spill] sm:$0xff] }
 0x48d   : > { %22545 = vmatmul.mubr.f32.gmra.mrb[20].mxu0 %v31760_v28  ;;  %v28410_v29 = vsub.f32 %v6946_v61, %v28399_v26  ;;  %v24761_v28 = vld [vmem:[%s24839_s21 + $0x40] sm:$0xff]  ;;  %vm31804_vm1 = vcmp.ge.s32.totalorder %v31803_v0, 0 }
 0x48e   : > { %22547 = vmatprep.mubr.f32.mxu0 %v31761_v54  ;;  %v6915_v54 = vsel %vm661_vm14, %v24760_v38, 0.0  ;;  %v6917_v34 = vsel %vm663_vm13, %v24761_v28, 0.0  ;;  %v24762_v38 = vld [vmem:[%s24839_s21 + $0x50] sm:$0xff] }
 0x48f   : > { %21195 = vmatmul.mubr.f32.gmra.mrb[20].mxu1 %v31721_v3  ;;  %v31766_v3 = vld [vmem:[#allocation141_spill] sm:$0xff]  ;;  %v6958_v10 = vsel %vm951_vm2, %v6915_v54, 0  ;;  %v30521_v61 = vand.u32 4294901760, %v28410_v29 }
 0x490   : > { %21197 = vmatprep.mubr.f32.mxu1 %v31723_v17 }
 0x491   : > { %22548 = vmatmul.mubr.f32.gmra.mrb[22].mxu0 %v31763_v4  ;;  %v31767_v4 = vld [vmem:[#allocation145_spill] sm:$0xff] }
 0x492   : > { %22550 = vmatprep.mubr.f32.mxu0 %v31764_v44  ;;  %v28414_v44 = vand.u32 4294901760, %v6952_v22 }
 0x493   : > { %21198 = vmatmul.mubr.f32.gmra.mrb[22].mxu1 %v31725_v36  ;;  %v28420_v36 = vand.u32 4294901760, %v6958_v10 }
 0x494   : > { %21200 = vmatprep.mubr.f32.mxu1 %v31727_v48  ;;  %v28427_v54 = vsub.f32 %v6952_v22, %v28414_v44  ;;  %v7113_v22 = vsub.f32 %v28410_v29, %v30521_v61  ;;  %v31797_v48 = vld [vmem:[#allocation303_spill] sm:$0xff] }
 0x495   : > { %22551 = vmatmul.mubr.f32.gmra.mrb[24].mxu0 %v31766_v3  ;;  %v31769_v3 = vld [vmem:[#allocation147_spill] sm:$0xff] }
 0x496   : > { %22553 = vmatprep.mubr.f32.mxu0 %v31767_v4  ;;  %v6964_v4 = vsel %vm951_vm2, %v6917_v34, 0  ;;  %v7114_v61 = vand.u32 4294901760, %v7113_v22  ;;  %v31772_v34 = vld [vmem:[#allocation21_spill] sm:$0xff] }
 0x497   : > { %21201 = vmatmul.mubr.f32.gmra.mrb[24].mxu1 %v31729_v39  ;;  %v6919_v39 = vsel %vm665_vm12, %v24762_v38, 0.0  ;;  %v24763_v38 = vld [vmem:[%s24839_s21 + $0x60] sm:$0xff] }
 0x498   : > { %21203 = vmatprep.mubr.f32.mxu1 %v31731_v15  ;;  %v6921_v28 = vsel %vm667_vm11, %v24763_v38, 0.0  ;;  %v31792_v15 = vld [vmem:[#allocation285_spill] sm:$0xff] }
 0x499   : > { %22554 = vmatmul.mubr.f32.gmra.mrb[26].mxu0 %v31769_v3  ;;  %v28435_v3 = vsub.f32 %v6958_v10, %v28420_v36  ;;  %v24764_v10 = vld [vmem:[%s24839_s21 + $0x70] sm:$0xff] }
 0x49a   : > { %22556 = vmatprep.mubr.f32.mxu0 %v31671_v57  ;;  %v28442_v57 = vand.u32 4294901760, %v6964_v4  ;;  %v6923_v25 = vsel %vm669_vm10, %v24764_v10, 0.0  ;;  %v24765_v10 = vld [vmem:[%s24839_s21 + $0x80] sm:$0xff] }
 0x49b   : > { %21204 = vmatmul.mubr.f32.gmra.mrb[26].mxu1 %v27922_v27  ;;  %v6970_v27 = vsel %vm951_vm2, %v6919_v39, 0  ;;  %v31773_v39 = vand.u32 4294901760, %v28427_v54 }
 0x49c   : > { %21206 = vmatprep.mubr.f32.mxu1 %v31734_v46  ;;  %v28455_v45 = vsub.f32 %v6964_v4, %v28442_v57  ;;  %v28457_v43 = vand.u32 4294901760, %v6970_v27  ;;  %v31775_v4 = vand.u32 4294901760, %v28435_v3 }
 0x49d   : > { %22557 = vmatmul.mubr.f32.gmra.mrb[28].mxu0 %v31676_v23  ;;  %v7133_v38 = vsub.f32 %v28427_v54, %v31773_v39  ;;  %v31778_v23 = vld [vmem:[#allocation32_spill] sm:$0xff] }
 0x49e   : > { %22559 = vmatprep.mubr.f32.mxu0 %v28212_v37  ;;  %v7153_v22 = vsub.f32 %v28435_v3, %v31775_v4  ;;  %v28474_v7 = vsub.f32 %v6970_v27, %v28457_v43 }
 0x49f   : > { %21207 = vmatmul.mubr.f32.gmra.mrb[28].mxu1 %v27939_v11  ;;  %v6976_v11 = vsel %vm951_vm2, %v6921_v28, 0  ;;  %v6982_v28 = vsel %vm951_vm2, %v6923_v25, 0  ;;  %v31782_v25 = vld [vmem:[#allocation43_spill] sm:$0xff] }
 0x4a0   : > { %21209 = vmatprep.mubr.f32.mxu1 %v31592_v18  ;;  %v28476_v39 = vand.u32 4294901760, %v6976_v11  ;;  %v7154_v27 = vand.u32 4294901760, %v7153_v22  ;;  %v31784_v22 = vld [vmem:[#allocation47_spill] sm:$0xff]  ;;  %v24767_v18 = vld [vmem:[%s24839_s21 + $0xa0] sm:$0xff] }
 0x4a1   : > { %22560 = vmatmul.mubr.f32.gmra.mrb[30].mxu0 %v28219_v16  ;;  %v6929_v46 = vsel %vm675_vm7, %v24767_v18, 0.0  ;;  %v24768_v18 = vld [vmem:[%s24839_s21 + $0xb0] sm:$0xff]  ;;  %vm31819_vm7 = vcmp.ge.s32.totalorder %v31818_v47, 0  ;;  %v31824_v47 = vld [vmem:[#allocation101_spill] sm:$0xff] }
 0x4a2   : > { %22564 = vmatprep.mubr.f32.mxu0 %v31772_v34  ;;  %31777 = vst [vmem:[#allocation333_spill] sm:$0xff] %v28476_v39  ;;  %v28486_v34 = vand.u32 4294901760, %v6982_v28  ;;  %v28495_v4 = vsub.f32 %v6976_v11, %v28476_v39  ;;  %v31788_v11 = vld [vmem:[#allocation48_spill] sm:$0xff] }
 0x4a3   : > { %21210 = vmatmul.mubr.f32.gmra.mrb[30].mxu1 %v31737_v52  ;;  %v7134_v52 = vand.u32 4294901760, %v7133_v38 }
 0x4a4   : > { %21214 = vmatprep.mubr.f32.mxu1 %v7114_v61  ;;  %v31780_v61 = vld [vmem:[#allocation274_spill] sm:$0xff]  ;;  %31781 = vst [vmem:[#allocation339_spill] sm:$0xff] %v28486_v34  ;;  %v30526_v51 = vand.u32 4294901760, %v28495_v4 }
 0x4a5   : > { %22565 = vmatmul.mubr.f32.vlgmr.msra.gmra.mrb[0].mxu0 %v31776_v53  ;;  %v6925_v53 = vsel %vm671_vm9, %v24765_v10, 0.0 }
 0x4a6   : > { %22567 = vmatprep.mubr.f32.mxu0 %v31778_v23  ;;  %22613 = vmatpush3.msra.mxu0 %v31740_v13  ;;  %v31783_v23 = vand.u32 4294901760, %v28455_v45  ;;  %v6988_v10 = vsel %vm951_vm2, %v6925_v53, 0 }
 0x4a7   : > { %22662 = vmatprep.subr.mxu0 %v27993_v8  ;;  %21215 = vmatmul.mubr.f32.vlgmr.msra.gmra.mrb[0].mxu1 %v31780_v61  ;;  %v24766_v61 = vld [vmem:[%s24839_s21 + $0x90] sm:$0xff]  ;;  %v28507_v38 = vand.u32 4294901760, %v6988_v10 }
 0x4a8   : > { %21263 = vmatpush3.msra.mxu1 %v28344_v6  ;;  %v7173_v13 = vsub.f32 %v28455_v45, %v31783_v23  ;;  %21217 = vmatprep.mubr.f32.mxu1 %v7134_v52  ;;  %v6927_v6 = vsel %vm673_vm8, %v24766_v61, 0.0  ;;  %v28505_v23 = vsub.f32 %v6982_v28, %v28486_v34  ;;  %v31789_v52 = vand.u32 4294901760, %v28474_v7  ;;  %v31790_v61 = vld [vmem:[#allocation50_spill] sm:$0xff] }
 0x4a9   : > { %22568 = vmatmul.mubr.f32.gmra.mrb[2].mxu0 %v31782_v25  ;;  %21312 = vmatprep.subr.mxu1 %v28324_v9  ;;  %v31786_v25 = vld [vmem:[#allocation283_spill] sm:$0xff]  ;;  %31787 = vst [vmem:[#allocation344_spill] sm:$0xff] %v28507_v38  ;;  %v31795_v28 = vld [vmem:[#allocation66_spill] sm:$0xff] }
 0x4aa   : > { %22570 = vmatprep.mubr.f32.mxu0 %v31784_v22  ;;  %v7174_v53 = vand.u32 4294901760, %v7173_v13  ;;  %v7193_v22 = vsub.f32 %v28474_v7, %v31789_v52  ;;  %v28522_v13 = vsub.f32 %v6988_v10, %v28507_v38  ;;  %v6931_v10 = vsel %vm677_vm6, %v24768_v18, 0.0  ;;  %v24769_v18 = vld [vmem:[%s24839_s21 + $0xc0] sm:$0xff] }
 0x4ab   : > { %21218 = vmatmul.mubr.f32.gmra.mrb[2].mxu1 %v31786_v25  ;;  %v6994_v25 = vsel %vm951_vm2, %v6927_v6, 0 }
 0x4ac   : > { %21220 = vmatprep.mubr.f32.mxu1 %v7154_v27  ;;  %v7194_v52 = vand.u32 4294901760, %v7193_v22  ;;  %v28528_v6 = vand.u32 4294901760, %v6994_v25  ;;  %v31802_v27 = vld [vmem:[#allocation69_spill] sm:$0xff] }
 0x4ad   : > { %22571 = vmatmul.mubr.f32.gmra.mrb[4].mxu0 %v31788_v11  ;;  %v31793_v11 = vld [vmem:[#allocation63_spill] sm:$0xff] }
 0x4ae   : > { %22573 = vmatprep.mubr.f32.mxu0 %v31790_v61  ;;  %v7213_v61 = vsub.f32 %v28495_v4, %v30526_v51  ;;  %31794 = vst [vmem:[#allocation178_spill] sm:$0xff] %v28528_v6  ;;  %v31799_v51 = vld [vmem:[#allocation68_spill] sm:$0xff] }
 0x4af   : > { %21221 = vmatmul.mubr.f32.gmra.mrb[4].mxu1 %v31792_v15  ;;  %v7000_v15 = vsel %vm951_vm2, %v6929_v46, 0 }
 0x4b0   : > { %21223 = vmatprep.mubr.f32.mxu1 %v7174_v53  ;;  %v31798_v53 = vand.u32 4294901760, %v28505_v23  ;;  %v7214_v17 = vand.u32 4294901760, %v7213_v61  ;;  %v28544_v46 = vand.u32 4294901760, %v7000_v15 }
 0x4b1   : > { %22574 = vmatmul.mubr.f32.gmra.mrb[6].mxu0 %v31793_v11 }
 0x4b2   : > { %22576 = vmatprep.mubr.f32.mxu0 %v31795_v28  ;;  %v7233_v22 = vsub.f32 %v28505_v23, %v31798_v53  ;;  %v28542_v28 = vsub.f32 %v6994_v25, %v28528_v6  ;;  %31801 = vst [vmem:[#allocation217_spill] sm:$0xff] %v28544_v46  ;;  %v6933_v53 = vsel %vm31804_vm1, %v24769_v18, 0.0  ;;  %v31807_v25 = vld [vmem:[#allocation81_spill] sm:$0xff]  ;;  %v31810_v18 = vld [vmem:[#allocation83_spill] sm:$0xff] }
 0x4b3   : > { %21224 = vmatmul.mubr.f32.gmra.mrb[6].mxu1 %v31797_v48  ;;  %v7006_v48 = vsel %vm951_vm2, %v6931_v10, 0  ;;  %v7012_v0 = vsel %vm951_vm2, %v6933_v53, 0 }
 0x4b4   : > { %21226 = vmatprep.mubr.f32.mxu1 %v7194_v52  ;;  %31800 = vst [vmem:[#allocation203_spill] sm:$0xff] %v28542_v28  ;;  %v7234_v11 = vand.u32 4294901760, %v7233_v22  ;;  %v30533_v61 = vand.u32 4294901760, %v28542_v28  ;;  %v28560_v10 = vand.u32 4294901760, %v7006_v48  ;;  %v31811_v22 = vld [vmem:[#allocation302_spill] sm:$0xff] }
 0x4b5   : > { %22577 = vmatmul.mubr.f32.gmra.mrb[8].mxu0 %v31799_v51  ;;  %v31806_v51 = vand.u32 4294901760, %v28522_v13  ;;  %vm31812_vm6 = vcmp.ge.s32.totalorder %v31811_v22, 0  ;;  %v31817_v22 = vld [vmem:[#allocation96_spill] sm:$0xff] }
 0x4b6   : > { %22579 = vmatprep.mubr.f32.mxu0 %v31802_v27  ;;  %v28558_v27 = vsub.f32 %v7000_v15, %v28544_v46  ;;  %31809 = vst [vmem:[#allocation239_spill] sm:$0xff] %v28560_v10  ;;  %v7273_v1 = vsub.f32 %v28542_v28, %v30533_v61  ;;  %v31821_v61 = vld [vmem:[#allocation100_spill] sm:$0xff] }
 0x4b7   : > { %21227 = vmatmul.mubr.f32.gmra.mrb[8].mxu1 %v31805_v33  ;;  %v7253_v52 = vsub.f32 %v28522_v13, %v31806_v51  ;;  %v24770_v33 = vld [vmem:[%s24839_s21 + $0xd0] sm:$0xff] }
 0x4b8   : > { %21229 = vmatprep.mubr.f32.mxu1 %v7214_v17  ;;  %31808 = vst [vmem:[#allocation229_spill] sm:$0xff] %v28558_v27  ;;  %v6935_v58 = vsel %vm31812_vm6, %v24770_v33, 0.0  ;;  %v31813_v51 = vld [vmem:[#allocation316_spill] sm:$0xff]  ;;  %v31815_v17 = vld [vmem:[#allocation85_spill] sm:$0xff]  ;;  %v7274_v53 = vand.u32 4294901760, %v7273_v1 }
 0x4b9   : > { %22580 = vmatmul.mubr.f32.gmra.mrb[10].mxu0 %v31807_v25  ;;  %v28568_v25 = vand.u32 4294901760, %v7012_v0  ;;  %v7254_v15 = vand.u32 4294901760, %v7253_v52  ;;  %v7018_v33 = vsel %vm951_vm2, %v6935_v58, 0  ;;  %v31838_v28 = vld [vmem:[#allocation128_spill] sm:$0xff] }
 0x4ba   : > { %22582 = vmatprep.mubr.f32.mxu0 %v31810_v18  ;;  %v28576_v18 = vsub.f32 %v7006_v48, %v28560_v10  ;;  %v31822_v48 = vand.u32 4294901760, %v28558_v27  ;;  %v28592_v58 = vand.u32 4294901760, %v7018_v33 }
 0x4bb   : > { %21230 = vmatmul.mubr.f32.gmra.mrb[10].mxu1 %v31813_v51  ;;  %31814 = vst [vmem:[#allocation175_spill] sm:$0xff] %v28568_v25  ;;  %v24771_v51 = vld [vmem:[%s24839_s21 + $0xe0] sm:$0xff]  ;;  %v28585_v52 = vsub.f32 %v7012_v0, %v28568_v25  ;;  %v31825_v0 = vld [vmem:[#allocation319_spill] sm:$0xff] }
 0x4bc   : > { %21232 = vmatprep.mubr.f32.mxu1 %v7234_v11  ;;  %31816 = vst [vmem:[#allocation251_spill] sm:$0xff] %v28576_v18  ;;  %v31820_v11 = vld [vmem:[#allocation321_spill] sm:$0xff]  ;;  %v7293_v31 = vsub.f32 %v28558_v27, %v31822_v48  ;;  %31823 = vst [vmem:[#allocation5_spill] sm:$0xff] %v28592_v58  ;;  %vm31826_vm8 = vcmp.ge.s32.totalorder %v31825_v0, 0  ;;  %v24773_v0 = vld [vmem:[%s24839_s21 + $0x100] sm:$0xff] }
 0x4bd   : > { %22583 = vmatmul.mubr.f32.gmra.mrb[12].mxu0 %v31815_v17  ;;  %v6937_v17 = vsel %vm31819_vm7, %v24771_v51, 0.0  ;;  %v31836_v27 = vld [vmem:[#allocation122_spill] sm:$0xff] }
 0x4be   : > { %22585 = vmatprep.mubr.f32.mxu0 %v31817_v22  ;;  %v30538_v22 = vand.u32 4294901760, %v28576_v18  ;;  %v7024_v51 = vsel %vm951_vm2, %v6937_v17, 0  ;;  %v7294_v48 = vand.u32 4294901760, %v7293_v31  ;;  %v31834_v31 = vand.u32 4294901760, %v28585_v52 }
 0x4bf   : > { %21233 = vmatmul.mubr.f32.gmra.mrb[12].mxu1 %v31820_v11  ;;  %v24772_v11 = vld [vmem:[%s24839_s21 + $0xf0] sm:$0xff]  ;;  %v28608_v17 = vand.u32 4294901760, %v7024_v51 }
 0x4c0   : > { %21235 = vmatprep.mubr.f32.mxu1 %v7254_v15  ;;  %v6939_v50 = vsel %vm31826_vm8, %v24772_v11, 0.0  ;;  %v31828_v15 = vld [vmem:[#allocation105_spill] sm:$0xff]  ;;  %v7313_v49 = vsub.f32 %v28576_v18, %v30538_v22  ;;  %v31835_v22 = vld [vmem:[#allocation116_spill] sm:$0xff] }
 0x4c1   : > { %22586 = vmatmul.mubr.f32.gmra.mrb[14].mxu0 %v31821_v61  ;;  %v31827_v61 = vld [vmem:[#allocation328_spill] sm:$0xff]  ;;  %31829 = vst [vmem:[#allocation259_spill] sm:$0xff] %v28608_v17  ;;  %v7030_v11 = vsel %vm951_vm2, %v6939_v50, 0 }
 0x4c2   : > { %22588 = vmatprep.mubr.f32.mxu0 %v31824_v47  ;;  %v28606_v47 = vsub.f32 %v7018_v33, %v28592_v58  ;;  %v7314_v33 = vand.u32 4294901760, %v7313_v49  ;;  %v28624_v50 = vand.u32 4294901760, %v7030_v11 }
 0x4c3   : > { %21236 = vmatmul.mubr.f32.gmra.mrb[14].mxu1 %v31827_v61  ;;  %v31831_v61 = vld [vmem:[#allocation327_spill] sm:$0xff] }
 0x4c4   : > { %21238 = vmatprep.mubr.f32.mxu1 %v7274_v53  ;;  %vm31832_vm9 = vcmp.ge.s32.totalorder %v31831_v61, 0  ;;  %v7333_v53 = vsub.f32 %v28585_v52, %v31834_v31  ;;  %v30545_v18 = vand.u32 4294901760, %v28606_v47  ;;  %v31837_v61 = vld [vmem:[#allocation340_spill] sm:$0xff]  ;;  %v31841_v31 = vld [vmem:[#allocation133_spill] sm:$0xff] }
 0x4c5   : > { %22589 = vmatmul.mubr.f32.gmra.mrb[16].mxu0 %v31828_v15  ;;  %v6941_v1 = vsel %vm31832_vm9, %v24773_v0, 0.0  ;;  %v31833_v15 = vld [vmem:[#allocation337_spill] sm:$0xff] }
 0x4c6   : > { %22591 = vmatprep.mubr.f32.mxu0 %v31830_v40  ;;  %v28622_v40 = vsub.f32 %v7024_v51, %v28608_v17  ;;  %v7036_v0 = vsel %vm951_vm2, %v6941_v1, 0  ;;  %v7353_v49 = vsub.f32 %v28606_v47, %v30545_v18  ;;  %v28635_v51 = vsub.f32 %v7030_v11, %v28624_v50  ;;  %v31840_v1 = vld [vmem:[#allocation345_spill] sm:$0xff]  ;;  %v31842_v11 = vld [vmem:[#allocation143_spill] sm:$0xff] }
 0x4c7   : > { %21239 = vmatmul.mubr.f32.gmra.mrb[16].mxu1 %v31833_v15  ;;  %v7334_v15 = vand.u32 4294901760, %v7333_v53  ;;  %v31843_v18 = vld [vmem:[#allocation349_spill] sm:$0xff] }
 0x4c8   : > { %21241 = vmatprep.mubr.f32.mxu1 %v7294_v48  ;;  %v28637_v48 = vand.u32 4294901760, %v7036_v0 }
 0x4c9   : > { %22592 = vmatmul.mubr.f32.gmra.mrb[18].mxu0 %v31835_v22  ;;  %v30546_v22 = vand.u32 4294901760, %v28622_v40 }
 0x4ca   : > { %22594 = vmatprep.mubr.f32.mxu0 %v31836_v27  ;;  %v31839_v27 = vld [vmem:[#allocation132_spill] sm:$0xff] }
 0x4cb   : > { %21242 = vmatmul.mubr.f32.gmra.mrb[18].mxu1 %v31837_v61  ;;  %v7373_v53 = vsub.f32 %v28622_v40, %v30546_v22  ;;  %v28647_v61 = vsub.f32 %v7036_v0, %v28637_v48  ;;  %v31846_v22 = vld [vmem:[#allocation352_spill] sm:$0xff]  ;;  %v31847_v0 = vld [vmem:[#allocation151_spill] sm:$0xff] }
 0x4cc   : > { %21244 = vmatprep.mubr.f32.mxu1 %v7314_v33  ;;  %v30548_v33 = vand.u32 4294901760, %v28635_v51 }
 0x4cd   : > { %22595 = vmatmul.mubr.f32.gmra.mrb[20].mxu0 %v31838_v28  ;;  %v7354_v28 = vand.u32 4294901760, %v7353_v49  ;;  %v30547_v49 = vand.u32 4294901760, %v28647_v61 }
 0x4ce   : > { %22597 = vmatprep.mubr.f32.mxu0 %v31839_v27  ;;  %v31844_v27 = vld [vmem:[#allocation146_spill] sm:$0xff] }
 0x4cf   : > { %21245 = vmatmul.mubr.f32.gmra.mrb[20].mxu1 %v31840_v1  ;;  %v7374_v1 = vand.u32 4294901760, %v7373_v53 }
 0x4d0   : > { %21247 = vmatprep.mubr.f32.mxu1 %v7334_v15  ;;  %v7393_v15 = vsub.f32 %v28635_v51, %v30548_v33  ;;  %v31868_v33 = vld [vmem:[#allocation119_spill] sm:$0xff] }
 0x4d1   : > { %22598 = vmatmul.mubr.f32.gmra.mrb[22].mxu0 %v31841_v31  ;;  %v31845_v31 = vld [vmem:[#allocation148_spill] sm:$0xff] }
 0x4d2   : > { %22600 = vmatprep.mubr.f32.mxu0 %v31842_v11  ;;  %v7394_v11 = vand.u32 4294901760, %v7393_v15 }
 0x4d3   : > { %21248 = vmatmul.mubr.f32.gmra.mrb[22].mxu1 %v31843_v18  ;;  %v7413_v18 = vsub.f32 %v28647_v61, %v30547_v49  ;;  %v31867_v49 = vld [vmem:[#allocation317_spill] sm:$0xff] }
 0x4d4   : > { %21250 = vmatprep.mubr.f32.mxu1 %v7354_v28  ;;  %v31848_v28 = vld [vmem:[#allocation354_spill] sm:$0xff] }
 0x4d5   : > { %22601 = vmatmul.mubr.f32.gmra.mrb[24].mxu0 %v31844_v27  ;;  %v7414_v53 = vand.u32 4294901760, %v7413_v18  ;;  %v31849_v27 = vand.u32 4294901760, %v28212_v37  ;;  %v31853_v37 = vld [vmem:[#allocation162_spill] sm:$0xff] }
 0x4d6   : > { %22603 = vmatprep.mubr.f32.mxu0 %v31845_v31  ;;  %v31851_v31 = vand.u32 4294901760, %v28219_v16  ;;  %v31854_v16 = vld [vmem:[#allocation255_spill] sm:$0xff]  ;;  %v31859_v18 = vld [vmem:[#allocation90_spill] sm:$0xff] }
 0x4d7   : > { %21251 = vmatmul.mubr.f32.gmra.mrb[24].mxu1 %v31846_v22  ;;  %v18525_v22 = vld [vmem:[%s29579_s1 + $0x20] sm:$0x7] }
 0x4d8   : > { %21253 = vmatprep.mubr.f32.mxu1 %v7374_v1  ;;  %v31850_v1 = vld [vmem:[#allocation355_spill] sm:$0xff]  ;;  %v16538_v15 = vsel %vm1016_vm0, %v18525_v22, 0 }
 0x4d9   : > { %22604 = vmatmul.mubr.f32.gmra.mrb[26].mxu0 %v31847_v0  ;;  %v31857_v0 = vld [vmem:[#allocation86_spill] sm:$0xff]  ;;  %v31862_v22 = vld [vmem:[#allocation99_spill] sm:$0xff] }
 0x4da   : > { %22606 = vmatprep.mubr.f32.mxu0 %v31670_v63  ;;  %v28675_v63 = vand.u32 4294901760, %v16538_v15 }
 0x4db   : > { %21254 = vmatmul.mubr.f32.gmra.mrb[26].mxu1 %v31848_v28  ;;  %v31860_v28 = vld [vmem:[#allocation93_spill] sm:$0xff] }
 0x4dc   : > { %21256 = vmatprep.mubr.f32.mxu1 %v7394_v11  ;;  %v31858_v11 = vld [vmem:[#allocation293_spill] sm:$0xff] }
 0x4dd   : > { %22607 = vmatmul.mubr.f32.gmra.mrb[28].mxu0 %v31675_v62  ;;  %v31852_v62 = vld [vmem:[#allocation320_spill] sm:$0xff] }
 0x4de   : > { %22609 = vmatprep.mubr.f32.mxu0 %v31849_v27  ;;  %v31863_v27 = vld [vmem:[#allocation104_spill] sm:$0xff] }
 0x4df   : > { %21257 = vmatmul.mubr.f32.gmra.mrb[28].mxu1 %v31850_v1  ;;  %v31864_v1 = vld [vmem:[#allocation309_spill] sm:$0xff] }
 0x4e0   : > { %21259 = vmatprep.mubr.f32.mxu1 %v7414_v53  ;;  %v31861_v53 = vld [vmem:[#allocation300_spill] sm:$0xff] }
 0x4e1   : > { %22610 = vmatmul.mubr.f32.gmra.mrb[30].mxu0 %v31851_v31  ;;  %v31865_v31 = vld [vmem:[#allocation107_spill] sm:$0xff] }
 0x4e2   : > { %22614 = vmatprep.mubr.f32.mxu0 %v31687_v55 }
 0x4e3   : > { %21260 = vmatmul.mubr.f32.gmra.mrb[30].mxu1 %v31852_v62  ;;  %v31866_v62 = vld [vmem:[#allocation114_spill] sm:$0xff] }
 0x4e4   : > { %21264 = vmatprep.mubr.f32.mxu1 %v28399_v26 }
 0x4e5   : > { %22615 = vmatmul.mubr.f32.vlgmr.msra.gmra.mrb[0].mxu0 %v31689_v20 }
 0x4e6   : > { %22617 = vmatprep.mubr.f32.mxu0 %v31690_v5  ;;  %22663 = vmatpush3.msra.mxu0 %v27993_v8  ;;  %v31855_v8 = vld [vmem:[#allocation271_spill] sm:$0xff] }
 0x4e7   : > { %22712 = vmatprep.subr.mxu0 %v28675_v63  ;;  %21265 = vmatmul.mubr.f32.vlgmr.msra.gmra.mrb[0].mxu1 %v31853_v37 }
 0x4e8   : > { %21313 = vmatpush3.msra.mxu1 %v28324_v9  ;;  %21267 = vmatprep.mubr.f32.mxu1 %v28414_v44  ;;  %v31856_v9 = vld [vmem:[#allocation80_spill] sm:$0xff] }
 0x4e9   : > { %22618 = vmatmul.mubr.f32.gmra.mrb[2].mxu0 %v31691_v24  ;;  %21362 = vmatprep.subr.mxu1 %v28266_v41 }
 0x4ea   : > { %22620 = vmatprep.mubr.f32.mxu0 %v31692_v19 }
 0x4eb   : > { %21268 = vmatmul.mubr.f32.gmra.mrb[2].mxu1 %v31854_v16 }
 0x4ec   : > { %21270 = vmatprep.mubr.f32.mxu1 %v28420_v36 }
 0x4ed   : > { %22621 = vmatmul.mubr.f32.gmra.mrb[4].mxu0 %v31693_v14 }
 0x4ee   : > { %22623 = vmatprep.mubr.f32.mxu0 %v31694_v2 }
 0x4ef   : > { %21271 = vmatmul.mubr.f32.gmra.mrb[4].mxu1 %v31244_v59 }
 0x4f0   : > { %21273 = vmatprep.mubr.f32.mxu1 %v28442_v57 }
 0x4f1   : > { %22624 = vmatmul.mubr.f32.gmra.mrb[6].mxu0 %v31695_v30 }
 0x4f2   : > { %22626 = vmatprep.mubr.f32.mxu0 %v31696_v32 }
 0x4f3   : > { %21274 = vmatmul.mubr.f32.gmra.mrb[6].mxu1 %v31855_v8 }
 0x4f4   : > { %21276 = vmatprep.mubr.f32.mxu1 %v28457_v43 }
 0x4f5   : > { %22627 = vmatmul.mubr.f32.gmra.mrb[8].mxu0 %v31697_v21 }
 0x4f6   : > { %22629 = vmatprep.mubr.f32.mxu0 %v31698_v35 }
 0x4f7   : > { %21277 = vmatmul.mubr.f32.gmra.mrb[8].mxu1 %v31402_v12  ;;  %v31884_v12 = vld [vmem:[#allocation307_spill] sm:$0xff] }
 0x4f8   : > { %21279 = vmatprep.mubr.f32.mxu1 %v28476_v39  ;;  %v31881_v39 = vld [vmem:[#allocation153_spill] sm:$0xff] }
 0x4f9   : > { %22630 = vmatmul.mubr.f32.gmra.mrb[10].mxu0 %v31699_v60 }
 0x4fa   : > { %22632 = vmatprep.mubr.f32.mxu0 %v31700_v42 }
 0x4fb   : > { %21280 = vmatmul.mubr.f32.gmra.mrb[10].mxu1 %v31404_v56 }
 0x4fc   : > { %21282 = vmatprep.mubr.f32.mxu1 %v28486_v34  ;;  %v31876_v34 = vld [vmem:[#allocation338_spill] sm:$0xff] }
 0x4fd   : > { %22633 = vmatmul.mubr.f32.gmra.mrb[12].mxu0 %v31856_v9 }
 0x4fe   : > { %22635 = vmatprep.mubr.f32.mxu0 %v31857_v0 }
 0x4ff   : > { %21283 = vmatmul.mubr.f32.gmra.mrb[12].mxu1 %v31858_v11  ;;  %v31873_v11 = vld [vmem:[#allocation331_spill] sm:$0xff] }
 0x500   : > { %21285 = vmatprep.mubr.f32.mxu1 %v28507_v38  ;;  %v31870_v38 = vld [vmem:[#allocation324_spill] sm:$0xff] }
 0x501   : > { %22636 = vmatmul.mubr.f32.gmra.mrb[14].mxu0 %v31859_v18 }
 0x502   : > { %22638 = vmatprep.mubr.f32.mxu0 %v31860_v28 }
 0x503   : > { %21286 = vmatmul.mubr.f32.gmra.mrb[14].mxu1 %v31861_v53  ;;  %v31869_v53 = vld [vmem:[#allocation125_spill] sm:$0xff] }
 0x504   : > { %21288 = vmatprep.mubr.f32.mxu1 %v28528_v6  ;;  %v31871_v6 = vld [vmem:[#allocation126_spill] sm:$0xff] }
 0x505   : > { %22639 = vmatmul.mubr.f32.gmra.mrb[16].mxu0 %v31862_v22 }
 0x506   : > { %22641 = vmatprep.mubr.f32.mxu0 %v31863_v27 }
 0x507   : > { %21289 = vmatmul.mubr.f32.gmra.mrb[16].mxu1 %v31864_v1  ;;  %v31872_v1 = vld [vmem:[#allocation134_spill] sm:$0xff] }
 0x508   : > { %21291 = vmatprep.mubr.f32.mxu1 %v28544_v46  ;;  %v31874_v46 = vld [vmem:[#allocation136_spill] sm:$0xff] }
 0x509   : > { %22642 = vmatmul.mubr.f32.gmra.mrb[18].mxu0 %v31865_v31 }
 0x50a   : > { %22644 = vmatprep.mubr.f32.mxu0 %v31866_v62 }
 0x50b   : > { %21292 = vmatmul.mubr.f32.gmra.mrb[18].mxu1 %v31867_v49  ;;  %v31875_v49 = vld [vmem:[#allocation140_spill] sm:$0xff] }
 0x50c   : > { %21294 = vmatprep.mubr.f32.mxu1 %v28560_v10  ;;  %v28734_v10 = vsub.f32 %v16538_v15, %v28675_v63 }
 0x50d   : > { %22645 = vmatmul.mubr.f32.gmra.mrb[20].mxu0 %v31868_v33 }
 0x50e   : > { %22647 = vmatprep.mubr.f32.mxu0 %v31869_v53  ;;  %v28741_v56 = vand.u32 4294901760, %v28734_v10 }
 0x50f   : > { %21295 = vmatmul.mubr.f32.gmra.mrb[20].mxu1 %v31870_v38  ;;  %v31877_v38 = vld [vmem:[#allocation142_spill] sm:$0xff] }
 0x510   : > { %21297 = vmatprep.mubr.f32.mxu1 %v28568_v25  ;;  %v31878_v25 = vld [vmem:[#allocation150_spill] sm:$0xff]  ;;  %31879 = vst [vmem:[#allocation12_spill] sm:$0xff] %v28741_v56  ;;  %v16930_v15 = vsub.f32 %v28734_v10, %v28741_v56  ;;  %v31886_v56 = vld [vmem:[#allocation252_spill] sm:$0xff] }
 0x511   : > { %22648 = vmatmul.mubr.f32.gmra.mrb[22].mxu0 %v31871_v6 }
 0x512   : > { %22650 = vmatprep.mubr.f32.mxu0 %v31872_v1 }
 0x513   : > { %21298 = vmatmul.mubr.f32.gmra.mrb[22].mxu1 %v31873_v11  ;;  %v31880_v11 = vld [vmem:[#allocation343_spill] sm:$0xff] }
 0x514   : > { %21300 = vmatprep.mubr.f32.mxu1 %v28592_v58  ;;  %v31882_v58 = vld [vmem:[#allocation299_spill] sm:$0xff] }
 0x515   : > { %22651 = vmatmul.mubr.f32.gmra.mrb[24].mxu0 %v31874_v46 }
 0x516   : > { %22653 = vmatprep.mubr.f32.mxu0 %v31875_v49 }
 0x517   : > { %21301 = vmatmul.mubr.f32.gmra.mrb[24].mxu1 %v31876_v34  ;;  %v31883_v34 = vld [vmem:[#allocation348_spill] sm:$0xff] }
 0x518   : > { %21303 = vmatprep.mubr.f32.mxu1 %v28608_v17  ;;  %v28753_v17 = vand.u32 4294901760, %v16930_v15  ;;  %v31887_v15 = vld [vmem:[#allocation326_spill] sm:$0xff] }
 0x519   : > { %22654 = vmatmul.mubr.f32.gmra.mrb[26].mxu0 %v31877_v38 }
 0x51a   : > { %22656 = vmatprep.mubr.f32.mxu0 %v31878_v25 }
 0x51b   : > { %21304 = vmatmul.mubr.f32.gmra.mrb[26].mxu1 %v31880_v11  ;;  %v31885_v11 = vld [vmem:[#allocation287_spill] sm:$0xff] }
 0x51c   : > { %21306 = vmatprep.mubr.f32.mxu1 %v28624_v50 }
 0x51d   : > { %22657 = vmatmul.mubr.f32.gmra.mrb[28].mxu0 %v31881_v39 }
 0x51e   : > { %22659 = vmatprep.mubr.f32.mxu0 %v31882_v58 }
 0x51f   : > { %21307 = vmatmul.mubr.f32.gmra.mrb[28].mxu1 %v31883_v34 }
 0x520   : > { %21309 = vmatprep.mubr.f32.mxu1 %v28637_v48 }
 0x521   : > { %22660 = vmatmul.mubr.f32.gmra.mrb[30].mxu0 %v31884_v12 }
 0x522   : > { %22664 = vmatprep.mubr.f32.mxu0 %v31687_v55 }
 0x523   : > { %21310 = vmatmul.mubr.f32.gmra.mrb[30].mxu1 %v31885_v11 }
 0x524   : > { %21314 = vmatprep.mubr.f32.mxu1 %v28410_v29 }
 0x525   : > { %22665 = vmatmul.mubr.f32.vlgmr.msra.gmra.mrb[0].mxu0 %v31689_v20  ;;  %v31888_v20 = vld [vmem:[#allocation261_spill] sm:$0xff] }
 0x526   : > { %22667 = vmatprep.mubr.f32.mxu0 %v31690_v5  ;;  %22713 = vmatpush3.msra.mxu0 %v28675_v63  ;;  %v31889_v5 = vld [vmem:[#allocation264_spill] sm:$0xff] }
 0x527   : > { %22762 = vmatprep.subr.mxu0 %v28753_v17  ;;  %21315 = vmatmul.mubr.f32.vlgmr.msra.gmra.mrb[0].mxu1 %v31886_v56  ;;  %v31890_v56 = vld [vmem:[#allocation278_spill] sm:$0xff] }
 0x528   : > { %21363 = vmatpush3.msra.mxu1 %v28266_v41  ;;  %21317 = vmatprep.mubr.f32.mxu1 %v28427_v54 }
 0x529   : > { %22668 = vmatmul.mubr.f32.gmra.mrb[2].mxu0 %v31691_v24  ;;  %21412 = vmatprep.subr.mxu1 %v31887_v15  ;;  %v31981_v24 = vld [vmem:[#allocation120_spill] sm:$0xff] }
 0x52a   : > { %22670 = vmatprep.mubr.f32.mxu0 %v31692_v19  ;;  %v31968_v19 = vld [vmem:[#allocation290_spill] sm:$0xff]  ;;  %vm31982_vm8 = vcmp.le.s32.totalorder %v31981_v24, 15 }
 0x52b   : > { %21318 = vmatmul.mubr.f32.gmra.mrb[2].mxu1 %v31888_v20  ;;  %v31891_v20 = vld [vmem:[#allocation281_spill] sm:$0xff] }
 0x52c   : > { %21320 = vmatprep.mubr.f32.mxu1 %v28435_v3 }
 0x52d   : > { %22671 = vmatmul.mubr.f32.gmra.mrb[4].mxu0 %v31693_v14  ;;  %v31966_v14 = vld [vmem:[#allocation208_spill] sm:$0xff] }
 0x52e   : > { %22673 = vmatprep.mubr.f32.mxu0 %v31694_v2  ;;  %v31951_v2 = vld [vmem:[#allocation270_spill] sm:$0xff]  ;;  %vm31967_vm6 = vcmp.le.s32.totalorder %v31966_v14, 15 }
 0x52f   : > { %21321 = vmatmul.mubr.f32.gmra.mrb[4].mxu1 %v31889_v5  ;;  %v31892_v5 = vld [vmem:[#allocation292_spill] sm:$0xff] }
 0x530   : > { %21323 = vmatprep.mubr.f32.mxu1 %v28455_v45 }
 0x531   : > { %22674 = vmatmul.mubr.f32.gmra.mrb[6].mxu0 %v31695_v30 }
 0x532   : > { %22676 = vmatprep.mubr.f32.mxu0 %v31696_v32 }
 0x533   : > { %21324 = vmatmul.mubr.f32.gmra.mrb[6].mxu1 %v31890_v56  ;;  %v31893_v56 = vld [vmem:[#allocation298_spill] sm:$0xff] }
 0x534   : > { %21326 = vmatprep.mubr.f32.mxu1 %v28474_v7 }
 0x535   : > { %22677 = vmatmul.mubr.f32.gmra.mrb[8].mxu0 %v31697_v21  ;;  %v31929_v21 = vld [vmem:[#allocation306_spill] sm:$0xff] }
 0x536   : > { %22679 = vmatprep.mubr.f32.mxu0 %v31698_v35  ;;  %v31927_v35 = vld [vmem:[#allocation40_spill] sm:$0xff] }
 0x537   : > { %21327 = vmatmul.mubr.f32.gmra.mrb[8].mxu1 %v31891_v20  ;;  %v31894_v20 = vld [vmem:[#allocation308_spill] sm:$0xff]  ;;  %vm31928_vm15 = vcmp.le.s32.totalorder %v31927_v35, 15 }
 0x538   : > { %21329 = vmatprep.mubr.f32.mxu1 %v28495_v4 }
 0x539   : > { %22680 = vmatmul.mubr.f32.gmra.mrb[10].mxu0 %v31699_v60  ;;  %v31906_v60 = vld [vmem:[#allocation330_spill] sm:$0xff] }
 0x53a   : > { %22682 = vmatprep.mubr.f32.mxu0 %v31700_v42  ;;  %v31895_v42 = vld [vmem:[#allocation203_spill] sm:$0xff] }
 0x53b   : > { %21330 = vmatmul.mubr.f32.gmra.mrb[10].mxu1 %v31892_v5  ;;  %v31896_v5 = vld [vmem:[#allocation314_spill] sm:$0xff] }
 0x53c   : > { %21332 = vmatprep.mubr.f32.mxu1 %v28505_v23 }
 0x53d   : > { %22683 = vmatmul.mubr.f32.gmra.mrb[12].mxu0 %v31856_v9  ;;  %v31901_v9 = vld [vmem:[#allocation323_spill] sm:$0xff] }
 0x53e   : > { %22685 = vmatprep.mubr.f32.mxu0 %v31857_v0  ;;  %v31897_v0 = vld [vmem:[#allocation229_spill] sm:$0xff] }
 0x53f   : > { %21333 = vmatmul.mubr.f32.gmra.mrb[12].mxu1 %v31893_v56  ;;  %v31898_v56 = vld [vmem:[#allocation9_spill] sm:$0xff] }
 0x540   : > { %21335 = vmatprep.mubr.f32.mxu1 %v28522_v13 }
 0x541   : > { %22686 = vmatmul.mubr.f32.gmra.mrb[14].mxu0 %v31859_v18  ;;  %v31899_v18 = vld [vmem:[#allocation6_spill] sm:$0xff] }
 0x542   : > { %22688 = vmatprep.mubr.f32.mxu0 %v31860_v28  ;;  %vm31900_vm0 = vcmp.le.s32.totalorder %v31899_v18, 15  ;;  %v31907_v18 = vld [vmem:[#allocation30_spill] sm:$0xff] }
 0x543   : > { %21336 = vmatmul.mubr.f32.gmra.mrb[14].mxu1 %v31894_v20  ;;  %v16408_v28 = vsel %vm31900_vm0, %v31898_v56, 0.0  ;;  %v31902_v20 = vld [vmem:[#allocation251_spill] sm:$0xff]  ;;  %vm31994_vm0 = vcmask 1045504  }
 0x544   : > { %21338 = vmatprep.mubr.f32.mxu1 %v31895_v42 }
 0x545   : > { %22689 = vmatmul.mubr.f32.gmra.mrb[16].mxu0 %v31862_v22 }
 0x546   : > { %22691 = vmatprep.mubr.f32.mxu0 %v31863_v27  ;;  %v16445_v27 = vsel %vm951_vm2, %v16408_v28, 0  ;;  %v31908_v28 = vld [vmem:[#allocation163_spill] sm:$0xff] }
 0x547   : > { %21339 = vmatmul.mubr.f32.gmra.mrb[16].mxu1 %v31896_v5  ;;  %v31903_v5 = vld [vmem:[#allocation166_spill] sm:$0xff]  ;;  %vm31909_vm11 = vcmp.le.s32.totalorder %v31908_v28, 15 }
 0x548   : > { %21341 = vmatprep.mubr.f32.mxu1 %v31897_v0  ;;  %v16412_v56 = vsel %vm31909_vm11, %v31907_v18, 0.0  ;;  %v31914_v18 = vld [vmem:[#allocation342_spill] sm:$0xff] }
 0x549   : > { %22692 = vmatmul.mubr.f32.gmra.mrb[18].mxu0 %v31865_v31  ;;  %v31904_v31 = vld [vmem:[#allocation8_spill] sm:$0xff] }
 0x54a   : > { %22694 = vmatprep.mubr.f32.mxu0 %v31866_v62  ;;  %vm31905_vm10 = vcmp.le.s32.totalorder %v31904_v31, 15  ;;  %v28811_v62 = vand.u32 4294901760, %v16445_v27 }
 0x54b   : > { %21342 = vmatmul.mubr.f32.gmra.mrb[18].mxu1 %v31901_v9  ;;  %v16410_v22 = vsel %vm31905_vm10, %v31903_v5, 0.0  ;;  %v16457_v5 = vsel %vm951_vm2, %v16412_v56, 0  ;;  %vm31995_vm10 = vmmov %vm31994_vm0 }
 0x54c   : > { %21344 = vmatprep.mubr.f32.mxu1 %v31902_v20  ;;  %v16451_v9 = vsel %vm951_vm2, %v16410_v22, 0  ;;  %v31911_v22 = vld [vmem:[#allocation174_spill] sm:$0xff] }
 0x54d   : > { %22695 = vmatmul.mubr.f32.gmra.mrb[20].mxu0 %v31868_v33  ;;  %v28821_v31 = vand.u32 4294901760, %v16451_v9 }
 0x54e   : > { %22697 = vmatprep.mubr.f32.mxu0 %v31869_v53  ;;  %v31910_v53 = vld [vmem:[#allocation335_spill] sm:$0xff] }
 0x54f   : > { %21345 = vmatmul.mubr.f32.gmra.mrb[20].mxu1 %v31906_v60  ;;  %v28826_v60 = vsub.f32 %v16445_v27, %v28811_v62 }
 0x550   : > { %21347 = vmatprep.mubr.f32.mxu1 %v28585_v52 }
 0x551   : > { %22698 = vmatmul.mubr.f32.gmra.mrb[22].mxu0 %v31871_v6  ;;  %v28837_v6 = vand.u32 4294901760, %v16457_v5  ;;  %v30592_v27 = vand.u32 4294901760, %v28826_v60 }
 0x552   : > { %22700 = vmatprep.mubr.f32.mxu0 %v31872_v1  ;;  %v31912_v1 = vld [vmem:[#allocation24_spill] sm:$0xff] }
 0x553   : > { %21348 = vmatmul.mubr.f32.gmra.mrb[22].mxu1 %v31910_v53  ;;  %vm31913_vm12 = vcmp.le.s32.totalorder %v31912_v1, 15  ;;  %v28835_v53 = vsub.f32 %v16451_v9, %v28821_v31  ;;  %v31916_v1 = vld [vmem:[#allocation170_spill] sm:$0xff] }
 0x554   : > { %21350 = vmatprep.mubr.f32.mxu1 %v28606_v47  ;;  %v16414_v28 = vsel %vm31913_vm12, %v31911_v22, 0.0  ;;  %vm31917_vm13 = vcmp.le.s32.totalorder %v31916_v1, 15  ;;  %v31919_v1 = vld [vmem:[#allocation177_spill] sm:$0xff] }
 0x555   : > { %22701 = vmatmul.mubr.f32.gmra.mrb[24].mxu0 %v31874_v46  ;;  %v16463_v56 = vsel %vm951_vm2, %v16414_v28, 0  ;;  %v28850_v46 = vsub.f32 %v16457_v5, %v28837_v6  ;;  %v31922_v5 = vld [vmem:[#allocation351_spill] sm:$0xff] }
 0x556   : > { %22703 = vmatprep.mubr.f32.mxu0 %v31875_v49  ;;  %v31915_v49 = vld [vmem:[#allocation176_spill] sm:$0xff]  ;;  %v28857_v28 = vand.u32 4294901760, %v16463_v56 }
 0x557   : > { %21351 = vmatmul.mubr.f32.gmra.mrb[24].mxu1 %v31914_v18  ;;  %v16416_v22 = vsel %vm31917_vm13, %v31915_v49, 0.0  ;;  %v31918_v18 = vld [vmem:[#allocation347_spill] sm:$0xff] }
 0x558   : > { %21353 = vmatprep.mubr.f32.mxu1 %v28622_v40  ;;  %v16469_v49 = vsel %vm951_vm2, %v16416_v22, 0 }
 0x559   : > { %22704 = vmatmul.mubr.f32.gmra.mrb[26].mxu0 %v31877_v38  ;;  %v28874_v22 = vand.u32 4294901760, %v16469_v49 }
 0x55a   : > { %22706 = vmatprep.mubr.f32.mxu0 %v31878_v25  ;;  %v16619_v25 = vsub.f32 %v28826_v60, %v30592_v27 }
 0x55b   : > { %21354 = vmatmul.mubr.f32.gmra.mrb[26].mxu1 %v31918_v18  ;;  %v31920_v18 = vld [vmem:[#allocation35_spill] sm:$0xff]  ;;  %31924 = vst [vmem:[#allocation171_spill] sm:$0xff] %v28874_v22 }
 0x55c   : > { %21356 = vmatprep.mubr.f32.mxu1 %v28635_v51  ;;  %vm31921_vm14 = vcmp.le.s32.totalorder %v31920_v18, 15  ;;  %v16620_v27 = vand.u32 4294901760, %v16619_v25  ;;  %v31925_v18 = vld [vmem:[#allocation41_spill] sm:$0xff] }
 0x55d   : > { %22707 = vmatmul.mubr.f32.gmra.mrb[28].mxu0 %v31881_v39  ;;  %v16418_v9 = vsel %vm31921_vm14, %v31919_v1, 0.0  ;;  %v31923_v39 = vand.u32 4294901760, %v28835_v53 }
 0x55e   : > { %22709 = vmatprep.mubr.f32.mxu0 %v31882_v58  ;;  %v28872_v58 = vsub.f32 %v16463_v56, %v28857_v28  ;;  %v16475_v1 = vsel %vm951_vm2, %v16418_v9, 0  ;;  %v31931_v56 = vand.u32 4294901760, %v28410_v29  ;;  %v31937_v29 = vld [vmem:[#allocation258_spill] sm:$0xff] }
 0x55f   : > { %21357 = vmatmul.mubr.f32.gmra.mrb[28].mxu1 %v31922_v5  ;;  %v16639_v38 = vsub.f32 %v28835_v53, %v31923_v39  ;;  %v31926_v5 = vld [vmem:[#allocation192_spill] sm:$0xff]  ;;  %v28891_v9 = vand.u32 4294901760, %v16475_v1 }
 0x560   : > { %21359 = vmatprep.mubr.f32.mxu1 %v28647_v61  ;;  %v16420_v39 = vsel %vm31928_vm15, %v31926_v5, 0.0  ;;  %v30596_v32 = vand.u32 4294901760, %v28872_v58  ;;  %v31933_v5 = vld [vmem:[#allocation55_spill] sm:$0xff] }
 0x561   : > { %22710 = vmatmul.mubr.f32.gmra.mrb[30].mxu0 %v31884_v12  ;;  %v16640_v33 = vand.u32 4294901760, %v16639_v38  ;;  %v31930_v12 = vand.u32 4294901760, %v28850_v46  ;;  %31932 = vst [vmem:[#allocation257_spill] sm:$0xff] %v28891_v9  ;;  %v16481_v35 = vsel %vm951_vm2, %v16420_v39, 0  ;;  %v31935_v38 = vld [vmem:[#allocation71_spill] sm:$0xff]  ;;  %v28909_v39 = vsub.f32 %v16475_v1, %v28891_v9 }
 0x562   : > { %22714 = vmatprep.mubr.f32.mxu0 %v31925_v18  ;;  %v28889_v18 = vsub.f32 %v16469_v49, %v28874_v22  ;;  %vm31936_vm5 = vcmp.le.s32.totalorder %v31935_v38, 15  ;;  %v16679_v49 = vsub.f32 %v28872_v58, %v30596_v32  ;;  %v31941_v38 = vld [vmem:[#allocation207_spill] sm:$0xff] }
 0x563   : > { %21360 = vmatmul.mubr.f32.gmra.mrb[30].mxu1 %v31929_v21  ;;  %v16659_v25 = vsub.f32 %v28850_v46, %v31930_v12  ;;  %v31934_v21 = vld [vmem:[#allocation198_spill] sm:$0xff] }
 0x564   : > { %21364 = vmatprep.mubr.f32.mxu1 %v31931_v56  ;;  %v28901_v56 = vand.u32 4294901760, %v16481_v35 }
 0x565   : > { %22715 = vmatmul.mubr.f32.vlgmr.msra.gmra.mrb[0].mxu0 %v16620_v27  ;;  %v16422_v27 = vsel %vm31936_vm5, %v31934_v21, 0.0  ;;  %v16660_v12 = vand.u32 4294901760, %v16659_v25  ;;  %v31939_v21 = vand.u32 4294901760, %v28427_v54  ;;  %v31940_v25 = vld [vmem:[#allocation199_spill] sm:$0xff]  ;;  %v16680_v54 = vand.u32 4294901760, %v16679_v49 }
 0x566   : > { %22717 = vmatprep.mubr.f32.mxu0 %v31933_v5  ;;  %22763 = vmatpush3.msra.mxu0 %v28753_v17  ;;  %31938 = vst [vmem:[#allocation7_spill] sm:$0xff] %v28901_v56  ;;  %v30599_v17 = vand.u32 4294901760, %v28889_v18  ;;  %v16487_v5 = vsel %vm951_vm2, %v16422_v27, 0  ;;  %v28921_v32 = vsub.f32 %v16481_v35, %v28901_v56  ;;  %v31946_v27 = vand.u32 4294901760, %v28435_v3  ;;  %v31949_v35 = vld [vmem:[#allocation205_spill] sm:$0xff]  ;;  %v31959_v3 = vld [vmem:[#allocation286_spill] sm:$0xff] }
 0x567   : > { %22812 = vmatprep.subr.mxu0 %v28734_v10  ;;  %21365 = vmatmul.mubr.f32.vlgmr.msra.gmra.mrb[0].mxu1 %v31937_v29  ;;  %v31942_v29 = vld [vmem:[#allocation193_spill] sm:$0xff]  ;;  %v28923_v1 = vand.u32 4294901760, %v16487_v5  ;;  %vm31950_vm4 = vcmp.le.s32.totalorder %v31949_v35, 15  ;;  %v31953_v49 = vand.u32 4294901760, %v28455_v45  ;;  %v31955_v35 = vld [vmem:[#allocation88_spill] sm:$0xff] }
 0x568   : > { %21413 = vmatpush3.msra.mxu1 %v31887_v15  ;;  %21367 = vmatprep.mubr.f32.mxu1 %v31939_v21  ;;  %vm31943_vm3 = vcmp.le.s32.totalorder %v31942_v29, 15  ;;  %v31944_v15 = vld [vmem:[#allocation267_spill] sm:$0xff]  ;;  %v16699_v21 = vsub.f32 %v28889_v18, %v30599_v17  ;;  %v31960_v45 = vand.u32 4294901760, %v28921_v32 }
 0x569   : > { %22718 = vmatmul.mubr.f32.gmra.mrb[2].mxu0 %v16640_v33  ;;  %v16424_v33 = vsel %vm31943_vm3, %v31941_v38, 0.0  ;;  %21462 = vmatprep.subr.mxu1 %v28266_v41  ;;  %31945 = vst [vmem:[#allocation181_spill] sm:$0xff] %v28923_v1  ;;  %v31947_v38 = vld [vmem:[#allocation202_spill] sm:$0xff]  ;;  %v31957_v17 = vld [vmem:[#allocation87_spill] sm:$0xff] }
 0x56a   : > { %22720 = vmatprep.mubr.f32.mxu0 %v31940_v25  ;;  %v30600_v25 = vand.u32 4294901760, %v28909_v39  ;;  %v16493_v29 = vsel %vm951_vm2, %v16424_v33, 0  ;;  %vm31958_vm1 = vcmp.le.s32.totalorder %v31957_v17, 15  ;;  %v31964_v17 = vld [vmem:[#allocation103_spill] sm:$0xff] }
 0x56b   : > { %21368 = vmatmul.mubr.f32.gmra.mrb[2].mxu1 %v31944_v15  ;;  %v31948_v15 = vld [vmem:[#allocation94_spill] sm:$0xff] }
 0x56c   : > { %21370 = vmatprep.mubr.f32.mxu1 %v31946_v27  ;;  %v16426_v30 = vsel %vm31950_vm4, %v31948_v15, 0.0  ;;  %v16700_v27 = vand.u32 4294901760, %v16699_v21  ;;  %v16719_v33 = vsub.f32 %v28909_v39, %v30600_v25  ;;  %v31956_v15 = vld [vmem:[#allocation212_spill] sm:$0xff] }
 0x56d   : > { %22721 = vmatmul.mubr.f32.gmra.mrb[4].mxu0 %v16660_v12  ;;  %v28939_v12 = vsub.f32 %v16487_v5, %v28923_v1  ;;  %v16428_v5 = vsel %vm31958_vm1, %v31956_v15, 0.0  ;;  %v31965_v15 = vld [vmem:[#allocation219_spill] sm:$0xff] }
 0x56e   : > { %22723 = vmatprep.mubr.f32.mxu0 %v31947_v38  ;;  %v28946_v38 = vand.u32 4294901760, %v16493_v29  ;;  %v16720_v25 = vand.u32 4294901760, %v16719_v33 }
 0x56f   : > { %21371 = vmatmul.mubr.f32.gmra.mrb[4].mxu1 %v31951_v2  ;;  %31952 = vst [vmem:[#allocation189_spill] sm:$0xff] %v28939_v12  ;;  %v16499_v2 = vsel %vm951_vm2, %v16426_v30, 0  ;;  %v30603_v21 = vand.u32 4294901760, %v28939_v12 }
 0x570   : > { %21373 = vmatprep.mubr.f32.mxu1 %v31953_v49  ;;  %31954 = vst [vmem:[#allocation190_spill] sm:$0xff] %v28946_v38  ;;  %v31961_v49 = vand.u32 4294901760, %v28474_v7  ;;  %v28963_v30 = vand.u32 4294901760, %v16499_v2 }
 0x571   : > { %22724 = vmatmul.mubr.f32.gmra.mrb[6].mxu0 %v16680_v54  ;;  %v16739_v54 = vsub.f32 %v28921_v32, %v31960_v45  ;;  %v16430_v45 = vsel %vm31967_vm6, %v31965_v15, 0.0  ;;  %v16759_v7 = vsub.f32 %v28939_v12, %v30603_v21  ;;  %v31989_v12 = vld [vmem:[#allocation223_spill] sm:$0xff] }
 0x572   : > { %22726 = vmatprep.mubr.f32.mxu0 %v31955_v35  ;;  %v28961_v35 = vsub.f32 %v16493_v29, %v28946_v38  ;;  %31963 = vst [vmem:[#allocation214_spill] sm:$0xff] %v28963_v30  ;;  %v31969_v29 = vand.u32 4294901760, %v28495_v4  ;;  %v16511_v14 = vsel %vm951_vm2, %v16430_v45, 0  ;;  %vm31990_vm9 = vcmp.le.s32.totalorder %v31989_v12, 15 }
 0x573   : > { %21374 = vmatmul.mubr.f32.gmra.mrb[6].mxu1 %v31959_v3  ;;  %v16505_v3 = vsel %vm951_vm2, %v16428_v5, 0  ;;  %v28988_v4 = vand.u32 4294901760, %v16511_v14 }
 0x574   : > { %21376 = vmatprep.mubr.f32.mxu1 %v31961_v49  ;;  %31962 = vst [vmem:[#allocation17_spill] sm:$0xff] %v28961_v35  ;;  %v30606_v33 = vand.u32 4294901760, %v28961_v35  ;;  %v28978_v49 = vsub.f32 %v16499_v2, %v28963_v30  ;;  %v28980_v5 = vand.u32 4294901760, %v16505_v3  ;;  %v31978_v2 = vand.u32 4294901760, %v28505_v23  ;;  %v24774_v23 = vld [vmem:[%s24839_s21 + $0x118] sm:$0xff] }
 0x575   : > { %22727 = vmatmul.mubr.f32.gmra.mrb[8].mxu0 %v16700_v27  ;;  %v16740_v27 = vand.u32 4294901760, %v16739_v54  ;;  %v31973_v54 = vld [vmem:[#allocation222_spill] sm:$0xff]  ;;  %31977 = vst [vmem:[#allocation243_spill] sm:$0xff] %v28988_v4  ;;  %v29007_v55 = vsub.f32 %v16511_v14, %v28988_v4 }
 0x576   : > { %22729 = vmatprep.mubr.f32.mxu0 %v31964_v17  ;;  %31970 = vst [vmem:[#allocation221_spill] sm:$0xff] %v28978_v49  ;;  %31971 = vst [vmem:[#allocation234_spill] sm:$0xff] %v28980_v5  ;;  %v31974_v17 = vld [vmem:[#allocation108_spill] sm:$0xff]  ;;  %v16779_v45 = vsub.f32 %v28961_v35, %v30606_v33  ;;  %v28997_v21 = vsub.f32 %v16505_v3, %v28980_v5  ;;  %v24775_v33 = vld [vmem:[%s24839_s21 + $0x120] sm:$0x3]  ;;  %v31984_v3 = vand.u32 4294901760, %v28522_v13 }
 0x577   : > { %21377 = vmatmul.mubr.f32.gmra.mrb[8].mxu1 %v31968_v19  ;;  %v31972_v19 = vld [vmem:[#allocation210_spill] sm:$0xff]  ;;  %vm31975_vm7 = vcmp.le.s32.totalorder %v31974_v17, 15  ;;  %v31999_v13 = vld [vmem:[#allocation235_spill] sm:$0xff] }
 0x578   : > { %21379 = vmatprep.mubr.f32.mxu1 %v31969_v29  ;;  %v16432_v15 = vsel %vm31975_vm7, %v31973_v54, 0.0  ;;  %v16760_v29 = vand.u32 4294901760, %v16759_v7  ;;  %v31979_v54 = vld [vmem:[#allocation109_spill] sm:$0xff] }
 0x579   : > { %22730 = vmatmul.mubr.f32.gmra.mrb[10].mxu0 %v16720_v25  ;;  %v31976_v25 = vld [vmem:[#allocation297_spill] sm:$0xff]  ;;  %v16517_v17 = vsel %vm951_vm2, %v16432_v15, 0  ;;  %v31985_v15 = vand.u32 4294901760, %v28978_v49 }
 0x57a   : > { %22732 = vmatprep.mubr.f32.mxu0 %v31972_v19  ;;  %v31983_v7 = vld [vmem:[#allocation305_spill] sm:$0xff]  ;;  %v16403_v19 = vrot.slane %v24775_v33, 2 }
 0x57b   : > { %21380 = vmatmul.mubr.f32.gmra.mrb[10].mxu1 %v31976_v25  ;;  %v31980_v25 = vld [vmem:[#allocation227_spill] sm:$0xff]  ;;  %v16799_v35 = vsub.f32 %v28978_v49, %v31985_v15  ;;  %v31996_v49 = vand.u32 4294901760, %v31895_v42 }
 0x57c   : > { %21382 = vmatprep.mubr.f32.mxu1 %v31978_v2  ;;  %v16401_v2 = vrot.slane %v24774_v23, 2  ;;  %v31987_v23 = vld [vmem:[#allocation230_spill] sm:$0xff] }
 0x57d   : > { %22733 = vmatmul.mubr.f32.gmra.mrb[12].mxu0 %v16740_v27  ;;  %v16434_v27 = vsel %vm31982_vm8, %v31980_v25, 0.0  ;;  %v29016_v25 = vand.u32 4294901760, %v16517_v17 }
 0x57e   : > { %22735 = vmatprep.mubr.f32.mxu0 %v31979_v54  ;;  %v16780_v54 = vand.u32 4294901760, %v16779_v45  ;;  %v16523_v14 = vsel %vm951_vm2, %v16434_v27, 0  ;;  %v31992_v45 = vld [vmem:[#allocation137_spill] sm:$0xff]  ;;  %v16404_v24 = vsel %vm31995_vm10, %v16401_v2, %v16403_v19  ;;  %v31997_v27 = vand.u32 4294901760, %v28997_v21 }
 0x57f   : > { %21383 = vmatmul.mubr.f32.gmra.mrb[12].mxu1 %v31983_v7  ;;  %31986 = vst [vmem:[#allocation195_spill] sm:$0xff] %v29016_v25  ;;  %v31988_v7 = vld [vmem:[#allocation232_spill] sm:$0xff] }
 0x580   : > { %21385 = vmatprep.mubr.f32.mxu1 %v31984_v3  ;;  %v16436_v33 = vsel %vm31990_vm9, %v31988_v7, 0.0  ;;  %v31993_v3 = vrot.slane %v31992_v45, 2  ;;  %v16819_v12 = vsub.f32 %v28997_v21, %v31997_v27  ;;  %v29035_v7 = vsub.f32 %v16517_v17, %v29016_v25  ;;  %v32006_v27 = vld [vmem:[#allocation238_spill] sm:$0xff] }
 0x581   : > { %22736 = vmatmul.mubr.f32.gmra.mrb[14].mxu0 %v16760_v29  ;;  %v31991_v29 = vld [vmem:[#allocation313_spill] sm:$0xff]  ;;  %v16529_v45 = vsel %vm951_vm2, %v16436_v33, 0  ;;  %v32004_v17 = vand.u32 4294901760, %v31897_v0  ;;  %v32009_v0 = vand.u32 4294901760, %v31902_v20  ;;  %v32013_v20 = vand.u32 4294901760, %v28585_v52 }
 0x582   : > { %22738 = vmatprep.mubr.f32.mxu0 %v31987_v23  ;;  %v16402_v15 = vsel %vm31994_vm0, %v31993_v3, %v16401_v2  ;;  %v16800_v23 = vand.u32 4294901760, %v16799_v35  ;;  %v32000_v2 = vld [vmem:[#allocation135_spill] sm:$0xff]  ;;  %v32003_v35 = vand.u32 4294901760, %v29007_v55  ;;  %v16820_v3 = vand.u32 4294901760, %v16819_v12 }
 0x583   : > { %21386 = vmatmul.mubr.f32.gmra.mrb[14].mxu1 %v31991_v29  ;;  %v29037_v29 = vand.u32 4294901760, %v16523_v14  ;;  %v16532_v19 = vsel %vm951_vm2, %v16402_v15, 0  ;;  %vm32001_vm11 = vcmp.le.s32.totalorder %v32000_v2, 15  ;;  %v29054_v15 = vand.u32 4294901760, %v16529_v45 }
 0x584   : > { %21388 = vmatprep.mubr.f32.mxu1 %v31996_v49  ;;  %v16438_v42 = vsel %vm32001_vm11, %v16404_v24, 0.0  ;;  %v32002_v49 = vld [vmem:[#allocation322_spill] sm:$0xff]  ;;  %v29057_v24 = vand.u32 4294901760, %v16532_v19  ;;  %v32016_v52 = vand.u32 4294901760, %v28606_v47 }
 0x585   : > { %22739 = vmatmul.mubr.f32.gmra.mrb[16].mxu0 %v16780_v54  ;;  %31998 = vst [vmem:[#allocation16_spill] sm:$0xff] %v29037_v29  ;;  %v16839_v54 = vsub.f32 %v29007_v55, %v32003_v35  ;;  %v29052_v33 = vsub.f32 %v16523_v14, %v29037_v29  ;;  %32005 = vst [vmem:[#allocation268_spill] sm:$0xff] %v29054_v15  ;;  %v16535_v2 = vsel %vm951_vm2, %v16438_v42, 0  ;;  %vm18422_vm2 = vcmask 523264  }
 0x586   : > { %22741 = vmatprep.mubr.f32.mxu0 %v31999_v13  ;;  %v30613_v13 = vand.u32 4294901760, %v29035_v7  ;;  %32007 = vst [vmem:[#allocation276_spill] sm:$0xff] %v29057_v24  ;;  %v29068_v35 = vsub.f32 %v16529_v45, %v29054_v15  ;;  %v29074_v42 = vsub.f32 %v16532_v19, %v29057_v24 }
 0x587   : > { %21389 = vmatmul.mubr.f32.gmra.mrb[16].mxu1 %v32002_v49  ;;  %v32008_v49 = vld [vmem:[#allocation329_spill] sm:$0xff]  ;;  %v30617_v12 = vand.u32 4294901760, %v29052_v33 }
 0x588   : > { %21391 = vmatprep.mubr.f32.mxu1 %v32004_v17  ;;  %v16859_v14 = vsub.f32 %v29035_v7, %v30613_v13  ;;  %v29070_v17 = vand.u32 4294901760, %v16535_v2  ;;  %v30614_v45 = vand.u32 4294901760, %v29068_v35  ;;  %v30615_v19 = vand.u32 4294901760, %v29074_v42  ;;  %v32015_v13 = vld [vmem:[#allocation341_spill] sm:$0xff] }
 0x589   : > { %22742 = vmatmul.mubr.f32.gmra.mrb[18].mxu0 %v16800_v23  ;;  %v16840_v23 = vand.u32 4294901760, %v16839_v54  ;;  %v32012_v54 = vld [vmem:[#allocation334_spill] sm:$0xff] }
 0x58a   : > { %22744 = vmatprep.mubr.f32.mxu0 %v32006_v27  ;;  %32010 = vst [vmem:[#allocation280_spill] sm:$0xff] %v29070_v17  ;;  %v32011_v27 = vld [vmem:[#allocation244_spill] sm:$0xff] }
 0x58b   : > { %21392 = vmatmul.mubr.f32.gmra.mrb[18].mxu1 %v32008_v49  ;;  %v16879_v49 = vsub.f32 %v29052_v33, %v30617_v12  ;;  %v32044_v12 = vld [vmem:[#allocation215_spill] sm:$0xff] }
 0x58c   : > { %21394 = vmatprep.mubr.f32.mxu1 %v32009_v0  ;;  %v29084_v0 = vsub.f32 %v16535_v2, %v29070_v17  ;;  %v16909_v2 = vsub.f32 %v29074_v42, %v30615_v19 }
 0x58d   : > { %22745 = vmatmul.mubr.f32.gmra.mrb[20].mxu0 %v16820_v3  ;;  %v16860_v3 = vand.u32 4294901760, %v16859_v14  ;;  %v16899_v14 = vsub.f32 %v29068_v35, %v30614_v45  ;;  %v32021_v45 = vld [vmem:[#allocation350_spill] sm:$0xff] }
 0x58e   : > { %22747 = vmatprep.mubr.f32.mxu0 %v32011_v27  ;;  %v32014_v27 = vld [vmem:[#allocation247_spill] sm:$0xff] }
 0x58f   : > { %21395 = vmatmul.mubr.f32.gmra.mrb[20].mxu1 %v32012_v54  ;;  %v30616_v54 = vand.u32 4294901760, %v29084_v0  ;;  %v16900_v47 = vand.u32 4294901760, %v16899_v14  ;;  %v32025_v14 = vld [vmem:[#allocation164_spill] sm:$0xff] }
 0x590   : > { %21397 = vmatprep.mubr.f32.mxu1 %v32013_v20  ;;  %v32017_v20 = vld [vmem:[#allocation249_spill] sm:$0xff] }
 0x591   : > { %22748 = vmatmul.mubr.f32.gmra.mrb[22].mxu0 %v16840_v23  ;;  %v16880_v23 = vand.u32 4294901760, %v16879_v49  ;;  %v32020_v49 = vld [vmem:[#allocation250_spill] sm:$0xff] }
 0x592   : > { %22750 = vmatprep.mubr.f32.mxu0 %v32014_v27  ;;  %v32018_v27 = vld [vmem:[#allocation346_spill] sm:$0xff] }
 0x593   : > { %21398 = vmatmul.mubr.f32.gmra.mrb[22].mxu1 %v32015_v13  ;;  %v32019_v13 = vand.u32 4294901760, %v28622_v40  ;;  %v32024_v40 = vand.u32 4294901760, %v28647_v61  ;;  %v32029_v61 = vld [vmem:[#allocation2_spill] sm:$0xff] }
 0x594   : > { %21400 = vmatprep.mubr.f32.mxu1 %v32016_v52  ;;  %v16910_v52 = vand.u32 4294901760, %v16909_v2  ;;  %v32033_v2 = vld [vmem:[#allocation273_spill] sm:$0xff] }
 0x595   : > { %22751 = vmatmul.mubr.f32.gmra.mrb[24].mxu0 %v16860_v3  ;;  %v16919_v3 = vsub.f32 %v29084_v0, %v30616_v54  ;;  %v32043_v54 = vld [vmem:[#allocation178_spill] sm:$0xff] }
 0x596   : > { %22753 = vmatprep.mubr.f32.mxu0 %v32017_v20  ;;  %v32022_v20 = vand.u32 4294901760, %v28635_v51  ;;  %v32028_v51 = vld [vmem:[#allocation53_spill] sm:$0xff] }
 0x597   : > { %21401 = vmatmul.mubr.f32.gmra.mrb[24].mxu1 %v32018_v27  ;;  %v16920_v19 = vand.u32 4294901760, %v16919_v3  ;;  %v32026_v27 = vld [vmem:[#allocation254_spill] sm:$0xff]  ;;  %v32036_v3 = vld [vmem:[#allocation284_spill] sm:$0xff] }
 0x598   : > { %21403 = vmatprep.mubr.f32.mxu1 %v32019_v13  ;;  %v32034_v13 = vld [vmem:[#allocation333_spill] sm:$0xff] }
 0x599   : > { %22754 = vmatmul.mubr.f32.gmra.mrb[26].mxu0 %v16880_v23  ;;  %v32023_v23 = vld [vmem:[#allocation353_spill] sm:$0xff] }
 0x59a   : > { %22756 = vmatprep.mubr.f32.mxu0 %v32020_v49  ;;  %v32037_v49 = vld [vmem:[#allocation339_spill] sm:$0xff] }
 0x59b   : > { %21404 = vmatmul.mubr.f32.gmra.mrb[26].mxu1 %v32021_v45  ;;  %v32027_v45 = vld [vmem:[#allocation165_spill] sm:$0xff] }
 0x59c   : > { %21406 = vmatprep.mubr.f32.mxu1 %v32022_v20  ;;  %v32039_v20 = vld [vmem:[#allocation293_spill] sm:$0xff] }
 0x59d   : > { %22757 = vmatmul.mubr.f32.gmra.mrb[28].mxu0 %v16900_v47  ;;  %v32035_v47 = vld [vmem:[#allocation191_spill] sm:$0xff] }
 0x59e   : > { %22759 = vmatprep.mubr.f32.mxu0 %v16910_v52  ;;  %v32038_v52 = vld [vmem:[#allocation201_spill] sm:$0xff] }
 0x59f   : > { %21407 = vmatmul.mubr.f32.gmra.mrb[28].mxu1 %v32023_v23  ;;  %v32040_v23 = vld [vmem:[#allocation344_spill] sm:$0xff] }
 0x5a0   : > { %21409 = vmatprep.mubr.f32.mxu1 %v32024_v40  ;;  %v32041_v40 = vld [vmem:[#allocation209_spill] sm:$0xff] }
 0x5a1   : > { %22760 = vmatmul.mubr.f32.gmra.mrb[30].mxu0 %v16920_v19  ;;  %v32032_v19 = vld [vmem:[#allocation186_spill] sm:$0xff] }
 0x5a2   : > { %22764 = vmatprep.mubr.f32.mxu0 %v32025_v14 }
 0x5a3   : > { %21410 = vmatmul.mubr.f32.gmra.mrb[30].mxu1 %v32026_v27  ;;  %v32042_v27 = vld [vmem:[#allocation300_spill] sm:$0xff] }
 0x5a4   : > { %21414 = vmatprep.mubr.f32.mxu1 %v28399_v26 }
 0x5a5   : > { %22765 = vmatmul.mubr.f32.vlgmr.msra.gmra.mrb[0].mxu0 %v28811_v62 }
 0x5a6   : > { %22767 = vmatprep.mubr.f32.mxu0 %v32027_v45  ;;  %22813 = vmatpush3.msra.mxu0 %v28734_v10  ;;  %v32030_v10 = vld [vmem:[#allocation179_spill] sm:$0xff] }
 0x5a7   : > { %22862 = vmatprep.subr.mxu0 %v28675_v63  ;;  %21415 = vmatmul.mubr.f32.vlgmr.msra.gmra.mrb[0].mxu1 %v31853_v37 }
 0x5a8   : > { %21463 = vmatpush3.msra.mxu1 %v28266_v41  ;;  %21417 = vmatprep.mubr.f32.mxu1 %v28414_v44  ;;  %v32031_v41 = vld [vmem:[#allocation184_spill] sm:$0xff] }
 0x5a9   : > { %22768 = vmatmul.mubr.f32.gmra.mrb[2].mxu0 %v28821_v31  ;;  %21512 = vmatprep.subr.mxu1 %v32029_v61 }
 0x5aa   : > { %22770 = vmatprep.mubr.f32.mxu0 %v32028_v51 }
 0x5ab   : > { %21418 = vmatmul.mubr.f32.gmra.mrb[2].mxu1 %v31854_v16 }
 0x5ac   : > { %21420 = vmatprep.mubr.f32.mxu1 %v28420_v36 }
 0x5ad   : > { %22771 = vmatmul.mubr.f32.gmra.mrb[4].mxu0 %v28837_v6 }
 0x5ae   : > { %22773 = vmatprep.mubr.f32.mxu0 %v32030_v10 }
 0x5af   : > { %21421 = vmatmul.mubr.f32.gmra.mrb[4].mxu1 %v31244_v59 }
 0x5b0   : > { %21423 = vmatprep.mubr.f32.mxu1 %v28442_v57 }
 0x5b1   : > { %22774 = vmatmul.mubr.f32.gmra.mrb[6].mxu0 %v28857_v28 }
 0x5b2   : > { %22776 = vmatprep.mubr.f32.mxu0 %v32031_v41  ;;  %v32059_v41 = vld [vmem:[#allocation242_spill] sm:$0xff] }
 0x5b3   : > { %21424 = vmatmul.mubr.f32.gmra.mrb[6].mxu1 %v31855_v8 }
 0x5b4   : > { %21426 = vmatprep.mubr.f32.mxu1 %v28457_v43 }
 0x5b5   : > { %22777 = vmatmul.mubr.f32.gmra.mrb[8].mxu0 %v28874_v22  ;;  %v32056_v22 = vld [vmem:[#allocation237_spill] sm:$0xff] }
 0x5b6   : > { %22779 = vmatprep.mubr.f32.mxu0 %v32032_v19  ;;  %v32053_v19 = vld [vmem:[#allocation231_spill] sm:$0xff] }
 0x5b7   : > { %21427 = vmatmul.mubr.f32.gmra.mrb[8].mxu1 %v32033_v2 }
 0x5b8   : > { %21429 = vmatprep.mubr.f32.mxu1 %v32034_v13 }
 0x5b9   : > { %22780 = vmatmul.mubr.f32.gmra.mrb[10].mxu0 %v28891_v9  ;;  %v32050_v9 = vld [vmem:[#allocation225_spill] sm:$0xff] }
 0x5ba   : > { %22782 = vmatprep.mubr.f32.mxu0 %v32035_v47  ;;  %v32047_v47 = vld [vmem:[#allocation218_spill] sm:$0xff] }
 0x5bb   : > { %21430 = vmatmul.mubr.f32.gmra.mrb[10].mxu1 %v32036_v3 }
 0x5bc   : > { %21432 = vmatprep.mubr.f32.mxu1 %v32037_v49 }
 0x5bd   : > { %22783 = vmatmul.mubr.f32.gmra.mrb[12].mxu0 %v28901_v56  ;;  %v32045_v56 = vld [vmem:[#allocation309_spill] sm:$0xff] }
 0x5be   : > { %22785 = vmatprep.mubr.f32.mxu0 %v32038_v52  ;;  %v32046_v52 = vld [vmem:[#allocation217_spill] sm:$0xff] }
 0x5bf   : > { %21433 = vmatmul.mubr.f32.gmra.mrb[12].mxu1 %v32039_v20 }
 0x5c0   : > { %21435 = vmatprep.mubr.f32.mxu1 %v32040_v23 }
 0x5c1   : > { %22786 = vmatmul.mubr.f32.gmra.mrb[14].mxu0 %v28923_v1  ;;  %v32048_v1 = vld [vmem:[#allocation317_spill] sm:$0xff] }
 0x5c2   : > { %22788 = vmatprep.mubr.f32.mxu0 %v32041_v40  ;;  %v32049_v40 = vld [vmem:[#allocation239_spill] sm:$0xff] }
 0x5c3   : > { %21436 = vmatmul.mubr.f32.gmra.mrb[14].mxu1 %v32042_v27 }
 0x5c4   : > { %21438 = vmatprep.mubr.f32.mxu1 %v32043_v54 }
 0x5c5   : > { %22789 = vmatmul.mubr.f32.gmra.mrb[16].mxu0 %v28946_v38  ;;  %v32051_v38 = vld [vmem:[#allocation324_spill] sm:$0xff] }
 0x5c6   : > { %22791 = vmatprep.mubr.f32.mxu0 %v32044_v12  ;;  %v32052_v12 = vld [vmem:[#allocation175_spill] sm:$0xff] }
 0x5c7   : > { %21439 = vmatmul.mubr.f32.gmra.mrb[16].mxu1 %v32045_v56 }
 0x5c8   : > { %21441 = vmatprep.mubr.f32.mxu1 %v32046_v52 }
 0x5c9   : > { %22792 = vmatmul.mubr.f32.gmra.mrb[18].mxu0 %v28963_v30  ;;  %v32054_v30 = vld [vmem:[#allocation331_spill] sm:$0xff] }
 0x5ca   : > { %22794 = vmatprep.mubr.f32.mxu0 %v32047_v47  ;;  %v32055_v47 = vld [vmem:[#allocation5_spill] sm:$0xff] }
 0x5cb   : > { %21442 = vmatmul.mubr.f32.gmra.mrb[18].mxu1 %v32048_v1 }
 0x5cc   : > { %21444 = vmatprep.mubr.f32.mxu1 %v32049_v40 }
 0x5cd   : > { %22795 = vmatmul.mubr.f32.gmra.mrb[20].mxu0 %v28980_v5  ;;  %v32057_v5 = vld [vmem:[#allocation338_spill] sm:$0xff] }
 0x5ce   : > { %22797 = vmatprep.mubr.f32.mxu0 %v32050_v9  ;;  %v32058_v9 = vld [vmem:[#allocation259_spill] sm:$0xff] }
 0x5cf   : > { %21445 = vmatmul.mubr.f32.gmra.mrb[20].mxu1 %v32051_v38 }
 0x5d0   : > { %21447 = vmatprep.mubr.f32.mxu1 %v32052_v12 }
 0x5d1   : > { %22798 = vmatmul.mubr.f32.gmra.mrb[22].mxu0 %v28988_v4  ;;  %v32060_v4 = vld [vmem:[#allocation343_spill] sm:$0xff] }
 0x5d2   : > { %22800 = vmatprep.mubr.f32.mxu0 %v32053_v19 }
 0x5d3   : > { %21448 = vmatmul.mubr.f32.gmra.mrb[22].mxu1 %v32054_v30 }
 0x5d4   : > { %21450 = vmatprep.mubr.f32.mxu1 %v32055_v47 }
 0x5d5   : > { %22801 = vmatmul.mubr.f32.gmra.mrb[24].mxu0 %v29016_v25  ;;  %v32063_v25 = vld [vmem:[#allocation3_spill] sm:$0xff] }
 0x5d6   : > { %22803 = vmatprep.mubr.f32.mxu0 %v32056_v22  ;;  %v32061_v22 = vld [vmem:[#allocation168_spill] sm:$0xff] }
 0x5d7   : > { %21451 = vmatmul.mubr.f32.gmra.mrb[24].mxu1 %v32057_v5 }
 0x5d8   : > { %21453 = vmatprep.mubr.f32.mxu1 %v32058_v9 }
 0x5d9   : > { %22804 = vmatmul.mubr.f32.gmra.mrb[26].mxu0 %v29037_v29  ;;  %v32062_v29 = vld [vmem:[#allocation4_spill] sm:$0xff] }
 0x5da   : > { %22806 = vmatprep.mubr.f32.mxu0 %v32059_v41  ;;  %v9260_v19 = vsub.f32 %v32063_v25, %v32062_v29  ;;  %v32076_v29 = vld [vmem:[#allocation221_spill] sm:$0xff] }
 0x5db   : > { %21454 = vmatmul.mubr.f32.gmra.mrb[26].mxu1 %v32060_v4 }
 0x5dc   : > { %21456 = vmatprep.mubr.f32.mxu1 %v28624_v50 }
 0x5dd   : > { %22807 = vmatmul.mubr.f32.gmra.mrb[28].mxu0 %v29054_v15  ;;  %v32064_v15 = vld [vmem:[#allocation25_spill] sm:$0xff] }
 0x5de   : > { %22809 = vmatprep.mubr.f32.mxu0 %v29057_v24  ;;  %v29188_v24 = vand.u32 4294901760, %v9260_v19  ;;  %v32094_v19 = vld [vmem:[#allocation51_spill] sm:$0xff] }
 0x5df   : > { %21457 = vmatmul.mubr.f32.gmra.mrb[28].mxu1 %v31883_v34 }
 0x5e0   : > { %21459 = vmatprep.mubr.f32.mxu1 %v28637_v48 }
 0x5e1   : > { %22810 = vmatmul.mubr.f32.gmra.mrb[30].mxu0 %v29070_v17  ;;  %v32065_v17 = vld [vmem:[#allocation12_spill] sm:$0xff] }
 0x5e2   : > { %22814 = vmatprep.mubr.f32.mxu0 %v32061_v22  ;;  %v32066_v22 = vld [vmem:[#allocation180_spill] sm:$0xff] }
 0x5e3   : > { %21460 = vmatmul.mubr.f32.gmra.mrb[30].mxu1 %v31885_v11 }
 0x5e4   : > { %21464 = vmatprep.mubr.f32.mxu1 %v28399_v26  ;;  %v32067_v26 = vld [vmem:[#allocation183_spill] sm:$0xff] }
 0x5e5   : > { %22815 = vmatmul.mubr.f32.vlgmr.msra.gmra.mrb[0].mxu0 %v28826_v60 }
 0x5e6   : > { %22817 = vmatprep.mubr.f32.mxu0 %v32064_v15  ;;  %22863 = vmatpush3.msra.mxu0 %v28675_v63  ;;  %v32077_v15 = vld [vmem:[#allocation220_spill] sm:$0xff] }
 0x5e7   : > { %22912 = vmatprep.subr.mxu0 %v32065_v17  ;;  %21465 = vmatmul.mubr.f32.vlgmr.msra.gmra.mrb[0].mxu1 %v31853_v37  ;;  %v32068_v37 = vld [vmem:[#allocation188_spill] sm:$0xff] }
 0x5e8   : > { %21513 = vmatpush3.msra.mxu1 %v32029_v61  ;;  %21467 = vmatprep.mubr.f32.mxu1 %v28414_v44  ;;  %v32069_v44 = vld [vmem:[#allocation74_spill] sm:$0xff]  ;;  %v32078_v61 = vld [vmem:[#allocation228_spill] sm:$0xff] }
 0x5e9   : > { %22818 = vmatmul.mubr.f32.gmra.mrb[2].mxu0 %v28835_v53  ;;  %21562 = vmatprep.subr.mxu1 %v29188_v24 }
 0x5ea   : > { %22820 = vmatprep.mubr.f32.mxu0 %v32066_v22  ;;  %v32110_v22 = vld [vmem:[#allocation89_spill] sm:$0xff] }
 0x5eb   : > { %21468 = vmatmul.mubr.f32.gmra.mrb[2].mxu1 %v31854_v16  ;;  %v32074_v16 = vld [vmem:[#allocation17_spill] sm:$0xff] }
 0x5ec   : > { %21470 = vmatprep.mubr.f32.mxu1 %v28420_v36  ;;  %v32073_v36 = vld [vmem:[#allocation213_spill] sm:$0xff] }
 0x5ed   : > { %22821 = vmatmul.mubr.f32.gmra.mrb[4].mxu0 %v28850_v46 }
 0x5ee   : > { %22823 = vmatprep.mubr.f32.mxu0 %v32067_v26 }
 0x5ef   : > { %21471 = vmatmul.mubr.f32.gmra.mrb[4].mxu1 %v31244_v59  ;;  %v32070_v59 = vld [vmem:[#allocation197_spill] sm:$0xff] }
 0x5f0   : > { %21473 = vmatprep.mubr.f32.mxu1 %v28442_v57  ;;  %v32071_v57 = vld [vmem:[#allocation204_spill] sm:$0xff] }
 0x5f1   : > { %22824 = vmatmul.mubr.f32.gmra.mrb[6].mxu0 %v28872_v58 }
 0x5f2   : > { %22826 = vmatprep.mubr.f32.mxu0 %v32068_v37  ;;  %v32113_v37 = vld [vmem:[#allocation216_spill] sm:$0xff] }
 0x5f3   : > { %21474 = vmatmul.mubr.f32.gmra.mrb[6].mxu1 %v31855_v8  ;;  %v32075_v8 = vld [vmem:[#allocation121_spill] sm:$0xff] }
 0x5f4   : > { %21476 = vmatprep.mubr.f32.mxu1 %v28457_v43  ;;  %v32072_v43 = vld [vmem:[#allocation189_spill] sm:$0xff] }
 0x5f5   : > { %22827 = vmatmul.mubr.f32.gmra.mrb[8].mxu0 %v28889_v18  ;;  %v32111_v26 = vand.u32 4294901760, %v32072_v43 }
 0x5f6   : > { %22829 = vmatprep.mubr.f32.mxu0 %v32069_v44  ;;  %v32114_v44 = vld [vmem:[#allocation98_spill] sm:$0xff] }
 0x5f7   : > { %21477 = vmatmul.mubr.f32.gmra.mrb[8].mxu1 %v32033_v2  ;;  %v32097_v2 = vld [vmem:[#allocation194_spill] sm:$0xff] }
 0x5f8   : > { %21479 = vmatprep.mubr.f32.mxu1 %v32034_v13  ;;  %v32098_v13 = vld [vmem:[#allocation61_spill] sm:$0xff] }
 0x5f9   : > { %22830 = vmatmul.mubr.f32.gmra.mrb[10].mxu0 %v28909_v39 }
 0x5fa   : > { %22832 = vmatprep.mubr.f32.mxu0 %v32070_v59  ;;  %v32115_v59 = vand.u32 4294901760, %v32074_v16 }
 0x5fb   : > { %21480 = vmatmul.mubr.f32.gmra.mrb[10].mxu1 %v32036_v3  ;;  %v32101_v3 = vld [vmem:[#allocation200_spill] sm:$0xff] }
 0x5fc   : > { %21482 = vmatprep.mubr.f32.mxu1 %v32037_v49  ;;  %v32102_v49 = vld [vmem:[#allocation72_spill] sm:$0xff] }
 0x5fd   : > { %22833 = vmatmul.mubr.f32.gmra.mrb[12].mxu0 %v28921_v32 }
 0x5fe   : > { %22835 = vmatprep.mubr.f32.mxu0 %v32071_v57  ;;  %v32117_v57 = vld [vmem:[#allocation224_spill] sm:$0xff] }
 0x5ff   : > { %21483 = vmatmul.mubr.f32.gmra.mrb[12].mxu1 %v32039_v20  ;;  %v32105_v20 = vld [vmem:[#allocation75_spill] sm:$0xff] }
 0x600   : > { %21485 = vmatprep.mubr.f32.mxu1 %v32040_v23  ;;  %v32106_v23 = vld [vmem:[#allocation79_spill] sm:$0xff] }
 0x601   : > { %22836 = vmatmul.mubr.f32.gmra.mrb[14].mxu0 %v32072_v43  ;;  %v32120_v43 = vld [vmem:[#allocation113_spill] sm:$0xff] }
 0x602   : > { %22838 = vmatprep.mubr.f32.mxu0 %v32073_v36  ;;  %v32118_v36 = vld [vmem:[#allocation111_spill] sm:$0xff] }
 0x603   : > { %21486 = vmatmul.mubr.f32.gmra.mrb[14].mxu1 %v32042_v27  ;;  %v32109_v27 = vld [vmem:[#allocation206_spill] sm:$0xff] }
 0x604   : > { %21488 = vmatprep.mubr.f32.mxu1 %v32043_v54  ;;  %v32093_v54 = vld [vmem:[#allocation187_spill] sm:$0xff] }
 0x605   : > { %22839 = vmatmul.mubr.f32.gmra.mrb[16].mxu0 %v32074_v16  ;;  %v32124_v16 = vld [vmem:[#allocation124_spill] sm:$0xff] }
 0x606   : > { %22841 = vmatprep.mubr.f32.mxu0 %v32075_v8  ;;  %v32119_v8 = vand.u32 4294901760, %v32076_v29 }
 0x607   : > { %21489 = vmatmul.mubr.f32.gmra.mrb[16].mxu1 %v32045_v56  ;;  %v32079_v56 = vld [vmem:[#allocation236_spill] sm:$0xff] }
 0x608   : > { %21491 = vmatprep.mubr.f32.mxu1 %v32046_v52  ;;  %v32103_v52 = vand.u32 4294901760, %v28909_v39  ;;  %v32112_v39 = vld [vmem:[#allocation92_spill] sm:$0xff] }
 0x609   : > { %22842 = vmatmul.mubr.f32.gmra.mrb[18].mxu0 %v32076_v29  ;;  %v32128_v29 = vld [vmem:[#allocation131_spill] sm:$0xff] }
 0x60a   : > { %22844 = vmatprep.mubr.f32.mxu0 %v32077_v15  ;;  %v32121_v15 = vld [vmem:[#allocation226_spill] sm:$0xff] }
 0x60b   : > { %21492 = vmatmul.mubr.f32.gmra.mrb[18].mxu1 %v32048_v1  ;;  %v32080_v1 = vld [vmem:[#allocation241_spill] sm:$0xff] }
 0x60c   : > { %21494 = vmatprep.mubr.f32.mxu1 %v32049_v40  ;;  %v32107_v40 = vand.u32 4294901760, %v28921_v32  ;;  %v32116_v32 = vld [vmem:[#allocation106_spill] sm:$0xff] }
 0x60d   : > { %22845 = vmatmul.mubr.f32.gmra.mrb[20].mxu0 %v28997_v21 }
 0x60e   : > { %22847 = vmatprep.mubr.f32.mxu0 %v32078_v61  ;;  %v32122_v61 = vld [vmem:[#allocation118_spill] sm:$0xff] }
 0x60f   : > { %21495 = vmatmul.mubr.f32.gmra.mrb[20].mxu1 %v32051_v38  ;;  %v32081_v38 = vld [vmem:[#allocation246_spill] sm:$0xff] }
 0x610   : > { %21497 = vmatprep.mubr.f32.mxu1 %v32052_v12  ;;  %v32091_v12 = vand.u32 4294901760, %v28850_v46  ;;  %v32100_v46 = vld [vmem:[#allocation65_spill] sm:$0xff] }
 0x611   : > { %22848 = vmatmul.mubr.f32.gmra.mrb[22].mxu0 %v29007_v55 }
 0x612   : > { %22850 = vmatprep.mubr.f32.mxu0 %v32079_v56  ;;  %v32123_v56 = vand.u32 4294901760, %v28997_v21  ;;  %v32132_v21 = vld [vmem:[#allocation144_spill] sm:$0xff] }
 0x613   : > { %21498 = vmatmul.mubr.f32.gmra.mrb[22].mxu1 %v32054_v30  ;;  %v32082_v30 = vld [vmem:[#allocation169_spill] sm:$0xff] }
 0x614   : > { %21500 = vmatprep.mubr.f32.mxu1 %v32055_v47  ;;  %v32099_v47 = vand.u32 4294901760, %v28889_v18  ;;  %v32108_v18 = vld [vmem:[#allocation82_spill] sm:$0xff] }
 0x615   : > { %22851 = vmatmul.mubr.f32.gmra.mrb[24].mxu0 %v29035_v7 }
 0x616   : > { %22853 = vmatprep.mubr.f32.mxu0 %v32080_v1  ;;  %v32125_v1 = vld [vmem:[#allocation233_spill] sm:$0xff] }
 0x617   : > { %21501 = vmatmul.mubr.f32.gmra.mrb[24].mxu1 %v32057_v5  ;;  %v32084_v5 = vld [vmem:[#allocation26_spill] sm:$0xff] }
 0x618   : > { %21503 = vmatprep.mubr.f32.mxu1 %v32058_v9  ;;  %v32083_v9 = vand.u32 4294901760, %v28826_v60  ;;  %v32090_v60 = vld [vmem:[#allocation36_spill] sm:$0xff] }
 0x619   : > { %22854 = vmatmul.mubr.f32.gmra.mrb[26].mxu0 %v29052_v33 }
 0x61a   : > { %22856 = vmatprep.mubr.f32.mxu0 %v32081_v38  ;;  %v32126_v38 = vld [vmem:[#allocation127_spill] sm:$0xff] }
 0x61b   : > { %21504 = vmatmul.mubr.f32.gmra.mrb[26].mxu1 %v32060_v4  ;;  %v32085_v4 = vld [vmem:[#allocation34_spill] sm:$0xff] }
 0x61c   : > { %21506 = vmatprep.mubr.f32.mxu1 %v28624_v50  ;;  %v32087_v50 = vand.u32 4294901760, %v28835_v53  ;;  %v32095_v53 = vand.u32 4294901760, %v28872_v58  ;;  %v32104_v58 = vld [vmem:[#allocation77_spill] sm:$0xff] }
 0x61d   : > { %22857 = vmatmul.mubr.f32.gmra.mrb[28].mxu0 %v29068_v35 }
 0x61e   : > { %22859 = vmatprep.mubr.f32.mxu0 %v29074_v42 }
 0x61f   : > { %21507 = vmatmul.mubr.f32.gmra.mrb[28].mxu1 %v31883_v34  ;;  %v32086_v34 = vld [vmem:[#allocation27_spill] sm:$0xff] }
 0x620   : > { %21509 = vmatprep.mubr.f32.mxu1 %v28637_v48  ;;  %v32088_v48 = vld [vmem:[#allocation31_spill] sm:$0xff] }
 0x621   : > { %22860 = vmatmul.mubr.f32.gmra.mrb[30].mxu0 %v29084_v0 }
 0x622   : > { %22864 = vmatprep.mubr.f32.mxu0 %v32082_v30  ;;  %v32127_v30 = vand.u32 4294901760, %v29007_v55  ;;  %v32136_v55 = vld [vmem:[#allocation152_spill] sm:$0xff] }
 0x623   : > { %21510 = vmatmul.mubr.f32.gmra.mrb[30].mxu1 %v31885_v11  ;;  %v32089_v11 = vld [vmem:[#allocation59_spill] sm:$0xff] }
 0x624   : > { %21514 = vmatprep.mubr.f32.mxu1 %v32084_v5  ;;  %v32130_v5 = vld [vmem:[#allocation139_spill] sm:$0xff] }
 0x625   : > { %22865 = vmatmul.mubr.f32.vlgmr.msra.gmra.mrb[0].mxu0 %v32083_v9  ;;  %v32129_v9 = vld [vmem:[#allocation240_spill] sm:$0xff] }
 0x626   : > { %22867 = vmatprep.mubr.f32.mxu0 %v32085_v4  ;;  %22913 = vmatpush3.msra.mxu0 %v32065_v17  ;;  %v32092_v17 = vld [vmem:[#allocation42_spill] sm:$0xff]  ;;  %v32131_v4 = vand.u32 4294901760, %v29035_v7  ;;  %v32140_v7 = vld [vmem:[#allocation159_spill] sm:$0xff] }
 0x627   : > { %22962 = vmatprep.subr.mxu0 %v28675_v63  ;;  %21515 = vmatmul.mubr.f32.vlgmr.msra.gmra.mrb[0].mxu1 %v32086_v34  ;;  %v32133_v34 = vld [vmem:[#allocation245_spill] sm:$0xff] }
 0x628   : > { %21563 = vmatpush3.msra.mxu1 %v29188_v24  ;;  %21517 = vmatprep.mubr.f32.mxu1 %v32088_v48  ;;  %v32096_v24 = vld [vmem:[#allocation57_spill] sm:$0xff]  ;;  %v32135_v48 = vand.u32 4294901760, %v29052_v33  ;;  %v32144_v33 = vld [vmem:[#allocation312_spill] sm:$0xff] }
 0x629   : > { %22868 = vmatmul.mubr.f32.gmra.mrb[2].mxu0 %v32087_v50  ;;  %21612 = vmatprep.subr.mxu1 %v32063_v25  ;;  %v32134_v50 = vld [vmem:[#allocation149_spill] sm:$0xff] }
 0x62a   : > { %22870 = vmatprep.mubr.f32.mxu0 %v32089_v11  ;;  %v32137_v11 = vld [vmem:[#allocation248_spill] sm:$0xff] }
 0x62b   : > { %21518 = vmatmul.mubr.f32.gmra.mrb[2].mxu1 %v32090_v60  ;;  %v32138_v60 = vld [vmem:[#allocation157_spill] sm:$0xff] }
 0x62c   : > { %21520 = vmatprep.mubr.f32.mxu1 %v32092_v17  ;;  %v32141_v17 = vand.u32 4294901760, %v29074_v42  ;;  %v32147_v42 = vld [vmem:[#allocation11_spill] sm:$0xff] }
 0x62d   : > { %22871 = vmatmul.mubr.f32.gmra.mrb[4].mxu0 %v32091_v12  ;;  %v32139_v12 = vand.u32 4294901760, %v29068_v35  ;;  %v32146_v35 = vld [vmem:[#allocation10_spill] sm:$0xff] }
 0x62e   : > { %22873 = vmatprep.mubr.f32.mxu0 %v32093_v54  ;;  %v32142_v54 = vld [vmem:[#allocation160_spill] sm:$0xff] }
 0x62f   : > { %21521 = vmatmul.mubr.f32.gmra.mrb[4].mxu1 %v32094_v19  ;;  %v32143_v19 = vand.u32 4294901760, %v29084_v0  ;;  %v32148_v0 = vld [vmem:[#allocation15_spill] sm:$0xff] }
 0x630   : > { %21523 = vmatprep.mubr.f32.mxu1 %v32096_v24  ;;  %v32149_v24 = vld [vmem:[#allocation19_spill] sm:$0xff] }
 0x631   : > { %22874 = vmatmul.mubr.f32.gmra.mrb[6].mxu0 %v32095_v53  ;;  %v32145_v53 = vld [vmem:[#allocation318_spill] sm:$0xff] }
 0x632   : > { %22876 = vmatprep.mubr.f32.mxu0 %v32097_v2  ;;  %v32150_v2 = vld [vmem:[#allocation23_spill] sm:$0xff] }
 0x633   : > { %21524 = vmatmul.mubr.f32.gmra.mrb[6].mxu1 %v32098_v13  ;;  %v32151_v13 = vld [vmem:[#allocation33_spill] sm:$0xff] }
 0x634   : > { %21526 = vmatprep.mubr.f32.mxu1 %v32100_v46  ;;  %v32155_v46 = vld [vmem:[#allocation171_spill] sm:$0xff] }
 0x635   : > { %22877 = vmatmul.mubr.f32.gmra.mrb[8].mxu0 %v32099_v47  ;;  %v32154_v47 = vld [vmem:[#allocation39_spill] sm:$0xff] }
 0x636   : > { %22879 = vmatprep.mubr.f32.mxu0 %v32101_v3  ;;  %v32156_v3 = vld [vmem:[#allocation46_spill] sm:$0xff] }
 0x637   : > { %21527 = vmatmul.mubr.f32.gmra.mrb[8].mxu1 %v32102_v49  ;;  %v32157_v49 = vld [vmem:[#allocation186_spill] sm:$0xff] }
 0x638   : > { %21529 = vmatprep.mubr.f32.mxu1 %v32104_v58  ;;  %v32159_v58 = vld [vmem:[#allocation257_spill] sm:$0xff] }
 0x639   : > { %22880 = vmatmul.mubr.f32.gmra.mrb[10].mxu0 %v32103_v52  ;;  %v32158_v52 = vld [vmem:[#allocation52_spill] sm:$0xff] }
 0x63a   : > { %22882 = vmatprep.mubr.f32.mxu0 %v32105_v20  ;;  %v32160_v20 = vld [vmem:[#allocation54_spill] sm:$0xff] }
 0x63b   : > { %21530 = vmatmul.mubr.f32.gmra.mrb[10].mxu1 %v32106_v23  ;;  %v32161_v23 = vld [vmem:[#allocation191_spill] sm:$0xff] }
 0x63c   : > { %21532 = vmatprep.mubr.f32.mxu1 %v32108_v18  ;;  %v32163_v18 = vld [vmem:[#allocation7_spill] sm:$0xff] }
 0x63d   : > { %22883 = vmatmul.mubr.f32.gmra.mrb[12].mxu0 %v32107_v40  ;;  %v32162_v40 = vld [vmem:[#allocation58_spill] sm:$0xff] }
 0x63e   : > { %22885 = vmatprep.mubr.f32.mxu0 %v32109_v27  ;;  %v32164_v27 = vld [vmem:[#allocation62_spill] sm:$0xff] }
 0x63f   : > { %21533 = vmatmul.mubr.f32.gmra.mrb[12].mxu1 %v32110_v22  ;;  %v32165_v22 = vld [vmem:[#allocation201_spill] sm:$0xff] }
 0x640   : > { %21535 = vmatprep.mubr.f32.mxu1 %v32112_v39  ;;  %v32167_v39 = vld [vmem:[#allocation181_spill] sm:$0xff] }
 0x641   : > { %22886 = vmatmul.mubr.f32.gmra.mrb[14].mxu0 %v32111_v26  ;;  %v32166_v26 = vld [vmem:[#allocation70_spill] sm:$0xff] }
 0x642   : > { %22888 = vmatprep.mubr.f32.mxu0 %v32113_v37  ;;  %v32168_v37 = vld [vmem:[#allocation73_spill] sm:$0xff] }
 0x643   : > { %21536 = vmatmul.mubr.f32.gmra.mrb[14].mxu1 %v32114_v44  ;;  %v32169_v44 = vld [vmem:[#allocation209_spill] sm:$0xff] }
 0x644   : > { %21538 = vmatprep.mubr.f32.mxu1 %v32116_v32  ;;  %v32171_v32 = vld [vmem:[#allocation190_spill] sm:$0xff] }
 0x645   : > { %22889 = vmatmul.mubr.f32.gmra.mrb[16].mxu0 %v32115_v59  ;;  %v32170_v59 = vld [vmem:[#allocation80_spill] sm:$0xff] }
 0x646   : > { %22891 = vmatprep.mubr.f32.mxu0 %v32117_v57  ;;  %v32172_v57 = vld [vmem:[#allocation86_spill] sm:$0xff] }
 0x647   : > { %21539 = vmatmul.mubr.f32.gmra.mrb[16].mxu1 %v32118_v36  ;;  %v32173_v36 = vld [vmem:[#allocation215_spill] sm:$0xff] }
 0x648   : > { %21541 = vmatprep.mubr.f32.mxu1 %v32120_v43  ;;  %v32175_v43 = vld [vmem:[#allocation214_spill] sm:$0xff] }
 0x649   : > { %22892 = vmatmul.mubr.f32.gmra.mrb[18].mxu0 %v32119_v8  ;;  %v32174_v8 = vld [vmem:[#allocation90_spill] sm:$0xff] }
 0x64a   : > { %22894 = vmatprep.mubr.f32.mxu0 %v32121_v15  ;;  %v32176_v15 = vld [vmem:[#allocation93_spill] sm:$0xff] }
 0x64b   : > { %21542 = vmatmul.mubr.f32.gmra.mrb[18].mxu1 %v32122_v61  ;;  %v32177_v61 = vld [vmem:[#allocation218_spill] sm:$0xff] }
 0x64c   : > { %21544 = vmatprep.mubr.f32.mxu1 %v32124_v16  ;;  %v32179_v16 = vld [vmem:[#allocation234_spill] sm:$0xff] }
 0x64d   : > { %22895 = vmatmul.mubr.f32.gmra.mrb[20].mxu0 %v32123_v56  ;;  %v32178_v56 = vld [vmem:[#allocation99_spill] sm:$0xff] }
 0x64e   : > { %22897 = vmatprep.mubr.f32.mxu0 %v32125_v1  ;;  %v32180_v1 = vld [vmem:[#allocation104_spill] sm:$0xff] }
 0x64f   : > { %21545 = vmatmul.mubr.f32.gmra.mrb[20].mxu1 %v32126_v38  ;;  %v32181_v38 = vld [vmem:[#allocation225_spill] sm:$0xff] }
 0x650   : > { %21547 = vmatprep.mubr.f32.mxu1 %v32128_v29  ;;  %v32183_v29 = vld [vmem:[#allocation243_spill] sm:$0xff] }
 0x651   : > { %22898 = vmatmul.mubr.f32.gmra.mrb[22].mxu0 %v32127_v30  ;;  %v32182_v30 = vld [vmem:[#allocation107_spill] sm:$0xff] }
 0x652   : > { %22900 = vmatprep.mubr.f32.mxu0 %v32129_v9  ;;  %v32184_v9 = vld [vmem:[#allocation114_spill] sm:$0xff] }
 0x653   : > { %21548 = vmatmul.mubr.f32.gmra.mrb[22].mxu1 %v32130_v5  ;;  %v32185_v5 = vld [vmem:[#allocation231_spill] sm:$0xff] }
 0x654   : > { %21550 = vmatprep.mubr.f32.mxu1 %v32132_v21  ;;  %v32187_v21 = vld [vmem:[#allocation195_spill] sm:$0xff] }
 0x655   : > { %22901 = vmatmul.mubr.f32.gmra.mrb[24].mxu0 %v32131_v4  ;;  %v32186_v4 = vld [vmem:[#allocation119_spill] sm:$0xff] }
 0x656   : > { %22903 = vmatprep.mubr.f32.mxu0 %v32133_v34  ;;  %v32188_v34 = vld [vmem:[#allocation125_spill] sm:$0xff] }
 0x657   : > { %21551 = vmatmul.mubr.f32.gmra.mrb[24].mxu1 %v32134_v50  ;;  %v32189_v50 = vld [vmem:[#allocation237_spill] sm:$0xff] }
 0x658   : > { %21553 = vmatprep.mubr.f32.mxu1 %v32136_v55  ;;  %v32191_v55 = vld [vmem:[#allocation16_spill] sm:$0xff] }
 0x659   : > { %22904 = vmatmul.mubr.f32.gmra.mrb[26].mxu0 %v32135_v48  ;;  %v32190_v48 = vld [vmem:[#allocation126_spill] sm:$0xff] }
 0x65a   : > { %22906 = vmatprep.mubr.f32.mxu0 %v32137_v11  ;;  %v32192_v11 = vld [vmem:[#allocation134_spill] sm:$0xff] }
 0x65b   : > { %21554 = vmatmul.mubr.f32.gmra.mrb[26].mxu1 %v32138_v60  ;;  %v32193_v60 = vld [vmem:[#allocation136_spill] sm:$0xff] }
 0x65c   : > { %21556 = vmatprep.mubr.f32.mxu1 %v32140_v7  ;;  %v32195_v7 = vld [vmem:[#allocation140_spill] sm:$0xff] }
 0x65d   : > { %22907 = vmatmul.mubr.f32.gmra.mrb[28].mxu0 %v32139_v12  ;;  %v32194_v12 = vld [vmem:[#allocation268_spill] sm:$0xff] }
 0x65e   : > { %22909 = vmatprep.mubr.f32.mxu0 %v32141_v17  ;;  %v32196_v17 = vld [vmem:[#allocation276_spill] sm:$0xff] }
 0x65f   : > { %21557 = vmatmul.mubr.f32.gmra.mrb[28].mxu1 %v32142_v54  ;;  %v32197_v54 = vld [vmem:[#allocation142_spill] sm:$0xff] }
 0x660   : > { %21559 = vmatprep.mubr.f32.mxu1 %v32144_v33  ;;  %v32199_v33 = vld [vmem:[#allocation150_spill] sm:$0xff] }
 0x661   : > { %22910 = vmatmul.mubr.f32.gmra.mrb[30].mxu0 %v32143_v19  ;;  %v32198_v19 = vld [vmem:[#allocation280_spill] sm:$0xff] }
 0x662   : > { %22914 = vmatprep.mubr.f32.mxu0 %v32025_v14 }
 0x663   : > { %21560 = vmatmul.mubr.f32.gmra.mrb[30].mxu1 %v32145_v53  ;;  %v32200_v53 = vld [vmem:[#allocation153_spill] sm:$0xff] }
 0x664   : > { %21564 = vmatprep.mubr.f32.mxu1 %v32146_v35  ;;  %v32201_v35 = vld [vmem:[#allocation13_spill] sm:$0xff] }
 0x665   : > { %22915 = vmatmul.mubr.f32.vlgmr.msra.gmra.mrb[0].mxu0 %v28811_v62 }
 0x666   : > { %22917 = vmatprep.mubr.f32.mxu0 %v32027_v45  ;;  %22963 = vmatpush3.msra.mxu0 %v28675_v63  ;;  %v32152_v63 = vld [vmem:[#allocation38_spill] sm:$0xff] }
 0x667   : > { %21565 = vmatmul.mubr.f32.vlgmr.msra.gmra.mrb[0].mxu1 %v32147_v42  ;;  %v32202_v42 = vld [vmem:[#allocation14_spill] sm:$0xff] }
 0x668   : > { %21613 = vmatpush3.msra.mxu1 %v32063_v25  ;;  %21567 = vmatprep.mubr.f32.mxu1 %v32148_v0  ;;  %v32153_v25 = vld [vmem:[#allocation184_spill] sm:$0xff]  ;;  %v32203_v0 = vld [vmem:[#allocation18_spill] sm:$0xff] }
 0x669   : > { %22918 = vmatmul.mubr.f32.gmra.mrb[2].mxu0 %v28821_v31 }
 0x66a   : > { %22920 = vmatprep.mubr.f32.mxu0 %v32028_v51 }
 0x66b   : > { %21568 = vmatmul.mubr.f32.gmra.mrb[2].mxu1 %v32149_v24  ;;  %v32204_v24 = vld [vmem:[#allocation22_spill] sm:$0xff] }
 0x66c   : > { %21570 = vmatprep.mubr.f32.mxu1 %v32150_v2  ;;  %v32213_v2 = vld [vmem:[#allocation67_spill] sm:$0xff] }
 0x66d   : > { %22921 = vmatmul.mubr.f32.gmra.mrb[4].mxu0 %v28837_v6 }
 0x66e   : > { %22923 = vmatprep.mubr.f32.mxu0 %v32030_v10 }
 0x66f   : > { %21571 = vmatmul.mubr.f32.gmra.mrb[4].mxu1 %v32151_v13  ;;  %v32214_v13 = vld [vmem:[#allocation76_spill] sm:$0xff] }
 0x670   : > { %21573 = vmatprep.mubr.f32.mxu1 %v32152_v63  ;;  %v32215_v63 = vld [vmem:[#allocation78_spill] sm:$0xff] }
 0x671   : > { %22924 = vmatmul.mubr.f32.gmra.mrb[6].mxu0 %v28857_v28 }
 0x672   : > { %22926 = vmatprep.mubr.f32.mxu0 %v32153_v25 }
 0x673   : > { %21574 = vmatmul.mubr.f32.gmra.mrb[6].mxu1 %v32154_v47  ;;  %v32217_v47 = vld [vmem:[#allocation91_spill] sm:$0xff] }
 0x674   : > { %21576 = vmatprep.mubr.f32.mxu1 %v32156_v3  ;;  %v32219_v3 = vld [vmem:[#allocation97_spill] sm:$0xff] }
 0x675   : > { %22927 = vmatmul.mubr.f32.gmra.mrb[8].mxu0 %v32155_v46 }
 0x676   : > { %22929 = vmatprep.mubr.f32.mxu0 %v32157_v49 }
 0x677   : > { %21577 = vmatmul.mubr.f32.gmra.mrb[8].mxu1 %v32158_v52  ;;  %v32221_v52 = vld [vmem:[#allocation110_spill] sm:$0xff] }
 0x678   : > { %21579 = vmatprep.mubr.f32.mxu1 %v32160_v20  ;;  %v32223_v20 = vld [vmem:[#allocation117_spill] sm:$0xff] }
 0x679   : > { %22930 = vmatmul.mubr.f32.gmra.mrb[10].mxu0 %v32159_v58 }
 0x67a   : > { %22932 = vmatprep.mubr.f32.mxu0 %v32161_v23 }
 0x67b   : > { %21580 = vmatmul.mubr.f32.gmra.mrb[10].mxu1 %v32162_v40  ;;  %v32225_v40 = vld [vmem:[#allocation129_spill] sm:$0xff] }
 0x67c   : > { %21582 = vmatprep.mubr.f32.mxu1 %v32164_v27  ;;  %v32227_v27 = vld [vmem:[#allocation138_spill] sm:$0xff] }
 0x67d   : > { %22933 = vmatmul.mubr.f32.gmra.mrb[12].mxu0 %v32163_v18 }
 0x67e   : > { %22935 = vmatprep.mubr.f32.mxu0 %v32165_v22 }
 0x67f   : > { %21583 = vmatmul.mubr.f32.gmra.mrb[12].mxu1 %v32166_v26  ;;  %v32229_v26 = vld [vmem:[#allocation145_spill] sm:$0xff] }
 0x680   : > { %21585 = vmatprep.mubr.f32.mxu1 %v32168_v37  ;;  %v32231_v37 = vld [vmem:[#allocation154_spill] sm:$0xff] }
 0x681   : > { %22936 = vmatmul.mubr.f32.gmra.mrb[14].mxu0 %v32167_v39 }
 0x682   : > { %22938 = vmatprep.mubr.f32.mxu0 %v32169_v44 }
 0x683   : > { %21586 = vmatmul.mubr.f32.gmra.mrb[14].mxu1 %v32170_v59 }
 0x684   : > { %21588 = vmatprep.mubr.f32.mxu1 %v32172_v57 }
 0x685   : > { %22939 = vmatmul.mubr.f32.gmra.mrb[16].mxu0 %v32171_v32 }
 0x686   : > { %22941 = vmatprep.mubr.f32.mxu0 %v32173_v36 }
 0x687   : > { %21589 = vmatmul.mubr.f32.gmra.mrb[16].mxu1 %v32174_v8 }
 0x688   : > { %21591 = vmatprep.mubr.f32.mxu1 %v32176_v15 }
 0x689   : > { %22942 = vmatmul.mubr.f32.gmra.mrb[18].mxu0 %v32175_v43 }
 0x68a   : > { %22944 = vmatprep.mubr.f32.mxu0 %v32177_v61 }
 0x68b   : > { %21592 = vmatmul.mubr.f32.gmra.mrb[18].mxu1 %v32178_v56 }
 0x68c   : > { %21594 = vmatprep.mubr.f32.mxu1 %v32180_v1 }
 0x68d   : > { %22945 = vmatmul.mubr.f32.gmra.mrb[20].mxu0 %v32179_v16 }
 0x68e   : > { %22947 = vmatprep.mubr.f32.mxu0 %v32181_v38 }
 0x68f   : > { %21595 = vmatmul.mubr.f32.gmra.mrb[20].mxu1 %v32182_v30 }
 0x690   : > { %21597 = vmatprep.mubr.f32.mxu1 %v32184_v9 }
 0x691   : > { %22948 = vmatmul.mubr.f32.gmra.mrb[22].mxu0 %v32183_v29 }
 0x692   : > { %22950 = vmatprep.mubr.f32.mxu0 %v32185_v5 }
 0x693   : > { %21598 = vmatmul.mubr.f32.gmra.mrb[22].mxu1 %v32186_v4 }
 0x694   : > { %21600 = vmatprep.mubr.f32.mxu1 %v32188_v34 }
 0x695   : > { %22951 = vmatmul.mubr.f32.gmra.mrb[24].mxu0 %v32187_v21 }
 0x696   : > { %22953 = vmatprep.mubr.f32.mxu0 %v32189_v50 }
 0x697   : > { %21601 = vmatmul.mubr.f32.gmra.mrb[24].mxu1 %v32190_v48 }
 0x698   : > { %21603 = vmatprep.mubr.f32.mxu1 %v32192_v11 }
 0x699   : > { %22954 = vmatmul.mubr.f32.gmra.mrb[26].mxu0 %v32191_v55 }
 0x69a   : > { %22956 = vmatprep.mubr.f32.mxu0 %v32059_v41 }
 0x69b   : > { %21604 = vmatmul.mubr.f32.gmra.mrb[26].mxu1 %v32193_v60 }
 0x69c   : > { %21606 = vmatprep.mubr.f32.mxu1 %v32195_v7 }
 0x69d   : > { %22957 = vmatmul.mubr.f32.gmra.mrb[28].mxu0 %v32194_v12 }
 0x69e   : > { %22959 = vmatprep.mubr.f32.mxu0 %v32196_v17 }
 0x69f   : > { %21607 = vmatmul.mubr.f32.gmra.mrb[28].mxu1 %v32197_v54 }
 0x6a0   : > { %21609 = vmatprep.mubr.f32.mxu1 %v32199_v33 }
 0x6a1   : > { %22960 = vmatmul.mubr.f32.gmra.mrb[30].mxu0 %v32198_v19 }
 0x6a2   : > { %22964 = vmatprep.mubr.f32.mxu0 %v32025_v14  ;;  %v32205_v14 = vld [vmem:[#allocation29_spill] sm:$0xff] }
 0x6a3   : > { %21610 = vmatmul.mubr.f32.gmra.mrb[30].mxu1 %v32200_v53 }
 0x6a4   : > { %21614 = vmatprep.mubr.f32.mxu1 %v32201_v35 }
 0x6a5   : > { %22965 = vmatmul.mubr.f32.vlgmr.msra.gmra.mrb[0].mxu0 %v28811_v62  ;;  %v32206_v62 = vld [vmem:[#allocation37_spill] sm:$0xff] }
 0x6a6   : > { %22967 = vmatprep.mubr.f32.mxu0 %v32027_v45  ;;  %v32207_v45 = vld [vmem:[#allocation44_spill] sm:$0xff] }
 0x6a7   : > { %21615 = vmatmul.mubr.f32.vlgmr.msra.gmra.mrb[0].mxu1 %v32202_v42 }
 0x6a8   : > { %21617 = vmatprep.mubr.f32.mxu1 %v32203_v0 }
 0x6a9   : > { %22968 = vmatmul.mubr.f32.gmra.mrb[2].mxu0 %v28821_v31  ;;  %v32208_v31 = vld [vmem:[#allocation45_spill] sm:$0xff] }
 0x6aa   : > { %22970 = vmatprep.mubr.f32.mxu0 %v32028_v51  ;;  %v32209_v51 = vld [vmem:[#allocation49_spill] sm:$0xff] }
 0x6ab   : > { %21618 = vmatmul.mubr.f32.gmra.mrb[2].mxu1 %v32204_v24 }
 0x6ac   : > { %21620 = vmatprep.mubr.f32.mxu1 %v32205_v14 }
 0x6ad   : > { %22971 = vmatmul.mubr.f32.gmra.mrb[4].mxu0 %v28837_v6  ;;  %v32210_v6 = vld [vmem:[#allocation56_spill] sm:$0xff] }
 0x6ae   : > { %22973 = vmatprep.mubr.f32.mxu0 %v32030_v10  ;;  %v32211_v10 = vld [vmem:[#allocation60_spill] sm:$0xff] }
 0x6af   : > { %21621 = vmatmul.mubr.f32.gmra.mrb[4].mxu1 %v32206_v62 }
 0x6b0   : > { %21623 = vmatprep.mubr.f32.mxu1 %v32207_v45 }
 0x6b1   : > { %22974 = vmatmul.mubr.f32.gmra.mrb[6].mxu0 %v28857_v28  ;;  %v32212_v28 = vld [vmem:[#allocation64_spill] sm:$0xff] }
 0x6b2   : > { %22976 = vmatprep.mubr.f32.mxu0 %v32153_v25  ;;  %v32216_v25 = vld [vmem:[#allocation84_spill] sm:$0xff] }
 0x6b3   : > { %21624 = vmatmul.mubr.f32.gmra.mrb[6].mxu1 %v32208_v31 }
 0x6b4   : > { %21626 = vmatprep.mubr.f32.mxu1 %v32209_v51 }
 0x6b5   : > { %22977 = vmatmul.mubr.f32.gmra.mrb[8].mxu0 %v32155_v46  ;;  %v32218_v46 = vld [vmem:[#allocation95_spill] sm:$0xff] }
 0x6b6   : > { %22979 = vmatprep.mubr.f32.mxu0 %v32157_v49  ;;  %v32220_v49 = vld [vmem:[#allocation102_spill] sm:$0xff] }
 0x6b7   : > { %21627 = vmatmul.mubr.f32.gmra.mrb[8].mxu1 %v32210_v6 }
 0x6b8   : > { %21629 = vmatprep.mubr.f32.mxu1 %v32211_v10 }
 0x6b9   : > { %22980 = vmatmul.mubr.f32.gmra.mrb[10].mxu0 %v32159_v58  ;;  %v32222_v58 = vld [vmem:[#allocation112_spill] sm:$0xff] }
 0x6ba   : > { %22982 = vmatprep.mubr.f32.mxu0 %v32161_v23  ;;  %v32224_v23 = vld [vmem:[#allocation123_spill] sm:$0xff] }
 0x6bb   : > { %21630 = vmatmul.mubr.f32.gmra.mrb[10].mxu1 %v32212_v28 }
 0x6bc   : > { %21632 = vmatprep.mubr.f32.mxu1 %v32213_v2 }
 0x6bd   : > { %22983 = vmatmul.mubr.f32.gmra.mrb[12].mxu0 %v32163_v18  ;;  %v32226_v18 = vld [vmem:[#allocation130_spill] sm:$0xff] }
 0x6be   : > { %22985 = vmatprep.mubr.f32.mxu0 %v32165_v22  ;;  %v32228_v22 = vld [vmem:[#allocation141_spill] sm:$0xff] }
 0x6bf   : > { %21633 = vmatmul.mubr.f32.gmra.mrb[12].mxu1 %v32214_v13 }
 0x6c0   : > { %21635 = vmatprep.mubr.f32.mxu1 %v32215_v63 }
 0x6c1   : > { %22986 = vmatmul.mubr.f32.gmra.mrb[14].mxu0 %v32167_v39  ;;  %v32230_v39 = vld [vmem:[#allocation147_spill] sm:$0xff] }
 0x6c2   : > { %22988 = vmatprep.mubr.f32.mxu0 %v32169_v44  ;;  %v32232_v44 = vld [vmem:[#allocation155_spill] sm:$0xff] }
 0x6c3   : > { %21636 = vmatmul.mubr.f32.gmra.mrb[14].mxu1 %v32216_v25 }
 0x6c4   : > { %21638 = vmatprep.mubr.f32.mxu1 %v32217_v47 }
 0x6c5   : > { %22989 = vmatmul.mubr.f32.gmra.mrb[16].mxu0 %v32171_v32 }
 0x6c6   : > { %22991 = vmatprep.mubr.f32.mxu0 %v32173_v36 }
 0x6c7   : > { %21639 = vmatmul.mubr.f32.gmra.mrb[16].mxu1 %v32218_v46 }
 0x6c8   : > { %21641 = vmatprep.mubr.f32.mxu1 %v32219_v3 }
 0x6c9   : > { %22992 = vmatmul.mubr.f32.gmra.mrb[18].mxu0 %v32175_v43 }
 0x6ca   : > { %22994 = vmatprep.mubr.f32.mxu0 %v32177_v61 }
 0x6cb   : > { %21642 = vmatmul.mubr.f32.gmra.mrb[18].mxu1 %v32220_v49 }
 0x6cc   : > { %21644 = vmatprep.mubr.f32.mxu1 %v32221_v52 }
 0x6cd   : > { %22995 = vmatmul.mubr.f32.gmra.mrb[20].mxu0 %v32179_v16 }
 0x6ce   : > { %22997 = vmatprep.mubr.f32.mxu0 %v32181_v38 }
 0x6cf   : > { %21645 = vmatmul.mubr.f32.gmra.mrb[20].mxu1 %v32222_v58 }
 0x6d0   : > { %21647 = vmatprep.mubr.f32.mxu1 %v32223_v20 }
 0x6d1   : > { %22998 = vmatmul.mubr.f32.gmra.mrb[22].mxu0 %v32183_v29 }
 0x6d2   : > { %23000 = vmatprep.mubr.f32.mxu0 %v32185_v5 }
 0x6d3   : > { %21648 = vmatmul.mubr.f32.gmra.mrb[22].mxu1 %v32224_v23 }
 0x6d4   : > { %21650 = vmatprep.mubr.f32.mxu1 %v32225_v40 }
 0x6d5   : > { %23001 = vmatmul.mubr.f32.gmra.mrb[24].mxu0 %v32187_v21 }
 0x6d6   : > { %23003 = vmatprep.mubr.f32.mxu0 %v32189_v50 }
 0x6d7   : > { %21651 = vmatmul.mubr.f32.gmra.mrb[24].mxu1 %v32226_v18 }
 0x6d8   : > { %21653 = vmatprep.mubr.f32.mxu1 %v32227_v27 }
 0x6d9   : > { %23004 = vmatmul.mubr.f32.gmra.mrb[26].mxu0 %v32191_v55 }
 0x6da   : > { %23006 = vmatprep.mubr.f32.mxu0 %v32059_v41  ;;  %v29471_v41 = vld [vmem:[%s29580_s2] ss:$0 sm:$0xff] }
 0x6db   : > { %21654 = vmatmul.mubr.f32.gmra.mrb[26].mxu1 %v32228_v22 }
 0x6dc   : > { %21656 = vmatprep.mubr.f32.mxu1 %v32229_v26 }
 0x6dd   : > { %23007 = vmatmul.mubr.f32.gmra.mrb[28].mxu0 %v32194_v12 }
 0x6de   : > { %23009 = vmatprep.mubr.f32.mxu0 %v32196_v17 }
 0x6df   : > { %21657 = vmatmul.mubr.f32.gmra.mrb[28].mxu1 %v32230_v39 }
 0x6e0   : > { %21659 = vmatprep.mubr.f32.mxu1 %v32231_v37 }
 0x6e1   : > { %23010 = vmatmul.mubr.f32.gmra.mrb[30].mxu0 %v32198_v19 }
 0x6e3   : > { %21660 = vmatmul.mubr.f32.gmra.mrb[30].mxu1 %v32232_v44 }
 0x778   : > { %v22966_v59 = vpop.f32.mrb[0].mxu0 }
 0x779   : > { %v18129_v32 = vpop.f32.mrb[1].mxu0 }
 0x77a   : > { %v21616_v57 = vpop.f32.mrb[0].mxu1 }
 0x77b   : > { %v23012_v36 = vadd.f32 %v22966_v59, %v21616_v57  ;;  %v9588_v43 = vpop.f32.mrb[1].mxu1 }
 0x77c   : > { %v22969_v8 = vpop.f32.mrb[2].mxu0  ;;  %v23013_v15 = vadd.f32 %v18129_v32, %v9588_v43 }
 0x77d   : > { %v18141_v61 = vpop.f32.mrb[3].mxu0  ;;  %v18359_v56 = vadd.f32 %v23012_v36, %v29471_v41 }
 0x77e   : > { %v18358_v16 = vadd.f32 %v23013_v15, %v29471_v41  ;;  %v21619_v1 = vpop.f32.mrb[2].mxu1 }
 0x77f   : > { %v18391_v38 = vmax.f32 %v18359_v56, 0.0  ;;  %v23014_v30 = vadd.f32 %v22969_v8, %v21619_v1  ;;  %v9602_v9 = vpop.f32.mrb[3].mxu1 }
 0x780   : > { %v22972_v29 = vpop.f32.mrb[4].mxu0  ;;  %v18390_v5 = vmax.f32 %v18358_v16, 0.0  ;;  %v23015_v4 = vadd.f32 %v18141_v61, %v9602_v9 }
 0x781   : > { %v18153_v21 = vpop.f32.mrb[5].mxu0  ;;  %18424 = vst.msk [vmem:[%s29478_s16 + $0x8] sm:$0xff] %vm18422_vm2, %v18391_v38  ;;  %v18361_v34 = vadd.f32 %v23014_v30, %v29471_v41 }
 0x782   : > { %18423 = vst.msk [vmem:[%s29478_s16] sm:$0xff] %vm18422_vm2, %v18390_v5  ;;  %v18360_v50 = vadd.f32 %v23015_v4, %v29471_v41  ;;  %v21622_v48 = vpop.f32.mrb[4].mxu1 }
 0x783   : > { %v18393_v55 = vmax.f32 %v18361_v34, 0.0  ;;  %v23016_v11 = vadd.f32 %v22972_v29, %v21622_v48  ;;  %v9616_v12 = vpop.f32.mrb[5].mxu1 }
 0x784   : > { %v22975_v60 = vpop.f32.mrb[6].mxu0  ;;  %v18392_v7 = vmax.f32 %v18360_v50, 0.0  ;;  %v23017_v17 = vadd.f32 %v18153_v21, %v9616_v12 }
 0x785   : > { %v18165_v54 = vpop.f32.mrb[7].mxu0  ;;  %18426 = vst.msk [vmem:[%s29478_s16 + $0x18] sm:$0xff] %vm18422_vm2, %v18393_v55  ;;  %v18363_v19 = vadd.f32 %v23016_v11, %v29471_v41 }
 0x786   : > { %18425 = vst.msk [vmem:[%s29478_s16 + $0x10] sm:$0xff] %vm18422_vm2, %v18392_v7  ;;  %v18362_v33 = vadd.f32 %v23017_v17, %v29471_v41  ;;  %v21625_v53 = vpop.f32.mrb[6].mxu1 }
 0x787   : > { %v18395_v35 = vmax.f32 %v18363_v19, 0.0  ;;  %v23018_v42 = vadd.f32 %v22975_v60, %v21625_v53  ;;  %v9630_v24 = vpop.f32.mrb[7].mxu1 }
 0x788   : > { %v22978_v0 = vpop.f32.mrb[8].mxu0  ;;  %v18394_v14 = vmax.f32 %v18362_v33, 0.0  ;;  %v23019_v62 = vadd.f32 %v18165_v54, %v9630_v24 }
 0x789   : > { %v18177_v45 = vpop.f32.mrb[9].mxu0  ;;  %18428 = vst.msk [vmem:[%s29478_s16 + $0x28] sm:$0xff] %vm18422_vm2, %v18395_v35  ;;  %v18365_v31 = vadd.f32 %v23018_v42, %v29471_v41 }
 0x78a   : > { %18427 = vst.msk [vmem:[%s29478_s16 + $0x20] sm:$0xff] %vm18422_vm2, %v18394_v14  ;;  %v18364_v51 = vadd.f32 %v23019_v62, %v29471_v41  ;;  %v21628_v6 = vpop.f32.mrb[8].mxu1 }
 0x78b   : > { %v18397_v10 = vmax.f32 %v18365_v31, 0.0  ;;  %v23020_v28 = vadd.f32 %v22978_v0, %v21628_v6  ;;  %v9644_v13 = vpop.f32.mrb[9].mxu1 }
 0x78c   : > { %v22981_v2 = vpop.f32.mrb[10].mxu0  ;;  %v18396_v63 = vmax.f32 %v18364_v51, 0.0  ;;  %v23021_v25 = vadd.f32 %v18177_v45, %v9644_v13 }
 0x78d   : > { %v18189_v47 = vpop.f32.mrb[11].mxu0  ;;  %18430 = vst.msk [vmem:[%s29478_s16 + $0x38] sm:$0xff] %vm18422_vm2, %v18397_v10  ;;  %v18367_v46 = vadd.f32 %v23020_v28, %v29471_v41 }
 0x78e   : > { %18429 = vst.msk [vmem:[%s29478_s16 + $0x30] sm:$0xff] %vm18422_vm2, %v18396_v63  ;;  %v18366_v3 = vadd.f32 %v23021_v25, %v29471_v41  ;;  %v21631_v49 = vpop.f32.mrb[10].mxu1 }
 0x78f   : > { %v18399_v52 = vmax.f32 %v18367_v46, 0.0  ;;  %v23022_v58 = vadd.f32 %v22981_v2, %v21631_v49  ;;  %v9658_v23 = vpop.f32.mrb[11].mxu1 }
 0x790   : > { %v22984_v20 = vpop.f32.mrb[12].mxu0  ;;  %v18398_v40 = vmax.f32 %v18366_v3, 0.0  ;;  %v23023_v18 = vadd.f32 %v18189_v47, %v9658_v23 }
 0x791   : > { %v18201_v27 = vpop.f32.mrb[13].mxu0  ;;  %18432 = vst.msk [vmem:[%s29478_s16 + $0x48] sm:$0xff] %vm18422_vm2, %v18399_v52  ;;  %v18369_v22 = vadd.f32 %v23022_v58, %v29471_v41 }
 0x792   : > { %18431 = vst.msk [vmem:[%s29478_s16 + $0x40] sm:$0xff] %vm18422_vm2, %v18398_v40  ;;  %v18368_v26 = vadd.f32 %v23023_v18, %v29471_v41  ;;  %v21634_v39 = vpop.f32.mrb[12].mxu1 }
 0x793   : > { %v18401_v37 = vmax.f32 %v18369_v22, 0.0  ;;  %v23024_v44 = vadd.f32 %v22984_v20, %v21634_v39  ;;  %v9672_v32 = vpop.f32.mrb[13].mxu1 }
 0x794   : > { %v22987_v59 = vpop.f32.mrb[14].mxu0  ;;  %v18400_v57 = vmax.f32 %v18368_v26, 0.0  ;;  %v23025_v36 = vadd.f32 %v18201_v27, %v9672_v32 }
 0x795   : > { %v18213_v8 = vpop.f32.mrb[15].mxu0  ;;  %18434 = vst.msk [vmem:[%s29478_s16 + $0x58] sm:$0xff] %vm18422_vm2, %v18401_v37  ;;  %v18371_v43 = vadd.f32 %v23024_v44, %v29471_v41 }
 0x796   : > { %18433 = vst.msk [vmem:[%s29478_s16 + $0x50] sm:$0xff] %vm18422_vm2, %v18400_v57  ;;  %v18370_v15 = vadd.f32 %v23025_v36, %v29471_v41  ;;  %v21637_v61 = vpop.f32.mrb[14].mxu1 }
 0x797   : > { %v18403_v56 = vmax.f32 %v18371_v43, 0.0  ;;  %v23026_v16 = vadd.f32 %v22987_v59, %v21637_v61  ;;  %v9686_v38 = vpop.f32.mrb[15].mxu1 }
 0x798   : > { %v22990_v1 = vpop.f32.mrb[16].mxu0  ;;  %v18402_v30 = vmax.f32 %v18370_v15, 0.0  ;;  %v23027_v29 = vadd.f32 %v18213_v8, %v9686_v38 }
 0x799   : > { %v18225_v9 = vpop.f32.mrb[17].mxu0  ;;  %18436 = vst.msk [vmem:[%s29478_s16 + $0x68] sm:$0xff] %vm18422_vm2, %v18403_v56  ;;  %v18373_v5 = vadd.f32 %v23026_v16, %v29471_v41 }
 0x79a   : > { %18435 = vst.msk [vmem:[%s29478_s16 + $0x60] sm:$0xff] %vm18422_vm2, %v18402_v30  ;;  %v18372_v4 = vadd.f32 %v23027_v29, %v29471_v41  ;;  %v21640_v21 = vpop.f32.mrb[16].mxu1 }
 0x79b   : > { %v18405_v34 = vmax.f32 %v18373_v5, 0.0  ;;  %v23028_v50 = vadd.f32 %v22990_v1, %v21640_v21  ;;  %v9700_v55 = vpop.f32.mrb[17].mxu1 }
 0x79c   : > { %v22993_v48 = vpop.f32.mrb[18].mxu0  ;;  %v18404_v11 = vmax.f32 %v18372_v4, 0.0  ;;  %v23029_v60 = vadd.f32 %v18225_v9, %v9700_v55 }
 0x79d   : > { %v18237_v12 = vpop.f32.mrb[19].mxu0  ;;  %18438 = vst.msk [vmem:[%s29478_s16 + $0x78] sm:$0xff] %vm18422_vm2, %v18405_v34  ;;  %v18375_v7 = vadd.f32 %v23028_v50, %v29471_v41 }
 0x79e   : > { %18437 = vst.msk [vmem:[%s29478_s16 + $0x70] sm:$0xff] %vm18422_vm2, %v18404_v11  ;;  %v18374_v17 = vadd.f32 %v23029_v60, %v29471_v41  ;;  %v21643_v54 = vpop.f32.mrb[18].mxu1 }
 0x79f   : > { %v18407_v19 = vmax.f32 %v18375_v7, 0.0  ;;  %v23030_v33 = vadd.f32 %v22993_v48, %v21643_v54  ;;  %v9714_v35 = vpop.f32.mrb[19].mxu1 }
 0x7a0   : > { %v22996_v53 = vpop.f32.mrb[20].mxu0  ;;  %v18406_v42 = vmax.f32 %v18374_v17, 0.0  ;;  %v23031_v0 = vadd.f32 %v18237_v12, %v9714_v35 }
 0x7a1   : > { %v18249_v24 = vpop.f32.mrb[21].mxu0  ;;  %18440 = vst.msk [vmem:[%s29478_s16 + $0x88] sm:$0xff] %vm18422_vm2, %v18407_v19  ;;  %v18377_v14 = vadd.f32 %v23030_v33, %v29471_v41 }
 0x7a2   : > { %18439 = vst.msk [vmem:[%s29478_s16 + $0x80] sm:$0xff] %vm18422_vm2, %v18406_v42  ;;  %v18376_v62 = vadd.f32 %v23031_v0, %v29471_v41  ;;  %v21646_v45 = vpop.f32.mrb[20].mxu1 }
 0x7a3   : > { %v18409_v31 = vmax.f32 %v18377_v14, 0.0  ;;  %v23032_v51 = vadd.f32 %v22996_v53, %v21646_v45  ;;  %v9728_v10 = vpop.f32.mrb[21].mxu1 }
 0x7a4   : > { %v22999_v6 = vpop.f32.mrb[22].mxu0  ;;  %v18408_v28 = vmax.f32 %v18376_v62, 0.0  ;;  %v23033_v2 = vadd.f32 %v18249_v24, %v9728_v10 }
 0x7a5   : > { %v18261_v13 = vpop.f32.mrb[23].mxu0  ;;  %18442 = vst.msk [vmem:[%s29478_s16 + $0x98] sm:$0xff] %vm18422_vm2, %v18409_v31  ;;  %v18379_v63 = vadd.f32 %v23032_v51, %v29471_v41 }
 0x7a6   : > { %18441 = vst.msk [vmem:[%s29478_s16 + $0x90] sm:$0xff] %vm18422_vm2, %v18408_v28  ;;  %v18378_v25 = vadd.f32 %v23033_v2, %v29471_v41  ;;  %v21649_v47 = vpop.f32.mrb[22].mxu1 }
 0x7a7   : > { %v18411_v46 = vmax.f32 %v18379_v63, 0.0  ;;  %v23034_v3 = vadd.f32 %v22999_v6, %v21649_v47  ;;  %v9742_v52 = vpop.f32.mrb[23].mxu1 }
 0x7a8   : > { %v23002_v49 = vpop.f32.mrb[24].mxu0  ;;  %v18410_v58 = vmax.f32 %v18378_v25, 0.0  ;;  %v23035_v20 = vadd.f32 %v18261_v13, %v9742_v52 }
 0x7a9   : > { %v18273_v23 = vpop.f32.mrb[25].mxu0  ;;  %18444 = vst.msk [vmem:[%s29478_s16 + $0xa8] sm:$0xff] %vm18422_vm2, %v18411_v46  ;;  %v18381_v40 = vadd.f32 %v23034_v3, %v29471_v41 }
 0x7aa   : > { %18443 = vst.msk [vmem:[%s29478_s16 + $0xa0] sm:$0xff] %vm18422_vm2, %v18410_v58  ;;  %v18380_v18 = vadd.f32 %v23035_v20, %v29471_v41  ;;  %v21652_v27 = vpop.f32.mrb[24].mxu1 }
 0x7ab   : > { %v18413_v22 = vmax.f32 %v18381_v40, 0.0  ;;  %v23036_v26 = vadd.f32 %v23002_v49, %v21652_v27  ;;  %v9756_v37 = vpop.f32.mrb[25].mxu1 }
 0x7ac   : > { %v23005_v39 = vpop.f32.mrb[26].mxu0  ;;  %v18412_v44 = vmax.f32 %v18380_v18, 0.0  ;;  %v23037_v59 = vadd.f32 %v18273_v23, %v9756_v37 }
 0x7ad   : > { %v18285_v32 = vpop.f32.mrb[27].mxu0  ;;  %18446 = vst.msk [vmem:[%s29478_s16 + $0xb8] sm:$0xff] %vm18422_vm2, %v18413_v22  ;;  %v18383_v57 = vadd.f32 %v23036_v26, %v29471_v41 }
 0x7ae   : > { %18445 = vst.msk [vmem:[%s29478_s16 + $0xb0] sm:$0xff] %vm18422_vm2, %v18412_v44  ;;  %v18382_v36 = vadd.f32 %v23037_v59, %v29471_v41  ;;  %v21655_v8 = vpop.f32.mrb[26].mxu1 }
 0x7af   : > { %v18415_v43 = vmax.f32 %v18383_v57, 0.0  ;;  %v23038_v15 = vadd.f32 %v23005_v39, %v21655_v8  ;;  %v9770_v56 = vpop.f32.mrb[27].mxu1 }
 0x7b0   : > { %v23008_v61 = vpop.f32.mrb[28].mxu0  ;;  %v18414_v16 = vmax.f32 %v18382_v36, 0.0  ;;  %v23039_v1 = vadd.f32 %v18285_v32, %v9770_v56 }
 0x7b1   : > { %v18297_v38 = vpop.f32.mrb[29].mxu0  ;;  %18448 = vst.msk [vmem:[%s29478_s16 + $0xc8] sm:$0xff] %vm18422_vm2, %v18415_v43  ;;  %v18385_v30 = vadd.f32 %v23038_v15, %v29471_v41 }
 0x7b2   : > { %18447 = vst.msk [vmem:[%s29478_s16 + $0xc0] sm:$0xff] %vm18422_vm2, %v18414_v16  ;;  %v18384_v29 = vadd.f32 %v23039_v1, %v29471_v41  ;;  %v21658_v9 = vpop.f32.mrb[28].mxu1 }
 0x7b3   : > { %v18417_v5 = vmax.f32 %v18385_v30, 0.0  ;;  %v23040_v4 = vadd.f32 %v23008_v61, %v21658_v9  ;;  %v9784_v34 = vpop.f32.mrb[29].mxu1 }
 0x7b4   : > { %v23011_v21 = vpop.f32.mrb[30].mxu0  ;;  %v18416_v50 = vmax.f32 %v18384_v29, 0.0  ;;  %v23041_v48 = vadd.f32 %v18297_v38, %v9784_v34 }
 0x7b5   : > { %v18309_v55 = vpop.f32.mrb[31].mxu0  ;;  %18450 = vst.msk [vmem:[%s29478_s16 + $0xd8] sm:$0xff] %vm18422_vm2, %v18417_v5  ;;  %v18387_v11 = vadd.f32 %v23040_v4, %v29471_v41 }
 0x7b6   : > { %18449 = vst.msk [vmem:[%s29478_s16 + $0xd0] sm:$0xff] %vm18422_vm2, %v18416_v50  ;;  %v18386_v60 = vadd.f32 %v23041_v48, %v29471_v41  ;;  %v21661_v12 = vpop.f32.mrb[30].mxu1 }
 0x7b7   : > { %v18419_v7 = vmax.f32 %v18387_v11, 0.0  ;;  %v23042_v17 = vadd.f32 %v23011_v21, %v21661_v12  ;;  %v9798_v54 = vpop.f32.mrb[31].mxu1 }
 0x7b8   : > { %v18418_v19 = vmax.f32 %v18386_v60, 0.0  ;;  %v23043_v33 = vadd.f32 %v18309_v55, %v9798_v54 }
 0x7b9   : > { %18452 = vst.msk [vmem:[%s29478_s16 + $0xe8] sm:$0xff] %vm18422_vm2, %v18419_v7  ;;  %v18389_v53 = vadd.f32 %v23042_v17, %v29471_v41 }
 0x7ba   : > { %18451 = vst.msk [vmem:[%s29478_s16 + $0xe0] sm:$0xff] %vm18422_vm2, %v18418_v19  ;;  %v18388_v35 = vadd.f32 %v23043_v33, %v29471_v41 }
 0x7bb   : > { %v18421_v42 = vmax.f32 %v18389_v53, 0.0 }
 0x7bc   : > { %v18420_v0 = vmax.f32 %v18388_v35, 0.0 }
 0x7bd   : > { %18454 = vst.msk [vmem:[%s29478_s16 + $0xf8] sm:$0xff] %vm18422_vm2, %v18421_v42 }
 0x7be   : > { %18453 = vst.msk [vmem:[%s29478_s16 + $0xf0] sm:$0xff] %vm18422_vm2, %v18420_v0 }
 0x7bf PF: > { %s13_s12 = sadd.s32 1, %s24782_s12  }
 0x7c0   : > { %p10_p4 = scmp.ge.s32.totalorder %s13_s12, 6  }
 0x7c2   :  { %12 = sbr.rel (!%p10_p4) target bundleno = 1 (0x1), region = 70 }

</bundles_post_ra>
